<compile_context>
chip_gen: v6e
topology: v6e:2x2x1
jax: 0.10.0
libtpu: 0.0.40
codegen_flags: <defaults>
</compile_context>

<pallas_src>
import functools

import jax
import jax.numpy as jnp
import numpy as np
from jax import lax
from jax.experimental import pallas as pl
from jax.experimental.pallas import tpu as pltpu


_OFFSETS = tuple((dy, dx) for dy in (-1, 0, 1) for dx in (-1, 0, 1))


def _silu(x):
    return x * jax.nn.sigmoid(x)


def _make_masks(H, W):
    """Border-validity masks (shape (H*W, 1) bool) for the 9 conv offsets."""
    HW = H * W
    idx = lax.broadcasted_iota(jnp.int32, (HW, 1), 0)
    if (W & (W - 1)) == 0:          # power-of-two fast path (AND, no int div)
        col = jnp.bitwise_and(idx, W - 1)
    else:
        col = idx % W
    masks = []
    for dy, dx in _OFFSETS:
        conds = []
        if dy < 0:
            conds.append(idx >= (-dy) * W)
        elif dy > 0:
            conds.append(idx < (H - dy) * W)
        if dx < 0:
            conds.append(col >= -dx)
        elif dx > 0:
            conds.append(col < W - dx)
        if conds:
            m = conds[0]
            for extra in conds[1:]:
                m = jnp.logical_and(m, extra)
            masks.append(m)
        else:
            masks.append(None)      # centre tap needs no mask
    return masks


def _conv3x3(a, w9, bias, masks, H, W):
    """3x3 conv, stride 1, pad 1, as 9 shifted channel matmuls.

    a:    (H*W, Cin) f32 activations (flattened NHWC plane, C on lanes)
    w9:   (9, Cin, Cout) BN-folded weights, index = ky*3 + kx
    bias: (1, Cout)
    """
    HW = H * W
    acc = None
    for i, (dy, dx) in enumerate(_OFFSETS):
        s = dy * W + dx
        sh = a if s == 0 else pltpu.roll(a, (-s) % HW, axis=0)
        if masks[i] is not None:
            sh = jnp.where(masks[i], sh, 0.0)
        term = jnp.dot(sh, w9[i], preferred_element_type=jnp.float32)
        acc = term if acc is None else acc + term
    return _silu(acc + bias)


def _c2f_kernel(x_ref, w1a_ref, b1a_ref, w1b_ref, b1b_ref,
                wm1_ref, bm1_ref, wm2_ref, bm2_ref,
                w2_ref, b2_ref, o_ref, *, H, W, n, shortcut):
    x = x_ref[0].astype(jnp.float32)                       # (H*W, C1)

    # cv1 (1x1, BN folded, SiLU).  The two output-channel halves (chunk(2,1))
    # are produced by two separate matmuls -> no lane-axis slicing.
    y0 = _silu(jnp.dot(x, w1a_ref[...], preferred_element_type=jnp.float32)
               + b1a_ref[...])
    y1 = _silu(jnp.dot(x, w1b_ref[...], preferred_element_type=jnp.float32)
               + b1b_ref[...])

    masks = _make_masks(H, W)        # hoisted once, shared by all 3x3 convs

    ys = [y0, y1]
    cur = y1
    for j in range(n):               # Bottleneck blocks (static unroll)
        t = _conv3x3(cur, wm1_ref[j], bm1_ref[j], masks, H, W)
        t = _conv3x3(t, wm2_ref[j], bm2_ref[j], masks, H, W)
        cur = cur + t if shortcut else t
        ys.append(cur)

    # cv2 (1x1): concat never materialized -> (2+n) accumulated partial matmuls
    acc = None
    for i, yi in enumerate(ys):
        term = jnp.dot(yi, w2_ref[i], preferred_element_type=jnp.float32)
        acc = term if acc is None else acc + term
    out = _silu(acc + b2_ref[...])

    o_ref[0] = out.astype(o_ref.dtype)


def c2f_pallas(x_nhwc, w1a, b1a, w1b, b1b, wm1, bm1, wm2, bm2, w2, b2,
               *, n=1, shortcut=False):
    """C2f forward.  x_nhwc: (N, H, W, C1) -> (N, H, W, C2).  Weights are
    BN-folded: 1x1 as (Cin, c), 3x3 as (n, 9, c, c), cv2 as (2+n, c, C2)."""
    N, H, W, C1 = x_nhwc.shape
    c = w1a.shape[1]
    C2 = w2.shape[-1]
    HW = H * W
    x = x_nhwc.reshape(N, HW, C1)            # free: same bytes, no transpose

    kernel = functools.partial(_c2f_kernel, H=H, W=W, n=n, shortcut=shortcut)

    out = pl.pallas_call(
        kernel,
        out_shape=jax.ShapeDtypeStruct((N, HW, C2), x_nhwc.dtype),
        grid_spec=pltpu.PrefetchScalarGridSpec(
            num_scalar_prefetch=0,
            grid=(N,),
            in_specs=[
                pl.BlockSpec((1, HW, C1), lambda b: (b, 0, 0)),
                pl.BlockSpec((C1, c), lambda b: (0, 0)),
                pl.BlockSpec((1, c), lambda b: (0, 0)),
                pl.BlockSpec((C1, c), lambda b: (0, 0)),
                pl.BlockSpec((1, c), lambda b: (0, 0)),
                pl.BlockSpec((n, 9, c, c), lambda b: (0, 0, 0, 0)),
                pl.BlockSpec((n, 1, c), lambda b: (0, 0, 0)),
                pl.BlockSpec((n, 9, c, c), lambda b: (0, 0, 0, 0)),
                pl.BlockSpec((n, 1, c), lambda b: (0, 0, 0)),
                pl.BlockSpec((2 + n, c, C2), lambda b: (0, 0, 0)),
                pl.BlockSpec((1, C2), lambda b: (0, 0)),
            ],
            out_specs=pl.BlockSpec((1, HW, C2), lambda b: (b, 0, 0)),
        ),
        compiler_params=pltpu.CompilerParams(
            dimension_semantics=("parallel",),
            vmem_limit_bytes=48 * 1024 * 1024,
        ),
    )(x, w1a, b1a, w1b, b1b, wm1, bm1, wm2, bm2, w2, b2)
    return out.reshape(N, H, W, C2)          # free reshape back to NHWC


# ----------------------------- pure-JAX reference ---------------------------

def _conv_bn_silu_ref(x, w_hwio, scale, bias, pad):
    y = lax.conv_general_dilated(
        x, w_hwio, window_strides=(1, 1),
        padding=[(pad, pad), (pad, pad)],
        dimension_numbers=('NHWC', 'HWIO', 'NHWC'),
        precision=lax.Precision.HIGHEST)
    y = y * scale + bias
    return y * jax.nn.sigmoid(y)


def c2f_ref(x, W1, s1, b1, Wm1, sm1, bm1, Wm2, sm2, bm2, W2, s2, b2,
            *, n=1, shortcut=False):
    C1 = x.shape[-1]
    two_c = W1.shape[-1]
    c = two_c // 2
    C2 = W2.shape[-1]
    h = _conv_bn_silu_ref(x, W1.reshape(1, 1, C1, two_c), s1, b1, 0)
    y0, y1 = h[..., :c], h[..., c:]
    ys = [y0, y1]
    cur = y1
    for j in range(n):
        t = _conv_bn_silu_ref(cur, Wm1[j], sm1[j], bm1[j], 1)
        t = _conv_bn_silu_ref(t, Wm2[j], sm2[j], bm2[j], 1)
        cur = cur + t if shortcut else t
        ys.append(cur)
    cat = jnp.concatenate(ys, axis=-1)
    return _conv_bn_silu_ref(cat, W2.reshape(1, 1, (2 + n) * c, C2), s2, b2, 0)


# ---------------------------------- test ------------------------------------

if __name__ == "__main__":
    key = jax.random.PRNGKey(0)
    N, C1, H, W = 2, 4, 16, 16          # C2f(c1=4, c2=8, n=1, shortcut=False)
    C2 = 8
    n = 1
    shortcut = False                    # module default
    e = 0.5
    c = int(C2 * e)                     # hidden channels = 4
    eps = 1e-5

    keys = iter(jax.random.split(key, 32))

    def make_bn(cout):
        g = jax.random.normal(next(keys), (cout,), jnp.float32) * 0.1 + 1.0
        beta = jax.random.normal(next(keys), (cout,), jnp.float32) * 0.1
        mean = jax.random.normal(next(keys), (cout,), jnp.float32) * 0.1
        var = jax.nn.softplus(jax.random.normal(next(keys), (cout,),
                                                jnp.float32)) + 0.5
        s = g / jnp.sqrt(var + eps)
        return s, beta - mean * s

    x = jax.random.normal(next(keys), (N, H, W, C1), jnp.float32)

    W1 = jax.random.normal(next(keys), (C1, 2 * c), jnp.float32) * 0.4
    s1, b1 = make_bn(2 * c)
    Wm1 = jax.random.normal(next(keys), (n, 3, 3, c, c), jnp.float32) * 0.25
    Wm2 = jax.random.normal(next(keys), (n, 3, 3, c, c), jnp.float32) * 0.25
    sm1l, bm1l, sm2l, bm2l = [], [], [], []
    for _ in range(n):
        s_, b_ = make_bn(c); sm1l.append(s_); bm1l.append(b_)
        s_, b_ = make_bn(c); sm2l.append(s_); bm2l.append(b_)
    sm1, bm1 = jnp.stack(sm1l), jnp.stack(bm1l)
    sm2, bm2 = jnp.stack(sm2l), jnp.stack(bm2l)
    W2 = jax.random.normal(next(keys), ((2 + n) * c, C2), jnp.float32) * 0.4
    s2, b2 = make_bn(C2)

    # ---- fold BN scale into the weights for the kernel (host side) ----
    W1f = W1 * s1[None, :]
    w1a, w1b = W1f[:, :c], W1f[:, c:]
    b1a, b1b = b1[:c].reshape(1, c), b1[c:].reshape(1, c)

    wm1k = (Wm1 * sm1[:, None, None, None, :]).reshape(n, 9, c, c)
    bm1k = bm1.reshape(n, 1, c)
    wm2k = (Wm2 * sm2[:, None, None, None, :]).reshape(n, 9, c, c)
    bm2k = bm2.reshape(n, 1, c)

    W2f = W2 * s2[None, :]
    w2k = W2f.reshape(2 + n, c, C2)
    b2k = b2.reshape(1, C2)

    out = c2f_pallas(x, w1a, b1a, w1b, b1b, wm1k, bm1k, wm2k, bm2k, w2k, b2k,
                     n=n, shortcut=shortcut)
    out = jax.block_until_ready(out)

    ref = c2f_ref(x, W1, s1, b1, Wm1, sm1, bm1, Wm2, sm2, bm2, W2, s2, b2,
                  n=n, shortcut=shortcut)
    assert out.shape == (N, H, W, C2)
    np.testing.assert_allclose(np.asarray(out), np.asarray(ref),
                               rtol=1e-4, atol=1e-4)
    print("KERNEL_OK")
</pallas_src>

<mosaic_0001>
module attributes {stable_mosaic.version = 11 : i64} {
  func.func @_c2f_kernel(%arg0: i32, %arg1: memref<1x256x4xf32, #tpu.memory_space<vmem>>, %arg2: memref<4x4xf32, #tpu.memory_space<vmem>>, %arg3: memref<1x4xf32, #tpu.memory_space<vmem>>, %arg4: memref<4x4xf32, #tpu.memory_space<vmem>>, %arg5: memref<1x4xf32, #tpu.memory_space<vmem>>, %arg6: memref<1x9x4x4xf32, #tpu.memory_space<vmem>>, %arg7: memref<1x1x4xf32, #tpu.memory_space<vmem>>, %arg8: memref<1x9x4x4xf32, #tpu.memory_space<vmem>>, %arg9: memref<1x1x4xf32, #tpu.memory_space<vmem>>, %arg10: memref<3x4x8xf32, #tpu.memory_space<vmem>>, %arg11: memref<1x8xf32, #tpu.memory_space<vmem>>, %arg12: memref<1x256x8xf32, #tpu.memory_space<vmem>>) attributes {dimension_semantics = [#tpu.dimension_semantics<parallel>], iteration_bounds = array<i64: 2>, scalar_prefetch = 0 : i64, scratch_operands = 0 : i64, tpu.core_type = #tpu.core_type<tc>, window_params = [{transform_indices = @transform_0, window_bounds = array<i64: 1, 256, 4>}, {pipeline_mode = #tpu.pipeline_mode<synchronous>, transform_indices = @transform_1, window_bounds = array<i64: 4, 4>}, {pipeline_mode = #tpu.pipeline_mode<synchronous>, transform_indices = @transform_2, window_bounds = array<i64: 1, 4>}, {pipeline_mode = #tpu.pipeline_mode<synchronous>, transform_indices = @transform_3, window_bounds = array<i64: 4, 4>}, {pipeline_mode = #tpu.pipeline_mode<synchronous>, transform_indices = @transform_4, window_bounds = array<i64: 1, 4>}, {pipeline_mode = #tpu.pipeline_mode<synchronous>, transform_indices = @transform_5, window_bounds = array<i64: 1, 9, 4, 4>}, {pipeline_mode = #tpu.pipeline_mode<synchronous>, transform_indices = @transform_6, window_bounds = array<i64: 1, 1, 4>}, {pipeline_mode = #tpu.pipeline_mode<synchronous>, transform_indices = @transform_7, window_bounds = array<i64: 1, 9, 4, 4>}, {pipeline_mode = #tpu.pipeline_mode<synchronous>, transform_indices = @transform_8, window_bounds = array<i64: 1, 1, 4>}, {pipeline_mode = #tpu.pipeline_mode<synchronous>, transform_indices = @transform_9, window_bounds = array<i64: 3, 4, 8>}, {pipeline_mode = #tpu.pipeline_mode<synchronous>, transform_indices = @transform_10, window_bounds = array<i64: 1, 8>}, {transform_indices = @transform_11, window_bounds = array<i64: 1, 256, 8>}]} {
    %c0 = arith.constant 0 : index
    %c0_0 = arith.constant 0 : index
    %c0_1 = arith.constant 0 : index
    %0 = vector.load %arg1[%c0, %c0_0, %c0_1] : memref<1x256x4xf32, #tpu.memory_space<vmem>>, vector<1x256x4xf32>
    %1 = vector.shape_cast %0 : vector<1x256x4xf32> to vector<256x4xf32>
    %c0_2 = arith.constant 0 : index
    %c0_3 = arith.constant 0 : index
    %2 = vector.load %arg2[%c0_2, %c0_3] : memref<4x4xf32, #tpu.memory_space<vmem>>, vector<4x4xf32>
    %cst = arith.constant dense<0.000000e+00> : vector<256x4xf32>
    %3 = tpu.matmul %1, %2, %cst {dimension_numbers = #tpu.dot_dimension_numbers<[1], [0], [0], [1], [0, 0, 1, 1], [], []>} : vector<256x4xf32>, vector<4x4xf32>, vector<256x4xf32> -> vector<256x4xf32>
    %c0_4 = arith.constant 0 : index
    %c0_5 = arith.constant 0 : index
    %4 = vector.load %arg3[%c0_4, %c0_5] : memref<1x4xf32, #tpu.memory_space<vmem>>, vector<1x4xf32>
    %5 = vector.broadcast %4 : vector<1x4xf32> to vector<256x4xf32>
    %6 = arith.addf %3, %5 : vector<256x4xf32>
    %7 = arith.negf %6 : vector<256x4xf32>
    %8 = math.exp %7 : vector<256x4xf32>
    %cst_6 = arith.constant 1.000000e+00 : f32
    %9 = vector.broadcast %cst_6 : f32 to vector<256x4xf32>
    %10 = arith.addf %9, %8 : vector<256x4xf32>
    %11 = arith.divf %9, %10 : vector<256x4xf32>
    %12 = arith.mulf %6, %11 : vector<256x4xf32>
    %c0_7 = arith.constant 0 : index
    %c0_8 = arith.constant 0 : index
    %13 = vector.load %arg4[%c0_7, %c0_8] : memref<4x4xf32, #tpu.memory_space<vmem>>, vector<4x4xf32>
    %cst_9 = arith.constant dense<0.000000e+00> : vector<256x4xf32>
    %14 = tpu.matmul %1, %13, %cst_9 {dimension_numbers = #tpu.dot_dimension_numbers<[1], [0], [0], [1], [0, 0, 1, 1], [], []>} : vector<256x4xf32>, vector<4x4xf32>, vector<256x4xf32> -> vector<256x4xf32>
    %c0_10 = arith.constant 0 : index
    %c0_11 = arith.constant 0 : index
    %15 = vector.load %arg5[%c0_10, %c0_11] : memref<1x4xf32, #tpu.memory_space<vmem>>, vector<1x4xf32>
    %16 = vector.broadcast %15 : vector<1x4xf32> to vector<256x4xf32>
    %17 = arith.addf %14, %16 : vector<256x4xf32>
    %18 = arith.negf %17 : vector<256x4xf32>
    %19 = math.exp %18 : vector<256x4xf32>
    %cst_12 = arith.constant 1.000000e+00 : f32
    %20 = vector.broadcast %cst_12 : f32 to vector<256x4xf32>
    %21 = arith.addf %20, %19 : vector<256x4xf32>
    %22 = arith.divf %20, %21 : vector<256x4xf32>
    %23 = arith.mulf %17, %22 : vector<256x4xf32>
    %24 = tpu.iota {dimensions = array<i32: 0>} : vector<256x1xi32>
    %c15_i32 = arith.constant 15 : i32
    %25 = vector.broadcast %c15_i32 : i32 to vector<256x1xi32>
    %26 = arith.andi %24, %25 : vector<256x1xi32>
    %c16_i32 = arith.constant 16 : i32
    %27 = vector.broadcast %c16_i32 : i32 to vector<256x1xi32>
    %28 = arith.cmpi sge, %24, %27 : vector<256x1xi32>
    %c1_i32 = arith.constant 1 : i32
    %29 = vector.broadcast %c1_i32 : i32 to vector<256x1xi32>
    %30 = arith.cmpi sge, %26, %29 : vector<256x1xi32>
    %31 = arith.andi %28, %30 : vector<256x1xi1>
    %c16_i32_13 = arith.constant 16 : i32
    %32 = vector.broadcast %c16_i32_13 : i32 to vector<256x1xi32>
    %33 = arith.cmpi sge, %24, %32 : vector<256x1xi32>
    %c16_i32_14 = arith.constant 16 : i32
    %34 = vector.broadcast %c16_i32_14 : i32 to vector<256x1xi32>
    %35 = arith.cmpi sge, %24, %34 : vector<256x1xi32>
    %c15_i32_15 = arith.constant 15 : i32
    %36 = vector.broadcast %c15_i32_15 : i32 to vector<256x1xi32>
    %37 = arith.cmpi slt, %26, %36 : vector<256x1xi32>
    %38 = arith.andi %35, %37 : vector<256x1xi1>
    %c1_i32_16 = arith.constant 1 : i32
    %39 = vector.broadcast %c1_i32_16 : i32 to vector<256x1xi32>
    %40 = arith.cmpi sge, %26, %39 : vector<256x1xi32>
    %c15_i32_17 = arith.constant 15 : i32
    %41 = vector.broadcast %c15_i32_17 : i32 to vector<256x1xi32>
    %42 = arith.cmpi slt, %26, %41 : vector<256x1xi32>
    %c240_i32 = arith.constant 240 : i32
    %43 = vector.broadcast %c240_i32 : i32 to vector<256x1xi32>
    %44 = arith.cmpi slt, %24, %43 : vector<256x1xi32>
    %c1_i32_18 = arith.constant 1 : i32
    %45 = vector.broadcast %c1_i32_18 : i32 to vector<256x1xi32>
    %46 = arith.cmpi sge, %26, %45 : vector<256x1xi32>
    %47 = arith.andi %44, %46 : vector<256x1xi1>
    %c240_i32_19 = arith.constant 240 : i32
    %48 = vector.broadcast %c240_i32_19 : i32 to vector<256x1xi32>
    %49 = arith.cmpi slt, %24, %48 : vector<256x1xi32>
    %c240_i32_20 = arith.constant 240 : i32
    %50 = vector.broadcast %c240_i32_20 : i32 to vector<256x1xi32>
    %51 = arith.cmpi slt, %24, %50 : vector<256x1xi32>
    %c15_i32_21 = arith.constant 15 : i32
    %52 = vector.broadcast %c15_i32_21 : i32 to vector<256x1xi32>
    %53 = arith.cmpi slt, %26, %52 : vector<256x1xi32>
    %54 = arith.andi %51, %53 : vector<256x1xi1>
    %c0_22 = arith.constant 0 : index
    %c0_23 = arith.constant 0 : index
    %c0_24 = arith.constant 0 : index
    %c0_25 = arith.constant 0 : index
    %55 = vector.load %arg6[%c0_22, %c0_23, %c0_24, %c0_25] : memref<1x9x4x4xf32, #tpu.memory_space<vmem>>, vector<1x9x4x4xf32>
    %56 = vector.shape_cast %55 : vector<1x9x4x4xf32> to vector<9x4x4xf32>
    %c0_26 = arith.constant 0 : index
    %c0_27 = arith.constant 0 : index
    %c0_28 = arith.constant 0 : index
    %57 = vector.load %arg7[%c0_26, %c0_27, %c0_28] : memref<1x1x4xf32, #tpu.memory_space<vmem>>, vector<1x1x4xf32>
    %58 = vector.shape_cast %57 : vector<1x1x4xf32> to vector<1x4xf32>
    %c17_i32 = arith.constant 17 : i32
    %59 = tpu.dynamic_rotate %23 by %c17_i32 dim 0 : vector<256x4xf32>, i32 -> vector<256x4xf32>
    %cst_29 = arith.constant 0.000000e+00 : f32
    %60 = vector.shape_cast %31 : vector<256x1xi1> to vector<256x1xi1>
    %61 = vector.broadcast %60 : vector<256x1xi1> to vector<256x4xi1>
    %62 = vector.broadcast %cst_29 : f32 to vector<256x4xf32>
    %63 = arith.select %61, %59, %62 : vector<256x4xi1>, vector<256x4xf32>
    %64 = vector.extract_strided_slice %56 {offsets = [0, 0, 0], sizes = [1, 4, 4], strides = [1, 1, 1]} : vector<9x4x4xf32> to vector<1x4x4xf32>
    %65 = vector.shape_cast %64 : vector<1x4x4xf32> to vector<4x4xf32>
    %cst_30 = arith.constant dense<0.000000e+00> : vector<256x4xf32>
    %66 = tpu.matmul %63, %65, %cst_30 {dimension_numbers = #tpu.dot_dimension_numbers<[1], [0], [0], [1], [0, 0, 1, 1], [], []>} : vector<256x4xf32>, vector<4x4xf32>, vector<256x4xf32> -> vector<256x4xf32>
    %c16_i32_31 = arith.constant 16 : i32
    %67 = tpu.dynamic_rotate %23 by %c16_i32_31 dim 0 : vector<256x4xf32>, i32 -> vector<256x4xf32>
    %cst_32 = arith.constant 0.000000e+00 : f32
    %68 = vector.shape_cast %33 : vector<256x1xi1> to vector<256x1xi1>
    %69 = vector.broadcast %68 : vector<256x1xi1> to vector<256x4xi1>
    %70 = vector.broadcast %cst_32 : f32 to vector<256x4xf32>
    %71 = arith.select %69, %67, %70 : vector<256x4xi1>, vector<256x4xf32>
    %72 = vector.extract_strided_slice %56 {offsets = [1, 0, 0], sizes = [1, 4, 4], strides = [1, 1, 1]} : vector<9x4x4xf32> to vector<1x4x4xf32>
    %73 = vector.shape_cast %72 : vector<1x4x4xf32> to vector<4x4xf32>
    %cst_33 = arith.constant dense<0.000000e+00> : vector<256x4xf32>
    %74 = tpu.matmul %71, %73, %cst_33 {dimension_numbers = #tpu.dot_dimension_numbers<[1], [0], [0], [1], [0, 0, 1, 1], [], []>} : vector<256x4xf32>, vector<4x4xf32>, vector<256x4xf32> -> vector<256x4xf32>
    %75 = arith.addf %66, %74 : vector<256x4xf32>
    %c15_i32_34 = arith.constant 15 : i32
    %76 = tpu.dynamic_rotate %23 by %c15_i32_34 dim 0 : vector<256x4xf32>, i32 -> vector<256x4xf32>
    %cst_35 = arith.constant 0.000000e+00 : f32
    %77 = vector.shape_cast %38 : vector<256x1xi1> to vector<256x1xi1>
    %78 = vector.broadcast %77 : vector<256x1xi1> to vector<256x4xi1>
    %79 = vector.broadcast %cst_35 : f32 to vector<256x4xf32>
    %80 = arith.select %78, %76, %79 : vector<256x4xi1>, vector<256x4xf32>
    %81 = vector.extract_strided_slice %56 {offsets = [2, 0, 0], sizes = [1, 4, 4], strides = [1, 1, 1]} : vector<9x4x4xf32> to vector<1x4x4xf32>
    %82 = vector.shape_cast %81 : vector<1x4x4xf32> to vector<4x4xf32>
    %cst_36 = arith.constant dense<0.000000e+00> : vector<256x4xf32>
    %83 = tpu.matmul %80, %82, %cst_36 {dimension_numbers = #tpu.dot_dimension_numbers<[1], [0], [0], [1], [0, 0, 1, 1], [], []>} : vector<256x4xf32>, vector<4x4xf32>, vector<256x4xf32> -> vector<256x4xf32>
    %84 = arith.addf %75, %83 : vector<256x4xf32>
    %c1_i32_37 = arith.constant 1 : i32
    %85 = tpu.dynamic_rotate %23 by %c1_i32_37 dim 0 : vector<256x4xf32>, i32 -> vector<256x4xf32>
    %cst_38 = arith.constant 0.000000e+00 : f32
    %86 = vector.shape_cast %40 : vector<256x1xi1> to vector<256x1xi1>
    %87 = vector.broadcast %86 : vector<256x1xi1> to vector<256x4xi1>
    %88 = vector.broadcast %cst_38 : f32 to vector<256x4xf32>
    %89 = arith.select %87, %85, %88 : vector<256x4xi1>, vector<256x4xf32>
    %90 = vector.extract_strided_slice %56 {offsets = [3, 0, 0], sizes = [1, 4, 4], strides = [1, 1, 1]} : vector<9x4x4xf32> to vector<1x4x4xf32>
    %91 = vector.shape_cast %90 : vector<1x4x4xf32> to vector<4x4xf32>
    %cst_39 = arith.constant dense<0.000000e+00> : vector<256x4xf32>
    %92 = tpu.matmul %89, %91, %cst_39 {dimension_numbers = #tpu.dot_dimension_numbers<[1], [0], [0], [1], [0, 0, 1, 1], [], []>} : vector<256x4xf32>, vector<4x4xf32>, vector<256x4xf32> -> vector<256x4xf32>
    %93 = arith.addf %84, %92 : vector<256x4xf32>
    %94 = vector.extract_strided_slice %56 {offsets = [4, 0, 0], sizes = [1, 4, 4], strides = [1, 1, 1]} : vector<9x4x4xf32> to vector<1x4x4xf32>
    %95 = vector.shape_cast %94 : vector<1x4x4xf32> to vector<4x4xf32>
    %cst_40 = arith.constant dense<0.000000e+00> : vector<256x4xf32>
    %96 = tpu.matmul %23, %95, %cst_40 {dimension_numbers = #tpu.dot_dimension_numbers<[1], [0], [0], [1], [0, 0, 1, 1], [], []>} : vector<256x4xf32>, vector<4x4xf32>, vector<256x4xf32> -> vector<256x4xf32>
    %97 = arith.addf %93, %96 : vector<256x4xf32>
    %c255_i32 = arith.constant 255 : i32
    %98 = tpu.dynamic_rotate %23 by %c255_i32 dim 0 : vector<256x4xf32>, i32 -> vector<256x4xf32>
    %cst_41 = arith.constant 0.000000e+00 : f32
    %99 = vector.shape_cast %42 : vector<256x1xi1> to vector<256x1xi1>
    %100 = vector.broadcast %99 : vector<256x1xi1> to vector<256x4xi1>
    %101 = vector.broadcast %cst_41 : f32 to vector<256x4xf32>
    %102 = arith.select %100, %98, %101 : vector<256x4xi1>, vector<256x4xf32>
    %103 = vector.extract_strided_slice %56 {offsets = [5, 0, 0], sizes = [1, 4, 4], strides = [1, 1, 1]} : vector<9x4x4xf32> to vector<1x4x4xf32>
    %104 = vector.shape_cast %103 : vector<1x4x4xf32> to vector<4x4xf32>
    %cst_42 = arith.constant dense<0.000000e+00> : vector<256x4xf32>
    %105 = tpu.matmul %102, %104, %cst_42 {dimension_numbers = #tpu.dot_dimension_numbers<[1], [0], [0], [1], [0, 0, 1, 1], [], []>} : vector<256x4xf32>, vector<4x4xf32>, vector<256x4xf32> -> vector<256x4xf32>
    %106 = arith.addf %97, %105 : vector<256x4xf32>
    %c241_i32 = arith.constant 241 : i32
    %107 = tpu.dynamic_rotate %23 by %c241_i32 dim 0 : vector<256x4xf32>, i32 -> vector<256x4xf32>
    %cst_43 = arith.constant 0.000000e+00 : f32
    %108 = vector.shape_cast %47 : vector<256x1xi1> to vector<256x1xi1>
    %109 = vector.broadcast %108 : vector<256x1xi1> to vector<256x4xi1>
    %110 = vector.broadcast %cst_43 : f32 to vector<256x4xf32>
    %111 = arith.select %109, %107, %110 : vector<256x4xi1>, vector<256x4xf32>
    %112 = vector.extract_strided_slice %56 {offsets = [6, 0, 0], sizes = [1, 4, 4], strides = [1, 1, 1]} : vector<9x4x4xf32> to vector<1x4x4xf32>
    %113 = vector.shape_cast %112 : vector<1x4x4xf32> to vector<4x4xf32>
    %cst_44 = arith.constant dense<0.000000e+00> : vector<256x4xf32>
    %114 = tpu.matmul %111, %113, %cst_44 {dimension_numbers = #tpu.dot_dimension_numbers<[1], [0], [0], [1], [0, 0, 1, 1], [], []>} : vector<256x4xf32>, vector<4x4xf32>, vector<256x4xf32> -> vector<256x4xf32>
    %115 = arith.addf %106, %114 : vector<256x4xf32>
    %c240_i32_45 = arith.constant 240 : i32
    %116 = tpu.dynamic_rotate %23 by %c240_i32_45 dim 0 : vector<256x4xf32>, i32 -> vector<256x4xf32>
    %cst_46 = arith.constant 0.000000e+00 : f32
    %117 = vector.shape_cast %49 : vector<256x1xi1> to vector<256x1xi1>
    %118 = vector.broadcast %117 : vector<256x1xi1> to vector<256x4xi1>
    %119 = vector.broadcast %cst_46 : f32 to vector<256x4xf32>
    %120 = arith.select %118, %116, %119 : vector<256x4xi1>, vector<256x4xf32>
    %121 = vector.extract_strided_slice %56 {offsets = [7, 0, 0], sizes = [1, 4, 4], strides = [1, 1, 1]} : vector<9x4x4xf32> to vector<1x4x4xf32>
    %122 = vector.shape_cast %121 : vector<1x4x4xf32> to vector<4x4xf32>
    %cst_47 = arith.constant dense<0.000000e+00> : vector<256x4xf32>
    %123 = tpu.matmul %120, %122, %cst_47 {dimension_numbers = #tpu.dot_dimension_numbers<[1], [0], [0], [1], [0, 0, 1, 1], [], []>} : vector<256x4xf32>, vector<4x4xf32>, vector<256x4xf32> -> vector<256x4xf32>
    %124 = arith.addf %115, %123 : vector<256x4xf32>
    %c239_i32 = arith.constant 239 : i32
    %125 = tpu.dynamic_rotate %23 by %c239_i32 dim 0 : vector<256x4xf32>, i32 -> vector<256x4xf32>
    %cst_48 = arith.constant 0.000000e+00 : f32
    %126 = vector.shape_cast %54 : vector<256x1xi1> to vector<256x1xi1>
    %127 = vector.broadcast %126 : vector<256x1xi1> to vector<256x4xi1>
    %128 = vector.broadcast %cst_48 : f32 to vector<256x4xf32>
    %129 = arith.select %127, %125, %128 : vector<256x4xi1>, vector<256x4xf32>
    %130 = vector.extract_strided_slice %56 {offsets = [8, 0, 0], sizes = [1, 4, 4], strides = [1, 1, 1]} : vector<9x4x4xf32> to vector<1x4x4xf32>
    %131 = vector.shape_cast %130 : vector<1x4x4xf32> to vector<4x4xf32>
    %cst_49 = arith.constant dense<0.000000e+00> : vector<256x4xf32>
    %132 = tpu.matmul %129, %131, %cst_49 {dimension_numbers = #tpu.dot_dimension_numbers<[1], [0], [0], [1], [0, 0, 1, 1], [], []>} : vector<256x4xf32>, vector<4x4xf32>, vector<256x4xf32> -> vector<256x4xf32>
    %133 = arith.addf %124, %132 : vector<256x4xf32>
    %134 = vector.broadcast %58 : vector<1x4xf32> to vector<256x4xf32>
    %135 = arith.addf %133, %134 : vector<256x4xf32>
    %136 = arith.negf %135 : vector<256x4xf32>
    %137 = math.exp %136 : vector<256x4xf32>
    %cst_50 = arith.constant 1.000000e+00 : f32
    %138 = vector.broadcast %cst_50 : f32 to vector<256x4xf32>
    %139 = arith.addf %138, %137 : vector<256x4xf32>
    %140 = arith.divf %138, %139 : vector<256x4xf32>
    %141 = arith.mulf %135, %140 : vector<256x4xf32>
    %c0_51 = arith.constant 0 : index
    %c0_52 = arith.constant 0 : index
    %c0_53 = arith.constant 0 : index
    %c0_54 = arith.constant 0 : index
    %142 = vector.load %arg8[%c0_51, %c0_52, %c0_53, %c0_54] : memref<1x9x4x4xf32, #tpu.memory_space<vmem>>, vector<1x9x4x4xf32>
    %143 = vector.shape_cast %142 : vector<1x9x4x4xf32> to vector<9x4x4xf32>
    %c0_55 = arith.constant 0 : index
    %c0_56 = arith.constant 0 : index
    %c0_57 = arith.constant 0 : index
    %144 = vector.load %arg9[%c0_55, %c0_56, %c0_57] : memref<1x1x4xf32, #tpu.memory_space<vmem>>, vector<1x1x4xf32>
    %145 = vector.shape_cast %144 : vector<1x1x4xf32> to vector<1x4xf32>
    %c17_i32_58 = arith.constant 17 : i32
    %146 = tpu.dynamic_rotate %141 by %c17_i32_58 dim 0 : vector<256x4xf32>, i32 -> vector<256x4xf32>
    %cst_59 = arith.constant 0.000000e+00 : f32
    %147 = vector.shape_cast %31 : vector<256x1xi1> to vector<256x1xi1>
    %148 = vector.broadcast %147 : vector<256x1xi1> to vector<256x4xi1>
    %149 = vector.broadcast %cst_59 : f32 to vector<256x4xf32>
    %150 = arith.select %148, %146, %149 : vector<256x4xi1>, vector<256x4xf32>
    %151 = vector.extract_strided_slice %143 {offsets = [0, 0, 0], sizes = [1, 4, 4], strides = [1, 1, 1]} : vector<9x4x4xf32> to vector<1x4x4xf32>
    %152 = vector.shape_cast %151 : vector<1x4x4xf32> to vector<4x4xf32>
    %cst_60 = arith.constant dense<0.000000e+00> : vector<256x4xf32>
    %153 = tpu.matmul %150, %152, %cst_60 {dimension_numbers = #tpu.dot_dimension_numbers<[1], [0], [0], [1], [0, 0, 1, 1], [], []>} : vector<256x4xf32>, vector<4x4xf32>, vector<256x4xf32> -> vector<256x4xf32>
    %c16_i32_61 = arith.constant 16 : i32
    %154 = tpu.dynamic_rotate %141 by %c16_i32_61 dim 0 : vector<256x4xf32>, i32 -> vector<256x4xf32>
    %cst_62 = arith.constant 0.000000e+00 : f32
    %155 = vector.shape_cast %33 : vector<256x1xi1> to vector<256x1xi1>
    %156 = vector.broadcast %155 : vector<256x1xi1> to vector<256x4xi1>
    %157 = vector.broadcast %cst_62 : f32 to vector<256x4xf32>
    %158 = arith.select %156, %154, %157 : vector<256x4xi1>, vector<256x4xf32>
    %159 = vector.extract_strided_slice %143 {offsets = [1, 0, 0], sizes = [1, 4, 4], strides = [1, 1, 1]} : vector<9x4x4xf32> to vector<1x4x4xf32>
    %160 = vector.shape_cast %159 : vector<1x4x4xf32> to vector<4x4xf32>
    %cst_63 = arith.constant dense<0.000000e+00> : vector<256x4xf32>
    %161 = tpu.matmul %158, %160, %cst_63 {dimension_numbers = #tpu.dot_dimension_numbers<[1], [0], [0], [1], [0, 0, 1, 1], [], []>} : vector<256x4xf32>, vector<4x4xf32>, vector<256x4xf32> -> vector<256x4xf32>
    %162 = arith.addf %153, %161 : vector<256x4xf32>
    %c15_i32_64 = arith.constant 15 : i32
    %163 = tpu.dynamic_rotate %141 by %c15_i32_64 dim 0 : vector<256x4xf32>, i32 -> vector<256x4xf32>
    %cst_65 = arith.constant 0.000000e+00 : f32
    %164 = vector.shape_cast %38 : vector<256x1xi1> to vector<256x1xi1>
    %165 = vector.broadcast %164 : vector<256x1xi1> to vector<256x4xi1>
    %166 = vector.broadcast %cst_65 : f32 to vector<256x4xf32>
    %167 = arith.select %165, %163, %166 : vector<256x4xi1>, vector<256x4xf32>
    %168 = vector.extract_strided_slice %143 {offsets = [2, 0, 0], sizes = [1, 4, 4], strides = [1, 1, 1]} : vector<9x4x4xf32> to vector<1x4x4xf32>
    %169 = vector.shape_cast %168 : vector<1x4x4xf32> to vector<4x4xf32>
    %cst_66 = arith.constant dense<0.000000e+00> : vector<256x4xf32>
    %170 = tpu.matmul %167, %169, %cst_66 {dimension_numbers = #tpu.dot_dimension_numbers<[1], [0], [0], [1], [0, 0, 1, 1], [], []>} : vector<256x4xf32>, vector<4x4xf32>, vector<256x4xf32> -> vector<256x4xf32>
    %171 = arith.addf %162, %170 : vector<256x4xf32>
    %c1_i32_67 = arith.constant 1 : i32
    %172 = tpu.dynamic_rotate %141 by %c1_i32_67 dim 0 : vector<256x4xf32>, i32 -> vector<256x4xf32>
    %cst_68 = arith.constant 0.000000e+00 : f32
    %173 = vector.shape_cast %40 : vector<256x1xi1> to vector<256x1xi1>
    %174 = vector.broadcast %173 : vector<256x1xi1> to vector<256x4xi1>
    %175 = vector.broadcast %cst_68 : f32 to vector<256x4xf32>
    %176 = arith.select %174, %172, %175 : vector<256x4xi1>, vector<256x4xf32>
    %177 = vector.extract_strided_slice %143 {offsets = [3, 0, 0], sizes = [1, 4, 4], strides = [1, 1, 1]} : vector<9x4x4xf32> to vector<1x4x4xf32>
    %178 = vector.shape_cast %177 : vector<1x4x4xf32> to vector<4x4xf32>
    %cst_69 = arith.constant dense<0.000000e+00> : vector<256x4xf32>
    %179 = tpu.matmul %176, %178, %cst_69 {dimension_numbers = #tpu.dot_dimension_numbers<[1], [0], [0], [1], [0, 0, 1, 1], [], []>} : vector<256x4xf32>, vector<4x4xf32>, vector<256x4xf32> -> vector<256x4xf32>
    %180 = arith.addf %171, %179 : vector<256x4xf32>
    %181 = vector.extract_strided_slice %143 {offsets = [4, 0, 0], sizes = [1, 4, 4], strides = [1, 1, 1]} : vector<9x4x4xf32> to vector<1x4x4xf32>
    %182 = vector.shape_cast %181 : vector<1x4x4xf32> to vector<4x4xf32>
    %cst_70 = arith.constant dense<0.000000e+00> : vector<256x4xf32>
    %183 = tpu.matmul %141, %182, %cst_70 {dimension_numbers = #tpu.dot_dimension_numbers<[1], [0], [0], [1], [0, 0, 1, 1], [], []>} : vector<256x4xf32>, vector<4x4xf32>, vector<256x4xf32> -> vector<256x4xf32>
    %184 = arith.addf %180, %183 : vector<256x4xf32>
    %c255_i32_71 = arith.constant 255 : i32
    %185 = tpu.dynamic_rotate %141 by %c255_i32_71 dim 0 : vector<256x4xf32>, i32 -> vector<256x4xf32>
    %cst_72 = arith.constant 0.000000e+00 : f32
    %186 = vector.shape_cast %42 : vector<256x1xi1> to vector<256x1xi1>
    %187 = vector.broadcast %186 : vector<256x1xi1> to vector<256x4xi1>
    %188 = vector.broadcast %cst_72 : f32 to vector<256x4xf32>
    %189 = arith.select %187, %185, %188 : vector<256x4xi1>, vector<256x4xf32>
    %190 = vector.extract_strided_slice %143 {offsets = [5, 0, 0], sizes = [1, 4, 4], strides = [1, 1, 1]} : vector<9x4x4xf32> to vector<1x4x4xf32>
    %191 = vector.shape_cast %190 : vector<1x4x4xf32> to vector<4x4xf32>
    %cst_73 = arith.constant dense<0.000000e+00> : vector<256x4xf32>
    %192 = tpu.matmul %189, %191, %cst_73 {dimension_numbers = #tpu.dot_dimension_numbers<[1], [0], [0], [1], [0, 0, 1, 1], [], []>} : vector<256x4xf32>, vector<4x4xf32>, vector<256x4xf32> -> vector<256x4xf32>
    %193 = arith.addf %184, %192 : vector<256x4xf32>
    %c241_i32_74 = arith.constant 241 : i32
    %194 = tpu.dynamic_rotate %141 by %c241_i32_74 dim 0 : vector<256x4xf32>, i32 -> vector<256x4xf32>
    %cst_75 = arith.constant 0.000000e+00 : f32
    %195 = vector.shape_cast %47 : vector<256x1xi1> to vector<256x1xi1>
    %196 = vector.broadcast %195 : vector<256x1xi1> to vector<256x4xi1>
    %197 = vector.broadcast %cst_75 : f32 to vector<256x4xf32>
    %198 = arith.select %196, %194, %197 : vector<256x4xi1>, vector<256x4xf32>
    %199 = vector.extract_strided_slice %143 {offsets = [6, 0, 0], sizes = [1, 4, 4], strides = [1, 1, 1]} : vector<9x4x4xf32> to vector<1x4x4xf32>
    %200 = vector.shape_cast %199 : vector<1x4x4xf32> to vector<4x4xf32>
    %cst_76 = arith.constant dense<0.000000e+00> : vector<256x4xf32>
    %201 = tpu.matmul %198, %200, %cst_76 {dimension_numbers = #tpu.dot_dimension_numbers<[1], [0], [0], [1], [0, 0, 1, 1], [], []>} : vector<256x4xf32>, vector<4x4xf32>, vector<256x4xf32> -> vector<256x4xf32>
    %202 = arith.addf %193, %201 : vector<256x4xf32>
    %c240_i32_77 = arith.constant 240 : i32
    %203 = tpu.dynamic_rotate %141 by %c240_i32_77 dim 0 : vector<256x4xf32>, i32 -> vector<256x4xf32>
    %cst_78 = arith.constant 0.000000e+00 : f32
    %204 = vector.shape_cast %49 : vector<256x1xi1> to vector<256x1xi1>
    %205 = vector.broadcast %204 : vector<256x1xi1> to vector<256x4xi1>
    %206 = vector.broadcast %cst_78 : f32 to vector<256x4xf32>
    %207 = arith.select %205, %203, %206 : vector<256x4xi1>, vector<256x4xf32>
    %208 = vector.extract_strided_slice %143 {offsets = [7, 0, 0], sizes = [1, 4, 4], strides = [1, 1, 1]} : vector<9x4x4xf32> to vector<1x4x4xf32>
    %209 = vector.shape_cast %208 : vector<1x4x4xf32> to vector<4x4xf32>
    %cst_79 = arith.constant dense<0.000000e+00> : vector<256x4xf32>
    %210 = tpu.matmul %207, %209, %cst_79 {dimension_numbers = #tpu.dot_dimension_numbers<[1], [0], [0], [1], [0, 0, 1, 1], [], []>} : vector<256x4xf32>, vector<4x4xf32>, vector<256x4xf32> -> vector<256x4xf32>
    %211 = arith.addf %202, %210 : vector<256x4xf32>
    %c239_i32_80 = arith.constant 239 : i32
    %212 = tpu.dynamic_rotate %141 by %c239_i32_80 dim 0 : vector<256x4xf32>, i32 -> vector<256x4xf32>
    %cst_81 = arith.constant 0.000000e+00 : f32
    %213 = vector.shape_cast %54 : vector<256x1xi1> to vector<256x1xi1>
    %214 = vector.broadcast %213 : vector<256x1xi1> to vector<256x4xi1>
    %215 = vector.broadcast %cst_81 : f32 to vector<256x4xf32>
    %216 = arith.select %214, %212, %215 : vector<256x4xi1>, vector<256x4xf32>
    %217 = vector.extract_strided_slice %143 {offsets = [8, 0, 0], sizes = [1, 4, 4], strides = [1, 1, 1]} : vector<9x4x4xf32> to vector<1x4x4xf32>
    %218 = vector.shape_cast %217 : vector<1x4x4xf32> to vector<4x4xf32>
    %cst_82 = arith.constant dense<0.000000e+00> : vector<256x4xf32>
    %219 = tpu.matmul %216, %218, %cst_82 {dimension_numbers = #tpu.dot_dimension_numbers<[1], [0], [0], [1], [0, 0, 1, 1], [], []>} : vector<256x4xf32>, vector<4x4xf32>, vector<256x4xf32> -> vector<256x4xf32>
    %220 = arith.addf %211, %219 : vector<256x4xf32>
    %221 = vector.broadcast %145 : vector<1x4xf32> to vector<256x4xf32>
    %222 = arith.addf %220, %221 : vector<256x4xf32>
    %223 = arith.negf %222 : vector<256x4xf32>
    %224 = math.exp %223 : vector<256x4xf32>
    %cst_83 = arith.constant 1.000000e+00 : f32
    %225 = vector.broadcast %cst_83 : f32 to vector<256x4xf32>
    %226 = arith.addf %225, %224 : vector<256x4xf32>
    %227 = arith.divf %225, %226 : vector<256x4xf32>
    %228 = arith.mulf %222, %227 : vector<256x4xf32>
    %c0_84 = arith.constant 0 : index
    %c0_85 = arith.constant 0 : index
    %c0_86 = arith.constant 0 : index
    %229 = vector.load %arg10[%c0_84, %c0_85, %c0_86] : memref<3x4x8xf32, #tpu.memory_space<vmem>>, vector<1x4x8xf32>
    %230 = vector.shape_cast %229 : vector<1x4x8xf32> to vector<4x8xf32>
    %cst_87 = arith.constant dense<0.000000e+00> : vector<256x8xf32>
    %231 = tpu.matmul %12, %230, %cst_87 {dimension_numbers = #tpu.dot_dimension_numbers<[1], [0], [0], [1], [0, 0, 1, 1], [], []>} : vector<256x4xf32>, vector<4x8xf32>, vector<256x8xf32> -> vector<256x8xf32>
    %c1 = arith.constant 1 : index
    %c0_88 = arith.constant 0 : index
    %c0_89 = arith.constant 0 : index
    %232 = vector.load %arg10[%c1, %c0_88, %c0_89] : memref<3x4x8xf32, #tpu.memory_space<vmem>>, vector<1x4x8xf32>
    %233 = vector.shape_cast %232 : vector<1x4x8xf32> to vector<4x8xf32>
    %cst_90 = arith.constant dense<0.000000e+00> : vector<256x8xf32>
    %234 = tpu.matmul %23, %233, %cst_90 {dimension_numbers = #tpu.dot_dimension_numbers<[1], [0], [0], [1], [0, 0, 1, 1], [], []>} : vector<256x4xf32>, vector<4x8xf32>, vector<256x8xf32> -> vector<256x8xf32>
    %235 = arith.addf %231, %234 : vector<256x8xf32>
    %c2 = arith.constant 2 : index
    %c0_91 = arith.constant 0 : index
    %c0_92 = arith.constant 0 : index
    %236 = vector.load %arg10[%c2, %c0_91, %c0_92] : memref<3x4x8xf32, #tpu.memory_space<vmem>>, vector<1x4x8xf32>
    %237 = vector.shape_cast %236 : vector<1x4x8xf32> to vector<4x8xf32>
    %cst_93 = arith.constant dense<0.000000e+00> : vector<256x8xf32>
    %238 = tpu.matmul %228, %237, %cst_93 {dimension_numbers = #tpu.dot_dimension_numbers<[1], [0], [0], [1], [0, 0, 1, 1], [], []>} : vector<256x4xf32>, vector<4x8xf32>, vector<256x8xf32> -> vector<256x8xf32>
    %239 = arith.addf %235, %238 : vector<256x8xf32>
    %c0_94 = arith.constant 0 : index
    %c0_95 = arith.constant 0 : index
    %240 = vector.load %arg11[%c0_94, %c0_95] : memref<1x8xf32, #tpu.memory_space<vmem>>, vector<1x8xf32>
    %241 = vector.broadcast %240 : vector<1x8xf32> to vector<256x8xf32>
    %242 = arith.addf %239, %241 : vector<256x8xf32>
    %243 = arith.negf %242 : vector<256x8xf32>
    %244 = math.exp %243 : vector<256x8xf32>
    %cst_96 = arith.constant 1.000000e+00 : f32
    %245 = vector.broadcast %cst_96 : f32 to vector<256x8xf32>
    %246 = arith.addf %245, %244 : vector<256x8xf32>
    %247 = arith.divf %245, %246 : vector<256x8xf32>
    %248 = arith.mulf %242, %247 : vector<256x8xf32>
    %c0_97 = arith.constant 0 : index
    %c0_98 = arith.constant 0 : index
    %c0_99 = arith.constant 0 : index
    %249 = vector.load %arg12[%c0_97, %c0_98, %c0_99] : memref<1x256x8xf32, #tpu.memory_space<vmem>>, vector<1x256x8xf32>
    %250 = vector.shape_cast %249 : vector<1x256x8xf32> to vector<256x8xf32>
    %251 = vector.shape_cast %248 : vector<256x8xf32> to vector<1x256x8xf32>
    tpu.vector_store %arg12[%c0_97, %c0_98, %c0_99], %251 {strides = array<i32>} : memref<1x256x8xf32, #tpu.memory_space<vmem>>, vector<1x256x8xf32>,
    return
  }
  func.func @transform_0(%arg0: i32) -> (i32, i32, i32) {
    %c0_i32 = arith.constant 0 : i32
    %c0_i32_0 = arith.constant 0 : i32
    %c0_i32_1 = arith.constant 0 : i32
    return %arg0, %c0_i32, %c0_i32_0 : i32, i32, i32
  }
  func.func @transform_1(%arg0: i32) -> (i32, i32) {
    %c0_i32 = arith.constant 0 : i32
    %c0_i32_0 = arith.constant 0 : i32
    %c0_i32_1 = arith.constant 0 : i32
    return %c0_i32, %c0_i32_0 : i32, i32
  }
  func.func @transform_2(%arg0: i32) -> (i32, i32) {
    %c0_i32 = arith.constant 0 : i32
    %c0_i32_0 = arith.constant 0 : i32
    %c0_i32_1 = arith.constant 0 : i32
    return %c0_i32, %c0_i32_0 : i32, i32
  }
  func.func @transform_3(%arg0: i32) -> (i32, i32) {
    %c0_i32 = arith.constant 0 : i32
    %c0_i32_0 = arith.constant 0 : i32
    %c0_i32_1 = arith.constant 0 : i32
    return %c0_i32, %c0_i32_0 : i32, i32
  }
  func.func @transform_4(%arg0: i32) -> (i32, i32) {
    %c0_i32 = arith.constant 0 : i32
    %c0_i32_0 = arith.constant 0 : i32
    %c0_i32_1 = arith.constant 0 : i32
    return %c0_i32, %c0_i32_0 : i32, i32
  }
  func.func @transform_5(%arg0: i32) -> (i32, i32, i32, i32) {
    %c0_i32 = arith.constant 0 : i32
    %c0_i32_0 = arith.constant 0 : i32
    %c0_i32_1 = arith.constant 0 : i32
    %c0_i32_2 = arith.constant 0 : i32
    %c0_i32_3 = arith.constant 0 : i32
    return %c0_i32, %c0_i32_0, %c0_i32_1, %c0_i32_2 : i32, i32, i32, i32
  }
  func.func @transform_6(%arg0: i32) -> (i32, i32, i32) {
    %c0_i32 = arith.constant 0 : i32
    %c0_i32_0 = arith.constant 0 : i32
    %c0_i32_1 = arith.constant 0 : i32
    %c0_i32_2 = arith.constant 0 : i32
    return %c0_i32, %c0_i32_0, %c0_i32_1 : i32, i32, i32
  }
  func.func @transform_7(%arg0: i32) -> (i32, i32, i32, i32) {
    %c0_i32 = arith.constant 0 : i32
    %c0_i32_0 = arith.constant 0 : i32
    %c0_i32_1 = arith.constant 0 : i32
    %c0_i32_2 = arith.constant 0 : i32
    %c0_i32_3 = arith.constant 0 : i32
    return %c0_i32, %c0_i32_0, %c0_i32_1, %c0_i32_2 : i32, i32, i32, i32
  }
  func.func @transform_8(%arg0: i32) -> (i32, i32, i32) {
    %c0_i32 = arith.constant 0 : i32
    %c0_i32_0 = arith.constant 0 : i32
    %c0_i32_1 = arith.constant 0 : i32
    %c0_i32_2 = arith.constant 0 : i32
    return %c0_i32, %c0_i32_0, %c0_i32_1 : i32, i32, i32
  }
  func.func @transform_9(%arg0: i32) -> (i32, i32, i32) {
    %c0_i32 = arith.constant 0 : i32
    %c0_i32_0 = arith.constant 0 : i32
    %c0_i32_1 = arith.constant 0 : i32
    %c0_i32_2 = arith.constant 0 : i32
    return %c0_i32, %c0_i32_0, %c0_i32_1 : i32, i32, i32
  }
  func.func @transform_10(%arg0: i32) -> (i32, i32) {
    %c0_i32 = arith.constant 0 : i32
    %c0_i32_0 = arith.constant 0 : i32
    %c0_i32_1 = arith.constant 0 : i32
    return %c0_i32, %c0_i32_0 : i32, i32
  }
  func.func @transform_11(%arg0: i32) -> (i32, i32, i32) {
    %c0_i32 = arith.constant 0 : i32
    %c0_i32_0 = arith.constant 0 : i32
    %c0_i32_1 = arith.constant 0 : i32
    return %arg0, %c0_i32, %c0_i32_0 : i32, i32, i32
  }
}

</mosaic_0001>

<bundles_post_ra>
// kernel: tpu_custom_call.1
= control target key start
LH: loop header
LB: loop body
LE: loop exit
PB: predicated region body
PF: predicated region fallthrough
CT: control target
= control target key end

     0   :  { %s14674_s17 = smov 0   ;;  %s19762_s0 = inlined_call_operand.vmem [shape: f32[2,256,4], index: 0, kind: input, shape index: {}]   ;;  %s19763_s1 = inlined_call_operand.vmem [shape: f32[4,4], index: 1, kind: input, shape index: {}]   ;;  %s19764_s2 = inlined_call_operand.vmem [shape: f32[1,4], index: 2, kind: input, shape index: {}]   ;;  %s19765_s3 = inlined_call_operand.vmem [shape: f32[4,4], index: 3, kind: input, shape index: {}]   ;;  %s19766_s4 = inlined_call_operand.vmem [shape: f32[1,4], index: 4, kind: input, shape index: {}]   ;;  %s19767_s5 = inlined_call_operand.vmem [shape: f32[1,9,4,4], index: 5, kind: input, shape index: {}]   ;;  %s19768_s6 = inlined_call_operand.vmem [shape: f32[1,1,4], index: 6, kind: input, shape index: {}]   ;;  %s19769_s7 = inlined_call_operand.vmem [shape: f32[1,9,4,4], index: 7, kind: input, shape index: {}]   ;;  %s19770_s8 = inlined_call_operand.vmem [shape: f32[1,1,4], index: 8, kind: input, shape index: {}]   ;;  %s19771_s9 = inlined_call_operand.vmem [shape: f32[3,4,8], index: 9, kind: input, shape index: {}]   ;;  %s19772_s10 = inlined_call_operand.vmem [shape: f32[1,8], index: 10, kind: input, shape index: {}]   ;;  %s19773_s11 = inlined_call_operand.vmem [shape: f32[2,256,8], index: 11, kind: output, shape index: {}]  }
   0x1 LB: > { %s11128_s18 = sadd.s32 4294967295, %s14611_s17   ;;  %p11132_p0 = scmp.ge.s32.totalorder %s14611_s17, 1  ;;  %s14611_s17 = sphi %s14674_s17, %s21_s17  }
   0x2   : > { %p337_p1 = scmp.lt.s32.totalorder %s14611_s17, 3 }
   0x4   : > { %p338_p2 = pnand %p11132_p0, %p337_p1 }
   0x6   : > { %341 = sbr.rel (%p338_p2) target bundleno = 1589 (0x635), region = 64 }
   0xb   : > { %v419_v0 = vld [vmem:[%s19763_s1] sm:$0xf]  ;;  %vm19806_vm0 = vcmask 1043456   ;;  %p377_p3 = scmp.lt.s32.totalorder %s11128_s18, 1  ;;  %vm20039_vm1 = vcmask 31744   ;;  %v19774_v36 = vmov 0.0  }
   0xc   : > { %13952 = vmatprep.subr.msk.mxu1 %vm19806_vm0, %v419_v0  ;;  %v977_v1 = vld [vmem:[%s19765_s3] sm:$0xf]  ;;  %12802 = vmatprep.subr.msk.mxu0 %vm19806_vm0, %v419_v0  ;;  %v1759_v34 = vld [vmem:[%s19767_s5 + $0x4] sm:$0xf]  ;;  %v1760_v37 = vld [vmem:[%s19767_s5 + $0x8] sm:$0xf] }
   0xd   : > { %13953 = vmatpush3.msk.msra.mxu1 %vm19806_vm0, %v419_v0  ;;  %s21471_s18 = smov (!%p377_p3, %s11128_s18), 1  ;;  %12803 = vmatpush3.msk.msra.mxu0 %vm19806_vm0, %v419_v0  ;;  %v1758_v35 = vld [vmem:[%s19767_s5] sm:$0xf]  ;;  %v1761_v40 = vld [vmem:[%s19767_s5 + $0xc] sm:$0xf] }
   0xe   : > { %12852 = vmatprep.subr.msk.mxu1 %vm19806_vm0, %v977_v1  ;;  %s12041_s23 = sshll.u32 %s21471_s18, 8  ;;  %12902 = vmatprep.subr.msk.mxu0 %vm19806_vm0, %v1759_v34  ;;  %v14865_v41 = vld [vmem:[%s19767_s5 + $0x10] sm:$0xf]  ;;  %v14902_v56 = vld [vmem:[%s19766_s4] ss:$0 sm:$0xff] }
   0xf   : > { %s14701_s26 = scalar_lea.vmem %s19762_s0, %s12041_s23  ;;  %s19568_s20 = scalar_lea.vmem %s19773_s11, %s12041_s23 }
  0x10   : > { %v14704_v2 = vld [vmem:[%s14701_s26 + $0x80] sm:$0xff]  ;;  %v14707_v3 = vld [vmem:[%s14701_s26 + $0x88] sm:$0xff]  ;;  %v14710_v4 = vld [vmem:[%s14701_s26 + $0x90] sm:$0xff] }
  0x11   : > { %12828 = vmatprep.mubr.msk.f32.mxu1 %vm20039_vm1, %v14704_v2  ;;  %v14720_v5 = vld [vmem:[%s14701_s26 + $0x98] sm:$0xff]  ;;  %v14723_v6 = vld [vmem:[%s14701_s26 + $0xa0] sm:$0xff]  ;;  %v388_v8 = vld [vmem:[%s14701_s26 + $0x8] sm:$0xff] }
  0x12   : > { %12829 = vmatmul.mubr.msk.f32.vlgmr.msra.gmra.mxu1 %vm20039_vm1, %v14707_v3  ;;  %v387_v7 = vld [vmem:[%s14701_s26] sm:$0xff]  ;;  %v14733_v9 = vld [vmem:[%s14701_s26 + $0xa8] sm:$0xff]  ;;  %v389_v10 = vld [vmem:[%s14701_s26 + $0x10] sm:$0xff] }
  0x13   : > { %12853 = vmatpush3.msk.msra.mxu1 %vm19806_vm0, %v977_v1  ;;  %12831 = vmatprep.mubr.msk.f32.mxu1 %vm20039_vm1, %v14710_v4  ;;  %v14738_v11 = vld [vmem:[%s14701_s26 + $0xb0] sm:$0xff]  ;;  %v390_v12 = vld [vmem:[%s14701_s26 + $0x18] sm:$0xff]  ;;  %v391_v14 = vld [vmem:[%s14701_s26 + $0x20] sm:$0xff] }
  0x14   : > { %12804 = vmatprep.mubr.msk.f32.mxu0 %vm20039_vm1, %v387_v7  ;;  %v14747_v13 = vld [vmem:[%s14701_s26 + $0xb8] sm:$0xff]  ;;  %v14752_v15 = vld [vmem:[%s14701_s26 + $0xc0] sm:$0xff]  ;;  %v392_v16 = vld [vmem:[%s14701_s26 + $0x28] sm:$0xff]  ;;  %12952 = vmatprep.subr.msk.mxu1 %vm19806_vm0, %v1758_v35 }
  0x15   : > { %12805 = vmatmul.mubr.msk.f32.vlgmr.msra.gmra.mxu0 %vm20039_vm1, %v388_v8  ;;  %v412_v17 = vld [vmem:[%s14701_s26 + $0xc8] sm:$0xff]  ;;  %v393_v18 = vld [vmem:[%s14701_s26 + $0x30] sm:$0xff]  ;;  %v394_v20 = vld [vmem:[%s14701_s26 + $0x38] sm:$0xff] }
  0x16   : > { %12832 = vmatmul.mubr.msk.f32.gmra.mxu1 %vm20039_vm1, %v14720_v5  ;;  %12807 = vmatprep.mubr.msk.f32.mxu0 %vm20039_vm1, %v389_v10  ;;  %v413_v19 = vld [vmem:[%s14701_s26 + $0xd0] sm:$0xff]  ;;  %v414_v21 = vld [vmem:[%s14701_s26 + $0xd8] sm:$0xff]  ;;  %v395_v22 = vld [vmem:[%s14701_s26 + $0x40] sm:$0xff] }
  0x17   : > { %12834 = vmatprep.mubr.msk.f32.mxu1 %vm20039_vm1, %v14723_v6  ;;  %v415_v23 = vld [vmem:[%s14701_s26 + $0xe0] sm:$0xff]  ;;  %v396_v24 = vld [vmem:[%s14701_s26 + $0x48] sm:$0xff]  ;;  %v397_v26 = vld [vmem:[%s14701_s26 + $0x50] sm:$0xff]  ;;  %12903 = vmatpush3.msk.msra.mxu0 %vm19806_vm0, %v1759_v34 }
  0x18   : > { %v416_v25 = vld [vmem:[%s14701_s26 + $0xe8] sm:$0xff]  ;;  %v417_v27 = vld [vmem:[%s14701_s26 + $0xf0] sm:$0xff]  ;;  %v398_v28 = vld [vmem:[%s14701_s26 + $0x58] sm:$0xff]  ;;  %13002 = vmatprep.subr.msk.mxu0 %vm19806_vm0, %v1760_v37 }
  0x19   : > { %12808 = vmatmul.mubr.msk.f32.gmra.mxu0 %vm20039_vm1, %v390_v12  ;;  %v418_v29 = vld [vmem:[%s14701_s26 + $0xf8] sm:$0xff]  ;;  %v399_v30 = vld [vmem:[%s14701_s26 + $0x60] sm:$0xff]  ;;  %v400_v31 = vld [vmem:[%s14701_s26 + $0x68] sm:$0xff] }
  0x1a   : > { %12835 = vmatmul.mubr.msk.f32.gmra.mxu1 %vm20039_vm1, %v14733_v9  ;;  %12810 = vmatprep.mubr.msk.f32.mxu0 %vm20039_vm1, %v391_v14  ;;  %v401_v32 = vld [vmem:[%s14701_s26 + $0x70] sm:$0xff]  ;;  %v402_v33 = vld [vmem:[%s14701_s26 + $0x78] sm:$0xff] }
  0x1b   : > { %12837 = vmatprep.mubr.msk.f32.mxu1 %vm20039_vm1, %v14738_v11 }
  0x1d   : > { %12811 = vmatmul.mubr.msk.f32.gmra.mxu0 %vm20039_vm1, %v392_v16 }
  0x1e   : > { %12838 = vmatmul.mubr.msk.f32.gmra.mxu1 %vm20039_vm1, %v14747_v13  ;;  %12813 = vmatprep.mubr.msk.f32.mxu0 %vm20039_vm1, %v393_v18 }
  0x1f   : > { %12840 = vmatprep.mubr.msk.f32.mxu1 %vm20039_vm1, %v14752_v15 }
  0x21   : > { %12814 = vmatmul.mubr.msk.f32.gmra.mxu0 %vm20039_vm1, %v394_v20 }
  0x22   : > { %12841 = vmatmul.mubr.msk.f32.gmra.mxu1 %vm20039_vm1, %v412_v17  ;;  %12816 = vmatprep.mubr.msk.f32.mxu0 %vm20039_vm1, %v395_v22 }
  0x23   : > { %12843 = vmatprep.mubr.msk.f32.mxu1 %vm20039_vm1, %v413_v19 }
  0x25   : > { %12817 = vmatmul.mubr.msk.f32.gmra.mxu0 %vm20039_vm1, %v396_v24 }
  0x26   : > { %12844 = vmatmul.mubr.msk.f32.gmra.mxu1 %vm20039_vm1, %v414_v21  ;;  %12819 = vmatprep.mubr.msk.f32.mxu0 %vm20039_vm1, %v397_v26 }
  0x27   : > { %12846 = vmatprep.mubr.msk.f32.mxu1 %vm20039_vm1, %v415_v23 }
  0x29   : > { %12820 = vmatmul.mubr.msk.f32.gmra.mxu0 %vm20039_vm1, %v398_v28 }
  0x2a   : > { %12847 = vmatmul.mubr.msk.f32.gmra.mxu1 %vm20039_vm1, %v416_v25  ;;  %12822 = vmatprep.mubr.msk.f32.mxu0 %vm20039_vm1, %v399_v30 }
  0x2b   : > { %12849 = vmatprep.mubr.msk.f32.mxu1 %vm20039_vm1, %v417_v27 }
  0x2d   : > { %12823 = vmatmul.mubr.msk.f32.gmra.mxu0 %vm20039_vm1, %v400_v31 }
  0x2e   : > { %12850 = vmatmul.mubr.msk.f32.gmra.mxu1 %vm20039_vm1, %v418_v29  ;;  %12825 = vmatprep.mubr.msk.f32.mxu0 %vm20039_vm1, %v401_v32 }
  0x2f   : > { %12854 = vmatprep.mubr.msk.f32.mxu1 %vm20039_vm1, %v387_v7 }
  0x31   : > { %12826 = vmatmul.mubr.msk.f32.gmra.mxu0 %vm20039_vm1, %v402_v33 }
  0x32   : > { %12855 = vmatmul.mubr.msk.f32.vlgmr.msra.gmra.mxu1 %vm20039_vm1, %v388_v8  ;;  %12904 = vmatprep.mubr.f32.mxu0 %v19774_v36 }
  0x33   : > { %12857 = vmatprep.mubr.msk.f32.mxu1 %vm20039_vm1, %v389_v10  ;;  %12953 = vmatpush3.msk.msra.mxu1 %vm19806_vm0, %v1758_v35 }
  0x34   : > { %13052 = vmatprep.subr.msk.mxu1 %vm19806_vm0, %v1761_v40 }
  0x35   : > { %12905 = vmatmul.mubr.f32.vlgmr.msra.gmra.mxu0 %v19774_v36 }
  0x36   : > { %12858 = vmatmul.mubr.msk.f32.gmra.mxu1 %vm20039_vm1, %v390_v12  ;;  %13003 = vmatpush3.msk.msra.mxu0 %vm19806_vm0, %v1760_v37 }
  0x37   : > { %12860 = vmatprep.mubr.msk.f32.mxu1 %vm20039_vm1, %v391_v14  ;;  %13102 = vmatprep.subr.msk.mxu0 %vm19806_vm0, %v14865_v41 }
  0x3a   : > { %12861 = vmatmul.mubr.msk.f32.gmra.mxu1 %vm20039_vm1, %v392_v16 }
  0x3b   : > { %12863 = vmatprep.mubr.msk.f32.mxu1 %vm20039_vm1, %v393_v18 }
  0x3e   : > { %12864 = vmatmul.mubr.msk.f32.gmra.mxu1 %vm20039_vm1, %v394_v20 }
  0x3f   : > { %12866 = vmatprep.mubr.msk.f32.mxu1 %vm20039_vm1, %v395_v22 }
  0x42   : > { %12867 = vmatmul.mubr.msk.f32.gmra.mxu1 %vm20039_vm1, %v396_v24 }
  0x43   : > { %12869 = vmatprep.mubr.msk.f32.mxu1 %vm20039_vm1, %v397_v26 }
  0x46   : > { %12870 = vmatmul.mubr.msk.f32.gmra.mxu1 %vm20039_vm1, %v398_v28 }
  0x47   : > { %12872 = vmatprep.mubr.msk.f32.mxu1 %vm20039_vm1, %v399_v30 }
  0x4a   : > { %12873 = vmatmul.mubr.msk.f32.gmra.mxu1 %vm20039_vm1, %v400_v31 }
  0x4b   : > { %12875 = vmatprep.mubr.msk.f32.mxu1 %vm20039_vm1, %v401_v32 }
  0x4e   : > { %12876 = vmatmul.mubr.msk.f32.gmra.mxu1 %vm20039_vm1, %v402_v33 }
  0x4f   : > { %12878 = vmatprep.mubr.msk.f32.mxu1 %vm20039_vm1, %v14704_v2 }
  0x52   : > { %12879 = vmatmul.mubr.msk.f32.gmra.mxu1 %vm20039_vm1, %v14707_v3 }
  0x53   : > { %12881 = vmatprep.mubr.msk.f32.mxu1 %vm20039_vm1, %v14710_v4 }
  0x56   : > { %12882 = vmatmul.mubr.msk.f32.gmra.mxu1 %vm20039_vm1, %v14720_v5 }
  0x57   : > { %12884 = vmatprep.mubr.msk.f32.mxu1 %vm20039_vm1, %v14723_v6 }
  0x5a   : > { %12885 = vmatmul.mubr.msk.f32.gmra.mxu1 %vm20039_vm1, %v14733_v9 }
  0x5b   : > { %12887 = vmatprep.mubr.msk.f32.mxu1 %vm20039_vm1, %v14738_v11 }
  0x5e   : > { %12888 = vmatmul.mubr.msk.f32.gmra.mxu1 %vm20039_vm1, %v14747_v13 }
  0x5f   : > { %12890 = vmatprep.mubr.msk.f32.mxu1 %vm20039_vm1, %v14752_v15 }
  0x62   : > { %12891 = vmatmul.mubr.msk.f32.gmra.mxu1 %vm20039_vm1, %v412_v17 }
  0x63   : > { %12893 = vmatprep.mubr.msk.f32.mxu1 %vm20039_vm1, %v413_v19 }
  0x66   : > { %12894 = vmatmul.mubr.msk.f32.gmra.mxu1 %vm20039_vm1, %v414_v21 }
  0x67   : > { %12896 = vmatprep.mubr.msk.f32.mxu1 %vm20039_vm1, %v415_v23 }
  0x6a   : > { %12897 = vmatmul.mubr.msk.f32.gmra.mxu1 %vm20039_vm1, %v416_v25 }
  0x6b   : > { %12899 = vmatprep.mubr.msk.f32.mxu1 %vm20039_vm1, %v417_v27 }
  0x6e   : > { %12900 = vmatmul.mubr.msk.f32.gmra.mxu1 %vm20039_vm1, %v418_v29 }
  0x6f   : > { %12954 = vmatprep.mubr.f32.mxu1 %v19774_v36 }
  0x72   : > { %12955 = vmatmul.mubr.f32.vlgmr.msra.gmra.mxu1 %v19774_v36 }
  0x73   : > { %13053 = vmatpush3.msk.msra.mxu1 %vm19806_vm0, %v1761_v40 }
  0xd2   : > { %v14855_v38 = vpop.f32.mrf.mxu1 }
  0xd3   : > { %20164 = vst [vmem:[#allocation2_spill] sm:$0xff] %v14855_v38  ;;  %v15275_v38 = vld [vmem:[%s19767_s5 + $0x18] sm:$0xf] }
  0xd4   : > { %v14857_v39 = vpop.f32.mrf.mxu1 }
  0xd5   : > { %20165 = vst [vmem:[#allocation3_spill] sm:$0xff] %v14857_v39  ;;  %v20240_v39 = vmov 0 }
  0xd6   : > { %v14870_v42 = vpop.f32.mrf.mxu1 }
  0xd7   : > { %20166 = vst [vmem:[#allocation4_spill] sm:$0xff] %v14870_v42  ;;  %v20233_v42 = vmov 0 }
  0xd8   : > { %v14873_v43 = vpop.f32.mrf.mxu1 }
  0xd9   : > { %20167 = vst [vmem:[#allocation5_spill] sm:$0xff] %v14873_v43 }
  0xda   : > { %v14875_v44 = vpop.f32.mrf.mxu1 }
  0xdb   : > { %20168 = vst [vmem:[#allocation6_spill] sm:$0xff] %v14875_v44 }
  0xdc   : > { %v14877_v45 = vpop.f32.mrf.mxu1 }
  0xdd   : > { %20169 = vst [vmem:[#allocation7_spill] sm:$0xff] %v14877_v45 }
  0xde   : > { %v14879_v46 = vpop.f32.mrf.mxu1 }
  0xdf   : > { %20170 = vst [vmem:[#allocation8_spill] sm:$0xff] %v14879_v46 }
  0xe0   : > { %v14881_v47 = vpop.f32.mrf.mxu1 }
  0xe1   : > { %20171 = vst [vmem:[#allocation9_spill] sm:$0xff] %v14881_v47 }
  0xe2   : > { %v14883_v48 = vpop.f32.mrf.mxu1 }
  0xe3   : > { %20172 = vst [vmem:[#allocation10_spill] sm:$0xff] %v14883_v48 }
  0xe4   : > { %v14885_v49 = vpop.f32.mrf.mxu1 }
  0xe5   : > { %20173 = vst [vmem:[#allocation11_spill] sm:$0xff] %v14885_v49 }
  0xe6   : > { %v14887_v50 = vpop.f32.mrf.mxu1 }
  0xe7   : > { %20174 = vst [vmem:[#allocation12_spill] sm:$0xff] %v14887_v50 }
  0xe8   : > { %v14889_v51 = vpop.f32.mrf.mxu1 }
  0xe9   : > { %20175 = vst [vmem:[#allocation13_spill] sm:$0xff] %v14889_v51 }
  0xea   : > { %v14891_v52 = vpop.f32.mrf.mxu1 }
  0xeb   : > { %20176 = vst [vmem:[#allocation14_spill] sm:$0xff] %v14891_v52 }
  0xec   : > { %v14893_v53 = vpop.f32.mrf.mxu1 }
  0xed   : > { %20177 = vst [vmem:[#allocation15_spill] sm:$0xff] %v14893_v53 }
  0xee   : > { %v14895_v54 = vpop.f32.mrf.mxu1 }
  0xef   : > { %20178 = vst [vmem:[#allocation16_spill] sm:$0xff] %v14895_v54 }
  0xf0   : > { %v14897_v55 = vpop.f32.mrf.mxu1 }
  0xf1   : > { %20179 = vst [vmem:[#allocation17_spill] sm:$0xff] %v14897_v55 }
  0xf2   : > { %v12856_v57 = vpop.f32.mrf.mxu1 }
  0xf3   : > { %v14905_v58 = vadd.f32 %v12856_v57, %v14902_v56 }
  0xf4   : > { %v1054_v59 = vpop.f32.mrf.mxu1 }
  0xf5   : > { %v11238_v60 = vmul.f32 -1.442695, %v14905_v58  ;;  %v14909_v61 = vadd.f32 %v14902_v56, %v1054_v59 }
  0xf6   : > { %v12859_v62 = vpop.f32.mrf.mxu1 }
  0xf7   : > { %13963 = vpow2.f32 %v11238_v60  ;;  %v11237_v63 = vmul.f32 -1.442695, %v14909_v61  ;;  %v14913_v0 = vadd.f32 %v12859_v62, %v14902_v56 }
  0xf8   : > { %v1064_v1 = vpop.f32.mrf.mxu1 }
  0xf9   : > { %13965 = vpow2.f32 %v11237_v63  ;;  %v11240_v2 = vmul.f32 -1.442695, %v14913_v0  ;;  %v14917_v3 = vadd.f32 %v14902_v56, %v1064_v1 }
  0xfa   : > { %v12862_v4 = vpop.f32.mrf.mxu1 }
  0xfb   : > { %13967 = vpow2.f32 %v11240_v2  ;;  %v11239_v5 = vmul.f32 -1.442695, %v14917_v3  ;;  %v14921_v6 = vadd.f32 %v12862_v4, %v14902_v56 }
  0xfc   : > { %v1074_v7 = vpop.f32.mrf.mxu1 }
  0xfd   : > { %13969 = vpow2.f32 %v11239_v5  ;;  %v11242_v8 = vmul.f32 -1.442695, %v14921_v6  ;;  %v14925_v9 = vadd.f32 %v14902_v56, %v1074_v7 }
  0xfe   : > { %v12865_v10 = vpop.f32.mrf.mxu1 }
  0xff   : > { %13971 = vpow2.f32 %v11242_v8  ;;  %v11241_v11 = vmul.f32 -1.442695, %v14925_v9  ;;  %v14929_v12 = vadd.f32 %v12865_v10, %v14902_v56 }
 0x100   : > { %v1084_v13 = vpop.f32.mrf.mxu1 }
 0x101   : > { %13973 = vpow2.f32 %v11241_v11  ;;  %v11244_v14 = vmul.f32 -1.442695, %v14929_v12  ;;  %v14933_v15 = vadd.f32 %v14902_v56, %v1084_v13 }
 0x102   : > { %v12868_v16 = vpop.f32.mrf.mxu1 }
 0x103   : > { %13975 = vpow2.f32 %v11244_v14  ;;  %v11243_v17 = vmul.f32 -1.442695, %v14933_v15  ;;  %v14937_v18 = vadd.f32 %v12868_v16, %v14902_v56 }
 0x104   : > { %v13964_v19 = vpop.eup %13963  ;;  %v1094_v20 = vpop.f32.mrf.mxu1 }
 0x105   : > { %v1310_v21 = vadd.f32 1.0, %v13964_v19  ;;  %13977 = vpow2.f32 %v11243_v17  ;;  %v11246_v22 = vmul.f32 -1.442695, %v14937_v18  ;;  %v14941_v23 = vadd.f32 %v14902_v56, %v1094_v20 }
 0x106   : > { %v13966_v24 = vpop.eup %13965  ;;  %v12871_v25 = vpop.f32.mrf.mxu1 }
 0x107   : > { %13979 = vrcp.f32 %v1310_v21  ;;  %v1309_v26 = vadd.f32 1.0, %v13966_v24  ;;  %v11245_v27 = vmul.f32 -1.442695, %v14941_v23  ;;  %v14945_v28 = vadd.f32 %v12871_v25, %v14902_v56 }
 0x108   : > { %v13968_v29 = vpop.eup %13967  ;;  %13981 = vpow2.f32 %v11246_v22  ;;  %v1104_v30 = vpop.f32.mrf.mxu1 }
 0x109   : > { %13983 = vrcp.f32 %v1309_v26  ;;  %v1312_v31 = vadd.f32 1.0, %v13968_v29  ;;  %v11248_v32 = vmul.f32 -1.442695, %v14945_v28  ;;  %v14949_v33 = vadd.f32 %v14902_v56, %v1104_v30  ;;  %v1763_v26 = vld [vmem:[%s19767_s5 + $0x14] sm:$0xf] }
 0x10a   : > { %v13970_v34 = vpop.eup %13969  ;;  %13985 = vpow2.f32 %v11245_v27  ;;  %v12874_v35 = vpop.f32.mrf.mxu1  ;;  %13152 = vmatprep.subr.msk.mxu1 %vm19806_vm0, %v1763_v26 }
 0x10b   : > { %13987 = vrcp.f32 %v1312_v31  ;;  %v1311_v37 = vadd.f32 1.0, %v13970_v34  ;;  %v11247_v40 = vmul.f32 -1.442695, %v14949_v33  ;;  %v14953_v57 = vadd.f32 %v12874_v35, %v14902_v56 }
 0x10c   : > { %v13972_v59 = vpop.eup %13971  ;;  %13989 = vpow2.f32 %v11248_v32  ;;  %v1114_v60 = vpop.f32.mrf.mxu1 }
 0x10d   : > { %13991 = vrcp.f32 %v1311_v37  ;;  %v1314_v62 = vadd.f32 1.0, %v13972_v59  ;;  %v11250_v63 = vmul.f32 -1.442695, %v14953_v57  ;;  %v14957_v1 = vadd.f32 %v14902_v56, %v1114_v60 }
 0x10e   : > { %v13974_v2 = vpop.eup %13973  ;;  %13993 = vpow2.f32 %v11247_v40  ;;  %v12877_v4 = vpop.f32.mrf.mxu1 }
 0x10f   : > { %13995 = vrcp.f32 %v1314_v62  ;;  %v1313_v5 = vadd.f32 1.0, %v13974_v2  ;;  %v11249_v7 = vmul.f32 -1.442695, %v14957_v1  ;;  %v14961_v8 = vadd.f32 %v12877_v4, %v14902_v56 }
 0x110   : > { %v13976_v10 = vpop.eup %13975  ;;  %13997 = vpow2.f32 %v11250_v63  ;;  %v1124_v11 = vpop.f32.mrf.mxu1 }
 0x111   : > { %13999 = vrcp.f32 %v1313_v5  ;;  %v1316_v13 = vadd.f32 1.0, %v13976_v10  ;;  %v11252_v14 = vmul.f32 -1.442695, %v14961_v8  ;;  %v14965_v16 = vadd.f32 %v14902_v56, %v1124_v11 }
 0x112   : > { %v13978_v17 = vpop.eup %13977  ;;  %14001 = vpow2.f32 %v11249_v7  ;;  %v12880_v19 = vpop.f32.mrf.mxu1 }
 0x113   : > { %14003 = vrcp.f32 %v1316_v13  ;;  %v1315_v20 = vadd.f32 1.0, %v13978_v17  ;;  %v11251_v21 = vmul.f32 -1.442695, %v14965_v16  ;;  %v14969_v22 = vadd.f32 %v12880_v19, %v14902_v56 }
 0x114   : > { %v13980_v24 = vpop.eup %13979  ;;  %14005 = vpow2.f32 %v11252_v14  ;;  %v1134_v25 = vpop.f32.mrf.mxu1 }
 0x115   : > { %v13982_v27 = vpop.eup %13981  ;;  %14007 = vrcp.f32 %v1315_v20  ;;  %v11254_v29 = vmul.f32 -1.442695, %v14969_v22  ;;  %v14976_v30 = vadd.f32 %v14902_v56, %v1134_v25  ;;  %v14987_v62 = vmul.f32 %v13980_v24, %v14905_v58 }
 0x116   : > { %v13984_v31 = vpop.eup %13983  ;;  %v1318_v32 = vadd.f32 1.0, %v13982_v27  ;;  %14009 = vpow2.f32 %v11251_v21  ;;  %v12883_v34 = vpop.f32.mrf.mxu1 }
 0x117   : > { %v13986_v35 = vpop.eup %13985  ;;  %v14980_v37 = vmul.f32 %v13984_v31, %v14909_v61  ;;  %14011 = vpow2.f32 %v11254_v29  ;;  %v11253_v40 = vmul.f32 -1.442695, %v14976_v30  ;;  %v14984_v59 = vadd.f32 %v12883_v34, %v14902_v56  ;;  %20181 = vst [vmem:[#allocation19_spill] sm:$0xff] %v14987_v62 }
 0x118   : > { %v13988_v60 = vpop.eup %13987  ;;  %14013 = vrcp.f32 %v1318_v32  ;;  %v1317_v63 = vadd.f32 1.0, %v13986_v35  ;;  %v1144_v2 = vpop.f32.mrf.mxu1  ;;  %v1769_v43 = vrot.slane %v14987_v62, 7 }
 0x119   : > { %20180 = vst [vmem:[#allocation18_spill] sm:$0xff] %v14980_v37  ;;  %v13990_v4 = vpop.eup %13989  ;;  %14015 = vpow2.f32 %v11253_v40  ;;  %v11256_v5 = vmul.f32 -1.442695, %v14984_v59  ;;  %v14991_v61 = vadd.f32 %v14902_v56, %v1144_v2  ;;  %12907 = vmatprep.mubr.msk.f32.mxu0 %vm20039_vm1, %v14980_v37  ;;  %v15005_v20 = vmul.f32 %v13988_v60, %v14913_v0 }
 0x11a   : > { %v13992_v7 = vpop.eup %13991  ;;  %14017 = vrcp.f32 %v1317_v63  ;;  %v1320_v10 = vadd.f32 1.0, %v13990_v4  ;;  %v12886_v11 = vpop.f32.mrf.mxu1  ;;  %12908 = vmatmul.mubr.msk.f32.gmra.mxu0 %vm20039_vm1, %v14987_v62 }
 0x11b   : > { %v13994_v58 = vpop.eup %13993  ;;  %v14998_v13 = vmul.f32 %v13992_v7, %v14917_v3  ;;  %14019 = vpow2.f32 %v11256_v5  ;;  %v11255_v14 = vmul.f32 -1.442695, %v14991_v61  ;;  %v15002_v17 = vadd.f32 %v12886_v11, %v14902_v56  ;;  %20183 = vst [vmem:[#allocation21_spill] sm:$0xff] %v15005_v20 }
 0x11c   : > { %v13996_v19 = vpop.eup %13995  ;;  %14021 = vrcp.f32 %v1320_v10  ;;  %v1319_v21 = vadd.f32 1.0, %v13994_v58  ;;  %v1154_v24 = vpop.f32.mrf.mxu1 }
 0x11d   : > { %20182 = vst [vmem:[#allocation20_spill] sm:$0xff] %v14998_v13  ;;  %v13998_v25 = vpop.eup %13997  ;;  %14023 = vpow2.f32 %v11255_v14  ;;  %v11258_v26 = vmul.f32 -1.442695, %v15002_v17  ;;  %v15009_v3 = vadd.f32 %v14902_v56, %v1154_v24  ;;  %12910 = vmatprep.mubr.msk.f32.mxu0 %vm20039_vm1, %v14998_v13  ;;  %v15023_v60 = vmul.f32 %v13996_v19, %v14921_v6 }
 0x11e   : > { %v14000_v27 = vpop.eup %13999  ;;  %14025 = vrcp.f32 %v1319_v21  ;;  %v1322_v29 = vadd.f32 1.0, %v13998_v25  ;;  %v12889_v31 = vpop.f32.mrf.mxu1  ;;  %12911 = vmatmul.mubr.msk.f32.gmra.mxu0 %vm20039_vm1, %v15005_v20 }
 0x11f   : > { %v14002_v0 = vpop.eup %14001  ;;  %v15016_v32 = vmul.f32 %v14000_v27, %v14925_v9  ;;  %14027 = vpow2.f32 %v11258_v26  ;;  %v11257_v34 = vmul.f32 -1.442695, %v15009_v3  ;;  %v15020_v35 = vadd.f32 %v12889_v31, %v14902_v56  ;;  %20185 = vst [vmem:[#allocation23_spill] sm:$0xff] %v15023_v60 }
 0x120   : > { %v14004_v40 = vpop.eup %14003  ;;  %14029 = vrcp.f32 %v1322_v29  ;;  %v1321_v63 = vadd.f32 1.0, %v14002_v0  ;;  %v1164_v2 = vpop.f32.mrf.mxu1 }
 0x121   : > { %20184 = vst [vmem:[#allocation22_spill] sm:$0xff] %v15016_v32  ;;  %v14006_v4 = vpop.eup %14005  ;;  %14031 = vpow2.f32 %v11257_v34  ;;  %v11260_v5 = vmul.f32 -1.442695, %v15020_v35  ;;  %v15027_v9 = vadd.f32 %v14902_v56, %v1164_v2  ;;  %12913 = vmatprep.mubr.msk.f32.mxu0 %vm20039_vm1, %v15016_v32  ;;  %v15041_v24 = vmul.f32 %v14004_v40, %v14929_v12 }
 0x122   : > { %v14008_v7 = vpop.eup %14007  ;;  %14033 = vrcp.f32 %v1321_v63  ;;  %v1324_v10 = vadd.f32 1.0, %v14006_v4  ;;  %v12892_v11 = vpop.f32.mrf.mxu1  ;;  %12914 = vmatmul.mubr.msk.f32.gmra.mxu0 %vm20039_vm1, %v15023_v60 }
 0x123   : > { %v14010_v6 = vpop.eup %14009  ;;  %v15034_v58 = vmul.f32 %v14008_v7, %v14933_v15  ;;  %14035 = vpow2.f32 %v11260_v5  ;;  %v11259_v14 = vmul.f32 -1.442695, %v15027_v9  ;;  %v15038_v19 = vadd.f32 %v12892_v11, %v14902_v56  ;;  %20187 = vst [vmem:[#allocation25_spill] sm:$0xff] %v15041_v24 }
 0x124   : > { %v14012_v21 = vpop.eup %14011  ;;  %14037 = vrcp.f32 %v1324_v10  ;;  %v1323_v25 = vadd.f32 1.0, %v14010_v6  ;;  %v1174_v26 = vpop.f32.mrf.mxu1 }
 0x125   : > { %20186 = vst [vmem:[#allocation24_spill] sm:$0xff] %v15034_v58  ;;  %v14014_v27 = vpop.eup %14013  ;;  %v1326_v29 = vadd.f32 1.0, %v14012_v21  ;;  %14039 = vpow2.f32 %v11259_v14  ;;  %v11262_v31 = vmul.f32 -1.442695, %v15038_v19  ;;  %v15045_v15 = vadd.f32 %v14902_v56, %v1174_v26  ;;  %12916 = vmatprep.mubr.msk.f32.mxu0 %vm20039_vm1, %v15034_v58 }
 0x126   : > { %v14016_v0 = vpop.eup %14015  ;;  %14041 = vrcp.f32 %v1323_v25  ;;  %v12895_v34 = vpop.f32.mrf.mxu1  ;;  %12917 = vmatmul.mubr.msk.f32.gmra.mxu0 %vm20039_vm1, %v15041_v24  ;;  %v15056_v5 = vmul.f32 %v14014_v27, %v14937_v18 }
 0x127   : > { %v14018_v12 = vpop.eup %14017  ;;  %14043 = vrcp.f32 %v1326_v29  ;;  %v1325_v40 = vadd.f32 1.0, %v14016_v0  ;;  %v11261_v63 = vmul.f32 -1.442695, %v15045_v15  ;;  %v15053_v2 = vadd.f32 %v12895_v34, %v14902_v56 }
 0x128   : > { %v14020_v4 = vpop.eup %14019  ;;  %20188 = vst [vmem:[#allocation26_spill] sm:$0xff] %v15056_v5  ;;  %v15059_v7 = vmul.f32 %v14018_v12, %v14941_v23  ;;  %14045 = vpow2.f32 %v11262_v31  ;;  %v1184_v10 = vpop.f32.mrf.mxu1 }
 0x129   : > { %v14022_v11 = vpop.eup %14021  ;;  %14047 = vrcp.f32 %v1325_v40  ;;  %v1328_v6 = vadd.f32 1.0, %v14020_v4  ;;  %v11264_v14 = vmul.f32 -1.442695, %v15053_v2  ;;  %v15063_v21 = vadd.f32 %v14902_v56, %v1184_v10  ;;  %v15079_v40 = vpop.f32.mrf.mxu0 }
 0x12a   : > { %20189 = vst [vmem:[#allocation27_spill] sm:$0xff] %v15059_v7  ;;  %v14024_v25 = vpop.eup %14023  ;;  %14049 = vpow2.f32 %v11261_v63  ;;  %12919 = vmatprep.mubr.msk.f32.mxu0 %vm20039_vm1, %v15059_v7  ;;  %v12898_v18 = vpop.f32.mrf.mxu1  ;;  %v15074_v0 = vmul.f32 %v14022_v11, %v14945_v28  ;;  %20192 = vst [vmem:[#allocation30_spill] sm:$0xff] %v15079_v40 }
 0x12b   : > { %v14026_v26 = vpop.eup %14025  ;;  %14051 = vrcp.f32 %v1328_v6  ;;  %v1327_v23 = vadd.f32 1.0, %v14024_v25  ;;  %v11263_v27 = vmul.f32 -1.442695, %v15063_v21  ;;  %v15069_v29 = vadd.f32 %v12898_v18, %v14902_v56  ;;  %12920 = vmatmul.mubr.msk.f32.gmra.mxu0 %vm20039_vm1, %v15056_v5 }
 0x12c   : > { %v14028_v31 = vpop.eup %14027  ;;  %20190 = vst [vmem:[#allocation28_spill] sm:$0xff] %v15074_v0  ;;  %v15077_v34 = vmul.f32 %v14026_v26, %v14949_v33  ;;  %14053 = vpow2.f32 %v11264_v14  ;;  %v1194_v12 = vpop.f32.mrf.mxu1 }
 0x12d   : > { %v14030_v63 = vpop.eup %14029  ;;  %14055 = vrcp.f32 %v1327_v23  ;;  %v1330_v4 = vadd.f32 1.0, %v14028_v31  ;;  %v11266_v10 = vmul.f32 -1.442695, %v15069_v29  ;;  %v15083_v6 = vadd.f32 %v14902_v56, %v1194_v12 }
 0x12e   : > { %20191 = vst [vmem:[#allocation29_spill] sm:$0xff] %v15077_v34  ;;  %v14032_v25 = vpop.eup %14031  ;;  %14057 = vpow2.f32 %v11263_v27  ;;  %12922 = vmatprep.mubr.msk.f32.mxu0 %vm20039_vm1, %v15077_v34  ;;  %v12901_v28 = vpop.f32.mrf.mxu1  ;;  %v15099_v12 = vmul.f32 %v14030_v63, %v14953_v57 }
 0x12f   : > { %v14034_v33 = vpop.eup %14033  ;;  %14059 = vrcp.f32 %v1330_v4  ;;  %v1329_v11 = vadd.f32 1.0, %v14032_v25  ;;  %v11265_v14 = vmul.f32 -1.442695, %v15083_v6  ;;  %v15089_v18 = vadd.f32 %v12901_v28, %v14902_v56  ;;  %12923 = vmatmul.mubr.msk.f32.gmra.mxu0 %vm20039_vm1, %v15074_v0  ;;  %v15096_v27 = vpop.f32.mrf.mxu0 }
 0x130   : > { %v14036_v26 = vpop.eup %14035  ;;  %v15094_v23 = vmul.f32 %v14034_v33, %v14957_v1  ;;  %14061 = vpow2.f32 %v11266_v10  ;;  %20194 = vst [vmem:[#allocation32_spill] sm:$0xff] %v15096_v27  ;;  %20195 = vst [vmem:[#allocation33_spill] sm:$0xff] %v15099_v12 }
 0x131   : > { %v14038_v31 = vpop.eup %14037  ;;  %14063 = vrcp.f32 %v1329_v11  ;;  %v1332_v4 = vadd.f32 1.0, %v14036_v26  ;;  %v11268_v25 = vmul.f32 -1.442695, %v15089_v18  ;;  %v15109_v57 = vpop.f32.mrf.mxu0 }
 0x132   : > { %20193 = vst [vmem:[#allocation31_spill] sm:$0xff] %v15094_v23  ;;  %v14040_v28 = vpop.eup %14039  ;;  %14065 = vpow2.f32 %v11265_v14  ;;  %12925 = vmatprep.mubr.msk.f32.mxu0 %vm20039_vm1, %v15094_v23  ;;  %20197 = vst [vmem:[#allocation35_spill] sm:$0xff] %v15109_v57  ;;  %v15112_v11 = vmul.f32 %v14038_v31, %v14961_v8  ;;  %v1771_v57 = vrot.slane %v15005_v20, 7 }
 0x133   : > { %v14042_v36 = vpop.eup %14041  ;;  %14067 = vrcp.f32 %v1332_v4  ;;  %v1331_v1 = vadd.f32 1.0, %v14040_v28  ;;  %12926 = vmatmul.mubr.msk.f32.gmra.mxu0 %vm20039_vm1, %v15099_v12 }
 0x134   : > { %v14044_v10 = vpop.eup %14043  ;;  %v15107_v33 = vmul.f32 %v14042_v36, %v14965_v16  ;;  %14069 = vpow2.f32 %v11268_v25  ;;  %20198 = vst [vmem:[#allocation36_spill] sm:$0xff] %v15112_v11  ;;  %v15121_v25 = vpop.f32.mrf.mxu0 }
 0x135   : > { %v14046_v63 = vpop.eup %14045  ;;  %14071 = vrcp.f32 %v1331_v1  ;;  %20200 = vst [vmem:[#allocation38_spill] sm:$0xff] %v15121_v25  ;;  %v15124_v8 = vmul.f32 %v14044_v10, %v14969_v22 }
 0x136   : > { %20196 = vst [vmem:[#allocation34_spill] sm:$0xff] %v15107_v33  ;;  %v14048_v14 = vpop.eup %14047  ;;  %v1334_v26 = vadd.f32 1.0, %v14046_v63  ;;  %12928 = vmatprep.mubr.msk.f32.mxu0 %vm20039_vm1, %v15107_v33  ;;  %v15133_v55 = vpop.f32.mrf.mxu0 }
 0x137   : > { %v14050_v4 = vpop.eup %14049  ;;  %v15117_v28 = vmul.f32 %v14048_v14, %v14976_v30  ;;  %12929 = vmatmul.mubr.msk.f32.gmra.mxu0 %vm20039_vm1, %v15112_v11  ;;  %20201 = vst [vmem:[#allocation39_spill] sm:$0xff] %v15124_v8  ;;  %20203 = vst [vmem:[#allocation41_spill] sm:$0xff] %v15133_v55  ;;  %v20243_v55 = vrot.slane %v14980_v37, 1 }
 0x138   : > { %v14052_v36 = vpop.eup %14051  ;;  %v1333_v16 = vadd.f32 1.0, %v14050_v4  ;;  %14073 = vrcp.f32 %v1334_v26  ;;  %v15145_v52 = vpop.f32.mrf.mxu0 }
 0x139   : > { %20199 = vst [vmem:[#allocation37_spill] sm:$0xff] %v15117_v28  ;;  %v14054_v54 = vpop.eup %14053  ;;  %12931 = vmatprep.mubr.msk.f32.mxu0 %vm20039_vm1, %v15117_v28  ;;  %v15136_v10 = vmul.f32 %v14052_v36, %v14984_v59  ;;  %20206 = vst [vmem:[#allocation44_spill] sm:$0xff] %v15145_v52 }
 0x13a   : > { %v14056_v31 = vpop.eup %14055  ;;  %14075 = vrcp.f32 %v1333_v16  ;;  %v1336_v1 = vadd.f32 1.0, %v14054_v54 }
 0x13b   : > { %v14058_v30 = vpop.eup %14057  ;;  %v15129_v63 = vmul.f32 %v14056_v31, %v14991_v61  ;;  %12932 = vmatmul.mubr.msk.f32.gmra.mxu0 %vm20039_vm1, %v15124_v8  ;;  %20204 = vst [vmem:[#allocation42_spill] sm:$0xff] %v15136_v10 }
 0x13c   : > { %v14060_v14 = vpop.eup %14059  ;;  %v1335_v4 = vadd.f32 1.0, %v14058_v30  ;;  %14077 = vrcp.f32 %v1336_v1 }
 0x13d   : > { %20202 = vst [vmem:[#allocation40_spill] sm:$0xff] %v15129_v63  ;;  %v14062_v22 = vpop.eup %14061  ;;  %12934 = vmatprep.mubr.msk.f32.mxu0 %vm20039_vm1, %v15129_v63  ;;  %v15148_v36 = vmul.f32 %v14060_v14, %v15002_v17 }
 0x13e   : > { %v14064_v54 = vpop.eup %14063  ;;  %14079 = vrcp.f32 %v1335_v4  ;;  %v1338_v26 = vadd.f32 1.0, %v14062_v22 }
 0x13f   : > { %v14066_v61 = vpop.eup %14065  ;;  %v15141_v16 = vmul.f32 %v14064_v54, %v15009_v3  ;;  %12935 = vmatmul.mubr.msk.f32.gmra.mxu0 %vm20039_vm1, %v15136_v10  ;;  %20207 = vst [vmem:[#allocation45_spill] sm:$0xff] %v15148_v36  ;;  %v1437_v3 = vlaneseq  ;;  %v15157_v54 = vpop.f32.mrf.mxu0 }
 0x140   : > { %v14068_v31 = vpop.eup %14067  ;;  %v1337_v30 = vadd.f32 1.0, %v14066_v61  ;;  %14081 = vrcp.f32 %v1338_v26  ;;  %20209 = vst [vmem:[#allocation47_spill] sm:$0xff] %v15157_v54 }
 0x141   : > { %20205 = vst [vmem:[#allocation43_spill] sm:$0xff] %v15141_v16  ;;  %v14070_v59 = vpop.eup %14069  ;;  %12937 = vmatprep.mubr.msk.f32.mxu0 %vm20039_vm1, %v15141_v16  ;;  %v15160_v17 = vmul.f32 %v14068_v31, %v15020_v35  ;;  %v15164_v26 = vshrl.u32 %v1437_v3, 7 }
 0x142   : > { %v14072_v1 = vpop.eup %14071  ;;  %14083 = vrcp.f32 %v1337_v30  ;;  %v1340_v4 = vadd.f32 1.0, %v14070_v59  ;;  %v15171_v30 = vpop.f32.mrf.mxu0 }
 0x143   : > { %v15153_v22 = vmul.f32 %v14072_v1, %v15027_v9  ;;  %12938 = vmatmul.mubr.msk.f32.gmra.mxu0 %vm20039_vm1, %v15148_v36  ;;  %20210 = vst [vmem:[#allocation48_spill] sm:$0xff] %v15160_v17  ;;  %20211 = vst [vmem:[#allocation49_spill] sm:$0xff] %v15164_v26  ;;  %v1440_v31 = vadd.s32 16, %v15164_v26  ;;  %v1442_v1 = vadd.s32 32, %v15164_v26  ;;  %v1443_v53 = vadd.s32 40, %v15164_v26 }
 0x144   : > { %14085 = vrcp.f32 %v1340_v4  ;;  %20213 = vst [vmem:[#allocation51_spill] sm:$0xff] %v15171_v30  ;;  %vm19950_vm2 = vcmp.lt.s32.totalorder %v15164_v26, 1  ;;  %vm19829_vm3 = vcmp.lt.s32.totalorder %v15164_v26, 7  ;;  %v1445_v45 = vadd.s32 56, %v15164_v26  ;;  %v1204_v30 = vpop.f32.mrf.mxu1 }
 0x145   : > { %20208 = vst [vmem:[#allocation46_spill] sm:$0xff] %v15153_v22  ;;  %12940 = vmatprep.mubr.msk.f32.mxu0 %vm20039_vm1, %v15153_v22  ;;  %v14074_v14 = vpop.eup %14073  ;;  %v1472_v51 = vand.u32 15, %v1440_v31  ;;  %v1474_v49 = vand.u32 15, %v1442_v1  ;;  %v1475_v46 = vand.u32 15, %v1443_v53  ;;  %v20228_v53 = vmov 0 }
 0x146   : > { %v15174_v59 = vmul.f32 %v14074_v14, %v15038_v19  ;;  %v1444_v14 = vadd.s32 48, %v15164_v26  ;;  %v1447_v54 = vadd.s32 72, %v15164_v26 }
 0x147   : > { %v14076_v61 = vpop.eup %14075  ;;  %12941 = vmatmul.mubr.msk.f32.gmra.mxu0 %vm20039_vm1, %v15160_v17  ;;  %vm15214_vm4 = vcmp.ge.s32.totalorder %v1472_v51, 1  ;;  %vm15218_vm5 = vcmp.ge.s32.totalorder %v1474_v49, 1  ;;  %v1448_v51 = vadd.s32 80, %v15164_v26  ;;  %v1768_v49 = vrot.slane %v14980_v37, 7 }
 0x148   : > { %v15169_v9 = vmul.f32 %v14076_v61, %v15045_v15  ;;  %20214 = vst [vmem:[#allocation52_spill] sm:$0xff] %v15174_v59  ;;  %v1441_v15 = vadd.s32 24, %v15164_v26  ;;  %v15186_v61 = vpop.f32.mrf.mxu0  ;;  %v1476_v1 = vand.u32 15, %v1444_v14  ;;  %vm15243_vm8 = vcmp.lt.s32.totalorder %v1475_v46, 15 }
 0x149   : > { %v14078_v35 = vpop.eup %14077  ;;  %20216 = vst [vmem:[#allocation54_spill] sm:$0xff] %v15186_v61  ;;  %v1480_v25 = vand.u32 15, %v1448_v51  ;;  %v1450_v51 = vadd.s32 96, %v15164_v26 }
 0x14a   : > { %20212 = vst [vmem:[#allocation50_spill] sm:$0xff] %v15169_v9  ;;  %12943 = vmatprep.mubr.msk.f32.mxu0 %vm20039_vm1, %v15169_v9  ;;  %v15189_v19 = vmul.f32 %v14078_v35, %v15053_v2  ;;  %v15203_v35 = vpop.f32.mrf.mxu0  ;;  %vm15239_vm7 = vcmp.ge.s32.totalorder %v1476_v1, 1  ;;  %v1772_v1 = vrot.slane %v15016_v32, 7 }
 0x14b   : > { %v14080_v4 = vpop.eup %14079  ;;  %12944 = vmatmul.mubr.msk.f32.gmra.mxu0 %vm20039_vm1, %v15174_v59  ;;  %20219 = vst [vmem:[#allocation57_spill] sm:$0xff] %v15203_v35  ;;  %v20234_v42 = vsel %vm15239_vm7, 4294967295, %v20233_v42  ;;  %v1477_v35 = vand.u32 15, %v1445_v45  ;;  %vm15337_vm11 = vcmp.ge.s32.totalorder %v1480_v25, 1 }
 0x14c   : > { %v15184_v3 = vmul.f32 %v14080_v4, %v15063_v21  ;;  %20217 = vst [vmem:[#allocation55_spill] sm:$0xff] %v15189_v19  ;;  %v1473_v21 = vand.u32 15, %v1441_v15  ;;  %v1446_v4 = vadd.s32 64, %v15164_v26  ;;  %v15236_v61 = vpop.f32.mrf.mxu0  ;;  %20235 = vst [vmem:[#allocation64_spill] sm:$0xff] %v20234_v42 }
 0x14d   : > { %v14082_v50 = vpop.eup %14081  ;;  %20232 = vst [vmem:[#allocation63_spill] sm:$0xff] %v15236_v61  ;;  %vm15301_vm10 = vcmp.lt.s32.totalorder %v1477_v35, 15  ;;  %v15318_v35 = vadd.f32 %v14902_v56, %v1204_v30  ;;  %v1773_v56 = vrot.slane %v15023_v60, 7  ;;  %v20251_v30 = vmov 0 }
 0x14e   : > { %20215 = vst [vmem:[#allocation53_spill] sm:$0xff] %v15184_v3  ;;  %12946 = vmatprep.mubr.msk.f32.mxu0 %vm20039_vm1, %v15184_v3  ;;  %v15206_v31 = vmul.f32 %v14082_v50, %v15069_v29  ;;  %v1770_v50 = vrot.slane %v14998_v13, 7  ;;  %vm15225_vm6 = vcmp.lt.s32.totalorder %v1473_v21, 15  ;;  %v1478_v29 = vand.u32 15, %v1446_v4  ;;  %v15291_v40 = vpop.f32.mrf.mxu0 }
 0x14f   : > { %v14084_v48 = vpop.eup %14083  ;;  %12947 = vmatmul.mubr.msk.f32.gmra.mxu0 %vm20039_vm1, %v15189_v19  ;;  %v20229_v53 = vsel %vm15225_vm6, 4294967295, %v20228_v53  ;;  %v2674_v21 = vrot.slane %v14987_v62, 1  ;;  %v20236_v4 = vmov 0  ;;  %20245 = vst [vmem:[#allocation69_spill] sm:$0xff] %v15291_v40  ;;  %v1479_v40 = vand.u32 15, %v1447_v54 }
 0x150   : > { %v15199_v2 = vmul.f32 %v14084_v48, %v15083_v6  ;;  %20220 = vst [vmem:[#allocation58_spill] sm:$0xff] %v15206_v31  ;;  %v20222_v48 = vmov 0  ;;  %v20225_v6 = vmov 0  ;;  %20230 = vst [vmem:[#allocation62_spill] sm:$0xff] %v20229_v53  ;;  %v20237_v4 = vsel %vm15243_vm8, 4294967295, %v20236_v4 }
 0x151   : > { %v14086_v47 = vpop.eup %14085  ;;  %v20223_v48 = vsel %vm15214_vm4, 4294967295, %v20222_v48  ;;  %v20226_v6 = vsel %vm15218_vm5, 4294967295, %v20225_v6  ;;  %20238 = vst [vmem:[#allocation65_spill] sm:$0xff] %v20237_v4  ;;  %v15255_v61 = vsel %vm19950_vm2, %v1769_v43, %v1770_v50  ;;  %vm15268_vm9 = vcmp.ge.s32.totalorder %v1478_v29, 1 }
 0x152   : > { %20218 = vst [vmem:[#allocation56_spill] sm:$0xff] %v15199_v2  ;;  %v15210_v15 = vmul.f32 %v14086_v47, %v15089_v18  ;;  %12949 = vmatprep.mubr.msk.f32.mxu0 %vm20039_vm1, %v15199_v2  ;;  %20224 = vst [vmem:[#allocation60_spill] sm:$0xff] %v20223_v48  ;;  %v2675_v47 = vrot.slane %v14998_v13, 1  ;;  %v20231_v18 = vmov 0.0   ;;  %v20241_v39 = vsel %vm15268_vm9, 4294967295, %v20240_v39 }
 0x153   : > { %20227 = vst [vmem:[#allocation61_spill] sm:$0xff] %v20226_v6  ;;  %12950 = vmatmul.mubr.msk.f32.gmra.mxu0 %vm20039_vm1, %v15206_v31  ;;  %20242 = vst [vmem:[#allocation67_spill] sm:$0xff] %v20241_v39  ;;  %v15284_v52 = vsel %vm19829_vm3, %v20243_v55, %v2674_v21  ;;  %v15288_v29 = vsel %vm19950_vm2, %v1768_v49, %v1769_v43  ;;  %v2676_v55 = vrot.slane %v15005_v20, 1  ;;  %v20246_v43 = vmov 0 }
 0x154   : > { %20221 = vst [vmem:[#allocation59_spill] sm:$0xff] %v15210_v15  ;;  %13004 = vmatprep.mubr.f32.mxu0 %v20231_v18  ;;  %v19776_v14 = vrot.slane %v15210_v15, 7  ;;  %v15265_v46 = vsel %vm19829_vm3, %v2674_v21, %v2675_v47  ;;  %20244 = vst [vmem:[#allocation68_spill] sm:$0xff] %v15284_v52  ;;  %v20247_v43 = vsel %vm15301_vm10, 4294967295, %v20246_v43  ;;  %v15312_v21 = vsel %vm19950_vm2, %v1771_v57, %v1772_v1 }
 0x155   : > { %20239 = vst [vmem:[#allocation66_spill] sm:$0xff] %v15265_v46  ;;  %20248 = vst [vmem:[#allocation70_spill] sm:$0xff] %v20247_v43  ;;  %v15334_v54 = vsel %vm19950_vm2, %v1770_v50, %v1771_v57  ;;  %v20252_v30 = vsel %vm15337_vm11, 4294967295, %v20251_v30  ;;  %v2678_v57 = vrot.slane %v15023_v60, 1  ;;  %v1482_v50 = vand.u32 15, %v1450_v51 }
 0x156   : > { %v15251_v44 = vsel %vm19950_vm2, %v19776_v14, %v1768_v49  ;;  %v2677_v14 = vrot.slane %v15016_v32, 1  ;;  %v2805_v49 = vsel %vm15225_vm6, %v15265_v46, 0.0  ;;  %20253 = vst [vmem:[#allocation73_spill] sm:$0xff] %v20252_v30  ;;  %v1452_v53 = vadd.s32 112, %v15164_v26 }
 0x157   : > { %13005 = vmatmul.mubr.f32.vlgmr.msra.gmra.mxu0 %v20231_v18  ;;  %v1899_v45 = vsel %vm15214_vm4, %v15251_v44, 0.0  ;;  %v2679_v18 = vrot.slane %v15034_v58, 1  ;;  %v1451_v46 = vadd.s32 104, %v15164_v26  ;;  %v2681_v4 = vrot.slane %v15059_v7, 1 }
 0x158   : > { %13103 = vmatpush3.msk.msra.mxu0 %vm19806_vm0, %v14865_v41  ;;  %12957 = vmatprep.mubr.msk.f32.mxu1 %vm20039_vm1, %v1899_v45  ;;  %v1901_v41 = vsel %vm15218_vm5, %v15255_v61, 0.0  ;;  %v1774_v45 = vrot.slane %v15034_v58, 7  ;;  %v15327_v27 = vsel %vm19829_vm3, %v2676_v55, %v2677_v14  ;;  %v15365_v51 = vsel %vm19829_vm3, %v2677_v14, %v2678_v57 }
 0x159   : > { %13007 = vmatprep.mubr.msk.f32.mxu0 %vm20039_vm1, %v15284_v52  ;;  %12958 = vmatmul.mubr.msk.f32.gmra.mxu1 %vm20039_vm1, %v15288_v29  ;;  %20250 = vst [vmem:[#allocation72_spill] sm:$0xff] %v15327_v27  ;;  %v2807_v25 = vsel %vm15243_vm8, %v15327_v27, 0.0  ;;  %v11267_v52 = vmul.f32 -1.442695, %v15318_v35  ;;  %20255 = vst [vmem:[#allocation75_spill] sm:$0xff] %v15365_v51  ;;  %v15376_v27 = vsel %vm19950_vm2, %v1772_v1, %v1773_v56  ;;  %v1775_v15 = vrot.slane %v15041_v24, 7 }
 0x15a   : > { %12960 = vmatprep.mubr.msk.f32.mxu1 %vm20039_vm1, %v1901_v41  ;;  %13202 = vmatprep.subr.msk.mxu0 %vm19806_vm0, %v15275_v38  ;;  %v15323_v41 = vsel %vm19829_vm3, %v2675_v47, %v2676_v55  ;;  %v1449_v47 = vadd.s32 88, %v15164_v26  ;;  %v1903_v55 = vsel %vm15239_vm7, %v15312_v21, 0.0  ;;  %vm15379_vm12 = vcmp.lt.s32.totalorder %v1479_v40, 15 }
 0x15b   : > { %13008 = vmatmul.mubr.msk.f32.gmra.mxu0 %vm20039_vm1, %v2805_v49  ;;  %20249 = vst [vmem:[#allocation71_spill] sm:$0xff] %v15323_v41  ;;  %v15342_v49 = vpop.f32.mrf.mxu0  ;;  %vm15391_vm13 = vcmp.ge.s32.totalorder %v1482_v50, 1  ;;  %v20261_v1 = vmov 0  ;;  %v1484_v40 = vand.u32 15, %v1452_v53  ;;  %14087 = vpow2.f32 %v11267_v52 }
 0x15c   : > { %13010 = vmatprep.mubr.msk.f32.mxu0 %vm20039_vm1, %v15323_v41  ;;  %20254 = vst [vmem:[#allocation74_spill] sm:$0xff] %v15342_v49  ;;  %v15357_v49 = vsel %vm19950_vm2, %v1773_v56, %v1774_v45  ;;  %v1776_v41 = vrot.slane %v15059_v7, 7  ;;  %v1481_v14 = vand.u32 15, %v1449_v47  ;;  %v20262_v1 = vsel %vm15391_vm13, 4294967295, %v20261_v1  ;;  %v20423_v6 = vld [vmem:[#allocation70_spill] sm:$0xff] }
 0x15d   : > { %12961 = vmatmul.mubr.msk.f32.gmra.mxu1 %vm20039_vm1, %v15334_v54  ;;  %v15383_v58 = vpop.f32.mrf.mxu0  ;;  %20263 = vst [vmem:[#allocation79_spill] sm:$0xff] %v20262_v1  ;;  %v1483_v7 = vand.u32 15, %v1451_v46  ;;  %v15418_v43 = vsel %vm19950_vm2, %v1774_v45, %v1775_v15  ;;  %v1777_v52 = vrot.slane %v15056_v5, 7  ;;  %v1454_v46 = vadd.s32 128, %v15164_v26  ;;  %v12956_v1 = vpop.f32.mrf.mxu1 }
 0x15e   : > { %12963 = vmatprep.mubr.msk.f32.mxu1 %vm20039_vm1, %v1903_v55  ;;  %v15369_v55 = vsel %vm19829_vm3, %v2678_v57, %v2679_v18  ;;  %20260 = vst [vmem:[#allocation78_spill] sm:$0xff] %v15383_v58  ;;  %v1905_v57 = vsel %vm15268_vm9, %v15357_v49, 0.0  ;;  %v15401_v47 = vsel %vm19950_vm2, %v1775_v15, %v1776_v41  ;;  %v1778_v58 = vrot.slane %v15077_v34, 7 }
 0x15f   : > { %13011 = vmatmul.mubr.msk.f32.gmra.mxu0 %vm20039_vm1, %v2807_v25  ;;  %20256 = vst [vmem:[#allocation76_spill] sm:$0xff] %v15369_v55  ;;  %v20257_v25 = vmov 0  ;;  %v2809_v56 = vsel %vm15301_vm10, %v15369_v55, 0.0  ;;  %vm15431_vm14 = vcmp.lt.s32.totalorder %v1481_v14, 15  ;;  %v20267_v15 = vmov 0 }
 0x160   : > { %13013 = vmatprep.mubr.msk.f32.mxu0 %vm20039_vm1, %v15365_v51  ;;  %v20258_v25 = vsel %vm15379_vm12, 4294967295, %v20257_v25  ;;  %v2680_v51 = vrot.slane %v15041_v24, 1  ;;  %v20268_v15 = vsel %vm15431_vm14, 4294967295, %v20267_v15  ;;  %v1456_v45 = vadd.s32 144, %v15164_v26 }
 0x161   : > { %20259 = vst [vmem:[#allocation77_spill] sm:$0xff] %v20258_v25  ;;  %12964 = vmatmul.mubr.msk.f32.gmra.mxu1 %vm20039_vm1, %v15376_v27  ;;  %20269 = vst [vmem:[#allocation83_spill] sm:$0xff] %v20268_v15  ;;  %v15442_v55 = vsel %vm19950_vm2, %v1777_v52, %v1778_v58  ;;  %vm15444_vm15 = vcmp.ge.s32.totalorder %v1484_v40, 1  ;;  %v1780_v14 = vrot.slane %v15094_v23, 7  ;;  %vm15458_vm0 = vcmp.lt.s32.totalorder %v1483_v7, 15 }
 0x162   : > { %12966 = vmatprep.mubr.msk.f32.mxu1 %vm20039_vm1, %v1905_v57  ;;  %v15407_v50 = vsel %vm19829_vm3, %v2679_v18, %v2680_v51  ;;  %v15411_v53 = vsel %vm19829_vm3, %v2680_v51, %v2681_v4  ;;  %v2683_v57 = vrot.slane %v15077_v34, 1  ;;  %v1453_v18 = vadd.s32 120, %v15164_v26 }
 0x163   : > { %13014 = vmatmul.mubr.msk.f32.gmra.mxu0 %vm20039_vm1, %v2809_v56  ;;  %20264 = vst [vmem:[#allocation80_spill] sm:$0xff] %v15407_v50  ;;  %20265 = vst [vmem:[#allocation81_spill] sm:$0xff] %v15411_v53  ;;  %v15423_v56 = vpop.f32.mrf.mxu0  ;;  %v1907_v51 = vsel %vm15337_vm11, %v15401_v47, 0.0  ;;  %v20270_v34 = vmov 0  ;;  %v20275_v25 = vmov 0  ;;  %v2685_v40 = vrot.slane %v15094_v23, 1 }
 0x164   : > { %13016 = vmatprep.mubr.msk.f32.mxu0 %vm20039_vm1, %v15407_v50  ;;  %20266 = vst [vmem:[#allocation82_spill] sm:$0xff] %v15423_v56  ;;  %v2682_v50 = vrot.slane %v15056_v5, 1  ;;  %v2811_v56 = vsel %vm15379_vm12, %v15411_v53, 0.0  ;;  %v20271_v34 = vsel %vm15444_vm15, 4294967295, %v20270_v34  ;;  %v20276_v25 = vsel %vm15458_vm0, 4294967295, %v20275_v25 }
 0x165   : > { %12967 = vmatmul.mubr.msk.f32.gmra.mxu1 %vm20039_vm1, %v15418_v43  ;;  %20272 = vst [vmem:[#allocation84_spill] sm:$0xff] %v20271_v34  ;;  %20277 = vst [vmem:[#allocation87_spill] sm:$0xff] %v20276_v25  ;;  %v1486_v53 = vand.u32 15, %v1454_v46  ;;  %v1485_v30 = vand.u32 15, %v1453_v18  ;;  %v15470_v24 = vpop.f32.mrf.mxu0  ;;  %v1909_v7 = vsel %vm15391_vm13, %v15442_v55, 0.0  ;;  %v1455_v23 = vadd.s32 136, %v15164_v26 }
 0x166   : > { %12969 = vmatprep.mubr.msk.f32.mxu1 %vm20039_vm1, %v1907_v51  ;;  %v15452_v5 = vsel %vm19829_vm3, %v2681_v4, %v2682_v50  ;;  %v15456_v51 = vsel %vm19829_vm3, %v2682_v50, %v2683_v57  ;;  %v1779_v4 = vrot.slane %v15074_v0, 7  ;;  %20278 = vst [vmem:[#allocation88_spill] sm:$0xff] %v15470_v24  ;;  %v2684_v50 = vrot.slane %v15074_v0, 1 }
 0x167   : > { %13017 = vmatmul.mubr.msk.f32.gmra.mxu0 %vm20039_vm1, %v2811_v56  ;;  %20273 = vst [vmem:[#allocation85_spill] sm:$0xff] %v15452_v5  ;;  %20274 = vst [vmem:[#allocation86_spill] sm:$0xff] %v15456_v51  ;;  %v15467_v56 = vsel %vm19950_vm2, %v1776_v41, %v1777_v52  ;;  %v2813_v41 = vsel %vm15431_vm14, %v15456_v51, 0.0  ;;  %v1782_v46 = vrot.slane %v15107_v33, 7  ;;  %v1458_v18 = vadd.s32 160, %v15164_v26  ;;  %v12906_v24 = vpop.f32.mrf.mxu0 }
 0x168   : > { %13019 = vmatprep.mubr.msk.f32.mxu0 %vm20039_vm1, %v15452_v5  ;;  %v1488_v5 = vand.u32 15, %v1456_v45  ;;  %v15485_v52 = vsel %vm19950_vm2, %v1779_v4, %v1780_v14  ;;  %v15492_v45 = vsel %vm19829_vm3, %v2683_v57, %v2684_v50  ;;  %v2687_v15 = vrot.slane %v15107_v33, 1  ;;  %v20428_v42 = vld [vmem:[#allocation77_spill] sm:$0xff]  ;;  %v20433_v39 = vld [vmem:[#allocation83_spill] sm:$0xff] }
 0x169   : > { %12970 = vmatmul.mubr.msk.f32.gmra.mxu1 %vm20039_vm1, %v15467_v56  ;;  %20279 = vst [vmem:[#allocation89_spill] sm:$0xff] %v15492_v45  ;;  %v15499_v51 = vadd.f32 %v12956_v1, %v12906_v24  ;;  %v15505_v0 = vsel %vm19950_vm2, %v1778_v58, %v1779_v4  ;;  %vm15508_vm14 = vcmp.ge.s32.totalorder %v1486_v53, 1  ;;  %v20282_v57 = vmov 0 }
 0x16a   : > { %12972 = vmatprep.mubr.msk.f32.mxu1 %vm20039_vm1, %v1909_v7  ;;  %v15496_v7 = vsel %vm19829_vm3, %v2684_v50, %v2685_v40  ;;  %v20283_v57 = vsel %vm15508_vm14, 4294967295, %v20282_v57  ;;  %v1457_v50 = vadd.s32 152, %v15164_v26  ;;  %v1911_v24 = vsel %vm15444_vm15, %v15485_v52, 0.0 }
 0x16b   : > { %13020 = vmatmul.mubr.msk.f32.gmra.mxu0 %vm20039_vm1, %v2813_v41  ;;  %20280 = vst [vmem:[#allocation90_spill] sm:$0xff] %v15496_v7  ;;  %20281 = vst [vmem:[#allocation91_spill] sm:$0xff] %v15499_v51  ;;  %v1781_v41 = vrot.slane %v15099_v12, 7  ;;  %v2686_v1 = vrot.slane %v15099_v12, 1  ;;  %vm15519_vm3 = vcmp.lt.s32.totalorder %v1485_v30, 15  ;;  %v20285_v58 = vmov 0 }
 0x16c   : > { %13022 = vmatprep.mubr.msk.f32.mxu0 %vm20039_vm1, %v15492_v45  ;;  %20284 = vst [vmem:[#allocation92_spill] sm:$0xff] %v20283_v57  ;;  %v20286_v58 = vsel %vm15519_vm3, 4294967295, %v20285_v58  ;;  %v1487_v4 = vand.u32 15, %v1455_v23  ;;  %v2815_v53 = vsel %vm15458_vm0, %v15496_v7, 0.0  ;;  %v1784_v45 = vrot.slane %v15117_v28, 7  ;;  %v14088_v7 = vpop.eup %14087 }
 0x16d   : > { %12973 = vmatmul.mubr.msk.f32.gmra.mxu1 %vm20039_vm1, %v15505_v0  ;;  %20287 = vst [vmem:[#allocation93_spill] sm:$0xff] %v20286_v58  ;;  %v15529_v51 = vsel %vm19950_vm2, %v1781_v41, %v1782_v46  ;;  %v1490_v33 = vand.u32 15, %v1458_v18  ;;  %vm20288_vm12 = vcmp.lt.s32.totalorder %v15164_v26, 7  ;;  %vm15541_vm8 = vcmp.ge.s32.totalorder %v1488_v5, 1 }
 0x16e   : > { %12975 = vmatprep.mubr.msk.f32.mxu1 %vm20039_vm1, %v1911_v24  ;;  %v15535_v30 = vsel %vm20288_vm12, %v2685_v40, %v2686_v1  ;;  %vm20290_vm10 = vmmov %vm20288_vm12  ;;  %v20292_v24 = vmov 0  ;;  %v2689_v25 = vrot.slane %v15117_v28, 1  ;;  %v15550_v18 = vsel %vm19950_vm2, %v1780_v14, %v1781_v41 }
 0x16f   : > { %13023 = vmatmul.mubr.msk.f32.gmra.mxu0 %vm20039_vm1, %v2815_v53  ;;  %20289 = vst [vmem:[#allocation94_spill] sm:$0xff] %v15535_v30  ;;  %v15539_v23 = vsel %vm20290_vm10, %v2686_v1, %v2687_v15  ;;  %v20293_v24 = vsel %vm15541_vm8, 4294967295, %v20292_v24  ;;  %v1783_v40 = vrot.slane %v15112_v11, 7  ;;  %v1489_v53 = vand.u32 15, %v1457_v50 }
 0x170   : > { %20291 = vst [vmem:[#allocation95_spill] sm:$0xff] %v15539_v23  ;;  %20294 = vst [vmem:[#allocation96_spill] sm:$0xff] %v20293_v24  ;;  %13025 = vmatprep.mubr.msk.f32.mxu0 %vm20039_vm1, %v15535_v30  ;;  %v1460_v1 = vadd.s32 176, %v15164_v26  ;;  %v1913_v5 = vsel %vm15508_vm14, %v15529_v51, 0.0  ;;  %v2688_v28 = vrot.slane %v15112_v11, 1  ;;  %vm15560_vm10 = vcmp.lt.s32.totalorder %v1487_v4, 15 }
 0x171   : > { %12976 = vmatmul.mubr.msk.f32.gmra.mxu1 %vm20039_vm1, %v15550_v18  ;;  %v20295_v30 = vmov 0  ;;  %v1459_v14 = vadd.s32 168, %v15164_v26  ;;  %v2817_v41 = vsel %vm15519_vm3, %v15539_v23, 0.0  ;;  %v15571_v50 = vsel %vm19950_vm2, %v1783_v40, %v1784_v45 }
 0x172   : > { %v20296_v30 = vsel %vm15560_vm10, 4294967295, %v20295_v30  ;;  %12978 = vmatprep.mubr.msk.f32.mxu1 %vm20039_vm1, %v1913_v5  ;;  %vm15573_vm12 = vcmp.ge.s32.totalorder %v1490_v33, 1  ;;  %v20298_v57 = vmov 0  ;;  %v1786_v4 = vrot.slane %v15129_v63, 7 }
 0x173   : > { %20297 = vst [vmem:[#allocation97_spill] sm:$0xff] %v20296_v30  ;;  %v20299_v57 = vsel %vm15573_vm12, 4294967295, %v20298_v57  ;;  %v1339_v11 = vadd.f32 1.0, %v14088_v7  ;;  %13026 = vmatmul.mubr.msk.f32.gmra.mxu0 %vm20039_vm1, %v2817_v41  ;;  %vm20301_vm0 = vcmp.lt.s32.totalorder %v15164_v26, 7  ;;  %v2691_v23 = vrot.slane %v15129_v63, 1 }
 0x174   : > { %20300 = vst [vmem:[#allocation98_spill] sm:$0xff] %v20299_v57  ;;  %v15581_v5 = vsel %vm20301_vm0, %v2687_v15, %v2688_v28  ;;  %vm20303_vm6 = vmmov %vm20301_vm0  ;;  %v15592_v33 = vsel %vm19950_vm2, %v1782_v46, %v1783_v40  ;;  %v1785_v7 = vrot.slane %v15124_v8, 7  ;;  %vm15595_vm3 = vcmp.lt.s32.totalorder %v1489_v53, 15 }
 0x175   : > { %20302 = vst [vmem:[#allocation99_spill] sm:$0xff] %v15581_v5  ;;  %v15585_v58 = vsel %vm20303_vm6, %v2688_v28, %v2689_v25  ;;  %13028 = vmatprep.mubr.msk.f32.mxu0 %vm20039_vm1, %v15581_v5  ;;  %v20305_v41 = vmov 0  ;;  %v1492_v15 = vand.u32 15, %v1460_v1  ;;  %12979 = vmatmul.mubr.msk.f32.gmra.mxu1 %vm20039_vm1, %v15592_v33  ;;  %v1915_v28 = vsel %vm15541_vm8, %v15571_v50, 0.0  ;;  %vm20309_vm6 = vmmov %vm20301_vm0 }
 0x176   : > { %20304 = vst [vmem:[#allocation100_spill] sm:$0xff] %v15585_v58  ;;  %v20306_v41 = vsel %vm15595_vm3, 4294967295, %v20305_v41  ;;  %v2690_v5 = vrot.slane %v15124_v8, 1  ;;  %v1491_v63 = vand.u32 15, %v1459_v14  ;;  %v1462_v46 = vadd.s32 192, %v15164_v26  ;;  %12981 = vmatprep.mubr.msk.f32.mxu1 %vm20039_vm1, %v1915_v28 }
 0x177   : > { %20307 = vst [vmem:[#allocation101_spill] sm:$0xff] %v20306_v41  ;;  %v2819_v40 = vsel %vm15560_vm10, %v15585_v58, 0.0  ;;  %v15612_v53 = vsel %vm19950_vm2, %v1785_v7, %v1786_v4  ;;  %v1788_v1 = vrot.slane %v15141_v16, 7  ;;  %v1461_v24 = vadd.s32 184, %v15164_v26 }
 0x178   : > { %14089 = vrcp.f32 %v1339_v11  ;;  %13029 = vmatmul.mubr.msk.f32.gmra.mxu0 %vm20039_vm1, %v2819_v40  ;;  %v15619_v14 = vsel %vm20301_vm0, %v2689_v25, %v2690_v5  ;;  %v15623_v28 = vsel %vm20309_vm6, %v2690_v5, %v2691_v23  ;;  %v2693_v30 = vrot.slane %v15141_v16, 1 }
 0x179   : > { %20308 = vst [vmem:[#allocation102_spill] sm:$0xff] %v15619_v14  ;;  %20310 = vst [vmem:[#allocation103_spill] sm:$0xff] %v15623_v28  ;;  %13031 = vmatprep.mubr.msk.f32.mxu0 %vm20039_vm1, %v15619_v14  ;;  %v15630_v58 = vsel %vm19950_vm2, %v1784_v45, %v1785_v7  ;;  %v1787_v11 = vrot.slane %v15136_v10, 7  ;;  %vm15633_vm10 = vcmp.ge.s32.totalorder %v1492_v15, 1  ;;  %v20311_v40 = vmov 0 }
 0x17a   : > { %v20312_v40 = vsel %vm15633_vm10, 4294967295, %v20311_v40  ;;  %v1464_v25 = vadd.s32 208, %v15164_v26  ;;  %12982 = vmatmul.mubr.msk.f32.gmra.mxu1 %vm20039_vm1, %v15630_v58  ;;  %v1917_v5 = vsel %vm15573_vm12, %v15612_v53, 0.0  ;;  %v2692_v14 = vrot.slane %v15136_v10, 1  ;;  %vm20318_vm12 = vmmov %vm20309_vm6 }
 0x17b   : > { %20313 = vst [vmem:[#allocation104_spill] sm:$0xff] %v20312_v40  ;;  %vm15644_vm0 = vcmp.lt.s32.totalorder %v1491_v63, 15  ;;  %v20314_v45 = vmov 0  ;;  %v1494_v7 = vand.u32 15, %v1462_v46  ;;  %12984 = vmatprep.mubr.msk.f32.mxu1 %vm20039_vm1, %v1917_v5  ;;  %v2821_v15 = vsel %vm15595_vm3, %v15623_v28, 0.0 }
 0x17c   : > { %v20315_v45 = vsel %vm15644_vm0, 4294967295, %v20314_v45  ;;  %v15654_v16 = vsel %vm19950_vm2, %v1787_v11, %v1788_v1  ;;  %v1790_v57 = vrot.slane %v15153_v22, 7  ;;  %v1493_v8 = vand.u32 15, %v1461_v24  ;;  %13032 = vmatmul.mubr.msk.f32.gmra.mxu0 %vm20039_vm1, %v2821_v15 }
 0x17d   : > { %20316 = vst [vmem:[#allocation105_spill] sm:$0xff] %v20315_v45  ;;  %v15660_v63 = vsel %vm20309_vm6, %v2691_v23, %v2692_v14  ;;  %v15664_v46 = vsel %vm20318_vm12, %v2692_v14, %v2693_v30  ;;  %v2695_v5 = vrot.slane %v15153_v22, 1  ;;  %v1463_v41 = vadd.s32 200, %v15164_v26 }
 0x17e   : > { %20317 = vst [vmem:[#allocation106_spill] sm:$0xff] %v15660_v63  ;;  %20319 = vst [vmem:[#allocation107_spill] sm:$0xff] %v15664_v46  ;;  %13034 = vmatprep.mubr.msk.f32.mxu0 %vm20039_vm1, %v15660_v63  ;;  %v15672_v24 = vsel %vm19950_vm2, %v1786_v4, %v1787_v11  ;;  %v1789_v15 = vrot.slane %v15148_v36, 7  ;;  %v1496_v28 = vand.u32 15, %v1464_v25  ;;  %v1466_v23 = vadd.s32 224, %v15164_v26 }
 0x17f   : > { %12985 = vmatmul.mubr.msk.f32.gmra.mxu1 %vm20039_vm1, %v15672_v24  ;;  %v1919_v14 = vsel %vm15633_vm10, %v15654_v16, 0.0  ;;  %v2694_v22 = vrot.slane %v15148_v36, 1  ;;  %vm15682_vm12 = vcmp.ge.s32.totalorder %v1494_v7, 1  ;;  %v20320_v63 = vmov 0 }
 0x180   : > { %v20321_v63 = vsel %vm15682_vm12, 4294967295, %v20320_v63  ;;  %v1465_v4 = vadd.s32 216, %v15164_v26  ;;  %12987 = vmatprep.mubr.msk.f32.mxu1 %vm20039_vm1, %v1919_v14  ;;  %v2823_v11 = vsel %vm15644_vm0, %v15664_v46, 0.0  ;;  %v15693_v25 = vsel %vm19950_vm2, %v1789_v15, %v1790_v57 }
 0x181   : > { %20322 = vst [vmem:[#allocation108_spill] sm:$0xff] %v20321_v63  ;;  %vm15695_vm6 = vcmp.lt.s32.totalorder %v1493_v8, 15  ;;  %v20323_v40 = vmov 0  ;;  %v1792_v7 = vrot.slane %v15169_v9, 7  ;;  %13035 = vmatmul.mubr.msk.f32.gmra.mxu0 %vm20039_vm1, %v2823_v11  ;;  %vm20326_vm3 = vcmp.lt.s32.totalorder %v15164_v26, 7 }
 0x182   : > { %v20324_v40 = vsel %vm15695_vm6, 4294967295, %v20323_v40  ;;  %v15703_v36 = vsel %vm20326_vm3, %v2693_v30, %v2694_v22  ;;  %vm20328_vm10 = vmmov %vm20326_vm3  ;;  %v1495_v45 = vand.u32 15, %v1463_v41  ;;  %v2697_v46 = vrot.slane %v15169_v9, 1 }
 0x183   : > { %20325 = vst [vmem:[#allocation109_spill] sm:$0xff] %v20324_v40  ;;  %20327 = vst [vmem:[#allocation110_spill] sm:$0xff] %v15703_v36  ;;  %v15707_v14 = vsel %vm20328_vm10, %v2694_v22, %v2695_v5  ;;  %13037 = vmatprep.mubr.msk.f32.mxu0 %vm20039_vm1, %v15703_v36  ;;  %v15714_v8 = vsel %vm19950_vm2, %v1788_v1, %v1789_v15  ;;  %v1791_v11 = vrot.slane %v15160_v17, 7  ;;  %vm15717_vm0 = vcmp.ge.s32.totalorder %v1496_v28, 1 }
 0x184   : > { %20329 = vst [vmem:[#allocation111_spill] sm:$0xff] %v15707_v14  ;;  %v20330_v10 = vmov 0  ;;  %v1498_v30 = vand.u32 15, %v1466_v23  ;;  %12988 = vmatmul.mubr.msk.f32.gmra.mxu1 %vm20039_vm1, %v15714_v8  ;;  %v1921_v22 = vsel %vm15682_vm12, %v15693_v25, 0.0  ;;  %v2696_v41 = vrot.slane %v15160_v17, 1 }
 0x185   : > { %v20331_v10 = vsel %vm15717_vm0, 4294967295, %v20330_v10  ;;  %v1497_v36 = vand.u32 15, %v1465_v4  ;;  %v1468_v1 = vadd.s32 240, %v15164_v26  ;;  %12990 = vmatprep.mubr.msk.f32.mxu1 %vm20039_vm1, %v1921_v22  ;;  %v2825_v28 = vsel %vm15695_vm6, %v15707_v14, 0.0  ;;  %vm20337_vm6 = vmmov %vm20326_vm3  ;;  %v14090_v17 = vpop.eup %14089 }
 0x186   : > { %20332 = vst [vmem:[#allocation112_spill] sm:$0xff] %v20331_v10  ;;  %v15734_v15 = vsel %vm19950_vm2, %v1791_v11, %v1792_v7  ;;  %v1794_v23 = vrot.slane %v15184_v3, 7  ;;  %v1467_v9 = vadd.s32 232, %v15164_v26  ;;  %13038 = vmatmul.mubr.msk.f32.gmra.mxu0 %vm20039_vm1, %v2825_v28  ;;  %v15741_v4 = vsel %vm20326_vm3, %v2695_v5, %v2696_v41 }
 0x187   : > { %20333 = vst [vmem:[#allocation113_spill] sm:$0xff] %v15741_v4  ;;  %vm15743_vm10 = vcmp.lt.s32.totalorder %v1495_v45, 15  ;;  %v20334_v22 = vmov 0  ;;  %v15749_v40 = vsel %vm20337_vm6, %v2696_v41, %v2697_v46  ;;  %v2699_v14 = vrot.slane %v15184_v3, 1  ;;  %13040 = vmatprep.mubr.msk.f32.mxu0 %vm20039_vm1, %v15741_v4 }
 0x188   : > { %v20335_v22 = vsel %vm15743_vm10, 4294967295, %v20334_v22  ;;  %v15756_v28 = vsel %vm19950_vm2, %v1790_v57, %v1791_v11  ;;  %v1793_v5 = vrot.slane %v15174_v59, 7  ;;  %vm15759_vm3 = vcmp.ge.s32.totalorder %v1498_v30, 1 }
 0x189   : > { %20336 = vst [vmem:[#allocation114_spill] sm:$0xff] %v20335_v22  ;;  %v20338_v45 = vmov 0  ;;  %12991 = vmatmul.mubr.msk.f32.gmra.mxu1 %vm20039_vm1, %v15756_v28  ;;  %v1923_v41 = vsel %vm15717_vm0, %v15734_v15, 0.0  ;;  %v2698_v3 = vrot.slane %v15174_v59, 1  ;;  %vm15769_vm6 = vcmp.lt.s32.totalorder %v1497_v36, 15 }
 0x18a   : > { %v20339_v45 = vsel %vm15759_vm3, 4294967295, %v20338_v45  ;;  %v20341_v4 = vmov 0  ;;  %v1500_v57 = vand.u32 15, %v1468_v1  ;;  %12993 = vmatprep.mubr.msk.f32.mxu1 %vm20039_vm1, %v1923_v41  ;;  %v2827_v11 = vsel %vm15743_vm10, %v15749_v40, 0.0 }
 0x18b   : > { %20340 = vst [vmem:[#allocation115_spill] sm:$0xff] %v20339_v45  ;;  %v20342_v4 = vsel %vm15769_vm6, 4294967295, %v20341_v4  ;;  %v15779_v30 = vsel %vm19950_vm2, %v1793_v5, %v1794_v23  ;;  %v1796_v10 = vrot.slane %v15199_v2, 7  ;;  %v1499_v63 = vand.u32 15, %v1467_v9  ;;  %13041 = vmatmul.mubr.msk.f32.gmra.mxu0 %vm20039_vm1, %v2827_v11 }
 0x18c   : > { %20343 = vst [vmem:[#allocation116_spill] sm:$0xff] %v20342_v4  ;;  %v15783_v59 = vmul.f32 %v14090_v17, %v15318_v35  ;;  %vm20345_vm0 = vcmp.lt.s32.totalorder %v15164_v26, 7  ;;  %v2701_v41 = vrot.slane %v15199_v2, 1  ;;  %v15799_v9 = vsel %vm19950_vm2, %v1792_v7, %v1793_v5 }
 0x18d   : > { %v15788_v36 = vsel %vm20345_vm0, %v2697_v46, %v2698_v3  ;;  %vm20347_vm12 = vmmov %vm20345_vm0  ;;  %v1795_v17 = vrot.slane %v15189_v19, 7  ;;  %12994 = vmatmul.mubr.msk.f32.gmra.mxu1 %vm20039_vm1, %v15799_v9  ;;  %v1925_v35 = vsel %vm15759_vm3, %v15779_v30, 0.0  ;;  %v1469_v46 = vadd.s32 248, %v15164_v26 }
 0x18e   : > { %20344 = vst [vmem:[#allocation117_spill] sm:$0xff] %v15783_v59  ;;  %20346 = vst [vmem:[#allocation118_spill] sm:$0xff] %v15788_v36  ;;  %v15792_v1 = vsel %vm20347_vm12, %v2698_v3, %v2699_v14  ;;  %13043 = vmatprep.mubr.msk.f32.mxu0 %vm20039_vm1, %v15788_v36  ;;  %v2700_v3 = vrot.slane %v15189_v19, 1  ;;  %12996 = vmatprep.mubr.msk.f32.mxu1 %vm20039_vm1, %v1925_v35  ;;  %vm15813_vm0 = vcmp.ge.s32.totalorder %v1500_v57, 1  ;;  %v20349_v5 = vmov 0 }
 0x18f   : > { %20348 = vst [vmem:[#allocation119_spill] sm:$0xff] %v15792_v1  ;;  %v2829_v7 = vsel %vm15769_vm6, %v15792_v1, 0.0  ;;  %v20350_v5 = vsel %vm15813_vm0, 4294967295, %v20349_v5  ;;  %v15819_v11 = vsel %vm19950_vm2, %v1795_v17, %v1796_v10  ;;  %vm15826_vm10 = vcmp.lt.s32.totalorder %v1499_v63, 15  ;;  %vm20356_vm6 = vmmov %vm20347_vm12 }
 0x190   : > { %20351 = vst [vmem:[#allocation120_spill] sm:$0xff] %v20350_v5  ;;  %13044 = vmatmul.mubr.msk.f32.gmra.mxu0 %vm20039_vm1, %v2829_v7  ;;  %v15824_v22 = vsel %vm20347_vm12, %v2699_v14, %v2700_v3  ;;  %v20353_v35 = vmov 0  ;;  %v15832_v57 = vsel %vm20356_vm6, %v2700_v3, %v2701_v41  ;;  %v15839_v7 = vsel %vm19950_vm2, %v1794_v23, %v1795_v17  ;;  %vm20358_vm12 = vmmov %vm20356_vm6 }
 0x191   : > { %20352 = vst [vmem:[#allocation121_spill] sm:$0xff] %v15824_v22  ;;  %v20354_v35 = vsel %vm15826_vm10, 4294967295, %v20353_v35  ;;  %13046 = vmatprep.mubr.msk.f32.mxu0 %vm20039_vm1, %v15824_v22  ;;  %v1470_v14 = vand.u32 15, %v15164_v26  ;;  %12997 = vmatmul.mubr.msk.f32.gmra.mxu1 %vm20039_vm1, %v15839_v7  ;;  %v1927_v63 = vsel %vm15813_vm0, %v15819_v11, 0.0  ;;  %v2702_v3 = vrot.slane %v15206_v31, 1 }
 0x192   : > { %20355 = vst [vmem:[#allocation122_spill] sm:$0xff] %v20354_v35  ;;  %v1501_v1 = vand.u32 15, %v1469_v46  ;;  %12999 = vmatprep.mubr.msk.f32.mxu1 %vm20039_vm1, %v1927_v63  ;;  %v2831_v4 = vsel %vm15826_vm10, %v15832_v57, 0.0  ;;  %v19953_v23 = vrot.slane %v15206_v31, 7  ;;  %v20357_v22 = vrot.slane %v15783_v59, 1 }
 0x193   : > { %v15856_v17 = vsel %vm20356_vm6, %v2701_v41, %v2702_v3  ;;  %vm15872_vm10 = vcmp.ge.s32.totalorder %v1470_v14, 1  ;;  %v20362_v41 = vmov 0  ;;  %v15895_v14 = vld [vmem:[%s19767_s5 + $0x1c] sm:$0xf]  ;;  %v15910_v63 = vld [vmem:[%s19767_s5 + $0x20] sm:$0xf] }
 0x194   : > { %13047 = vmatmul.mubr.msk.f32.gmra.mxu0 %vm20039_vm1, %v2831_v4  ;;  %v15862_v36 = vsel %vm20358_vm12, %v2702_v3, %v20357_v22  ;;  %v15870_v46 = vsel %vm19950_vm2, %v1796_v10, %v19953_v23  ;;  %v20359_v4 = vmov 0  ;;  %v3254_v22 = vsel %vm15872_vm10, %v15251_v44, 0.0  ;;  %v20369_v3 = vld [vmem:[#allocation24_spill] sm:$0xff]  ;;  %v20374_v23 = vld [vmem:[#allocation29_spill] sm:$0xff] }
 0x195   : > { %13049 = vmatprep.mubr.msk.f32.mxu0 %vm20039_vm1, %v15856_v17  ;;  %v20360_v4 = vsel %vm15872_vm10, 4294967295, %v20359_v4  ;;  %13000 = vmatmul.mubr.msk.f32.gmra.mxu1 %vm20039_vm1, %v15870_v46  ;;  %vm15881_vm6 = vcmp.lt.s32.totalorder %v1501_v1, 15  ;;  %v3256_v44 = vsel %vm15214_vm4, %v15255_v61, 0.0  ;;  %v14603_v1 = vld [vmem:[%s19767_s5 + $0x14] sm:$0xf]  ;;  %vm20365_vm12 = vcmask 1043456  }
 0x196   : > { %20361 = vst [vmem:[#allocation123_spill] sm:$0xff] %v20360_v4  ;;  %v20363_v41 = vsel %vm15881_vm6, 4294967295, %v20362_v41  ;;  %13054 = vmatprep.mubr.msk.f32.mxu1 %vm20039_vm1, %v3254_v22  ;;  %v2833_v10 = vsel %vm15881_vm6, %v15862_v36, 0.0  ;;  %vm20366_vm2 = vmmov %vm20365_vm12  ;;  %v3262_v22 = vsel %vm15268_vm9, %v15401_v47, 0.0  ;;  %v4514_v5 = vsel %vm15872_vm10, %v15255_v61, 0.0  ;;  %v20421_v4 = vld [vmem:[#allocation80_spill] sm:$0xff] }
 0x197   : > { %20364 = vst [vmem:[#allocation124_spill] sm:$0xff] %v20363_v41  ;;  %vm20367_vm6 = vmmov %vm20366_vm2  ;;  %v4516_v61 = vsel %vm15214_vm4, %v15312_v21, 0.0 }
 0x198   : > { %13050 = vmatmul.mubr.msk.f32.gmra.mxu0 %vm20039_vm1, %v2833_v10  ;;  %v20370_v10 = vld [vmem:[#allocation25_spill] sm:$0xff] }
 0x199   : > { %13104 = vmatprep.mubr.msk.f32.mxu0 %vm20039_vm1, %v14980_v37  ;;  %13055 = vmatmul.mubr.msk.f32.vlgmr.msra.gmra.mxu1 %vm20039_vm1, %v15288_v29  ;;  %v3258_v29 = vsel %vm15218_vm5, %v15312_v21, 0.0  ;;  %v4518_v21 = vsel %vm15218_vm5, %v15357_v49, 0.0 }
 0x19a   : > { %13153 = vmatpush3.msk.msra.mxu1 %vm20365_vm12, %v14603_v1  ;;  %13057 = vmatprep.mubr.msk.f32.mxu1 %vm20039_vm1, %v3256_v44  ;;  %vm20368_vm12 = vmmov %vm20366_vm2  ;;  %v20371_v44 = vld [vmem:[#allocation27_spill] sm:$0xff] }
 0x19b   : > { %13252 = vmatprep.subr.msk.mxu1 %vm20366_vm2, %v15895_v14 }
 0x19c   : > { %13105 = vmatmul.mubr.msk.f32.vlgmr.msra.gmra.mxu0 %vm20039_vm1, %v14987_v62  ;;  %v3266_v62 = vsel %vm15391_vm13, %v15485_v52, 0.0 }
 0x19d   : > { %13203 = vmatpush3.msk.msra.mxu0 %vm20367_vm6, %v15275_v38  ;;  %13107 = vmatprep.mubr.msk.f32.mxu0 %vm20039_vm1, %v14998_v13  ;;  %v3260_v38 = vsel %vm15239_vm7, %v15357_v49, 0.0  ;;  %v20399_v13 = vld [vmem:[#allocation52_spill] sm:$0xff] }
 0x19e   : > { %13058 = vmatmul.mubr.msk.f32.gmra.mxu1 %vm20039_vm1, %v15334_v54  ;;  %13302 = vmatprep.subr.msk.mxu0 %vm20368_vm12, %v15910_v63 }
 0x19f   : > { %13060 = vmatprep.mubr.msk.f32.mxu1 %vm20039_vm1, %v3258_v29  ;;  %v3264_v29 = vsel %vm15337_vm11, %v15442_v55, 0.0 }
 0x1a0   : > { %13108 = vmatmul.mubr.msk.f32.gmra.mxu0 %vm20039_vm1, %v15005_v20  ;;  %v20396_v20 = vld [vmem:[#allocation50_spill] sm:$0xff] }
 0x1a1   : > { %13110 = vmatprep.mubr.msk.f32.mxu0 %vm20039_vm1, %v15016_v32  ;;  %v20392_v32 = vld [vmem:[#allocation46_spill] sm:$0xff] }
 0x1a2   : > { %13061 = vmatmul.mubr.msk.f32.gmra.mxu1 %vm20039_vm1, %v15376_v27 }
 0x1a3   : > { %13063 = vmatprep.mubr.msk.f32.mxu1 %vm20039_vm1, %v3260_v38  ;;  %v20373_v38 = vld [vmem:[#allocation26_spill] sm:$0xff] }
 0x1a4   : > { %13111 = vmatmul.mubr.msk.f32.gmra.mxu0 %vm20039_vm1, %v15023_v60  ;;  %v20388_v60 = vld [vmem:[#allocation43_spill] sm:$0xff] }
 0x1a5   : > { %13113 = vmatprep.mubr.msk.f32.mxu0 %vm20039_vm1, %v20369_v3  ;;  %v20384_v3 = vld [vmem:[#allocation40_spill] sm:$0xff] }
 0x1a6   : > { %13064 = vmatmul.mubr.msk.f32.gmra.mxu1 %vm20039_vm1, %v15418_v43 }
 0x1a7   : > { %13066 = vmatprep.mubr.msk.f32.mxu1 %vm20039_vm1, %v3262_v22 }
 0x1a8   : > { %13114 = vmatmul.mubr.msk.f32.gmra.mxu0 %vm20039_vm1, %v20370_v10  ;;  %v20377_v10 = vld [vmem:[#allocation31_spill] sm:$0xff] }
 0x1a9   : > { %13116 = vmatprep.mubr.msk.f32.mxu0 %vm20039_vm1, %v20371_v44  ;;  %v20376_v44 = vld [vmem:[#allocation28_spill] sm:$0xff] }
 0x1aa   : > { %13067 = vmatmul.mubr.msk.f32.gmra.mxu1 %vm20039_vm1, %v15467_v56 }
 0x1ab   : > { %13069 = vmatprep.mubr.msk.f32.mxu1 %vm20039_vm1, %v3264_v29  ;;  %v3268_v29 = vsel %vm15444_vm15, %v15529_v51, 0.0 }
 0x1ac   : > { %13117 = vmatmul.mubr.msk.f32.gmra.mxu0 %vm20039_vm1, %v20373_v38  ;;  %v20381_v38 = vld [vmem:[#allocation37_spill] sm:$0xff] }
 0x1ad   : > { %13119 = vmatprep.mubr.msk.f32.mxu0 %vm20039_vm1, %v20374_v23  ;;  %v20378_v23 = vld [vmem:[#allocation34_spill] sm:$0xff] }
 0x1ae   : > { %13070 = vmatmul.mubr.msk.f32.gmra.mxu1 %vm20039_vm1, %v15505_v0 }
 0x1af   : > { %13072 = vmatprep.mubr.msk.f32.mxu1 %vm20039_vm1, %v3266_v62 }
 0x1b0   : > { %13120 = vmatmul.mubr.msk.f32.gmra.mxu0 %vm20039_vm1, %v20376_v44  ;;  %v20380_v44 = vld [vmem:[#allocation36_spill] sm:$0xff] }
 0x1b1   : > { %13122 = vmatprep.mubr.msk.f32.mxu0 %vm20039_vm1, %v20377_v10  ;;  %v3270_v10 = vsel %vm15508_vm14, %v15571_v50, 0.0 }
 0x1b2   : > { %13073 = vmatmul.mubr.msk.f32.gmra.mxu1 %vm20039_vm1, %v15550_v18 }
 0x1b3   : > { %13075 = vmatprep.mubr.msk.f32.mxu1 %vm20039_vm1, %v3268_v29 }
 0x1b4   : > { %13123 = vmatmul.mubr.msk.f32.gmra.mxu0 %vm20039_vm1, %v15099_v12  ;;  %v20383_v12 = vld [vmem:[#allocation39_spill] sm:$0xff] }
 0x1b5   : > { %13125 = vmatprep.mubr.msk.f32.mxu0 %vm20039_vm1, %v20378_v23  ;;  %v3272_v23 = vsel %vm15541_vm8, %v15612_v53, 0.0 }
 0x1b6   : > { %13076 = vmatmul.mubr.msk.f32.gmra.mxu1 %vm20039_vm1, %v15592_v33 }
 0x1b7   : > { %13078 = vmatprep.mubr.msk.f32.mxu1 %vm20039_vm1, %v3270_v10  ;;  %v20385_v10 = vld [vmem:[#allocation98_spill] sm:$0xff] }
 0x1b8   : > { %13126 = vmatmul.mubr.msk.f32.gmra.mxu0 %vm20039_vm1, %v20380_v44  ;;  %vm20386_vm2 = vnez %v20385_v10  ;;  %v20387_v44 = vld [vmem:[#allocation42_spill] sm:$0xff] }
 0x1b9   : > { %13128 = vmatprep.mubr.msk.f32.mxu0 %vm20039_vm1, %v20381_v38  ;;  %v3274_v38 = vsel %vm20386_vm2, %v15654_v16, 0.0 }
 0x1ba   : > { %13079 = vmatmul.mubr.msk.f32.gmra.mxu1 %vm20039_vm1, %v15630_v58 }
 0x1bb   : > { %13081 = vmatprep.mubr.msk.f32.mxu1 %vm20039_vm1, %v3272_v23  ;;  %v20389_v23 = vld [vmem:[#allocation104_spill] sm:$0xff] }
 0x1bc   : > { %13129 = vmatmul.mubr.msk.f32.gmra.mxu0 %vm20039_vm1, %v20383_v12  ;;  %vm20390_vm6 = vnez %v20389_v23  ;;  %v20391_v12 = vld [vmem:[#allocation45_spill] sm:$0xff] }
 0x1bd   : > { %13131 = vmatprep.mubr.msk.f32.mxu0 %vm20039_vm1, %v20384_v3  ;;  %v3276_v3 = vsel %vm20390_vm6, %v15693_v25, 0.0 }
 0x1be   : > { %13082 = vmatmul.mubr.msk.f32.gmra.mxu1 %vm20039_vm1, %v15672_v24 }
 0x1bf   : > { %13084 = vmatprep.mubr.msk.f32.mxu1 %vm20039_vm1, %v3274_v38  ;;  %v20393_v38 = vld [vmem:[#allocation108_spill] sm:$0xff] }
 0x1c0   : > { %13132 = vmatmul.mubr.msk.f32.gmra.mxu0 %vm20039_vm1, %v20387_v44  ;;  %vm20394_vm12 = vnez %v20393_v38  ;;  %v20395_v44 = vld [vmem:[#allocation48_spill] sm:$0xff] }
 0x1c1   : > { %13134 = vmatprep.mubr.msk.f32.mxu0 %vm20039_vm1, %v20388_v60  ;;  %v3278_v60 = vsel %vm20394_vm12, %v15734_v15, 0.0 }
 0x1c2   : > { %13085 = vmatmul.mubr.msk.f32.gmra.mxu1 %vm20039_vm1, %v15714_v8 }
 0x1c3   : > { %13087 = vmatprep.mubr.msk.f32.mxu1 %vm20039_vm1, %v3276_v3  ;;  %v20397_v3 = vld [vmem:[#allocation112_spill] sm:$0xff] }
 0x1c4   : > { %13135 = vmatmul.mubr.msk.f32.gmra.mxu0 %vm20039_vm1, %v20391_v12  ;;  %vm20398_vm6 = vnez %v20397_v3  ;;  %v1798_v12 = vrot.slane %v15783_v59, 7 }
 0x1c5   : > { %13137 = vmatprep.mubr.msk.f32.mxu0 %vm20039_vm1, %v20392_v32  ;;  %v3280_v32 = vsel %vm20398_vm6, %v15779_v30, 0.0  ;;  %vm20402_vm6 = vcmp.lt.s32.totalorder %v15164_v26, 1 }
 0x1c6   : > { %13088 = vmatmul.mubr.msk.f32.gmra.mxu1 %vm20039_vm1, %v15756_v28 }
 0x1c7   : > { %13090 = vmatprep.mubr.msk.f32.mxu1 %vm20039_vm1, %v3278_v60  ;;  %v20400_v60 = vld [vmem:[#allocation53_spill] sm:$0xff] }
 0x1c8   : > { %13138 = vmatmul.mubr.msk.f32.gmra.mxu0 %vm20039_vm1, %v20395_v44  ;;  %v1439_v44 = vadd.s32 8, %v15164_v26 }
 0x1c9   : > { %13140 = vmatprep.mubr.msk.f32.mxu0 %vm20039_vm1, %v20396_v20  ;;  %v3282_v20 = vsel %vm15759_vm3, %v15819_v11, 0.0 }
 0x1ca   : > { %13091 = vmatmul.mubr.msk.f32.gmra.mxu1 %vm20039_vm1, %v15799_v9 }
 0x1cb   : > { %13093 = vmatprep.mubr.msk.f32.mxu1 %vm20039_vm1, %v3280_v32  ;;  %v20401_v32 = vrot.slane %v15206_v31, 7 }
 0x1cc   : > { %13141 = vmatmul.mubr.msk.f32.gmra.mxu0 %vm20039_vm1, %v20399_v13 }
 0x1cd   : > { %13143 = vmatprep.mubr.msk.f32.mxu0 %vm20039_vm1, %v20400_v60  ;;  %v16054_v41 = vsel %vm20402_vm6, %v20401_v32, %v1798_v12  ;;  %v1471_v60 = vand.u32 15, %v1439_v44  ;;  %v20403_v32 = vld [vmem:[#allocation59_spill] sm:$0xff] }
 0x1ce   : > { %13094 = vmatmul.mubr.msk.f32.gmra.mxu1 %vm20039_vm1, %v15839_v7 }
 0x1cf   : > { %13096 = vmatprep.mubr.msk.f32.mxu1 %vm20039_vm1, %v3282_v20  ;;  %v3284_v20 = vsel %vm15813_vm0, %v16054_v41, 0.0  ;;  %vm16076_vm3 = vcmp.lt.s32.totalorder %v1471_v60, 15  ;;  %v16103_v60 = vpop.f32.mrf.mxu0  ;;  %vm20424_vm0 = vnez %v20423_v6  ;;  %v20430_v6 = vld [vmem:[#allocation89_spill] sm:$0xff] }
 0x1d0   : > { %13144 = vmatmul.mubr.msk.f32.gmra.mxu0 %vm20039_vm1, %v15189_v19  ;;  %v20404_v19 = vrot.slane %v20403_v32, 7 }
 0x1d1   : > { %13146 = vmatprep.mubr.msk.f32.mxu0 %vm20039_vm1, %v15199_v2  ;;  %v20405_v2 = vmov 0 }
 0x1d2   : > { %13097 = vmatmul.mubr.msk.f32.gmra.mxu1 %vm20039_vm1, %v15870_v46  ;;  %v16074_v44 = vsel %vm20402_vm6, %v1798_v12, %v20404_v19  ;;  %v20406_v2 = vsel %vm16076_vm3, 4294967295, %v20405_v2  ;;  %vm20410_vm6 = vcmask 1043456   ;;  %v20411_v19 = vld [vmem:[#allocation71_spill] sm:$0xff] }
 0x1d3   : > { %13099 = vmatprep.mubr.msk.f32.mxu1 %vm20039_vm1, %v3284_v20  ;;  %20407 = vst [vmem:[#allocation125_spill] sm:$0xff] %v20406_v2  ;;  %v20408_v20 = vld [vmem:[#allocation68_spill] sm:$0xff]  ;;  %vm20413_vm10 = vmmov %vm20410_vm6 }
 0x1d4   : > { %13147 = vmatmul.mubr.msk.f32.gmra.mxu0 %vm20039_vm1, %v15206_v31  ;;  %v20409_v31 = vld [vmem:[#allocation66_spill] sm:$0xff]  ;;  %20412 = vst [vmem:[#allocation68_spill] sm:$0xff] %v16103_v60  ;;  %v20425_v60 = vld [vmem:[#allocation85_spill] sm:$0xff] }
 0x1d5   : > { %13149 = vmatprep.mubr.msk.f32.mxu0 %vm20039_vm1, %v15783_v59  ;;  %v4063_v12 = vsel %vm16076_vm3, %v20409_v31, 0.0  ;;  %v20414_v31 = vld [vmem:[#allocation72_spill] sm:$0xff] }
 0x1d6   : > { %13100 = vmatmul.mubr.msk.f32.gmra.mxu1 %vm20039_vm1, %v16074_v44 }
 0x1d7   : > { %13154 = vmatprep.mubr.msk.f32.mxu1 %vm20039_vm1, %v20408_v20  ;;  %v20417_v20 = vld [vmem:[#allocation75_spill] sm:$0xff] }
 0x1d8   : > { %13150 = vmatmul.mubr.msk.f32.gmra.mxu0 %vm20039_vm1, %v20403_v32 }
 0x1d9   : > { %13204 = vmatprep.mubr.msk.f32.mxu0 %vm20039_vm1, %v4514_v5  ;;  %v20415_v5 = vld [vmem:[#allocation62_spill] sm:$0xff] }
 0x1da   : > { %13155 = vmatmul.mubr.msk.f32.vlgmr.msra.gmra.mxu1 %vm20039_vm1, %v4063_v12  ;;  %v20418_v12 = vld [vmem:[#allocation76_spill] sm:$0xff] }
 0x1db   : > { %13253 = vmatpush3.msk.msra.mxu1 %vm20410_vm6, %v15895_v14  ;;  %13157 = vmatprep.mubr.msk.f32.mxu1 %vm20039_vm1, %v20411_v19  ;;  %vm20416_vm6 = vnez %v20415_v5 }
 0x1dc   : > { %13205 = vmatmul.mubr.msk.f32.vlgmr.msra.gmra.mxu0 %vm20039_vm1, %v15334_v54  ;;  %v4065_v14 = vsel %vm20416_vm6, %v20414_v31, 0.0  ;;  %v16114_v54 = vpop.f32.mrf.mxu0 }
 0x1dd   : > { %13303 = vmatpush3.msk.msra.mxu0 %vm20413_vm10, %v15910_v63  ;;  %13207 = vmatprep.mubr.msk.f32.mxu0 %vm20039_vm1, %v4516_v61  ;;  %v20419_v61 = vld [vmem:[#allocation65_spill] sm:$0xff] }
 0x1de   : > { %13158 = vmatmul.mubr.msk.f32.gmra.mxu1 %vm20039_vm1, %v4065_v14  ;;  %v16122_v63 = vpop.f32.mrf.mxu0  ;;  %vm20420_vm10 = vnez %v20419_v61 }
 0x1df   : > { %13160 = vmatprep.mubr.msk.f32.mxu1 %vm20039_vm1, %v20417_v20  ;;  %v4067_v14 = vsel %vm20420_vm10, %v20418_v12, 0.0 }
 0x1e0   : > { %13208 = vmatmul.mubr.msk.f32.gmra.mxu0 %vm20039_vm1, %v15376_v27  ;;  %v16130_v48 = vpop.f32.mrf.mxu0  ;;  %v4520_v27 = vsel %vm15239_vm7, %v15401_v47, 0.0  ;;  %vm20429_vm7 = vnez %v20428_v42  ;;  %v20435_v42 = vld [vmem:[#allocation94_spill] sm:$0xff] }
 0x1e1   : > { %13210 = vmatprep.mubr.msk.f32.mxu0 %vm20039_vm1, %v4518_v21  ;;  %v20422_v21 = vld [vmem:[#allocation81_spill] sm:$0xff] }
 0x1e2   : > { %13161 = vmatmul.mubr.msk.f32.gmra.mxu1 %vm20039_vm1, %v4067_v14  ;;  %v16138_v49 = vpop.f32.mrf.mxu0  ;;  %v4069_v14 = vsel %vm20424_vm0, %v20422_v21, 0.0 }
 0x1e3   : > { %13163 = vmatprep.mubr.msk.f32.mxu1 %vm20039_vm1, %v20421_v4 }
 0x1e4   : > { %13211 = vmatmul.mubr.msk.f32.gmra.mxu0 %vm20039_vm1, %v15418_v43  ;;  %v16146_v13 = vpop.f32.mrf.mxu0  ;;  %v4522_v43 = vsel %vm15268_vm9, %v15442_v55, 0.0  ;;  %v4524_v55 = vsel %vm15337_vm11, %v15485_v52, 0.0  ;;  %vm20434_vm9 = vnez %v20433_v39  ;;  %v20437_v52 = vld [vmem:[#allocation95_spill] sm:$0xff] }
 0x1e5   : > { %13213 = vmatprep.mubr.msk.f32.mxu0 %vm20039_vm1, %v4520_v27  ;;  %20426 = vst [vmem:[#allocation66_spill] sm:$0xff] %v16146_v13  ;;  %v20427_v27 = vld [vmem:[#allocation86_spill] sm:$0xff] }
 0x1e6   : > { %13164 = vmatmul.mubr.msk.f32.gmra.mxu1 %vm20039_vm1, %v4069_v14  ;;  %v16154_v47 = vpop.f32.mrf.mxu0  ;;  %v4071_v14 = vsel %vm20429_vm7, %v20427_v27, 0.0 }
 0x1e7   : > { %13166 = vmatprep.mubr.msk.f32.mxu1 %vm20039_vm1, %v20425_v60 }
 0x1e8   : > { %13214 = vmatmul.mubr.msk.f32.gmra.mxu0 %vm20039_vm1, %v15467_v56  ;;  %v16162_v13 = vpop.f32.mrf.mxu0 }
 0x1e9   : > { %13216 = vmatprep.mubr.msk.f32.mxu0 %vm20039_vm1, %v4522_v43  ;;  %20431 = vst [vmem:[#allocation71_spill] sm:$0xff] %v16162_v13  ;;  %v20432_v43 = vld [vmem:[#allocation90_spill] sm:$0xff] }
 0x1ea   : > { %13167 = vmatmul.mubr.msk.f32.gmra.mxu1 %vm20039_vm1, %v4071_v14  ;;  %v16170_v56 = vpop.f32.mrf.mxu0  ;;  %v4073_v14 = vsel %vm20434_vm9, %v20432_v43, 0.0 }
 0x1eb   : > { %13169 = vmatprep.mubr.msk.f32.mxu1 %vm20039_vm1, %v20430_v6 }
 0x1ec   : > { %13217 = vmatmul.mubr.msk.f32.gmra.mxu0 %vm20039_vm1, %v15505_v0  ;;  %v16178_v13 = vpop.f32.mrf.mxu0  ;;  %v4526_v0 = vsel %vm15391_vm13, %v15529_v51, 0.0  ;;  %v4528_v51 = vsel %vm15444_vm15, %v15571_v50, 0.0  ;;  %v4530_v50 = vsel %vm15508_vm14, %v15612_v53, 0.0  ;;  %v20452_v53 = vld [vmem:[#allocation107_spill] sm:$0xff] }
 0x1ed   : > { %13219 = vmatprep.mubr.msk.f32.mxu0 %vm20039_vm1, %v4524_v55  ;;  %20436 = vst [vmem:[#allocation72_spill] sm:$0xff] %v16178_v13  ;;  %v20438_v55 = vld [vmem:[#allocation87_spill] sm:$0xff] }
 0x1ee   : > { %13170 = vmatmul.mubr.msk.f32.gmra.mxu1 %vm20039_vm1, %v4073_v14  ;;  %vm20439_vm11 = vnez %v20438_v55  ;;  %v16189_v39 = vpop.f32.mrf.mxu0  ;;  %v20440_v14 = vld [vmem:[#allocation99_spill] sm:$0xff] }
 0x1ef   : > { %13172 = vmatprep.mubr.msk.f32.mxu1 %vm20039_vm1, %v20435_v42  ;;  %v4075_v1 = vsel %vm20439_vm11, %v20437_v52, 0.0 }
 0x1f0   : > { %13220 = vmatmul.mubr.msk.f32.gmra.mxu0 %vm20039_vm1, %v15550_v18  ;;  %v16194_v13 = vpop.f32.mrf.mxu0  ;;  %v20442_v18 = vld [vmem:[#allocation100_spill] sm:$0xff] }
 0x1f1   : > { %13222 = vmatprep.mubr.msk.f32.mxu0 %vm20039_vm1, %v4526_v0  ;;  %20441 = vst [vmem:[#allocation75_spill] sm:$0xff] %v16194_v13  ;;  %v20443_v0 = vld [vmem:[#allocation93_spill] sm:$0xff] }
 0x1f2   : > { %13173 = vmatmul.mubr.msk.f32.gmra.mxu1 %vm20039_vm1, %v4075_v1  ;;  %vm20444_vm13 = vnez %v20443_v0  ;;  %v16205_v55 = vpop.f32.mrf.mxu0  ;;  %v20445_v1 = vld [vmem:[#allocation102_spill] sm:$0xff] }
 0x1f3   : > { %13175 = vmatprep.mubr.msk.f32.mxu1 %vm20039_vm1, %v20440_v14  ;;  %v4077_v22 = vsel %vm20444_vm13, %v20442_v18, 0.0 }
 0x1f4   : > { %13223 = vmatmul.mubr.msk.f32.gmra.mxu0 %vm20039_vm1, %v15592_v33  ;;  %v16210_v13 = vpop.f32.mrf.mxu0  ;;  %v20447_v33 = vld [vmem:[#allocation103_spill] sm:$0xff] }
 0x1f5   : > { %13225 = vmatprep.mubr.msk.f32.mxu0 %vm20039_vm1, %v4528_v51  ;;  %20446 = vst [vmem:[#allocation76_spill] sm:$0xff] %v16210_v13  ;;  %v20448_v51 = vld [vmem:[#allocation97_spill] sm:$0xff] }
 0x1f6   : > { %13176 = vmatmul.mubr.msk.f32.gmra.mxu1 %vm20039_vm1, %v4077_v22  ;;  %vm20449_vm15 = vnez %v20448_v51  ;;  %v16221_v0 = vpop.f32.mrf.mxu0  ;;  %v20450_v22 = vld [vmem:[#allocation106_spill] sm:$0xff] }
 0x1f7   : > { %13178 = vmatprep.mubr.msk.f32.mxu1 %vm20039_vm1, %v20445_v1  ;;  %v4079_v34 = vsel %vm20449_vm15, %v20447_v33, 0.0 }
 0x1f8   : > { %13226 = vmatmul.mubr.msk.f32.gmra.mxu0 %vm20039_vm1, %v15630_v58  ;;  %v16226_v13 = vpop.f32.mrf.mxu0  ;;  %v4532_v58 = vsel %vm15541_vm8, %v15654_v16, 0.0  ;;  %v4534_v16 = vsel %vm20386_vm2, %v15693_v25, 0.0  ;;  %vm20462_vm2 = vnez %v20389_v23 }
 0x1f9   : > { %13228 = vmatprep.mubr.msk.f32.mxu0 %vm20039_vm1, %v4530_v50  ;;  %20451 = vst [vmem:[#allocation80_spill] sm:$0xff] %v16226_v13  ;;  %v20453_v50 = vld [vmem:[#allocation101_spill] sm:$0xff]  ;;  %v4536_v25 = vsel %vm20462_vm2, %v15734_v15, 0.0  ;;  %v4538_v15 = vsel %vm20394_vm12, %v15779_v30, 0.0  ;;  %vm20472_vm12 = vnez %v20397_v3  ;;  %v20479_v3 = vrot.slane %v15783_v59, 1 }
 0x1fa   : > { %13179 = vmatmul.mubr.msk.f32.gmra.mxu1 %vm20039_vm1, %v4079_v34  ;;  %vm20454_vm14 = vnez %v20453_v50  ;;  %v16237_v51 = vpop.f32.mrf.mxu0  ;;  %v20455_v34 = vld [vmem:[#allocation110_spill] sm:$0xff]  ;;  %v4540_v30 = vsel %vm20472_vm12, %v15819_v11, 0.0  ;;  %vm20476_vm12 = vnez %v20339_v45 }
 0x1fb   : > { %13181 = vmatprep.mubr.msk.f32.mxu1 %vm20039_vm1, %v20450_v22  ;;  %v4081_v62 = vsel %vm20454_vm14, %v20452_v53, 0.0  ;;  %v4542_v11 = vsel %vm20476_vm12, %v16054_v41, 0.0 }
 0x1fc   : > { %13229 = vmatmul.mubr.msk.f32.gmra.mxu0 %vm20039_vm1, %v15672_v24  ;;  %v16242_v13 = vpop.f32.mrf.mxu0  ;;  %v20457_v24 = vld [vmem:[#allocation111_spill] sm:$0xff] }
 0x1fd   : > { %13231 = vmatprep.mubr.msk.f32.mxu0 %vm20039_vm1, %v4532_v58  ;;  %20456 = vst [vmem:[#allocation81_spill] sm:$0xff] %v16242_v13  ;;  %v20458_v58 = vld [vmem:[#allocation105_spill] sm:$0xff] }
 0x1fe   : > { %13182 = vmatmul.mubr.msk.f32.gmra.mxu1 %vm20039_vm1, %v4081_v62  ;;  %vm20459_vm8 = vnez %v20458_v58  ;;  %v16253_v50 = vpop.f32.mrf.mxu0  ;;  %v20461_v62 = vld [vmem:[#allocation113_spill] sm:$0xff] }
 0x1ff   : > { %13184 = vmatprep.mubr.msk.f32.mxu1 %vm20039_vm1, %v20455_v34  ;;  %v4083_v29 = vsel %vm20459_vm8, %v20457_v24, 0.0  ;;  %20460 = vst [vmem:[#allocation85_spill] sm:$0xff] %v16253_v50 }
 0x200   : > { %13232 = vmatmul.mubr.msk.f32.gmra.mxu0 %vm20039_vm1, %v15714_v8  ;;  %v16258_v13 = vpop.f32.mrf.mxu0  ;;  %v20463_v8 = vld [vmem:[#allocation109_spill] sm:$0xff] }
 0x201   : > { %13234 = vmatprep.mubr.msk.f32.mxu0 %vm20039_vm1, %v4534_v16  ;;  %vm20464_vm5 = vnez %v20463_v8 }
 0x202   : > { %13185 = vmatmul.mubr.msk.f32.gmra.mxu1 %vm20039_vm1, %v4083_v29  ;;  %v4085_v16 = vsel %vm20464_vm5, %v15749_v40, 0.0  ;;  %v16269_v10 = vpop.f32.mrf.mxu0  ;;  %v20466_v29 = vld [vmem:[#allocation118_spill] sm:$0xff] }
 0x203   : > { %13187 = vmatprep.mubr.msk.f32.mxu1 %vm20039_vm1, %v20461_v62  ;;  %20465 = vst [vmem:[#allocation86_spill] sm:$0xff] %v16269_v10 }
 0x204   : > { %13235 = vmatmul.mubr.msk.f32.gmra.mxu0 %vm20039_vm1, %v15756_v28  ;;  %v16274_v50 = vpop.f32.mrf.mxu0  ;;  %v20467_v28 = vld [vmem:[#allocation119_spill] sm:$0xff] }
 0x205   : > { %13237 = vmatprep.mubr.msk.f32.mxu0 %vm20039_vm1, %v4536_v25  ;;  %v20468_v25 = vld [vmem:[#allocation114_spill] sm:$0xff] }
 0x206   : > { %13188 = vmatmul.mubr.msk.f32.gmra.mxu1 %vm20039_vm1, %v4085_v16  ;;  %vm20469_vm2 = vnez %v20468_v25  ;;  %v16285_v10 = vpop.f32.mrf.mxu0  ;;  %v20471_v16 = vld [vmem:[#allocation121_spill] sm:$0xff] }
 0x207   : > { %13190 = vmatprep.mubr.msk.f32.mxu1 %vm20039_vm1, %v20466_v29  ;;  %v4087_v23 = vsel %vm20469_vm2, %v20467_v28, 0.0  ;;  %20470 = vst [vmem:[#allocation89_spill] sm:$0xff] %v16285_v10  ;;  %vm20480_vm2 = vcmp.lt.s32.totalorder %v15164_v26, 7 }
 0x208   : > { %13238 = vmatmul.mubr.msk.f32.gmra.mxu0 %vm20039_vm1, %v15799_v9  ;;  %v16290_v8 = vpop.f32.mrf.mxu0  ;;  %v20473_v9 = vld [vmem:[#allocation116_spill] sm:$0xff]  ;;  %vm20482_vm12 = vmmov %vm20480_vm2 }
 0x209   : > { %13240 = vmatprep.mubr.msk.f32.mxu0 %vm20039_vm1, %v4538_v15  ;;  %vm20474_vm4 = vnez %v20473_v9 }
 0x20a   : > { %13191 = vmatmul.mubr.msk.f32.gmra.mxu1 %vm20039_vm1, %v4087_v23  ;;  %v4089_v15 = vsel %vm20474_vm4, %v15832_v57, 0.0  ;;  %v16301_v38 = vpop.f32.mrf.mxu0  ;;  %v2704_v23 = vrot.slane %v20403_v32, 1  ;;  %vm20477_vm4 = vnez %v20354_v35 }
 0x20b   : > { %13193 = vmatprep.mubr.msk.f32.mxu1 %vm20039_vm1, %v20471_v16  ;;  %20475 = vst [vmem:[#allocation90_spill] sm:$0xff] %v16301_v38 }
 0x20c   : > { %13241 = vmatmul.mubr.msk.f32.gmra.mxu0 %vm20039_vm1, %v15839_v7  ;;  %v16307_v7 = vpop.f32.mrf.mxu0  ;;  %v16325_v38 = vsel %vm20480_vm2, %v20479_v3, %v2704_v23  ;;  %v20485_v3 = vmov 0.0   ;;  %vm20526_vm2 = vcmask 1043456  }
 0x20d   : > { %13243 = vmatprep.mubr.msk.f32.mxu0 %vm20039_vm1, %v4540_v30  ;;  %v4091_v30 = vsel %vm20477_vm4, %v15862_v36, 0.0 }
 0x20e   : > { %13194 = vmatmul.mubr.msk.f32.gmra.mxu1 %vm20039_vm1, %v4089_v15  ;;  %v16318_v15 = vpop.f32.mrf.mxu0 }
 0x20f   : > { %13196 = vmatprep.mubr.msk.f32.mxu1 %vm20039_vm1, %v15856_v17  ;;  %20478 = vst [vmem:[#allocation94_spill] sm:$0xff] %v16318_v15 }
 0x210   : > { %13244 = vmatmul.mubr.msk.f32.gmra.mxu0 %vm20039_vm1, %v15870_v46  ;;  %v20481_v46 = vrot.slane %v14980_v37, 1  ;;  %v20489_v37 = vld [vmem:[#allocation21_spill] sm:$0xff] }
 0x211   : > { %13246 = vmatprep.mubr.msk.f32.mxu0 %vm20039_vm1, %v4542_v11  ;;  %v16335_v11 = vpop.f32.mrf.mxu0 }
 0x212   : > { %13197 = vmatmul.mubr.msk.f32.gmra.mxu1 %vm20039_vm1, %v4091_v30  ;;  %v16331_v41 = vsel %vm20482_vm12, %v2704_v23, %v20481_v46  ;;  %v20483_v30 = vld [vmem:[#allocation124_spill] sm:$0xff]  ;;  %vm20528_vm12 = vmmov %vm20526_vm2 }
 0x213   : > { %13199 = vmatprep.mubr.msk.f32.mxu1 %vm20039_vm1, %v16325_v38  ;;  %vm20484_vm4 = vnez %v20483_v30  ;;  %v16343_v15 = vpop.f32.mrf.mxu0  ;;  %v20487_v23 = vld [vmem:[#allocation20_spill] sm:$0xff]  ;;  %v5419_v30 = vsel %vm16076_vm3, %v20414_v31, 0.0  ;;  %vm20537_vm3 = vnez %v20354_v35 }
 0x214   : > { %13247 = vmatmul.mubr.msk.f32.gmra.mxu0 %vm20039_vm1, %v16074_v44  ;;  %v4093_v45 = vsel %vm20484_vm4, %v16331_v41, 0.0  ;;  %20486 = vst [vmem:[#allocation95_spill] sm:$0xff] %v16343_v15  ;;  %v20491_v15 = vld [vmem:[#allocation91_spill] sm:$0xff] }
 0x215   : > { %13249 = vmatprep.mubr.f32.mxu0 %v20485_v3  ;;  %v16348_v46 = vpop.f32.mrf.mxu0 }
 0x216   : > { %13200 = vmatmul.mubr.msk.f32.gmra.mxu1 %vm20039_vm1, %v4093_v45  ;;  %v20490_v45 = vld [vmem:[#allocation22_spill] sm:$0xff] }
 0x217   : > { %13254 = vmatprep.mubr.msk.f32.mxu1 %vm20039_vm1, %v20487_v23  ;;  %v16353_v44 = vpop.f32.mrf.mxu0  ;;  %v16362_v23 = vpop.f32.mrf.mxu1 }
 0x218   : > { %13250 = vmatmul.mubr.f32.gmra.mxu0 %v20485_v3  ;;  %20488 = vst [vmem:[#allocation99_spill] sm:$0xff] %v16353_v44  ;;  %v20492_v44 = vld [vmem:[#allocation23_spill] sm:$0xff] }
 0x219   : > { %13304 = vmatprep.mubr.msk.f32.mxu0 %vm20039_vm1, %v20411_v19  ;;  %v13006_v26 = vpop.f32.mrf.mxu0  ;;  %v12959_v19 = vpop.f32.mrf.mxu1 }
 0x21a   : > { %13255 = vmatmul.mubr.msk.f32.vlgmr.msra.gmra.mxu1 %vm20039_vm1, %v20489_v37  ;;  %v16366_v10 = vadd.f32 %v13006_v26, %v20491_v15  ;;  %v2530_v31 = vadd.f32 %v12959_v19, %v16114_v54  ;;  %v20494_v19 = vld [vmem:[#allocation25_spill] sm:$0xff] }
 0x21b   : > { %13257 = vmatprep.mubr.msk.f32.mxu1 %vm20039_vm1, %v20490_v45  ;;  %v16370_v37 = vpop.f32.mrf.mxu0  ;;  %v20493_v45 = vld [vmem:[#allocation24_spill] sm:$0xff]  ;;  %v2524_v26 = vpop.f32.mrf.mxu1 }
 0x21c   : > { %13305 = vmatmul.mubr.msk.f32.vlgmr.msra.gmra.mxu0 %vm20039_vm1, %v5419_v30  ;;  %v5421_v30 = vsel %vm20416_vm6, %v20418_v12, 0.0  ;;  %v20495_v12 = vld [vmem:[#allocation27_spill] sm:$0xff] }
 0x21d   : > { %13307 = vmatprep.mubr.msk.f32.mxu0 %vm20039_vm1, %v20417_v20  ;;  %v13009_v15 = vpop.f32.mrf.mxu0  ;;  %v2525_v20 = vadd.f32 %v2524_v26, %v16122_v63  ;;  %v5423_v63 = vsel %vm20420_vm10, %v20422_v21, 0.0  ;;  %v20498_v21 = vld [vmem:[#allocation29_spill] sm:$0xff] }
 0x21e   : > { %13258 = vmatmul.mubr.msk.f32.gmra.mxu1 %vm20039_vm1, %v20492_v44  ;;  %v16382_v2 = vadd.f32 %v13009_v15, %v2530_v31  ;;  %v12962_v44 = vpop.f32.mrf.mxu1  ;;  %v20496_v15 = vld [vmem:[#allocation26_spill] sm:$0xff] }
 0x21f   : > { %13260 = vmatprep.mubr.msk.f32.mxu1 %vm20039_vm1, %v20493_v45  ;;  %v3009_v54 = vpop.f32.mrf.mxu0  ;;  %v2540_v45 = vadd.f32 %v12962_v44, %v16130_v48 }
 0x220   : > { %13308 = vmatmul.mubr.msk.f32.gmra.mxu0 %vm20039_vm1, %v5421_v30  ;;  %v16389_v5 = vadd.f32 %v3009_v54, %v2525_v20  ;;  %v2534_v31 = vpop.f32.mrf.mxu1  ;;  %v20497_v20 = vld [vmem:[#allocation66_spill] sm:$0xff] }
 0x221   : > { %13310 = vmatprep.mubr.msk.f32.mxu0 %vm20039_vm1, %v20421_v4  ;;  %v13012_v30 = vpop.f32.mrf.mxu0  ;;  %v2535_v4 = vadd.f32 %v2534_v31, %v16138_v49  ;;  %v5425_v49 = vsel %vm20424_vm0, %v20427_v27, 0.0  ;;  %v20502_v27 = vld [vmem:[#allocation31_spill] sm:$0xff] }
 0x222   : > { %13261 = vmatmul.mubr.msk.f32.gmra.mxu1 %vm20039_vm1, %v20494_v19  ;;  %v16398_v26 = vadd.f32 %v13012_v30, %v2540_v45  ;;  %v12965_v48 = vpop.f32.mrf.mxu1 }
 0x223   : > { %13263 = vmatprep.mubr.msk.f32.mxu1 %vm20039_vm1, %v20495_v12  ;;  %v3019_v44 = vpop.f32.mrf.mxu0  ;;  %v2550_v54 = vadd.f32 %v12965_v48, %v20497_v20  ;;  %v20501_v20 = vld [vmem:[#allocation71_spill] sm:$0xff] }
 0x224   : > { %13311 = vmatmul.mubr.msk.f32.gmra.mxu0 %vm20039_vm1, %v5423_v63  ;;  %v16405_v12 = vadd.f32 %v3019_v44, %v2535_v4  ;;  %v2544_v45 = vpop.f32.mrf.mxu1  ;;  %v20500_v44 = vld [vmem:[#allocation28_spill] sm:$0xff] }
 0x225   : > { %13313 = vmatprep.mubr.msk.f32.mxu0 %vm20039_vm1, %v20425_v60  ;;  %v13015_v31 = vpop.f32.mrf.mxu0  ;;  %v2545_v60 = vadd.f32 %v2544_v45, %v16154_v47  ;;  %v5427_v47 = vsel %vm20429_vm7, %v20432_v43, 0.0  ;;  %v20506_v43 = vld [vmem:[#allocation34_spill] sm:$0xff] }
 0x226   : > { %13264 = vmatmul.mubr.msk.f32.gmra.mxu1 %vm20039_vm1, %v20496_v15  ;;  %v16414_v30 = vadd.f32 %v13015_v31, %v2550_v54  ;;  %v12968_v4 = vpop.f32.mrf.mxu1 }
 0x227   : > { %13266 = vmatprep.mubr.msk.f32.mxu1 %vm20039_vm1, %v20498_v21  ;;  %v3029_v48 = vpop.f32.mrf.mxu0  ;;  %v2560_v21 = vadd.f32 %v12968_v4, %v20501_v20  ;;  %v20505_v20 = vld [vmem:[#allocation72_spill] sm:$0xff] }
 0x228   : > { %13314 = vmatmul.mubr.msk.f32.gmra.mxu0 %vm20039_vm1, %v5425_v49  ;;  %v16421_v15 = vadd.f32 %v3029_v48, %v2545_v60  ;;  %v2554_v54 = vpop.f32.mrf.mxu1  ;;  %v20504_v48 = vld [vmem:[#allocation33_spill] sm:$0xff] }
 0x229   : > { %13316 = vmatprep.mubr.msk.f32.mxu0 %vm20039_vm1, %v20430_v6  ;;  %v13018_v45 = vpop.f32.mrf.mxu0  ;;  %v2555_v6 = vadd.f32 %v2554_v54, %v16170_v56  ;;  %v5429_v56 = vsel %vm20434_vm9, %v20437_v52, 0.0  ;;  %v20510_v52 = vld [vmem:[#allocation37_spill] sm:$0xff] }
 0x22a   : > { %13267 = vmatmul.mubr.msk.f32.gmra.mxu1 %vm20039_vm1, %v20500_v44  ;;  %v16430_v31 = vadd.f32 %v13018_v45, %v2560_v21  ;;  %v12971_v60 = vpop.f32.mrf.mxu1 }
 0x22b   : > { %13269 = vmatprep.mubr.msk.f32.mxu1 %vm20039_vm1, %v20502_v27  ;;  %v3039_v4 = vpop.f32.mrf.mxu0  ;;  %v2570_v27 = vadd.f32 %v12971_v60, %v20505_v20  ;;  %v20509_v20 = vld [vmem:[#allocation75_spill] sm:$0xff] }
 0x22c   : > { %13317 = vmatmul.mubr.msk.f32.gmra.mxu0 %vm20039_vm1, %v5427_v47  ;;  %v16437_v44 = vadd.f32 %v3039_v4, %v2555_v6  ;;  %v2564_v21 = vpop.f32.mrf.mxu1  ;;  %v20508_v4 = vld [vmem:[#allocation36_spill] sm:$0xff] }
 0x22d   : > { %13319 = vmatprep.mubr.msk.f32.mxu0 %vm20039_vm1, %v20435_v42  ;;  %v13021_v54 = vpop.f32.mrf.mxu0  ;;  %v2565_v42 = vadd.f32 %v2564_v21, %v16189_v39  ;;  %v5431_v39 = vsel %vm20439_vm11, %v20442_v18, 0.0  ;;  %v20514_v18 = vld [vmem:[#allocation40_spill] sm:$0xff] }
 0x22e   : > { %13270 = vmatmul.mubr.msk.f32.gmra.mxu1 %vm20039_vm1, %v20504_v48  ;;  %v16446_v45 = vadd.f32 %v13021_v54, %v2570_v27  ;;  %v12974_v6 = vpop.f32.mrf.mxu1 }
 0x22f   : > { %13272 = vmatprep.mubr.msk.f32.mxu1 %vm20039_vm1, %v20506_v43  ;;  %v3049_v60 = vpop.f32.mrf.mxu0  ;;  %v2580_v43 = vadd.f32 %v12974_v6, %v20509_v20  ;;  %v20513_v20 = vld [vmem:[#allocation76_spill] sm:$0xff] }
 0x230   : > { %13320 = vmatmul.mubr.msk.f32.gmra.mxu0 %vm20039_vm1, %v5429_v56  ;;  %v16453_v48 = vadd.f32 %v3049_v60, %v2565_v42  ;;  %v2574_v27 = vpop.f32.mrf.mxu1  ;;  %v20512_v60 = vld [vmem:[#allocation39_spill] sm:$0xff] }
 0x231   : > { %13322 = vmatprep.mubr.msk.f32.mxu0 %vm20039_vm1, %v20440_v14  ;;  %v13024_v21 = vpop.f32.mrf.mxu0  ;;  %v2575_v14 = vadd.f32 %v2574_v27, %v16205_v55  ;;  %v5433_v55 = vsel %vm20444_vm13, %v20447_v33, 0.0  ;;  %v20519_v33 = vld [vmem:[#allocation43_spill] sm:$0xff] }
 0x232   : > { %13273 = vmatmul.mubr.msk.f32.gmra.mxu1 %vm20039_vm1, %v20508_v4  ;;  %v16462_v54 = vadd.f32 %v13024_v21, %v2580_v43  ;;  %v12977_v42 = vpop.f32.mrf.mxu1 }
 0x233   : > { %13275 = vmatprep.mubr.msk.f32.mxu1 %vm20039_vm1, %v20510_v52  ;;  %v3059_v6 = vpop.f32.mrf.mxu0  ;;  %v2590_v52 = vadd.f32 %v12977_v42, %v20513_v20  ;;  %v20517_v20 = vld [vmem:[#allocation80_spill] sm:$0xff] }
 0x234   : > { %13323 = vmatmul.mubr.msk.f32.gmra.mxu0 %vm20039_vm1, %v5431_v39  ;;  %v16469_v4 = vadd.f32 %v3059_v6, %v2575_v14  ;;  %v2584_v43 = vpop.f32.mrf.mxu1  ;;  %v20516_v6 = vld [vmem:[#allocation42_spill] sm:$0xff] }
 0x235   : > { %13325 = vmatprep.mubr.msk.f32.mxu0 %vm20039_vm1, %v20445_v1  ;;  %v13027_v27 = vpop.f32.mrf.mxu0  ;;  %v2585_v1 = vadd.f32 %v2584_v43, %v16221_v0  ;;  %v5435_v0 = vsel %vm20449_vm15, %v20452_v53, 0.0 }
 0x236   : > { %13276 = vmatmul.mubr.msk.f32.gmra.mxu1 %vm20039_vm1, %v20512_v60  ;;  %v16478_v21 = vadd.f32 %v13027_v27, %v2590_v52  ;;  %v12980_v14 = vpop.f32.mrf.mxu1 }
 0x237   : > { %13278 = vmatprep.mubr.msk.f32.mxu1 %vm20039_vm1, %v20514_v18  ;;  %v3069_v42 = vpop.f32.mrf.mxu0  ;;  %v2600_v18 = vadd.f32 %v12980_v14, %v20517_v20  ;;  %v20522_v20 = vld [vmem:[#allocation81_spill] sm:$0xff] }
 0x238   : > { %13326 = vmatmul.mubr.msk.f32.gmra.mxu0 %vm20039_vm1, %v5433_v55  ;;  %v16485_v60 = vadd.f32 %v3069_v42, %v2585_v1  ;;  %v2594_v52 = vpop.f32.mrf.mxu1  ;;  %v20521_v42 = vld [vmem:[#allocation45_spill] sm:$0xff] }
 0x239   : > { %13328 = vmatprep.mubr.msk.f32.mxu0 %vm20039_vm1, %v20450_v22  ;;  %v13030_v43 = vpop.f32.mrf.mxu0  ;;  %v16494_v22 = vadd.f32 %v2594_v52, %v16237_v51  ;;  %v5437_v51 = vsel %vm20454_vm14, %v20457_v24, 0.0 }
 0x23a   : > { %13279 = vmatmul.mubr.msk.f32.gmra.mxu1 %vm20039_vm1, %v20516_v6  ;;  %20518 = vst [vmem:[#allocation100_spill] sm:$0xff] %v16485_v60  ;;  %v16496_v27 = vadd.f32 %v13030_v43, %v2600_v18  ;;  %v12983_v1 = vpop.f32.mrf.mxu1  ;;  %v6069_v43 = vld [vmem:[%s19769_s7 + $0x4] sm:$0xf] }
 0x23b   : > { %13281 = vmatprep.mubr.msk.f32.mxu1 %vm20039_vm1, %v20519_v33  ;;  %v16500_v14 = vpop.f32.mrf.mxu0  ;;  %v2610_v53 = vadd.f32 %v12983_v1, %v20522_v20  ;;  %v20523_v33 = vld [vmem:[#allocation46_spill] sm:$0xff]  ;;  %13352 = vmatprep.subr.msk.mxu1 %vm20526_vm2, %v6069_v43  ;;  %vm20534_vm2 = vnez %v20468_v25 }
 0x23c   : > { %13329 = vmatmul.mubr.msk.f32.gmra.mxu0 %vm20039_vm1, %v5435_v0  ;;  %v16510_v18 = vpop.f32.mrf.mxu1  ;;  %13353 = vmatpush3.msk.msra.mxu1 %vm20528_vm12, %v6069_v43  ;;  %vm20536_vm12 = vnez %v20473_v9 }
 0x23d   : > { %13331 = vmatprep.mubr.msk.f32.mxu0 %vm20039_vm1, %v20455_v34  ;;  %v13033_v52 = vpop.f32.mrf.mxu0 }
 0x23e   : > { %13282 = vmatmul.mubr.msk.f32.gmra.mxu1 %vm20039_vm1, %v20521_v42  ;;  %v16513_v34 = vadd.f32 %v13033_v52, %v2610_v53 }
 0x23f   : > { %13284 = vmatprep.mubr.msk.f32.mxu1 %vm20039_vm1, %v20523_v33  ;;  %v12986_v1 = vpop.f32.mrf.mxu1  ;;  %v16520_v20 = vpop.f32.mrf.mxu0  ;;  %v20525_v33 = vld [vmem:[#allocation48_spill] sm:$0xff] }
 0x240   : > { %13332 = vmatmul.mubr.msk.f32.gmra.mxu0 %vm20039_vm1, %v5437_v51  ;;  %v2620_v24 = vadd.f32 %v12986_v1, %v16258_v13  ;;  %v20527_v51 = vld [vmem:[#allocation50_spill] sm:$0xff] }
 0x241   : > { %13334 = vmatprep.mubr.msk.f32.mxu0 %vm20039_vm1, %v20461_v62  ;;  %v5439_v62 = vsel %vm20459_vm8, %v15749_v40, 0.0  ;;  %v16532_v53 = vpop.f32.mrf.mxu1  ;;  %v13036_v52 = vpop.f32.mrf.mxu0 }
 0x242   : > { %13285 = vmatmul.mubr.msk.f32.gmra.mxu1 %vm20039_vm1, %v20525_v33  ;;  %v16535_v42 = vadd.f32 %v13036_v52, %v2620_v24  ;;  %v20530_v33 = vld [vmem:[#allocation53_spill] sm:$0xff] }
 0x243   : > { %13287 = vmatprep.mubr.msk.f32.mxu1 %vm20039_vm1, %v20527_v51  ;;  %v16539_v1 = vpop.f32.mrf.mxu0  ;;  %v20529_v51 = vld [vmem:[#allocation52_spill] sm:$0xff] }
 0x244   : > { %13335 = vmatmul.mubr.msk.f32.gmra.mxu0 %vm20039_vm1, %v5439_v62  ;;  %v12989_v13 = vpop.f32.mrf.mxu1  ;;  %v5441_v62 = vsel %vm20464_vm5, %v20467_v28, 0.0  ;;  %v5443_v28 = vsel %vm20534_vm2, %v15832_v57, 0.0  ;;  %v5445_v57 = vsel %vm20536_vm12, %v15862_v36, 0.0  ;;  %v5447_v36 = vsel %vm20537_vm3, %v16331_v41, 0.0 }
 0x245   : > { %13337 = vmatprep.mubr.msk.f32.mxu0 %vm20039_vm1, %v20466_v29  ;;  %v2630_v40 = vadd.f32 %v12989_v13, %v16274_v50  ;;  %v20532_v50 = vld [vmem:[#allocation55_spill] sm:$0xff] }
 0x246   : > { %13288 = vmatmul.mubr.msk.f32.gmra.mxu1 %vm20039_vm1, %v20529_v51  ;;  %v16549_v24 = vpop.f32.mrf.mxu1  ;;  %v13039_v52 = vpop.f32.mrf.mxu0 }
 0x247   : > { %13290 = vmatprep.mubr.msk.f32.mxu1 %vm20039_vm1, %v20530_v33  ;;  %v16552_v29 = vadd.f32 %v13039_v52, %v2630_v40  ;;  %v20533_v33 = vld [vmem:[#allocation56_spill] sm:$0xff] }
 0x248   : > { %13338 = vmatmul.mubr.msk.f32.gmra.mxu0 %vm20039_vm1, %v5441_v62  ;;  %v16556_v6 = vpop.f32.mrf.mxu0 }
 0x249   : > { %13340 = vmatprep.mubr.msk.f32.mxu0 %vm20039_vm1, %v20471_v16  ;;  %v12992_v51 = vpop.f32.mrf.mxu1 }
 0x24a   : > { %13291 = vmatmul.mubr.msk.f32.gmra.mxu1 %vm20039_vm1, %v20532_v50  ;;  %v2640_v13 = vadd.f32 %v12992_v51, %v16290_v8  ;;  %v20535_v8 = vld [vmem:[#allocation58_spill] sm:$0xff] }
 0x24b   : > { %13293 = vmatprep.mubr.msk.f32.mxu1 %vm20039_vm1, %v20533_v33  ;;  %v16566_v40 = vpop.f32.mrf.mxu1  ;;  %v13042_v62 = vpop.f32.mrf.mxu0 }
 0x24c   : > { %13341 = vmatmul.mubr.msk.f32.gmra.mxu0 %vm20039_vm1, %v5443_v28  ;;  %v16569_v16 = vadd.f32 %v13042_v62, %v2640_v13 }
 0x24d   : > { %13343 = vmatprep.mubr.msk.f32.mxu0 %vm20039_vm1, %v15856_v17  ;;  %v12995_v52 = vpop.f32.mrf.mxu1  ;;  %v16573_v50 = vpop.f32.mrf.mxu0 }
 0x24e   : > { %13294 = vmatmul.mubr.msk.f32.gmra.mxu1 %vm20039_vm1, %v20535_v8  ;;  %v2650_v51 = vadd.f32 %v12995_v52, %v16307_v7 }
 0x24f   : > { %13296 = vmatprep.mubr.msk.f32.mxu1 %vm20039_vm1, %v15783_v59  ;;  %v16583_v13 = vpop.f32.mrf.mxu1 }
 0x250   : > { %v13045_v28 = vpop.f32.mrf.mxu0  ;;  %13344 = vmatmul.mubr.msk.f32.gmra.mxu0 %vm20039_vm1, %v5445_v57 }
 0x251   : > { %v16586_v17 = vadd.f32 %v13045_v28, %v2650_v51  ;;  %13346 = vmatprep.mubr.msk.f32.mxu0 %vm20039_vm1, %v16325_v38  ;;  %v12998_v62 = vpop.f32.mrf.mxu1 }
 0x252   : > { %v16590_v8 = vpop.f32.mrf.mxu0  ;;  %13297 = vmatmul.mubr.msk.f32.gmra.mxu1 %vm20039_vm1, %v20403_v32  ;;  %v2660_v7 = vadd.f32 %v12998_v62, %v16335_v11 }
 0x253   : > { %13299 = vmatprep.mubr.f32.mxu1 %v20485_v3  ;;  %v16599_v52 = vpop.f32.mrf.mxu1 }
 0x254   : > { %v13048_v51 = vpop.f32.mrf.mxu0  ;;  %13347 = vmatmul.mubr.msk.f32.gmra.mxu0 %vm20039_vm1, %v5447_v36  ;;  %vm20567_vm1 = vcmask 1043456  }
 0x255   : > { %v16602_v38 = vadd.f32 %v13048_v51, %v2660_v7  ;;  %13349 = vmatprep.mubr.f32.mxu0 %v20485_v3  ;;  %v13001_v57 = vpop.f32.mrf.mxu1  ;;  %vm20568_vm4 = vmmov %vm20567_vm1 }
 0x256   : > { %v16605_v28 = vpop.f32.mrf.mxu0  ;;  %13300 = vmatmul.mubr.f32.gmra.mxu1 %v20485_v3  ;;  %v2670_v11 = vadd.f32 %v13001_v57, %v16348_v46  ;;  %vm20570_vm3 = vmmov %vm20567_vm1 }
 0x257   : > { %13354 = vmatprep.mubr.f32.mxu1 %v20485_v3  ;;  %v16610_v41 = vpop.f32.mrf.mxu1  ;;  %vm20572_vm12 = vmmov %vm20567_vm1 }
 0x258   : > { %v13051_v62 = vpop.f32.mrf.mxu0  ;;  %13350 = vmatmul.mubr.f32.gmra.mxu0 %v20485_v3 }
 0x259   : > { %v16613_v32 = vadd.f32 %v13051_v62, %v2670_v11  ;;  %13404 = vmatprep.mubr.f32.mxu0 %v20485_v3  ;;  %v13056_v36 = vpop.f32.mrf.mxu1 }
 0x25a   : > { %v16616_v7 = vpop.f32.mrf.mxu0  ;;  %13355 = vmatmul.mubr.f32.vlgmr.msra.gmra.mxu1 %v20485_v3  ;;  %v3611_v51 = vadd.f32 %v13056_v36, %v16366_v10 }
 0x25b   : > { %v16620_v59 = vpop.f32.mrf.mxu1 }
 0x25c   : > { %v13106_v46 = vpop.f32.mrf.mxu0 }
 0x25d   : > { %v16622_v57 = vadd.f32 %v13106_v46, %v3611_v51 }
 0x25e   : > { %v13059_v33 = vpop.f32.mrf.mxu1  ;;  %v16624_v19 = vpop.f32.mrf.mxu0 }
 0x25f   : > { %v3613_v11 = vadd.f32 %v13059_v33, %v16382_v2 }
 0x260   : > { %v16627_v62 = vpop.f32.mrf.mxu1  ;;  %v13109_v35 = vpop.f32.mrf.mxu0 }
 0x261   : > { %v16629_v9 = vadd.f32 %v13109_v35, %v3613_v11 }
 0x262   : > { %v13062_v25 = vpop.f32.mrf.mxu1  ;;  %v16631_v43 = vpop.f32.mrf.mxu0 }
 0x263   : > { %v3615_v10 = vadd.f32 %v13062_v25, %v16398_v26 }
 0x264   : > { %v16634_v36 = vpop.f32.mrf.mxu1  ;;  %v13112_v58 = vpop.f32.mrf.mxu0 }
 0x265   : > { %v16636_v51 = vadd.f32 %v13112_v58, %v3615_v10 }
 0x266   : > { %v13065_v46 = vpop.f32.mrf.mxu1  ;;  %v16638_v0 = vpop.f32.mrf.mxu0 }
 0x267   : > { %20538 = vst [vmem:[#allocation102_spill] sm:$0xff] %v16638_v0  ;;  %v3617_v2 = vadd.f32 %v13065_v46, %v16414_v30 }
 0x268   : > { %v16641_v33 = vpop.f32.mrf.mxu1  ;;  %v13115_v55 = vpop.f32.mrf.mxu0 }
 0x269   : > { %v16643_v35 = vadd.f32 %v13115_v55, %v3617_v2 }
 0x26a   : > { %v13068_v11 = vpop.f32.mrf.mxu1  ;;  %v16645_v39 = vpop.f32.mrf.mxu0 }
 0x26b   : > { %20539 = vst [vmem:[#allocation103_spill] sm:$0xff] %v16645_v39  ;;  %v3619_v25 = vadd.f32 %v13068_v11, %v16430_v31 }
 0x26c   : > { %v16648_v26 = vpop.f32.mrf.mxu1  ;;  %v13118_v56 = vpop.f32.mrf.mxu0 }
 0x26d   : > { %v16650_v58 = vadd.f32 %v13118_v56, %v3619_v25 }
 0x26e   : > { %v13071_v10 = vpop.f32.mrf.mxu1  ;;  %v16652_v47 = vpop.f32.mrf.mxu0 }
 0x26f   : > { %20540 = vst [vmem:[#allocation106_spill] sm:$0xff] %v16652_v47  ;;  %v3621_v30 = vadd.f32 %v13071_v10, %v16446_v45 }
 0x270   : > { %v16655_v46 = vpop.f32.mrf.mxu1  ;;  %v13121_v49 = vpop.f32.mrf.mxu0 }
 0x271   : > { %v16657_v55 = vadd.f32 %v13121_v49, %v3621_v30 }
 0x272   : > { %v13074_v2 = vpop.f32.mrf.mxu1  ;;  %v16659_v63 = vpop.f32.mrf.mxu0 }
 0x273   : > { %20541 = vst [vmem:[#allocation107_spill] sm:$0xff] %v16659_v63  ;;  %v3623_v31 = vadd.f32 %v13074_v2, %v16462_v54 }
 0x274   : > { %v16662_v11 = vpop.f32.mrf.mxu1  ;;  %v13124_v61 = vpop.f32.mrf.mxu0 }
 0x275   : > { %v16664_v56 = vadd.f32 %v13124_v61, %v3623_v31 }
 0x276   : > { %v13077_v25 = vpop.f32.mrf.mxu1  ;;  %v16666_v39 = vpop.f32.mrf.mxu0 }
 0x277   : > { %20542 = vst [vmem:[#allocation110_spill] sm:$0xff] %v16666_v39  ;;  %v3625_v45 = vadd.f32 %v13077_v25, %v16478_v21 }
 0x278   : > { %v16669_v10 = vpop.f32.mrf.mxu1  ;;  %v13127_v47 = vpop.f32.mrf.mxu0 }
 0x279   : > { %20543 = vst [vmem:[#allocation111_spill] sm:$0xff] %v16669_v10  ;;  %v16671_v49 = vadd.f32 %v13127_v47, %v3625_v45 }
 0x27a   : > { %v13080_v30 = vpop.f32.mrf.mxu1  ;;  %v16673_v60 = vpop.f32.mrf.mxu0 }
 0x27b   : > { %20544 = vst [vmem:[#allocation113_spill] sm:$0xff] %v16673_v60  ;;  %v3627_v54 = vadd.f32 %v13080_v30, %v16496_v27 }
 0x27c   : > { %v16676_v2 = vpop.f32.mrf.mxu1  ;;  %v13130_v63 = vpop.f32.mrf.mxu0 }
 0x27d   : > { %20545 = vst [vmem:[#allocation118_spill] sm:$0xff] %v16676_v2  ;;  %v16678_v61 = vadd.f32 %v13130_v63, %v3627_v54 }
 0x27e   : > { %v13083_v31 = vpop.f32.mrf.mxu1  ;;  %v16680_v0 = vpop.f32.mrf.mxu0 }
 0x27f   : > { %20546 = vst [vmem:[#allocation119_spill] sm:$0xff] %v16680_v0  ;;  %v3629_v21 = vadd.f32 %v13083_v31, %v16513_v34 }
 0x280   : > { %v16683_v25 = vpop.f32.mrf.mxu1  ;;  %v13133_v39 = vpop.f32.mrf.mxu0 }
 0x281   : > { %20547 = vst [vmem:[#allocation121_spill] sm:$0xff] %v16683_v25  ;;  %v16685_v47 = vadd.f32 %v13133_v39, %v3629_v21 }
 0x282   : > { %v13086_v45 = vpop.f32.mrf.mxu1  ;;  %v16687_v10 = vpop.f32.mrf.mxu0 }
 0x283   : > { %20548 = vst [vmem:[#allocation91_spill] sm:$0xff] %v16687_v10  ;;  %v3631_v27 = vadd.f32 %v13086_v45, %v16535_v42 }
 0x284   : > { %v16690_v30 = vpop.f32.mrf.mxu1  ;;  %v13136_v60 = vpop.f32.mrf.mxu0 }
 0x285   : > { %20549 = vst [vmem:[#allocation66_spill] sm:$0xff] %v16690_v30  ;;  %v16692_v63 = vadd.f32 %v13136_v60, %v3631_v27 }
 0x286   : > { %v13089_v54 = vpop.f32.mrf.mxu1  ;;  %v16694_v2 = vpop.f32.mrf.mxu0 }
 0x287   : > { %20550 = vst [vmem:[#allocation71_spill] sm:$0xff] %v16694_v2  ;;  %v3633_v34 = vadd.f32 %v13089_v54, %v16552_v29 }
 0x288   : > { %v16697_v31 = vpop.f32.mrf.mxu1  ;;  %v13139_v0 = vpop.f32.mrf.mxu0 }
 0x289   : > { %20551 = vst [vmem:[#allocation72_spill] sm:$0xff] %v16697_v31  ;;  %v16699_v39 = vadd.f32 %v13139_v0, %v3633_v34 }
 0x28a   : > { %v13092_v21 = vpop.f32.mrf.mxu1  ;;  %v16701_v25 = vpop.f32.mrf.mxu0 }
 0x28b   : > { %20552 = vst [vmem:[#allocation75_spill] sm:$0xff] %v16701_v25  ;;  %v3635_v42 = vadd.f32 %v13092_v21, %v16569_v16 }
 0x28c   : > { %v16704_v45 = vpop.f32.mrf.mxu1  ;;  %v13142_v10 = vpop.f32.mrf.mxu0 }
 0x28d   : > { %20553 = vst [vmem:[#allocation76_spill] sm:$0xff] %v16704_v45  ;;  %v16706_v60 = vadd.f32 %v13142_v10, %v3635_v42 }
 0x28e   : > { %v13095_v27 = vpop.f32.mrf.mxu1  ;;  %v16708_v30 = vpop.f32.mrf.mxu0 }
 0x28f   : > { %20554 = vst [vmem:[#allocation80_spill] sm:$0xff] %v16708_v30  ;;  %v3637_v29 = vadd.f32 %v13095_v27, %v16586_v17 }
 0x290   : > { %v16711_v54 = vpop.f32.mrf.mxu1  ;;  %v13145_v2 = vpop.f32.mrf.mxu0 }
 0x291   : > { %20555 = vst [vmem:[#allocation81_spill] sm:$0xff] %v16711_v54  ;;  %v16713_v0 = vadd.f32 %v13145_v2, %v3637_v29 }
 0x292   : > { %v13098_v34 = vpop.f32.mrf.mxu1  ;;  %v16715_v31 = vpop.f32.mrf.mxu0 }
 0x293   : > { %20556 = vst [vmem:[#allocation126_spill] sm:$0xff] %v16715_v31  ;;  %v3639_v16 = vadd.f32 %v13098_v34, %v16602_v38 }
 0x294   : > { %v16718_v21 = vpop.f32.mrf.mxu1  ;;  %v13148_v45 = vpop.f32.mrf.mxu0 }
 0x295   : > { %20557 = vst [vmem:[#allocation127_spill] sm:$0xff] %v16718_v21  ;;  %v16720_v10 = vadd.f32 %v13148_v45, %v3639_v16 }
 0x296   : > { %v13101_v42 = vpop.f32.mrf.mxu1  ;;  %v16722_v25 = vpop.f32.mrf.mxu0 }
 0x297   : > { %20558 = vst [vmem:[#allocation128_spill] sm:$0xff] %v16722_v25  ;;  %v3641_v17 = vadd.f32 %v13101_v42, %v16613_v32 }
 0x298   : > { %v16725_v27 = vpop.f32.mrf.mxu1  ;;  %v13151_v30 = vpop.f32.mrf.mxu0 }
 0x299   : > { %20559 = vst [vmem:[#allocation129_spill] sm:$0xff] %v16725_v27  ;;  %v16727_v2 = vadd.f32 %v13151_v30, %v3641_v17 }
 0x29a   : > { %v16729_v29 = vpop.f32.mrf.mxu0  ;;  %v16731_v31 = vpop.f32.mrf.mxu1 }
 0x29b   : > { %20560 = vst [vmem:[#allocation130_spill] sm:$0xff] %v16727_v2  ;;  %20561 = vst [vmem:[#allocation131_spill] sm:$0xff] %v16729_v29 }
 0x29c   : > { %v16733_v38 = vpop.f32.mrf.mxu1  ;;  %v16735_v34 = vpop.f32.mrf.mxu0 }
 0x29e   : > { %v13159_v45 = vpop.f32.mrf.mxu1  ;;  %v16737_v16 = vpop.f32.mrf.mxu0 }
 0x29f   : > { %20562 = vst [vmem:[#allocation132_spill] sm:$0xff] %v16737_v16  ;;  %v4421_v25 = vadd.f32 %v13159_v45, %v16629_v9  ;;  %v6068_v16 = vld [vmem:[%s19769_s7] sm:$0xf] }
 0x2a0   : > { %v16740_v21 = vpop.f32.mrf.mxu1  ;;  %v13209_v32 = vpop.f32.mrf.mxu0  ;;  %13402 = vmatprep.subr.msk.mxu0 %vm20567_vm1, %v6068_v16 }
 0x2a1   : > { %v16742_v42 = vadd.f32 %v13209_v32, %v4421_v25  ;;  %13403 = vmatpush3.msk.msra.mxu0 %vm20568_vm4, %v6068_v16  ;;  %vm20587_vm4 = vmmov %vm20567_vm1 }
 0x2a2   : > { %v13162_v30 = vpop.f32.mrf.mxu1  ;;  %v16744_v17 = vpop.f32.mrf.mxu0  ;;  %13405 = vmatmul.mubr.f32.vlgmr.msra.gmra.mxu0 %v20485_v3 }
 0x2a3   : > { %20563 = vst [vmem:[#allocation133_spill] sm:$0xff] %v16742_v42  ;;  %20564 = vst [vmem:[#allocation134_spill] sm:$0xff] %v16744_v17  ;;  %v4423_v2 = vadd.f32 %v13162_v30, %v16636_v51  ;;  %v6070_v51 = vld [vmem:[%s19769_s7 + $0x8] sm:$0xf] }
 0x2a4   : > { %v16747_v29 = vpop.f32.mrf.mxu1  ;;  %v13212_v27 = vpop.f32.mrf.mxu0  ;;  %13452 = vmatprep.subr.msk.mxu1 %vm20570_vm3, %v6070_v51  ;;  %vm20588_vm3 = vmmov %vm20567_vm1 }
 0x2a5   : > { %v16749_v54 = vadd.f32 %v13212_v27, %v4423_v2  ;;  %13453 = vmatpush3.msk.msra.mxu1 %vm20572_vm12, %v6070_v51  ;;  %vm20652_vm12 = vcmask 31744  }
 0x2a6   : > { %v13165_v9 = vpop.f32.mrf.mxu1  ;;  %v16754_v45 = vpop.f32.mrf.mxu0 }
 0x2a7   : > { %20565 = vst [vmem:[#allocation135_spill] sm:$0xff] %v16749_v54  ;;  %20566 = vst [vmem:[#allocation136_spill] sm:$0xff] %v16754_v45  ;;  %v4425_v25 = vadd.f32 %v13165_v9, %v16643_v35 }
 0x2a8   : > { %v16762_v32 = vpop.f32.mrf.mxu1  ;;  %v13215_v27 = vpop.f32.mrf.mxu0 }
 0x2a9   : > { %20569 = vst [vmem:[#allocation137_spill] sm:$0xff] %v16762_v32  ;;  %v16766_v2 = vadd.f32 %v13215_v27, %v4425_v25 }
 0x2aa   : > { %v13168_v30 = vpop.f32.mrf.mxu1  ;;  %v16769_v54 = vpop.f32.mrf.mxu0 }
 0x2ab   : > { %20571 = vst [vmem:[#allocation138_spill] sm:$0xff] %v16766_v2  ;;  %v4427_v35 = vadd.f32 %v13168_v30, %v16650_v58 }
 0x2ac   : > { %v16772_v16 = vpop.f32.mrf.mxu1  ;;  %v13218_v9 = vpop.f32.mrf.mxu0 }
 0x2ad   : > { %20573 = vst [vmem:[#allocation139_spill] sm:$0xff] %v16772_v16  ;;  %v16774_v45 = vadd.f32 %v13218_v9, %v4427_v35 }
 0x2ae   : > { %v13171_v32 = vpop.f32.mrf.mxu1  ;;  %v16776_v42 = vpop.f32.mrf.mxu0 }
 0x2af   : > { %20574 = vst [vmem:[#allocation140_spill] sm:$0xff] %v16774_v45  ;;  %v4429_v3 = vadd.f32 %v13171_v32, %v16657_v55 }
 0x2b0   : > { %v16779_v17 = vpop.f32.mrf.mxu1  ;;  %v13221_v25 = vpop.f32.mrf.mxu0 }
 0x2b1   : > { %20575 = vst [vmem:[#allocation141_spill] sm:$0xff] %v16779_v17  ;;  %v16781_v27 = vadd.f32 %v13221_v25, %v4429_v3 }
 0x2b2   : > { %v13174_v51 = vpop.f32.mrf.mxu1  ;;  %v16783_v2 = vpop.f32.mrf.mxu0 }
 0x2b3   : > { %20576 = vst [vmem:[#allocation142_spill] sm:$0xff] %v16781_v27  ;;  %20577 = vst [vmem:[#allocation143_spill] sm:$0xff] %v16783_v2  ;;  %v4431_v58 = vadd.f32 %v13174_v51, %v16664_v56 }
 0x2b4   : > { %v16786_v30 = vpop.f32.mrf.mxu1  ;;  %v13224_v16 = vpop.f32.mrf.mxu0 }
 0x2b5   : > { %v16788_v35 = vadd.f32 %v13224_v16, %v4431_v58 }
 0x2b6   : > { %v13177_v9 = vpop.f32.mrf.mxu1  ;;  %v16790_v45 = vpop.f32.mrf.mxu0 }
 0x2b7   : > { %20578 = vst [vmem:[#allocation144_spill] sm:$0xff] %v16788_v35  ;;  %20579 = vst [vmem:[#allocation145_spill] sm:$0xff] %v16790_v45  ;;  %v4433_v55 = vadd.f32 %v13177_v9, %v16671_v49 }
 0x2b8   : > { %v16793_v32 = vpop.f32.mrf.mxu1  ;;  %v13227_v17 = vpop.f32.mrf.mxu0 }
 0x2b9   : > { %v16795_v3 = vadd.f32 %v13227_v17, %v4433_v55 }
 0x2ba   : > { %v13180_v25 = vpop.f32.mrf.mxu1  ;;  %v16797_v27 = vpop.f32.mrf.mxu0 }
 0x2bb   : > { %20580 = vst [vmem:[#allocation146_spill] sm:$0xff] %v16795_v3  ;;  %20581 = vst [vmem:[#allocation147_spill] sm:$0xff] %v16797_v27  ;;  %v4435_v56 = vadd.f32 %v13180_v25, %v16678_v61 }
 0x2bc   : > { %v16800_v51 = vpop.f32.mrf.mxu1  ;;  %v13230_v2 = vpop.f32.mrf.mxu0 }
 0x2bd   : > { %v16802_v16 = vadd.f32 %v13230_v2, %v4435_v56  ;;  %v6071_v2 = vld [vmem:[%s19769_s7 + $0xc] sm:$0xf] }
 0x2be   : > { %v13183_v58 = vpop.f32.mrf.mxu1  ;;  %v16804_v35 = vpop.f32.mrf.mxu0  ;;  %13502 = vmatprep.subr.msk.mxu0 %vm20567_vm1, %v6071_v2 }
 0x2bf   : > { %20582 = vst [vmem:[#allocation148_spill] sm:$0xff] %v16802_v16  ;;  %20583 = vst [vmem:[#allocation149_spill] sm:$0xff] %v16804_v35  ;;  %v4437_v49 = vadd.f32 %v13183_v58, %v16685_v47  ;;  %v6072_v47 = vld [vmem:[%s19769_s7 + $0x10] sm:$0xf]  ;;  %13503 = vmatpush3.msk.msra.mxu0 %vm20587_vm4, %v6071_v2 }
 0x2c0   : > { %v16807_v9 = vpop.f32.mrf.mxu1  ;;  %v13233_v45 = vpop.f32.mrf.mxu0  ;;  %13552 = vmatprep.subr.msk.mxu1 %vm20588_vm3, %v6072_v47  ;;  %vm20653_vm4 = vmmov %vm20652_vm12 }
 0x2c1   : > { %v16809_v17 = vadd.f32 %v13233_v45, %v4437_v49  ;;  %vm20656_vm3 = vmmov %vm20653_vm4 }
 0x2c2   : > { %v13186_v55 = vpop.f32.mrf.mxu1  ;;  %v16811_v3 = vpop.f32.mrf.mxu0 }
 0x2c3   : > { %20584 = vst [vmem:[#allocation150_spill] sm:$0xff] %v16809_v17  ;;  %20585 = vst [vmem:[#allocation151_spill] sm:$0xff] %v16811_v3  ;;  %v4439_v61 = vadd.f32 %v13186_v55, %v16692_v63 }
 0x2c4   : > { %v16817_v25 = vpop.f32.mrf.mxu1  ;;  %v13236_v56 = vpop.f32.mrf.mxu0 }
 0x2c5   : > { %v16823_v45 = vadd.f32 %v13236_v56, %v4439_v61 }
 0x2c6   : > { %v13189_v63 = vpop.f32.mrf.mxu1  ;;  %v16827_v58 = vpop.f32.mrf.mxu0 }
 0x2c7   : > { %20586 = vst [vmem:[#allocation152_spill] sm:$0xff] %v16823_v45  ;;  %20589 = vst [vmem:[#allocation153_spill] sm:$0xff] %v16827_v58  ;;  %v4441_v49 = vadd.f32 %v13189_v63, %v16699_v39  ;;  %v20593_v45 = vld [vmem:[#allocation68_spill] sm:$0xff] }
 0x2c8   : > { %v16830_v55 = vpop.f32.mrf.mxu1  ;;  %v13239_v17 = vpop.f32.mrf.mxu0  ;;  %v2515_v47 = vadd.f32 %v16362_v23, %v20593_v45  ;;  %v20596_v23 = vld [vmem:[#allocation85_spill] sm:$0xff] }
 0x2c9   : > { %v16832_v16 = vadd.f32 %v13239_v17, %v4441_v49  ;;  %v2605_v45 = vadd.f32 %v16510_v18, %v20596_v23  ;;  %v3612_v18 = vadd.f32 %v16627_v62, %v16389_v5 }
 0x2ca   : > { %v13192_v3 = vpop.f32.mrf.mxu1  ;;  %v16834_v35 = vpop.f32.mrf.mxu0  ;;  %v3158_v63 = vadd.f32 %v16370_v37, %v2515_v47  ;;  %v20598_v47 = vld [vmem:[#allocation89_spill] sm:$0xff] }
 0x2cb   : > { %20590 = vst [vmem:[#allocation154_spill] sm:$0xff] %v16832_v16  ;;  %20591 = vst [vmem:[#allocation155_spill] sm:$0xff] %v16834_v35  ;;  %v4443_v61 = vadd.f32 %v13192_v3, %v16706_v60  ;;  %v3176_v5 = vadd.f32 %v16520_v20, %v2605_v45 }
 0x2cc   : > { %v16837_v56 = vpop.f32.mrf.mxu1  ;;  %v13242_v2 = vpop.f32.mrf.mxu0  ;;  %v3610_v60 = vadd.f32 %v16620_v59, %v3158_v63  ;;  %v20600_v59 = vld [vmem:[#allocation94_spill] sm:$0xff] }
 0x2cd   : > { %20592 = vst [vmem:[#allocation156_spill] sm:$0xff] %v16837_v56  ;;  %v16841_v27 = vadd.f32 %v13242_v2, %v4443_v61  ;;  %v20597_v2 = vld [vmem:[#allocation86_spill] sm:$0xff] }
 0x2ce   : > { %v13195_v58 = vpop.f32.mrf.mxu1  ;;  %v16843_v39 = vpop.f32.mrf.mxu0  ;;  %v2615_v37 = vadd.f32 %v16532_v53, %v20597_v2  ;;  %v4419_v53 = vadd.f32 %v16731_v31, %v16622_v57  ;;  %v3614_v57 = vadd.f32 %v16634_v36, %v16405_v12  ;;  %v3618_v12 = vadd.f32 %v16648_v26, %v16437_v44 }
 0x2cf   : > { %20594 = vst [vmem:[#allocation68_spill] sm:$0xff] %v16841_v27  ;;  %v4445_v17 = vadd.f32 %v13195_v58, %v16713_v0  ;;  %v2625_v0 = vadd.f32 %v16549_v24, %v20598_v47  ;;  %v20599_v58 = vld [vmem:[#allocation90_spill] sm:$0xff]  ;;  %v20601_v24 = vld [vmem:[#allocation95_spill] sm:$0xff] }
 0x2d0   : > { %v16847_v49 = vpop.f32.mrf.mxu1  ;;  %v13245_v16 = vpop.f32.mrf.mxu0  ;;  %v2635_v27 = vadd.f32 %v16566_v40, %v20599_v58  ;;  %v20602_v40 = vld [vmem:[#allocation99_spill] sm:$0xff]  ;;  %v3178_v31 = vadd.f32 %v16539_v1, %v2615_v37  ;;  %v4871_v20 = vadd.f32 %v16735_v34, %v4419_v53  ;;  %v20605_v34 = vld [vmem:[#allocation100_spill] sm:$0xff]  ;;  %v20608_v37 = vld [vmem:[#allocation121_spill] sm:$0xff] }
 0x2d1   : > { %v16850_v3 = vadd.f32 %v13245_v16, %v4445_v17  ;;  %v2645_v16 = vadd.f32 %v16583_v13, %v20600_v59  ;;  %v2665_v23 = vadd.f32 %v16610_v41, %v20602_v40  ;;  %v20610_v59 = vld [vmem:[#allocation103_spill] sm:$0xff]  ;;  %v20613_v40 = vld [vmem:[#allocation110_spill] sm:$0xff] }
 0x2d2   : > { %v13198_v35 = vpop.f32.mrf.mxu1  ;;  %v16852_v56 = vpop.f32.mrf.mxu0  ;;  %v3182_v41 = vadd.f32 %v16573_v50, %v2635_v27  ;;  %v3620_v50 = vadd.f32 %v16655_v46, %v16453_v48  ;;  %v3628_v48 = vadd.f32 %v20608_v37, %v3176_v5  ;;  %v20609_v46 = vld [vmem:[#allocation66_spill] sm:$0xff] }
 0x2d3   : > { %20595 = vst [vmem:[#allocation157_spill] sm:$0xff] %v16850_v3  ;;  %v4447_v61 = vadd.f32 %v13198_v35, %v16720_v10  ;;  %v3966_v3 = vadd.f32 %v16624_v19, %v3610_v60  ;;  %v2655_v35 = vadd.f32 %v16599_v52, %v20601_v24  ;;  %v3174_v19 = vadd.f32 %v16500_v14, %v16494_v22  ;;  %v20612_v24 = vld [vmem:[#allocation107_spill] sm:$0xff] }
 0x2d4   : > { %v16865_v63 = vpop.f32.mrf.mxu1  ;;  %v13248_v17 = vpop.f32.mrf.mxu0  ;;  %v3180_v52 = vadd.f32 %v16556_v6, %v2625_v0  ;;  %v3184_v60 = vadd.f32 %v16590_v8, %v2645_v16  ;;  %v3968_v22 = vadd.f32 %v16631_v43, %v3612_v18  ;;  %v3616_v14 = vadd.f32 %v16641_v33, %v16421_v15  ;;  %v20604_v33 = vld [vmem:[#allocation132_spill] sm:$0xff] }
 0x2d5   : > { %v16872_v10 = vadd.f32 %v13248_v17, %v4447_v61  ;;  %v4418_v62 = vadd.f32 %v16733_v38, %v3966_v3  ;;  %v3186_v6 = vadd.f32 %v16605_v28, %v2655_v35  ;;  %v3188_v1 = vadd.f32 %v16616_v7, %v2665_v23  ;;  %v20603_v38 = vld [vmem:[#allocation102_spill] sm:$0xff]  ;;  %v20606_v28 = vld [vmem:[#allocation111_spill] sm:$0xff] }
 0x2d6   : > { %v16878_v13 = vpop.f32.mrf.mxu1  ;;  %v16880_v2 = vpop.f32.mrf.mxu0  ;;  %v3622_v8 = vadd.f32 %v16662_v11, %v16469_v4  ;;  %v3970_v15 = vadd.f32 %v20603_v38, %v3614_v57  ;;  %v4420_v44 = vadd.f32 %v16740_v21, %v3968_v22  ;;  %v3624_v3 = vadd.f32 %v20606_v28, %v20605_v34  ;;  %v20607_v7 = vld [vmem:[#allocation118_spill] sm:$0xff]  ;;  %v20619_v34 = vld [vmem:[#allocation91_spill] sm:$0xff] }
 0x2d7   : > { %v4870_v27 = vadd.f32 %v20604_v33, %v4418_v62  ;;  %v3626_v45 = vadd.f32 %v20607_v7, %v3174_v19  ;;  %v3630_v0 = vadd.f32 %v20609_v46, %v3178_v31  ;;  %v16921_v11 = vld [vmem:[%s19768_s6] ss:$0 sm:$0xff]  ;;  %v3972_v16 = vadd.f32 %v20610_v59, %v3616_v14  ;;  %v20614_v19 = vld [vmem:[#allocation72_spill] sm:$0xff]  ;;  %v20616_v14 = vld [vmem:[#allocation133_spill] sm:$0xff] }
 0x2d8   : > { %v16892_v61 = vpop.f32.mrf.mxu1  ;;  %v16894_v47 = vpop.f32.mrf.mxu0  ;;  %v20611_v21 = vld [vmem:[#allocation106_spill] sm:$0xff]  ;;  %v3976_v35 = vadd.f32 %v20612_v24, %v3620_v50  ;;  %v3978_v23 = vadd.f32 %v20613_v40, %v3622_v8  ;;  %v3632_v5 = vadd.f32 %v20614_v19, %v3180_v52  ;;  %v4422_v57 = vadd.f32 %v16747_v29, %v3970_v15  ;;  %v20617_v33 = vld [vmem:[#allocation113_spill] sm:$0xff]  ;;  %v20620_v28 = vld [vmem:[#allocation71_spill] sm:$0xff] }
 0x2d9   : > { %v3974_v17 = vadd.f32 %v20611_v21, %v3618_v12  ;;  %v20615_v22 = vld [vmem:[#allocation134_spill] sm:$0xff]  ;;  %v3984_v8 = vadd.f32 %v20619_v34, %v3628_v48  ;;  %v16938_v52 = vadd.f32 %v20620_v28, %v3630_v0  ;;  %v20624_v48 = vld [vmem:[#allocation137_spill] sm:$0xff]  ;;  %v20625_v19 = vld [vmem:[#allocation135_spill] sm:$0xff] }
 0x2da   : > { %v16908_v36 = vpop.f32.mrf.mxu0  ;;  %v13256_v43 = vpop.f32.mrf.mxu1  ;;  %v20629_v34 = vld [vmem:[#allocation80_spill] sm:$0xff] }
 0x2db   : > { %v5323_v26 = vadd.f32 %v13256_v43, %v4871_v20  ;;  %v4872_v20 = vadd.f32 %v20615_v22, %v4420_v44 }
 0x2dc   : > { %v5163_v4 = vpop.f32.mrf.mxu1  ;;  %v13306_v58 = vpop.f32.mrf.mxu0 }
 0x2dd   : > { %v5322_v18 = vadd.f32 %v5163_v4, %v4870_v27  ;;  %v5775_v53 = vadd.f32 %v13306_v58, %v5323_v26  ;;  %v3980_v27 = vadd.f32 %v20617_v33, %v3624_v3  ;;  %v20618_v26 = vld [vmem:[#allocation119_spill] sm:$0xff]  ;;  %v20622_v3 = vld [vmem:[#allocation76_spill] sm:$0xff] }
 0x2de   : > { %v13259_v62 = vpop.f32.mrf.mxu1  ;;  %v5615_v31 = vpop.f32.mrf.mxu0  ;;  %v3982_v50 = vadd.f32 %v20618_v26, %v3626_v45  ;;  %v20621_v4 = vld [vmem:[#allocation75_spill] sm:$0xff]  ;;  %v3634_v59 = vadd.f32 %v20622_v3, %v3182_v41  ;;  %v20623_v45 = vld [vmem:[#allocation136_spill] sm:$0xff] }
 0x2df   : > { %v16931_v43 = vadd.f32 %v16921_v11, %v5775_v53  ;;  %v5325_v38 = vadd.f32 %v13259_v62, %v20616_v14  ;;  %v5774_v12 = vadd.f32 %v5615_v31, %v5322_v18  ;;  %v16945_v58 = vadd.f32 %v20621_v4, %v3632_v5  ;;  %v20626_v31 = vld [vmem:[#allocation81_spill] sm:$0xff]  ;;  %v20627_v5 = vld [vmem:[#allocation127_spill] sm:$0xff] }
 0x2e0   : > { %v5173_v29 = vpop.f32.mrf.mxu1  ;;  %v13309_v15 = vpop.f32.mrf.mxu0  ;;  %v4874_v21 = vadd.f32 %v20623_v45, %v4422_v57  ;;  %v4424_v18 = vadd.f32 %v20624_v48, %v3972_v16  ;;  %v3636_v22 = vadd.f32 %v20626_v31, %v3184_v60  ;;  %v20628_v14 = vld [vmem:[#allocation129_spill] sm:$0xff]  ;;  %v16960_v28 = vadd.f32 %v20629_v34, %v3634_v59  ;;  %v20632_v45 = vld [vmem:[#allocation126_spill] sm:$0xff]  ;;  %v20633_v59 = vld [vmem:[#allocation128_spill] sm:$0xff] }
 0x2e1   : > { %v11556_v7 = vmul.f32 -1.442695, %v16931_v43  ;;  %v16942_v44 = vadd.f32 %v16921_v11, %v5774_v12  ;;  %v5324_v37 = vadd.f32 %v5173_v29, %v4872_v20  ;;  %v5777_v46 = vadd.f32 %v13309_v15, %v5325_v38  ;;  %v20630_v15 = vld [vmem:[#allocation139_spill] sm:$0xff] }
 0x2e2   : > { %v13262_v0 = vpop.f32.mrf.mxu1  ;;  %v5625_v53 = vpop.f32.mrf.mxu0  ;;  %v3638_v20 = vadd.f32 %v20627_v5, %v3186_v6  ;;  %v3640_v41 = vadd.f32 %v20628_v14, %v3188_v1  ;;  %v4876_v29 = vadd.f32 %v16769_v54, %v4424_v18  ;;  %v20634_v54 = vld [vmem:[#allocation131_spill] sm:$0xff]  ;;  %v20635_v5 = vld [vmem:[#allocation141_spill] sm:$0xff]  ;;  %v4434_v34 = vadd.f32 %v16800_v51, %v3982_v50  ;;  %v20639_v50 = vld [vmem:[#allocation142_spill] sm:$0xff] }
 0x2e3   : > { %14091 = vpow2.f32 %v11556_v7  ;;  %v11555_v24 = vmul.f32 -1.442695, %v16942_v44  ;;  %v16952_v40 = vadd.f32 %v16921_v11, %v5777_v46  ;;  %v5327_v62 = vadd.f32 %v13262_v0, %v20625_v19  ;;  %v20631_v46 = vld [vmem:[#allocation138_spill] sm:$0xff] }
 0x2e4   : > { %v5776_v38 = vadd.f32 %v5625_v53, %v5324_v37  ;;  %v5183_v57 = vpop.f32.mrf.mxu1  ;;  %v13312_v12 = vpop.f32.mrf.mxu0  ;;  %v4426_v7 = vadd.f32 %v20630_v15, %v3974_v17  ;;  %v16975_v48 = vadd.f32 %v20633_v59, %v3638_v20  ;;  %v16978_v17 = vadd.f32 %v20634_v54, %v3640_v41  ;;  %v20640_v54 = vld [vmem:[#allocation147_spill] sm:$0xff] }
 0x2e5   : > { %14093 = vpow2.f32 %v11555_v24  ;;  %v11558_v16 = vmul.f32 -1.442695, %v16952_v40  ;;  %v5326_v33 = vadd.f32 %v5183_v57, %v4874_v21  ;;  %v5779_v26 = vadd.f32 %v13312_v12, %v5327_v62 }
 0x2e6   : > { %v16965_v60 = vadd.f32 %v16921_v11, %v5776_v38  ;;  %v13265_v6 = vpop.f32.mrf.mxu1  ;;  %v5635_v1 = vpop.f32.mrf.mxu0  ;;  %v16972_v21 = vadd.f32 %v20632_v45, %v3636_v22  ;;  %v4878_v22 = vadd.f32 %v16776_v42, %v4426_v7  ;;  %v4428_v14 = vadd.f32 %v20635_v5, %v3976_v35 }
 0x2e7   : > { %14095 = vpow2.f32 %v11558_v16  ;;  %v16968_v37 = vadd.f32 %v16921_v11, %v5779_v26  ;;  %v5329_v4 = vadd.f32 %v13265_v6, %v20631_v46  ;;  %v5778_v3 = vadd.f32 %v5635_v1, %v5326_v33  ;;  %v20636_v16 = vld [vmem:[#allocation140_spill] sm:$0xff]  ;;  %v20637_v6 = vld [vmem:[#allocation143_spill] sm:$0xff]  ;;  %v20638_v46 = vld [vmem:[#allocation145_spill] sm:$0xff] }
 0x2e8   : > { %v11557_v18 = vmul.f32 -1.442695, %v16965_v60  ;;  %v5193_v0 = vpop.f32.mrf.mxu1  ;;  %v13315_v53 = vpop.f32.mrf.mxu0  ;;  %v4430_v20 = vadd.f32 %v16786_v30, %v3978_v23  ;;  %v4432_v26 = vadd.f32 %v16793_v32, %v3980_v27  ;;  %v4436_v42 = vadd.f32 %v16807_v9, %v3984_v8 }
 0x2e9   : > { %v11560_v24 = vmul.f32 -1.442695, %v16968_v37  ;;  %v16983_v19 = vadd.f32 %v16921_v11, %v5778_v3  ;;  %v5328_v62 = vadd.f32 %v5193_v0, %v4876_v29  ;;  %v5781_v31 = vadd.f32 %v13315_v53, %v5329_v4  ;;  %v20641_v0 = vld [vmem:[#allocation149_spill] sm:$0xff] }
 0x2ea   : > { %14097 = vpow2.f32 %v11557_v18  ;;  %v13268_v41 = vpop.f32.mrf.mxu1  ;;  %v5645_v38 = vpop.f32.mrf.mxu0  ;;  %v4880_v1 = vadd.f32 %v20637_v6, %v4428_v14  ;;  %v4882_v4 = vadd.f32 %v20638_v46, %v4430_v20  ;;  %v4438_v3 = vadd.f32 %v16817_v25, %v16938_v52 }
 0x2eb   : > { %14099 = vpow2.f32 %v11560_v24  ;;  %v11559_v57 = vmul.f32 -1.442695, %v16983_v19  ;;  %v16990_v12 = vadd.f32 %v16921_v11, %v5781_v31  ;;  %v5331_v33 = vadd.f32 %v13268_v41, %v20636_v16  ;;  %v20642_v24 = vld [vmem:[#allocation151_spill] sm:$0xff] }
 0x2ec   : > { %v5780_v35 = vadd.f32 %v5645_v38, %v5328_v62  ;;  %v5203_v29 = vpop.f32.mrf.mxu1  ;;  %v13318_v30 = vpop.f32.mrf.mxu0  ;;  %v4884_v18 = vadd.f32 %v20640_v54, %v4432_v26  ;;  %v17010_v53 = vadd.f32 %v20641_v0, %v4434_v34  ;;  %v17013_v25 = vadd.f32 %v20642_v24, %v4436_v42  ;;  %v20643_v38 = vld [vmem:[#allocation153_spill] sm:$0xff]  ;;  %v20646_v54 = vld [vmem:[#allocation155_spill] sm:$0xff] }
 0x2ed   : > { %14101 = vpow2.f32 %v11559_v57  ;;  %v11562_v23 = vmul.f32 -1.442695, %v16990_v12  ;;  %v5330_v15 = vadd.f32 %v5203_v29, %v4878_v22  ;;  %v5783_v7 = vadd.f32 %v13318_v30, %v5331_v33  ;;  %v20644_v29 = vld [vmem:[#allocation144_spill] sm:$0xff] }
 0x2ee   : > { %v17002_v32 = vadd.f32 %v16921_v11, %v5780_v35  ;;  %v13271_v51 = vpop.f32.mrf.mxu1  ;;  %v5655_v9 = vpop.f32.mrf.mxu0  ;;  %v17021_v57 = vadd.f32 %v20643_v38, %v4438_v3  ;;  %v4440_v16 = vadd.f32 %v16830_v55, %v16945_v58 }
 0x2ef   : > { %14103 = vpow2.f32 %v11562_v23  ;;  %v17005_v27 = vadd.f32 %v16921_v11, %v5783_v7  ;;  %v5333_v8 = vadd.f32 %v13271_v51, %v20639_v50  ;;  %v5782_v45 = vadd.f32 %v5655_v9, %v5330_v15  ;;  %v20645_v15 = vld [vmem:[#allocation156_spill] sm:$0xff] }
 0x2f0   : > { %v14092_v59 = vpop.eup %14091  ;;  %v11561_v52 = vmul.f32 -1.442695, %v17002_v32  ;;  %v5213_v62 = vpop.f32.mrf.mxu1  ;;  %v4442_v7 = vadd.f32 %v20645_v15, %v16960_v28  ;;  %v4444_v9 = vadd.f32 %v16847_v49, %v16972_v21  ;;  %v17039_v0 = vadd.f32 %v20646_v54, %v4440_v16 }
 0x2f1   : > { %v13321_v31 = vpop.f32.mrf.mxu0  ;;  %v5941_v22 = vadd.f32 1.0, %v14092_v59  ;;  %v11564_v5 = vmul.f32 -1.442695, %v17005_v27  ;;  %v17018_v14 = vadd.f32 %v16921_v11, %v5782_v45  ;;  %v5332_v20 = vadd.f32 %v5213_v62, %v4880_v1 }
 0x2f2   : > { %v14094_v41 = vpop.eup %14093  ;;  %14105 = vpow2.f32 %v11561_v52  ;;  %v5785_v33 = vadd.f32 %v13321_v31, %v5333_v8  ;;  %v13274_v26 = vpop.f32.mrf.mxu1  ;;  %v17046_v49 = vadd.f32 %v16843_v39, %v4442_v7 }
 0x2f3   : > { %v5665_v34 = vpop.f32.mrf.mxu0  ;;  %14107 = vrcp.f32 %v5941_v22  ;;  %v5940_v42 = vadd.f32 1.0, %v14094_v41  ;;  %v11563_v35 = vmul.f32 -1.442695, %v17018_v14  ;;  %v5335_v30 = vadd.f32 %v13274_v26, %v20644_v29 }
 0x2f4   : > { %v14096_v23 = vpop.eup %14095  ;;  %14109 = vpow2.f32 %v11564_v5  ;;  %v17030_v6 = vadd.f32 %v16921_v11, %v5785_v33  ;;  %v5784_v1 = vadd.f32 %v5665_v34, %v5332_v20  ;;  %v5223_v55 = vpop.f32.mrf.mxu1  ;;  %v17053_v26 = vadd.f32 %v16852_v56, %v4444_v9 }
 0x2f5   : > { %v13324_v58 = vpop.f32.mrf.mxu0  ;;  %14111 = vrcp.f32 %v5940_v42  ;;  %v5943_v46 = vadd.f32 1.0, %v14096_v23  ;;  %v5334_v3 = vadd.f32 %v5223_v55, %v4882_v4  ;;  %v20647_v4 = vld [vmem:[#allocation146_spill] sm:$0xff]  ;;  %v4446_v29 = vadd.f32 %v16865_v63, %v16975_v48  ;;  %v20648_v23 = vld [vmem:[#allocation148_spill] sm:$0xff] }
 0x2f6   : > { %v5787_v51 = vadd.f32 %v13324_v58, %v5335_v30  ;;  %14113 = vpow2.f32 %v11563_v35  ;;  %v11566_v50 = vmul.f32 -1.442695, %v17030_v6  ;;  %v17036_v8 = vadd.f32 %v16921_v11, %v5784_v1  ;;  %v13277_v28 = vpop.f32.mrf.mxu1  ;;  %v20649_v63 = vld [vmem:[#allocation130_spill] sm:$0xff] }
 0x2f7   : > { %v5675_v45 = vpop.f32.mrf.mxu0  ;;  %v14098_v59 = vpop.eup %14097  ;;  %v5337_v52 = vadd.f32 %v13277_v28, %v20647_v4  ;;  %v17066_v48 = vadd.f32 %v16878_v13, %v20649_v63  ;;  %v20650_v4 = vld [vmem:[#allocation150_spill] sm:$0xff]  ;;  %v17077_v13 = vadd.f32 %v16880_v2, %v4446_v29 }
 0x2f8   : > { %v17042_v24 = vadd.f32 %v16921_v11, %v5787_v51  ;;  %v5786_v62 = vadd.f32 %v5675_v45, %v5334_v3  ;;  %v14100_v31 = vpop.eup %14099  ;;  %v5942_v21 = vadd.f32 1.0, %v14098_v59  ;;  %14115 = vpow2.f32 %v11566_v50  ;;  %v5233_v5 = vpop.f32.mrf.mxu1 }
 0x2f9   : > { %v11565_v22 = vmul.f32 -1.442695, %v17036_v8  ;;  %v13327_v20 = vpop.f32.mrf.mxu0  ;;  %14117 = vrcp.f32 %v5943_v46  ;;  %v5945_v41 = vadd.f32 1.0, %v14100_v31  ;;  %v5336_v16 = vadd.f32 %v5233_v5, %v4884_v18 }
 0x2fa   : > { %v17050_v38 = vadd.f32 %v16921_v11, %v5786_v62  ;;  %v14102_v33 = vpop.eup %14101  ;;  %14119 = vrcp.f32 %v5942_v21  ;;  %v11568_v39 = vmul.f32 -1.442695, %v17042_v24  ;;  %v5789_v34 = vadd.f32 %v13327_v20, %v5337_v52  ;;  %v13280_v42 = vpop.f32.mrf.mxu1 }
 0x2fb   : > { %v5685_v35 = vpop.f32.mrf.mxu0  ;;  %14121 = vrcp.f32 %v5945_v41  ;;  %v5944_v30 = vadd.f32 1.0, %v14102_v33  ;;  %v5339_v15 = vadd.f32 %v13280_v42, %v20648_v23 }
 0x2fc   : > { %v14104_v7 = vpop.eup %14103  ;;  %14123 = vpow2.f32 %v11565_v22  ;;  %v11567_v18 = vmul.f32 -1.442695, %v17050_v38  ;;  %v17061_v56 = vadd.f32 %v16921_v11, %v5789_v34  ;;  %v5788_v1 = vadd.f32 %v5685_v35, %v5336_v16  ;;  %v5243_v55 = vpop.f32.mrf.mxu1 }
 0x2fd   : > { %v13330_v58 = vpop.f32.mrf.mxu0  ;;  %14125 = vrcp.f32 %v5944_v30  ;;  %v5947_v46 = vadd.f32 1.0, %v14104_v7  ;;  %v5338_v3 = vadd.f32 %v5243_v55, %v17010_v53 }
 0x2fe   : > { %v5791_v51 = vadd.f32 %v13330_v58, %v5339_v15  ;;  %14127 = vpow2.f32 %v11568_v39  ;;  %v11570_v9 = vmul.f32 -1.442695, %v17061_v56  ;;  %v17070_v50 = vadd.f32 %v16921_v11, %v5788_v1  ;;  %v13283_v28 = vpop.f32.mrf.mxu1  ;;  %v20651_v15 = vld [vmem:[#allocation152_spill] sm:$0xff] }
 0x2ff   : > { %v5695_v45 = vpop.f32.mrf.mxu0  ;;  %v14106_v59 = vpop.eup %14105  ;;  %14129 = vrcp.f32 %v5947_v46  ;;  %v5341_v53 = vadd.f32 %v13283_v28, %v20650_v4  ;;  %v17099_v46 = vld [vmem:[%s19769_s7 + $0x14] sm:$0xf] }
 0x300   : > { %v17073_v54 = vadd.f32 %v16921_v11, %v5791_v51  ;;  %v5790_v52 = vadd.f32 %v5695_v45, %v5338_v3  ;;  %v14108_v62 = vpop.eup %14107  ;;  %v5946_v31 = vadd.f32 1.0, %v14106_v59  ;;  %14131 = vpow2.f32 %v11567_v18  ;;  %v5253_v22 = vpop.f32.mrf.mxu1  ;;  %13602 = vmatprep.subr.msk.mxu0 %vm20567_vm1, %v17099_v46  ;;  %vm20661_vm1 = vmmov %vm20656_vm3 }
 0x301   : > { %v11569_v21 = vmul.f32 -1.442695, %v17070_v50  ;;  %v13333_v5 = vpop.f32.mrf.mxu0  ;;  %v14110_v20 = vpop.eup %14109  ;;  %v17081_v41 = vmul.f32 %v14108_v62, %v16931_v43  ;;  %14133 = vpow2.f32 %v11570_v9  ;;  %v5340_v34 = vadd.f32 %v5253_v22, %v17013_v25 }
 0x302   : > { %v11572_v16 = vmul.f32 -1.442695, %v17073_v54  ;;  %v17085_v33 = vadd.f32 %v16921_v11, %v5790_v52  ;;  %v14112_v39 = vpop.eup %14111  ;;  %14135 = vrcp.f32 %v5946_v31  ;;  %v5949_v2 = vadd.f32 1.0, %v14110_v20  ;;  %v13286_v35 = vpop.f32.mrf.mxu1 }
 0x303   : > { %v5793_v42 = vadd.f32 %v13333_v5, %v5341_v53  ;;  %v5705_v29 = vpop.f32.mrf.mxu0  ;;  %v14114_v30 = vpop.eup %14113  ;;  %v17089_v23 = vmul.f32 %v14112_v39, %v16942_v44  ;;  %14137 = vpow2.f32 %v11569_v21  ;;  %v5343_v7 = vadd.f32 %v13286_v35, %v20651_v15  ;;  %v20654_v53 = vld [vmem:[#allocation154_spill] sm:$0xff] }
 0x304   : > { %v11571_v43 = vmul.f32 -1.442695, %v17085_v33  ;;  %14139 = vrcp.f32 %v5949_v2  ;;  %v5948_v18 = vadd.f32 1.0, %v14114_v30  ;;  %v5792_v55 = vadd.f32 %v5705_v29, %v5340_v34  ;;  %v5263_v58 = vpop.f32.mrf.mxu1 }
 0x305   : > { %v17094_v1 = vadd.f32 %v16921_v11, %v5793_v42  ;;  %v13336_v25 = vpop.f32.mrf.mxu0  ;;  %v14116_v44 = vpop.eup %14115  ;;  %v17103_v3 = vadd.f32 %v16892_v61, %v16978_v17  ;;  %14141 = vpow2.f32 %v11572_v16  ;;  %v5342_v51 = vadd.f32 %v5263_v58, %v17021_v57  ;;  %13357 = vmatprep.mubr.msk.f32.mxu1 %vm20652_vm12, %v17089_v23  ;;  %vm20659_vm12 = vmmov %vm20656_vm3 }
 0x306   : > { %v5795_v63 = vadd.f32 %v13336_v25, %v5343_v7  ;;  %v14118_v9 = vpop.eup %14117  ;;  %14143 = vrcp.f32 %v5948_v18  ;;  %v5951_v28 = vadd.f32 1.0, %v14116_v44  ;;  %v17112_v59 = vadd.f32 %v16921_v11, %v5792_v55  ;;  %v13289_v61 = vpop.f32.mrf.mxu1  ;;  %13358 = vmatmul.mubr.msk.f32.gmra.mxu1 %vm20653_vm4, %v17081_v41  ;;  %v20658_v7 = vld [vmem:[#allocation68_spill] sm:$0xff]  ;;  %vm20663_vm4 = vmmov %vm20661_vm1 }
 0x307   : > { %v11574_v45 = vmul.f32 -1.442695, %v17094_v1  ;;  %v5715_v17 = vpop.f32.mrf.mxu0  ;;  %v14120_v57 = vpop.eup %14119  ;;  %14145 = vpow2.f32 %v11571_v43  ;;  %v5345_v52 = vadd.f32 %v13289_v61, %v20654_v53  ;;  %v17122_v21 = vadd.f32 %v16894_v47, %v17066_v48 }
 0x308   : > { %v17117_v4 = vadd.f32 %v16921_v11, %v5795_v63  ;;  %v5794_v62 = vadd.f32 %v5715_v17, %v5342_v51  ;;  %v14122_v31 = vpop.eup %14121  ;;  %v17125_v22 = vmul.f32 %v14120_v57, %v16965_v60  ;;  %14147 = vrcp.f32 %v5951_v28  ;;  %v5273_v20 = vpop.f32.mrf.mxu1 }
 0x309   : > { %v11573_v5 = vmul.f32 -1.442695, %v17112_v59  ;;  %v13339_v16 = vpop.f32.mrf.mxu0  ;;  %v14124_v39 = vpop.eup %14123  ;;  %v17129_v2 = vmul.f32 %v14118_v9, %v16952_v40  ;;  %14149 = vpow2.f32 %v11574_v45  ;;  %v5344_v60 = vadd.f32 %v5273_v20, %v17039_v0 }
 0x30a   : > { %v11576_v34 = vmul.f32 -1.442695, %v17117_v4  ;;  %v17133_v42 = vadd.f32 %v16921_v11, %v5794_v62  ;;  %v14126_v47 = vpop.eup %14125  ;;  %v5950_v48 = vadd.f32 1.0, %v14124_v39  ;;  %v5797_v35 = vadd.f32 %v13339_v16, %v5345_v52  ;;  %13360 = vmatprep.mubr.msk.f32.mxu1 %vm20656_vm3, %v17125_v22  ;;  %v13292_v29 = vpop.f32.mrf.mxu1  ;;  %vm20667_vm3 = vmmov %vm20661_vm1 }
 0x30b   : > { %20655 = vst [vmem:[#allocation85_spill] sm:$0xff] %v17129_v2  ;;  %14151 = vpow2.f32 %v11573_v5  ;;  %v5725_v30 = vpop.f32.mrf.mxu0  ;;  %v14128_v43 = vpop.eup %14127  ;;  %v17139_v40 = vmul.f32 %v14126_v47, %v16983_v19  ;;  %v5347_v18 = vadd.f32 %v13292_v29, %v20658_v7  ;;  %13361 = vmatmul.mubr.msk.f32.gmra.mxu1 %vm20659_vm12, %v17129_v2  ;;  %v17149_v19 = vmul.f32 %v14122_v31, %v16968_v37  ;;  %vm20668_vm12 = vmmov %vm20661_vm1 }
 0x30c   : > { %14153 = vpow2.f32 %v11576_v34  ;;  %v11575_v15 = vmul.f32 -1.442695, %v17133_v42  ;;  %v14130_v55 = vpop.eup %14129  ;;  %v5953_v0 = vadd.f32 1.0, %v14128_v43  ;;  %v17146_v58 = vadd.f32 %v16921_v11, %v5797_v35  ;;  %v5283_v44 = vpop.f32.mrf.mxu1 }
 0x30d   : > { %20657 = vst [vmem:[#allocation86_spill] sm:$0xff] %v17139_v40  ;;  %14155 = vrcp.f32 %v5950_v48  ;;  %v5796_v25 = vadd.f32 %v5725_v30, %v5344_v60  ;;  %v13342_v51 = vpop.f32.mrf.mxu0  ;;  %v14132_v63 = vpop.eup %14131  ;;  %20660 = vst [vmem:[#allocation89_spill] sm:$0xff] %v17149_v19  ;;  %v5346_v9 = vadd.f32 %v5283_v44, %v17046_v49  ;;  %13363 = vmatprep.mubr.msk.f32.mxu1 %vm20661_vm1, %v17139_v40  ;;  %v20662_v49 = vld [vmem:[#allocation157_spill] sm:$0xff] }
 0x30e   : > { %14157 = vpow2.f32 %v11575_v15  ;;  %v5799_v28 = vadd.f32 %v13342_v51, %v5347_v18  ;;  %v14134_v45 = vpop.eup %14133  ;;  %v5952_v61 = vadd.f32 1.0, %v14132_v63  ;;  %v11578_v17 = vmul.f32 -1.442695, %v17146_v58  ;;  %v13295_v53 = vpop.f32.mrf.mxu1 }
 0x30f   : > { %14159 = vrcp.f32 %v5953_v0  ;;  %v17156_v57 = vadd.f32 %v16921_v11, %v5796_v25  ;;  %v5735_v52 = vpop.f32.mrf.mxu0  ;;  %v14136_v62 = vpop.eup %14135  ;;  %v5955_v37 = vadd.f32 1.0, %v14134_v45  ;;  %v5349_v5 = vadd.f32 %v13295_v53, %v20662_v49  ;;  %13364 = vmatmul.mubr.msk.f32.gmra.mxu1 %vm20663_vm4, %v17149_v19  ;;  %vm20671_vm4 = vmmov %vm20661_vm1 }
 0x310   : > { %v17159_v31 = vadd.f32 %v16921_v11, %v5799_v28  ;;  %v5798_v20 = vadd.f32 %v5735_v52, %v5346_v9  ;;  %v14138_v16 = vpop.eup %14137  ;;  %v17165_v39 = vmul.f32 %v14130_v55, %v16990_v12  ;;  %v17168_v34 = vmul.f32 %v14136_v62, %v17002_v32  ;;  %v5293_v48 = vpop.f32.mrf.mxu1 }
 0x311   : > { %14161 = vrcp.f32 %v5952_v61  ;;  %v11577_v47 = vmul.f32 -1.442695, %v17156_v57  ;;  %v13345_v60 = vpop.f32.mrf.mxu0  ;;  %v14140_v35 = vpop.eup %14139  ;;  %v5954_v29 = vadd.f32 1.0, %v14138_v16  ;;  %v5348_v32 = vadd.f32 %v5293_v48, %v17053_v26 }
 0x312   : > { %20664 = vst [vmem:[#allocation90_spill] sm:$0xff] %v17165_v39  ;;  %20665 = vst [vmem:[#allocation94_spill] sm:$0xff] %v17168_v34  ;;  %14163 = vrcp.f32 %v5955_v37  ;;  %v11580_v30 = vmul.f32 -1.442695, %v17159_v31  ;;  %v17173_v43 = vadd.f32 %v16921_v11, %v5798_v20  ;;  %v14142_v15 = vpop.eup %14141  ;;  %v17176_v12 = vmul.f32 %v14140_v35, %v17005_v27  ;;  %13366 = vmatprep.mubr.msk.f32.mxu1 %vm20667_vm3, %v17168_v34  ;;  %v13298_v18 = vpop.f32.mrf.mxu1 }
 0x313   : > { %14165 = vpow2.f32 %v11578_v17  ;;  %v5801_v7 = vadd.f32 %v13345_v60, %v5349_v5  ;;  %v5745_v55 = vpop.f32.mrf.mxu0  ;;  %v14144_v0 = vpop.eup %14143  ;;  %v5957_v25 = vadd.f32 1.0, %v14142_v15  ;;  %v5351_v51 = vadd.f32 %v13298_v18, %v16872_v10  ;;  %13367 = vmatmul.mubr.msk.f32.gmra.mxu1 %vm20668_vm12, %v17165_v39  ;;  %vm20673_vm3 = vmmov %vm20661_vm1 }
 0x314   : > { %20666 = vst [vmem:[#allocation95_spill] sm:$0xff] %v17176_v12  ;;  %14167 = vrcp.f32 %v5954_v29  ;;  %v11579_v44 = vmul.f32 -1.442695, %v17173_v43  ;;  %v14146_v27 = vpop.eup %14145  ;;  %v17186_v63 = vmul.f32 %v14144_v0, %v17018_v14  ;;  %v5800_v9 = vadd.f32 %v5745_v55, %v5348_v32  ;;  %v5303_v28 = vpop.f32.mrf.mxu1  ;;  %vm20674_vm12 = vmmov %vm20661_vm1 }
 0x315   : > { %14169 = vpow2.f32 %v11577_v47  ;;  %v17189_v26 = vadd.f32 %v16921_v11, %v5801_v7  ;;  %v13348_v45 = vpop.f32.mrf.mxu0  ;;  %v14148_v61 = vpop.eup %14147  ;;  %v5956_v17 = vadd.f32 1.0, %v14146_v27  ;;  %v5350_v53 = vadd.f32 %v5303_v28, %v17077_v13 }
 0x316   : > { %20669 = vst [vmem:[#allocation99_spill] sm:$0xff] %v17186_v63  ;;  %14171 = vrcp.f32 %v5957_v25  ;;  %v5803_v10 = vadd.f32 %v13348_v45, %v5351_v51  ;;  %v14150_v52 = vpop.eup %14149  ;;  %v4900_v62 = vadd.f32 %v16908_v36, %v17103_v3  ;;  %v17195_v14 = vmul.f32 %v14148_v61, %v17030_v6  ;;  %13369 = vmatprep.mubr.msk.f32.mxu1 %vm20661_vm1, %v17186_v63  ;;  %v13301_v49 = vpop.f32.mrf.mxu1 }
 0x317   : > { %14173 = vpow2.f32 %v11580_v30  ;;  %v17198_v37 = vadd.f32 %v16921_v11, %v5800_v9  ;;  %v5755_v5 = vpop.f32.mrf.mxu0  ;;  %v5959_v13 = vadd.f32 1.0, %v14150_v52  ;;  %v5353_v36 = vadd.f32 %v13301_v49, %v17122_v21  ;;  %13370 = vmatmul.mubr.msk.f32.gmra.mxu1 %vm20671_vm4, %v17176_v12  ;;  %vm20678_vm4 = vmmov %vm20661_vm1 }
 0x318   : > { %20670 = vst [vmem:[#allocation102_spill] sm:$0xff] %v17195_v14  ;;  %v14152_v20 = vpop.eup %14151  ;;  %14175 = vrcp.f32 %v5956_v17  ;;  %v17203_v16 = vadd.f32 %v16921_v11, %v5803_v10  ;;  %v11582_v47 = vmul.f32 -1.442695, %v17189_v26  ;;  %v5802_v48 = vadd.f32 %v5755_v5, %v5350_v53  ;;  %v5313_v60 = vpop.f32.mrf.mxu1 }
 0x319   : > { %v14154_v6 = vpop.eup %14153  ;;  %v5958_v3 = vadd.f32 1.0, %v14152_v20  ;;  %14177 = vpow2.f32 %v11579_v44  ;;  %v13351_v35 = vpop.f32.mrf.mxu0  ;;  %v11581_v15 = vmul.f32 -1.442695, %v17198_v37  ;;  %v5352_v32 = vadd.f32 %v5313_v60, %v4900_v62 }
 0x31a   : > { %v14156_v29 = vpop.eup %14155  ;;  %14179 = vrcp.f32 %v5959_v13  ;;  %v5961_v30 = vadd.f32 1.0, %v14154_v6  ;;  %v17214_v18 = vadd.f32 %v16921_v11, %v5802_v48  ;;  %v5805_v55 = vadd.f32 %v13351_v35, %v5353_v36 }
 0x31b   : > { %v14158_v7 = vpop.eup %14157  ;;  %v17211_v21 = vmul.f32 %v14156_v29, %v17036_v8  ;;  %14181 = vrcp.f32 %v5958_v3  ;;  %v5765_v0 = vpop.f32.mrf.mxu0  ;;  %v11584_v51 = vmul.f32 -1.442695, %v17203_v16 }
 0x31c   : > { %v14160_v25 = vpop.eup %14159  ;;  %14183 = vrcp.f32 %v5961_v30  ;;  %v5960_v44 = vadd.f32 1.0, %v14158_v7  ;;  %v5804_v27 = vadd.f32 %v5765_v0, %v5352_v32  ;;  %v11583_v9 = vmul.f32 -1.442695, %v17214_v18 }
 0x31d   : > { %20672 = vst [vmem:[#allocation132_spill] sm:$0xff] %v17211_v21  ;;  %14185 = vpow2.f32 %v11582_v47  ;;  %v17219_v28 = vadd.f32 %v16921_v11, %v5805_v55  ;;  %13372 = vmatprep.mubr.msk.f32.mxu1 %vm20673_vm3, %v17211_v21  ;;  %v17233_v52 = vmul.f32 %v14160_v25, %v17042_v24  ;;  %vm20680_vm3 = vmmov %vm20661_vm1 }
 0x31e   : > { %v14162_v8 = vpop.eup %14161  ;;  %14187 = vrcp.f32 %v5960_v44  ;;  %v17224_v45 = vadd.f32 %v16921_v11, %v5804_v27  ;;  %13373 = vmatmul.mubr.msk.f32.gmra.mxu1 %vm20674_vm12, %v17195_v14  ;;  %vm20682_vm12 = vmmov %vm20661_vm1 }
 0x31f   : > { %v14164_v61 = vpop.eup %14163  ;;  %v17229_v17 = vmul.f32 %v14162_v8, %v17050_v38  ;;  %14189 = vpow2.f32 %v11581_v15  ;;  %v11586_v53 = vmul.f32 -1.442695, %v17219_v28  ;;  %20676 = vst [vmem:[#allocation111_spill] sm:$0xff] %v17233_v52 }
 0x320   : > { %v14166_v10 = vpop.eup %14165  ;;  %14191 = vpow2.f32 %v11584_v51  ;;  %v17243_v24 = vmul.f32 %v14164_v61, %v17061_v56 }
 0x321   : > { %20675 = vst [vmem:[#allocation100_spill] sm:$0xff] %v17229_v17  ;;  %v14168_v62 = vpop.eup %14167  ;;  %v5963_v49 = vadd.f32 1.0, %v14166_v10  ;;  %14193 = vpow2.f32 %v11583_v9  ;;  %13375 = vmatprep.mubr.msk.f32.mxu1 %vm20661_vm1, %v17229_v17 }
 0x322   : > { %v14170_v11 = vpop.eup %14169  ;;  %v17238_v5 = vmul.f32 %v14168_v62, %v17070_v50  ;;  %14195 = vpow2.f32 %v11586_v53  ;;  %13376 = vmatmul.mubr.msk.f32.gmra.mxu1 %vm20678_vm4, %v17233_v52  ;;  %20679 = vst [vmem:[#allocation121_spill] sm:$0xff] %v17243_v24  ;;  %vm20685_vm4 = vmmov %vm20661_vm1 }
 0x323   : > { %v14172_v38 = vpop.eup %14171  ;;  %v5962_v20 = vadd.f32 1.0, %v14170_v11  ;;  %14197 = vrcp.f32 %v5963_v49 }
 0x324   : > { %20677 = vst [vmem:[#allocation118_spill] sm:$0xff] %v17238_v5  ;;  %v14174_v13 = vpop.eup %14173  ;;  %13378 = vmatprep.mubr.msk.f32.mxu1 %vm20680_vm3, %v17238_v5  ;;  %v17253_v56 = vmul.f32 %v14172_v38, %v17073_v54  ;;  %vm20686_vm3 = vmmov %vm20661_vm1 }
 0x325   : > { %v14176_v36 = vpop.eup %14175  ;;  %14199 = vrcp.f32 %v5962_v20  ;;  %v5965_v6 = vadd.f32 1.0, %v14174_v13 }
 0x326   : > { %v14178_v3 = vpop.eup %14177  ;;  %v17248_v50 = vmul.f32 %v14176_v36, %v17085_v33  ;;  %13379 = vmatmul.mubr.msk.f32.gmra.mxu1 %vm20682_vm12, %v17243_v24  ;;  %20683 = vst [vmem:[#allocation103_spill] sm:$0xff] %v17253_v56  ;;  %vm20689_vm12 = vmmov %vm20661_vm1 }
 0x327   : > { %v14180_v47 = vpop.eup %14179  ;;  %v5964_v48 = vadd.f32 1.0, %v14178_v3  ;;  %14201 = vrcp.f32 %v5965_v6  ;;  %v6079_v6 = vrot.slane %v17081_v41, 7  ;;  %v20707_v3 = vld [vmem:[#allocation49_spill] sm:$0xff] }
 0x328   : > { %20681 = vst [vmem:[#allocation66_spill] sm:$0xff] %v17248_v50  ;;  %v14182_v60 = vpop.eup %14181  ;;  %13381 = vmatprep.mubr.msk.f32.mxu1 %vm20661_vm1, %v17248_v50  ;;  %v17265_v32 = vmul.f32 %v14180_v47, %v17094_v1 }
 0x329   : > { %v14184_v35 = vpop.eup %14183  ;;  %v17258_v29 = vmul.f32 %v14182_v60, %v17112_v59  ;;  %14203 = vrcp.f32 %v5964_v48  ;;  %v6856_v48 = vrot.slane %v17125_v22, 1  ;;  %v6082_v60 = vrot.slane %v17139_v40, 7 }
 0x32a   : > { %v14186_v33 = vpop.eup %14185  ;;  %13382 = vmatmul.mubr.msk.f32.gmra.mxu1 %vm20685_vm4, %v17253_v56  ;;  %20687 = vst [vmem:[#allocation107_spill] sm:$0xff] %v17265_v32  ;;  %v17275_v1 = vmul.f32 %v14184_v35, %v17117_v4  ;;  %vm20691_vm4 = vmmov %vm20661_vm1  ;;  %v20710_v35 = vmov 0.0  }
 0x32b   : > { %20684 = vst [vmem:[#allocation106_spill] sm:$0xff] %v17258_v29  ;;  %v14188_v30 = vpop.eup %14187  ;;  %v5967_v15 = vadd.f32 1.0, %v14186_v33  ;;  %13384 = vmatprep.mubr.msk.f32.mxu1 %vm20686_vm3, %v17258_v29  ;;  %vm20694_vm3 = vmmov %vm20661_vm1  ;;  %v20711_v33 = vld [vmem:[#allocation60_spill] sm:$0xff] }
 0x32c   : > { %v14190_v54 = vpop.eup %14189  ;;  %v17268_v7 = vmul.f32 %v14188_v30, %v17133_v42  ;;  %20690 = vst [vmem:[#allocation72_spill] sm:$0xff] %v17275_v1 }
 0x32d   : > { %v14192_v55 = vpop.eup %14191  ;;  %v5966_v59 = vadd.f32 1.0, %v14190_v54  ;;  %14205 = vrcp.f32 %v5967_v15  ;;  %v6855_v15 = vrot.slane %v17081_v41, 1 }
 0x32e   : > { %20688 = vst [vmem:[#allocation110_spill] sm:$0xff] %v17268_v7  ;;  %v14194_v0 = vpop.eup %14193  ;;  %v5969_v25 = vadd.f32 1.0, %v14192_v55  ;;  %13385 = vmatmul.mubr.msk.f32.gmra.mxu1 %vm20689_vm12, %v17265_v32  ;;  %vm20695_vm12 = vmmov %vm20661_vm1  ;;  %v6081_v55 = vrot.slane %v17129_v2, 7 }
 0x32f   : > { %v14196_v44 = vpop.eup %14195  ;;  %14207 = vrcp.f32 %v5966_v59  ;;  %v5968_v51 = vadd.f32 1.0, %v14194_v0  ;;  %13387 = vmatprep.mubr.msk.f32.mxu1 %vm20661_vm1, %v17268_v7  ;;  %v20716_v0 = vld [vmem:[#allocation61_spill] sm:$0xff] }
 0x330   : > { %14209 = vrcp.f32 %v5969_v25  ;;  %v5971_v42 = vadd.f32 1.0, %v14196_v44  ;;  %v14198_v27 = vpop.eup %14197  ;;  %v17364_v44 = vld [vmem:[%s19769_s7 + $0x18] sm:$0xf] }
 0x331   : > { %14211 = vrcp.f32 %v5968_v51  ;;  %v17283_v61 = vmul.f32 %v14198_v27, %v17146_v58  ;;  %v6858_v27 = vrot.slane %v17139_v40, 1 }
 0x332   : > { %v14200_v9 = vpop.eup %14199  ;;  %14213 = vrcp.f32 %v5971_v42  ;;  %13388 = vmatmul.mubr.msk.f32.gmra.mxu1 %vm20691_vm4, %v17275_v1  ;;  %vm20698_vm4 = vmmov %vm20661_vm1 }
 0x333   : > { %v17280_v8 = vmul.f32 %v14200_v9, %v17156_v57  ;;  %20693 = vst [vmem:[#allocation133_spill] sm:$0xff] %v17283_v61  ;;  %v6084_v9 = vrot.slane %v17168_v34, 7 }
 0x334   : > { %v14202_v53 = vpop.eup %14201 }
 0x335   : > { %20692 = vst [vmem:[#allocation134_spill] sm:$0xff] %v17280_v8  ;;  %13390 = vmatprep.mubr.msk.f32.mxu1 %vm20694_vm3, %v17280_v8  ;;  %v17293_v62 = vmul.f32 %v14202_v53, %v17159_v31  ;;  %vm20702_vm3 = vmmov %vm20661_vm1  ;;  %v14604_v53 = vld [vmem:[%s19769_s7 + $0x10] sm:$0xf] }
 0x336   : > { %v14204_v4 = vpop.eup %14203  ;;  %13391 = vmatmul.mubr.msk.f32.gmra.mxu1 %vm20695_vm12, %v17283_v61  ;;  %vm20704_vm12 = vmmov %vm20661_vm1 }
 0x337   : > { %v17290_v10 = vmul.f32 %v14204_v4, %v17173_v43  ;;  %20697 = vst [vmem:[#allocation119_spill] sm:$0xff] %v17293_v62  ;;  %v6857_v4 = vrot.slane %v17129_v2, 1 }
 0x339   : > { %20696 = vst [vmem:[#allocation113_spill] sm:$0xff] %v17290_v10  ;;  %13393 = vmatprep.mubr.msk.f32.mxu1 %vm20661_vm1, %v17290_v10 }
 0x33a   : > { %13394 = vmatmul.mubr.msk.f32.gmra.mxu1 %vm20698_vm4, %v17293_v62  ;;  %v14206_v58 = vpop.eup %14205  ;;  %vm20706_vm4 = vmmov %vm20661_vm1 }
 0x33b   : > { %v17303_v20 = vmul.f32 %v14206_v58, %v17189_v26  ;;  %vm20715_vm2 = vmmov %vm20706_vm4 }
 0x33c   : > { %v14208_v57 = vpop.eup %14207 }
 0x33d   : > { %v14210_v49 = vpop.eup %14209  ;;  %v17300_v11 = vmul.f32 %v14208_v57, %v17198_v37  ;;  %20700 = vst [vmem:[#allocation71_spill] sm:$0xff] %v17303_v20  ;;  %v6080_v37 = vrot.slane %v17125_v22, 7  ;;  %v6083_v57 = vrot.slane %v17149_v19, 7 }
 0x33e   : > { %v14212_v38 = vpop.eup %14211  ;;  %v17319_v26 = vmul.f32 %v14210_v49, %v17203_v16  ;;  %v6861_v49 = vrot.slane %v17165_v39, 1 }
 0x33f   : > { %20699 = vst [vmem:[#allocation91_spill] sm:$0xff] %v17300_v11  ;;  %v14214_v43 = vpop.eup %14213  ;;  %v17306_v31 = vmul.f32 %v14212_v38, %v17214_v18  ;;  %13396 = vmatprep.mubr.msk.f32.mxu1 %vm20702_vm3, %v17300_v11  ;;  %v6078_v18 = vrot.slane %v17089_v23, 7  ;;  %vm20708_vm3 = vcmp.lt.s32.totalorder %v20707_v3, 1 }
 0x340   : > { %v17311_v13 = vmul.f32 %v14214_v43, %v17219_v28  ;;  %13397 = vmatmul.mubr.msk.f32.gmra.mxu1 %vm20704_vm12, %v17303_v20  ;;  %20705 = vst [vmem:[#allocation136_spill] sm:$0xff] %v17319_v26  ;;  %v20043_v28 = vrot.slane %v17089_v23, 1  ;;  %vm20709_vm12 = vmmov %vm20708_vm3 }
 0x341   : > { %20701 = vst [vmem:[#allocation75_spill] sm:$0xff] %v17306_v31  ;;  %13399 = vmatprep.mubr.msk.f32.mxu1 %vm20661_vm1, %v17306_v31  ;;  %v17335_v16 = vsel %vm20709_vm12, %v6079_v6, %v6080_v37  ;;  %vm20712_vm1 = vnez %v20711_v33  ;;  %v17347_v54 = vsel %vm20708_vm3, %v6078_v18, %v6079_v6  ;;  %vm20713_vm12 = vcmp.lt.s32.totalorder %v20707_v3, 7 }
 0x342   : > { %20703 = vst [vmem:[#allocation76_spill] sm:$0xff] %v17311_v13  ;;  %v20044_v36 = vrot.slane %v17311_v13, 7  ;;  %v17354_v59 = vsel %vm20713_vm12, %v20043_v28, %v6855_v15 }
 0x343   : > { %20714 = vst [vmem:[#allocation137_spill] sm:$0xff] %v17354_v59 }
 0x344   : > { %13400 = vmatmul.mubr.msk.f32.gmra.mxu1 %vm20706_vm4, %v17319_v26  ;;  %v17331_v47 = vsel %vm20708_vm3, %v20044_v36, %v6078_v18  ;;  %vm20719_vm3 = vmmov %vm20713_vm12  ;;  %vm20721_vm12 = vcmp.lt.s32.totalorder %v20707_v3, 1  ;;  %v20728_v18 = vld [vmem:[#allocation64_spill] sm:$0xff]  ;;  %v20741_v36 = vld [vmem:[#allocation67_spill] sm:$0xff] }
 0x345   : > { %13454 = vmatprep.mubr.f32.mxu1 %v20710_v35  ;;  %v6144_v30 = vsel %vm20712_vm1, %v17331_v47, 0.0  ;;  %vm20717_vm1 = vnez %v20716_v0  ;;  %v17370_v51 = vsel %vm20719_vm3, %v6855_v15, %v6856_v48  ;;  %v17374_v42 = vsel %vm20721_vm12, %v6081_v55, %v6082_v60  ;;  %vm20723_vm3 = vmmov %vm20721_vm12 }
 0x346   : > { %13407 = vmatprep.mubr.msk.f32.mxu0 %vm20706_vm4, %v6144_v30  ;;  %v6146_v25 = vsel %vm20717_vm1, %v17335_v16, 0.0  ;;  %vm20718_vm4 = vmmov %vm20715_vm2  ;;  %20720 = vst [vmem:[#allocation135_spill] sm:$0xff] %v17370_v51  ;;  %v17387_v58 = vsel %vm20723_vm3, %v6080_v37, %v6081_v55  ;;  %v6921_v38 = vsel %vm20416_vm6, %v17370_v51, 0.0  ;;  %vm20729_vm3 = vnez %v20728_v18 }
 0x347   : > { %13408 = vmatmul.mubr.msk.f32.gmra.mxu0 %vm20715_vm2, %v17347_v54  ;;  %vm20722_vm2 = vcmask 1043456   ;;  %v6148_v37 = vsel %vm20729_vm3, %v17374_v42, 0.0  ;;  %vm20730_vm1 = vmmov %vm20718_vm4  ;;  %vm20734_vm6 = vcmp.lt.s32.totalorder %v20707_v3, 1  ;;  %v6086_v15 = vrot.slane %v17186_v63, 7 }
 0x348   : > { %13455 = vmatmul.mubr.f32.vlgmr.msra.gmra.mxu1 %v20710_v35  ;;  %13410 = vmatprep.mubr.msk.f32.mxu0 %vm20718_vm4, %v6146_v25  ;;  %vm20724_vm12 = vmmov %vm20722_vm2  ;;  %v17412_v30 = vsel %vm20734_vm6, %v6083_v57, %v6084_v9  ;;  %v6859_v55 = vrot.slane %v17149_v19, 1 }
 0x349   : > { %13553 = vmatpush3.msk.msra.mxu1 %vm20722_vm2, %v14604_v53  ;;  %13457 = vmatprep.mubr.msk.f32.mxu1 %vm20718_vm4, %v17354_v59  ;;  %vm20726_vm2 = vcmp.lt.s32.totalorder %v20707_v3, 7  ;;  %vm20731_vm5 = vmmov %vm20730_vm1  ;;  %v6085_v53 = vrot.slane %v17165_v39, 7 }
 0x34a   : > { %13652 = vmatprep.subr.msk.mxu1 %vm20724_vm12, %v17364_v44  ;;  %v17397_v43 = vsel %vm20726_vm2, %v6856_v48, %v6857_v4  ;;  %vm20732_vm12 = vmmov %vm20726_vm2  ;;  %v6860_v48 = vrot.slane %v17168_v34, 1 }
 0x34b   : > { %20727 = vst [vmem:[#allocation81_spill] sm:$0xff] %v17397_v43  ;;  %13411 = vmatmul.mubr.msk.f32.gmra.mxu0 %vm20718_vm4, %v17387_v58  ;;  %v17408_v6 = vsel %vm20732_vm12, %v6857_v4, %v6858_v27  ;;  %vm20735_vm2 = vmmov %vm20730_vm1  ;;  %v11585_v4 = vmul.f32 -1.442695, %v17224_v45  ;;  %vm20742_vm4 = vnez %v20741_v36 }
 0x34c   : > { %13458 = vmatmul.mubr.msk.f32.gmra.mxu1 %vm20730_vm1, %v6921_v38  ;;  %13413 = vmatprep.mubr.msk.f32.mxu0 %vm20731_vm5, %v6148_v37  ;;  %20733 = vst [vmem:[#allocation127_spill] sm:$0xff] %v17408_v6  ;;  %vm20736_vm1 = vmmov %vm20734_vm6  ;;  %v6923_v37 = vsel %vm20420_vm10, %v17408_v6, 0.0  ;;  %vm20746_vm10 = vcmp.lt.s32.totalorder %v20707_v3, 1  ;;  %v6088_v38 = vrot.slane %v17211_v21, 7 }
 0x34d   : > { %13460 = vmatprep.mubr.msk.f32.mxu1 %vm20735_vm2, %v17397_v43  ;;  %v17421_v25 = vsel %vm20736_vm1, %v6082_v60, %v6083_v57  ;;  %vm20738_vm5 = vmmov %vm20732_vm12  ;;  %v6150_v60 = vsel %vm20742_vm4, %v17412_v30, 0.0  ;;  %v17445_v35 = vsel %vm20746_vm10, %v6085_v53, %v6086_v15  ;;  %14215 = vpow2.f32 %v11585_v4 }
 0x34e   : > { %v17430_v28 = vsel %vm20738_vm5, %v6858_v27, %v6859_v55  ;;  %vm20740_vm6 = vmmov %vm20735_vm2  ;;  %v6862_v27 = vrot.slane %v17186_v63, 1  ;;  %v6090_v4 = vrot.slane %v17229_v17, 7 }
 0x34f   : > { %20739 = vst [vmem:[#allocation129_spill] sm:$0xff] %v17430_v28  ;;  %13414 = vmatmul.mubr.msk.f32.gmra.mxu0 %vm20740_vm6, %v17421_v25  ;;  %vm20743_vm12 = vmmov %vm20735_vm2 }
 0x350   : > { %13461 = vmatmul.mubr.msk.f32.gmra.mxu1 %vm20743_vm12, %v6923_v37  ;;  %13416 = vmatprep.mubr.msk.f32.mxu0 %vm20735_vm2, %v6150_v60  ;;  %vm20744_vm1 = vmmov %vm20738_vm5  ;;  %v6863_v60 = vrot.slane %v17176_v12, 1 }
 0x351   : > { %v17441_v57 = vsel %vm20744_vm1, %v6859_v55, %v6860_v48  ;;  %vm20747_vm5 = vmmov %vm20735_vm2  ;;  %v6087_v55 = vrot.slane %v17176_v12, 7 }
 0x352   : > { %20745 = vst [vmem:[#allocation80_spill] sm:$0xff] %v17441_v57  ;;  %13463 = vmatprep.mubr.msk.f32.mxu1 %vm20747_vm5, %v17430_v28  ;;  %vm20748_vm6 = vmmov %vm20746_vm10  ;;  %v6925_v6 = vsel %vm20424_vm0, %v17441_v57, 0.0  ;;  %v20753_v28 = vld [vmem:[#allocation73_spill] sm:$0xff]  ;;  %vm20759_vm0 = vcmp.lt.s32.totalorder %v20707_v3, 1 }
 0x353   : > { %v17454_v37 = vsel %vm20748_vm6, %v6084_v9, %v6085_v53  ;;  %vm20750_vm10 = vmmov %vm20744_vm1  ;;  %v17477_v53 = vsel %vm20759_vm0, %v6087_v55, %v6088_v38 }
 0x354   : > { %v17462_v43 = vsel %vm20750_vm10, %v6860_v48, %v6861_v49  ;;  %vm20752_vm12 = vmmov %vm20735_vm2  ;;  %vm20754_vm2 = vnez %v20753_v28  ;;  %v6864_v48 = vrot.slane %v17211_v21, 1 }
 0x355   : > { %20751 = vst [vmem:[#allocation139_spill] sm:$0xff] %v17462_v43  ;;  %13417 = vmatmul.mubr.msk.f32.gmra.mxu0 %vm20752_vm12, %v17454_v37  ;;  %v6152_v51 = vsel %vm20754_vm2, %v17445_v35, 0.0  ;;  %vm20755_vm1 = vmmov %vm20747_vm5 }
 0x356   : > { %13464 = vmatmul.mubr.msk.f32.gmra.mxu1 %vm20755_vm1, %v6925_v6  ;;  %vm20756_vm5 = vmmov %vm20755_vm1  ;;  %v6092_v6 = vrot.slane %v17238_v5, 7 }
 0x357   : > { %13419 = vmatprep.mubr.msk.f32.mxu0 %vm20756_vm5, %v6152_v51  ;;  %vm20757_vm6 = vmmov %vm20750_vm10 }
 0x358   : > { %v17473_v9 = vsel %vm20757_vm6, %v6861_v49, %v6862_v27  ;;  %vm20760_vm10 = vmmov %vm20755_vm1  ;;  %v6089_v49 = vrot.slane %v17195_v14, 7 }
 0x359   : > { %20758 = vst [vmem:[#allocation138_spill] sm:$0xff] %v17473_v9  ;;  %13466 = vmatprep.mubr.msk.f32.mxu1 %vm20760_vm10, %v17462_v43  ;;  %vm20761_vm12 = vmmov %vm20759_vm0  ;;  %v6927_v57 = vsel %vm20429_vm7, %v17473_v9, 0.0  ;;  %v20765_v43 = vld [vmem:[#allocation79_spill] sm:$0xff]  ;;  %vm20771_vm7 = vcmp.lt.s32.totalorder %v20707_v3, 1  ;;  %v6865_v9 = vrot.slane %v17195_v14, 1 }
 0x35a   : > { %v17486_v51 = vsel %vm20761_vm12, %v6086_v15, %v6087_v55  ;;  %vm20763_vm0 = vmmov %vm20757_vm6  ;;  %vm20766_vm5 = vnez %v20765_v43  ;;  %v17509_v55 = vsel %vm20771_vm7, %v6089_v49, %v6090_v4  ;;  %v14216_v12 = vpop.eup %14215 }
 0x35b   : > { %v17494_v59 = vsel %vm20763_vm0, %v6862_v27, %v6863_v60  ;;  %13420 = vmatmul.mubr.msk.f32.gmra.mxu0 %vm20755_vm1, %v17486_v51  ;;  %v6154_v13 = vsel %vm20766_vm5, %v17477_v53, 0.0  ;;  %vm20767_vm6 = vmmov %vm20755_vm1  ;;  %v6866_v27 = vrot.slane %v17229_v17, 1  ;;  %v8448_v36 = vsel %vm20754_vm2, %v17509_v55, 0.0 }
 0x35c   : > { %20764 = vst [vmem:[#allocation126_spill] sm:$0xff] %v17494_v59  ;;  %13467 = vmatmul.mubr.msk.f32.gmra.mxu1 %vm20767_vm6, %v6927_v57  ;;  %vm20768_vm10 = vmmov %vm20755_vm1  ;;  %v6091_v57 = vrot.slane %v17233_v52, 7 }
 0x35d   : > { %13422 = vmatprep.mubr.msk.f32.mxu0 %vm20768_vm10, %v6154_v13  ;;  %vm20769_vm12 = vmmov %vm20763_vm0 }
 0x35e   : > { %v17505_v15 = vsel %vm20769_vm12, %v6863_v60, %v6864_v48  ;;  %vm20772_vm0 = vmmov %vm20755_vm1  ;;  %v6094_v60 = vrot.slane %v17248_v50, 7 }
 0x35f   : > { %20770 = vst [vmem:[#allocation128_spill] sm:$0xff] %v17505_v15  ;;  %13469 = vmatprep.mubr.msk.f32.mxu1 %vm20772_vm0, %v17494_v59  ;;  %vm20773_vm1 = vmmov %vm20771_vm7  ;;  %v6929_v21 = vsel %vm20434_vm9, %v17505_v15, 0.0  ;;  %v20778_v59 = vld [vmem:[#allocation84_spill] sm:$0xff]  ;;  %vm20783_vm9 = vcmp.lt.s32.totalorder %v20707_v3, 1  ;;  %v6867_v15 = vrot.slane %v17233_v52, 1 }
 0x360   : > { %v17518_v13 = vsel %vm20773_vm1, %v6088_v38, %v6089_v49  ;;  %vm20775_vm7 = vmmov %vm20769_vm12  ;;  %vm20779_vm10 = vnez %v20778_v59  ;;  %v17541_v49 = vsel %vm20783_vm9, %v6091_v57, %v6092_v6 }
 0x361   : > { %v17526_v17 = vsel %vm20775_vm7, %v6864_v48, %v6865_v9  ;;  %vm20777_vm6 = vmmov %vm20772_vm0  ;;  %v6156_v14 = vsel %vm20779_vm10, %v17509_v55, 0.0  ;;  %20784 = vst [vmem:[#allocation140_spill] sm:$0xff] %v17541_v49  ;;  %v6868_v48 = vrot.slane %v17238_v5, 1 }
 0x362   : > { %20776 = vst [vmem:[#allocation131_spill] sm:$0xff] %v17526_v17  ;;  %13423 = vmatmul.mubr.msk.f32.gmra.mxu0 %vm20777_vm6, %v17518_v13  ;;  %vm20780_vm12 = vmmov %vm20772_vm0 }
 0x363   : > { %13470 = vmatmul.mubr.msk.f32.gmra.mxu1 %vm20780_vm12, %v6929_v21  ;;  %13425 = vmatprep.mubr.msk.f32.mxu0 %vm20772_vm0, %v6156_v14  ;;  %vm20781_vm1 = vmmov %vm20775_vm7  ;;  %v6093_v21 = vrot.slane %v17243_v24, 7 }
 0x364   : > { %v17537_v38 = vsel %vm20781_vm1, %v6865_v9, %v6866_v27  ;;  %vm20785_vm7 = vmmov %vm20772_vm0  ;;  %v6096_v9 = vrot.slane %v17258_v29, 7 }
 0x365   : > { %20782 = vst [vmem:[#allocation141_spill] sm:$0xff] %v17537_v38  ;;  %13472 = vmatprep.mubr.msk.f32.mxu1 %vm20785_vm7, %v17526_v17  ;;  %vm20786_vm6 = vmmov %vm20783_vm9  ;;  %v6931_v59 = vsel %vm20439_vm11, %v17537_v38, 0.0  ;;  %v20791_v17 = vld [vmem:[#allocation92_spill] sm:$0xff]  ;;  %vm20797_vm11 = vcmp.lt.s32.totalorder %v20707_v3, 1  ;;  %v6869_v38 = vrot.slane %v17243_v24, 1 }
 0x366   : > { %v17550_v14 = vsel %vm20786_vm6, %v6090_v4, %v6091_v57  ;;  %vm20788_vm9 = vmmov %vm20781_vm1  ;;  %v6870_v57 = vrot.slane %v17248_v50, 1 }
 0x367   : > { %v17558_v5 = vsel %vm20788_vm9, %v6866_v27, %v6867_v15  ;;  %vm20790_vm12 = vmmov %vm20772_vm0  ;;  %vm20792_vm0 = vnez %v20791_v17  ;;  %v17573_v27 = vsel %vm20797_vm11, %v6093_v21, %v6094_v60  ;;  %v6871_v17 = vrot.slane %v17253_v56, 1 }
 0x368   : > { %20789 = vst [vmem:[#allocation143_spill] sm:$0xff] %v17558_v5  ;;  %13426 = vmatmul.mubr.msk.f32.gmra.mxu0 %vm20790_vm12, %v17550_v14  ;;  %v6158_v52 = vsel %vm20792_vm0, %v17541_v49, 0.0  ;;  %vm20793_vm1 = vmmov %vm20785_vm7  ;;  %v8452_v43 = vsel %vm20779_vm10, %v17573_v27, 0.0 }
 0x369   : > { %13473 = vmatmul.mubr.msk.f32.gmra.mxu1 %vm20793_vm1, %v6931_v59  ;;  %vm20794_vm7 = vmmov %vm20793_vm1  ;;  %v6095_v59 = vrot.slane %v17253_v56, 7 }
 0x36a   : > { %13428 = vmatprep.mubr.msk.f32.mxu0 %vm20794_vm7, %v6158_v52  ;;  %vm20795_vm6 = vmmov %vm20788_vm9 }
 0x36b   : > { %v17569_v4 = vsel %vm20795_vm6, %v6867_v15, %v6868_v48  ;;  %vm20798_vm9 = vmmov %vm20793_vm1  ;;  %v5970_v15 = vadd.f32 1.0, %v14216_v12 }
 0x36c   : > { %20796 = vst [vmem:[#allocation145_spill] sm:$0xff] %v17569_v4  ;;  %13475 = vmatprep.mubr.msk.f32.mxu1 %vm20798_vm9, %v17558_v5  ;;  %vm20799_vm12 = vmmov %vm20797_vm11  ;;  %v6933_v49 = vsel %vm20444_vm13, %v17569_v4, 0.0  ;;  %v20803_v5 = vld [vmem:[#allocation96_spill] sm:$0xff]  ;;  %vm20809_vm13 = vcmp.lt.s32.totalorder %v20707_v3, 1 }
 0x36d   : > { %v17582_v52 = vsel %vm20799_vm12, %v6092_v6, %v6093_v21  ;;  %vm20801_vm11 = vmmov %vm20795_vm6  ;;  %vm20804_vm7 = vnez %v20803_v5  ;;  %v17605_v6 = vsel %vm20809_vm13, %v6095_v59, %v6096_v9  ;;  %v6098_v21 = vrot.slane %v17268_v7, 7 }
 0x36e   : > { %v17590_v50 = vsel %vm20801_vm11, %v6868_v48, %v6869_v38  ;;  %13429 = vmatmul.mubr.msk.f32.gmra.mxu0 %vm20793_vm1, %v17582_v52  ;;  %v6160_v24 = vsel %vm20804_vm7, %v17573_v27, 0.0  ;;  %vm20805_vm6 = vmmov %vm20793_vm1  ;;  %20810 = vst [vmem:[#allocation149_spill] sm:$0xff] %v17605_v6  ;;  %v6872_v48 = vrot.slane %v17258_v29, 1  ;;  %14217 = vrcp.f32 %v5970_v15 }
 0x36f   : > { %20802 = vst [vmem:[#allocation142_spill] sm:$0xff] %v17590_v50  ;;  %13476 = vmatmul.mubr.msk.f32.gmra.mxu1 %vm20805_vm6, %v6933_v49  ;;  %vm20806_vm9 = vmmov %vm20793_vm1  ;;  %v6100_v15 = vrot.slane %v17280_v8, 7  ;;  %v6873_v49 = vrot.slane %v17265_v32, 1 }
 0x370   : > { %13431 = vmatprep.mubr.msk.f32.mxu0 %vm20806_vm9, %v6160_v24  ;;  %vm20807_vm12 = vmmov %vm20801_vm11 }
 0x371   : > { %v17601_v12 = vsel %vm20807_vm12, %v6869_v38, %v6870_v57  ;;  %vm20811_vm11 = vmmov %vm20793_vm1  ;;  %v6097_v38 = vrot.slane %v17265_v32, 7 }
 0x372   : > { %20808 = vst [vmem:[#allocation147_spill] sm:$0xff] %v17601_v12  ;;  %13478 = vmatprep.mubr.msk.f32.mxu1 %vm20811_vm11, %v17590_v50  ;;  %vm20812_vm1 = vmmov %vm20809_vm13  ;;  %v6935_v4 = vsel %vm20449_vm15, %v17601_v12, 0.0  ;;  %v20816_v50 = vld [vmem:[#allocation98_spill] sm:$0xff]  ;;  %vm20822_vm15 = vcmp.lt.s32.totalorder %v20707_v3, 1  ;;  %v13406_v12 = vpop.f32.mrf.mxu0 }
 0x373   : > { %v17614_v24 = vsel %vm20812_vm1, %v6094_v60, %v6095_v59  ;;  %vm20814_vm13 = vmmov %vm20807_vm12  ;;  %vm20817_vm9 = vnez %v20816_v50  ;;  %v17637_v59 = vsel %vm20822_vm15, %v6097_v38, %v6098_v21 }
 0x374   : > { %v17622_v29 = vsel %vm20814_vm13, %v6870_v57, %v6871_v17  ;;  %13432 = vmatmul.mubr.msk.f32.gmra.mxu0 %vm20805_vm6, %v17614_v24  ;;  %v6162_v56 = vsel %vm20817_vm9, %v17605_v6, 0.0  ;;  %vm20818_vm12 = vmmov %vm20805_vm6  ;;  %v6874_v57 = vrot.slane %v17268_v7, 1 }
 0x375   : > { %20815 = vst [vmem:[#allocation151_spill] sm:$0xff] %v17622_v29  ;;  %13479 = vmatmul.mubr.msk.f32.gmra.mxu1 %vm20818_vm12, %v6935_v4  ;;  %vm20819_vm11 = vmmov %vm20805_vm6  ;;  %v13356_v4 = vpop.f32.mrf.mxu1 }
 0x376   : > { %13434 = vmatprep.mubr.msk.f32.mxu0 %vm20819_vm11, %v6162_v56  ;;  %vm20820_vm1 = vmmov %vm20814_vm13  ;;  %v17649_v50 = vadd.f32 %v13406_v12, %v13356_v4  ;;  %v6102_v4 = vrot.slane %v17290_v10, 7 }
 0x377   : > { %v17633_v60 = vsel %vm20820_vm1, %v6871_v17, %v6872_v48  ;;  %vm20823_vm13 = vmmov %vm20805_vm6  ;;  %v6099_v17 = vrot.slane %v17275_v1, 7 }
 0x378   : > { %20821 = vst [vmem:[#allocation153_spill] sm:$0xff] %v17633_v60  ;;  %13481 = vmatprep.mubr.msk.f32.mxu1 %vm20823_vm13, %v17622_v29  ;;  %vm20824_vm6 = vmmov %vm20822_vm15  ;;  %v6937_v7 = vsel %vm20454_vm14, %v17633_v60, 0.0  ;;  %v20830_v29 = vld [vmem:[#allocation104_spill] sm:$0xff]  ;;  %vm20836_vm14 = vcmp.lt.s32.totalorder %v20707_v3, 1 }
 0x379   : > { %v17646_v56 = vsel %vm20824_vm6, %v6096_v9, %v6097_v38  ;;  %20825 = vst [vmem:[#allocation144_spill] sm:$0xff] %v17649_v50  ;;  %vm20827_vm15 = vmmov %vm20820_vm1  ;;  %v17671_v38 = vsel %vm20836_vm14, %v6099_v17, %v6100_v15  ;;  %v6875_v50 = vrot.slane %v17275_v1, 1 }
 0x37a   : > { %v17656_v6 = vsel %vm20827_vm15, %v6872_v48, %v6873_v49  ;;  %vm20829_vm12 = vmmov %vm20819_vm11  ;;  %vm20831_vm11 = vnez %v20830_v29  ;;  %v6876_v48 = vrot.slane %v17280_v8, 1 }
 0x37b   : > { %20828 = vst [vmem:[#allocation156_spill] sm:$0xff] %v17656_v6  ;;  %13435 = vmatmul.mubr.msk.f32.gmra.mxu0 %vm20829_vm12, %v17646_v56  ;;  %v6164_v9 = vsel %vm20831_vm11, %v17637_v59, 0.0  ;;  %vm20832_vm1 = vmmov %vm20829_vm12 }
 0x37c   : > { %13482 = vmatmul.mubr.msk.f32.gmra.mxu1 %vm20832_vm1, %v6937_v7  ;;  %vm20833_vm13 = vmmov %vm20832_vm1 }
 0x37d   : > { %13437 = vmatprep.mubr.msk.f32.mxu0 %vm20833_vm13, %v6164_v9  ;;  %vm20834_vm6 = vmmov %vm20827_vm15  ;;  %v6104_v9 = vrot.slane %v17300_v11, 7 }
 0x37e   : > { %v17667_v12 = vsel %vm20834_vm6, %v6873_v49, %v6874_v57  ;;  %vm20837_vm15 = vmmov %vm20832_vm1  ;;  %v6101_v49 = vrot.slane %v17283_v61, 7 }
 0x37f   : > { %20835 = vst [vmem:[#allocation155_spill] sm:$0xff] %v17667_v12  ;;  %13484 = vmatprep.mubr.msk.f32.mxu1 %vm20837_vm15, %v17656_v6  ;;  %vm20838_vm12 = vmmov %vm20836_vm14  ;;  %v6939_v5 = vsel %vm20459_vm8, %v17667_v12, 0.0  ;;  %v20842_v6 = vld [vmem:[#allocation108_spill] sm:$0xff]  ;;  %vm20848_vm8 = vcmp.lt.s32.totalorder %v20707_v3, 1  ;;  %v6877_v12 = vrot.slane %v17283_v61, 1 }
 0x380   : > { %v17680_v7 = vsel %vm20838_vm12, %v6098_v21, %v6099_v17  ;;  %vm20840_vm14 = vmmov %vm20834_vm6  ;;  %vm20843_vm13 = vnez %v20842_v6  ;;  %v17703_v17 = vsel %vm20848_vm8, %v6101_v49, %v6102_v4  ;;  %v14218_v6 = vpop.eup %14217 }
 0x381   : > { %v17688_v60 = vsel %vm20840_vm14, %v6874_v57, %v6875_v50  ;;  %13438 = vmatmul.mubr.msk.f32.gmra.mxu0 %vm20832_vm1, %v17680_v7  ;;  %v6166_v8 = vsel %vm20843_vm13, %v17671_v38, 0.0  ;;  %vm20844_vm6 = vmmov %vm20832_vm1  ;;  %v6878_v57 = vrot.slane %v17290_v10, 1 }
 0x382   : > { %20841 = vst [vmem:[#allocation146_spill] sm:$0xff] %v17688_v60  ;;  %13485 = vmatmul.mubr.msk.f32.gmra.mxu1 %vm20844_vm6, %v6939_v5  ;;  %vm20845_vm15 = vmmov %vm20832_vm1 }
 0x383   : > { %13440 = vmatprep.mubr.msk.f32.mxu0 %vm20845_vm15, %v6166_v8  ;;  %vm20846_vm12 = vmmov %vm20840_vm14  ;;  %v20851_v8 = vld [vmem:[#allocation109_spill] sm:$0xff] }
 0x384   : > { %v17699_v21 = vsel %vm20846_vm12, %v6875_v50, %v6876_v48  ;;  %vm20849_vm14 = vmmov %vm20832_vm1  ;;  %v6103_v50 = vrot.slane %v17293_v62, 7  ;;  %vm20852_vm6 = vnez %v20851_v8  ;;  %v6106_v8 = vrot.slane %v17306_v31, 7 }
 0x385   : > { %20847 = vst [vmem:[#allocation148_spill] sm:$0xff] %v17699_v21  ;;  %13487 = vmatprep.mubr.msk.f32.mxu1 %vm20849_vm14, %v17688_v60  ;;  %vm20850_vm1 = vmmov %vm20848_vm8  ;;  %v6941_v1 = vsel %vm20852_vm6, %v17699_v21, 0.0  ;;  %v20856_v60 = vld [vmem:[#allocation112_spill] sm:$0xff]  ;;  %vm20861_vm6 = vcmp.lt.s32.totalorder %v20707_v3, 1  ;;  %v6879_v21 = vrot.slane %v17293_v62, 1 }
 0x386   : > { %v17712_v5 = vsel %vm20850_vm1, %v6100_v15, %v6101_v49  ;;  %vm20853_vm8 = vmmov %vm20846_vm12  ;;  %vm20857_vm12 = vnez %v20856_v60  ;;  %13488 = vmatmul.mubr.msk.f32.gmra.mxu1 %vm20849_vm14, %v6941_v1  ;;  %v6880_v49 = vrot.slane %v17300_v11, 1  ;;  %v20864_v60 = vld [vmem:[#allocation114_spill] sm:$0xff] }
 0x387   : > { %v17720_v10 = vsel %vm20853_vm8, %v6876_v48, %v6877_v12  ;;  %vm20855_vm15 = vmmov %vm20849_vm14  ;;  %v6168_v61 = vsel %vm20857_vm12, %v17703_v17, 0.0  ;;  %v17735_v48 = vsel %vm20861_vm6, %v6103_v50, %v6104_v9 }
 0x388   : > { %20854 = vst [vmem:[#allocation130_spill] sm:$0xff] %v17720_v10  ;;  %13441 = vmatmul.mubr.msk.f32.gmra.mxu0 %vm20855_vm15, %v17712_v5  ;;  %vm20858_vm1 = vmmov %vm20849_vm14 }
 0x389   : > { %13443 = vmatprep.mubr.msk.f32.mxu0 %vm20858_vm1, %v6168_v61  ;;  %vm20859_vm13 = vmmov %vm20853_vm8  ;;  %v6105_v61 = vrot.slane %v17303_v20, 7 }
 0x38a   : > { %v17731_v15 = vsel %vm20859_vm13, %v6877_v12, %v6878_v57  ;;  %vm20862_vm8 = vmmov %vm20858_vm1  ;;  %v17748_v12 = vmul.f32 %v14218_v6, %v17224_v45  ;;  %vm20865_vm13 = vnez %v20864_v60  ;;  %v20880_v60 = vld [vmem:[#allocation120_spill] sm:$0xff] }
 0x38b   : > { %20860 = vst [vmem:[#allocation150_spill] sm:$0xff] %v17731_v15  ;;  %13490 = vmatprep.mubr.msk.f32.mxu1 %vm20862_vm8, %v17720_v10  ;;  %vm20863_vm15 = vmmov %vm20861_vm6  ;;  %v6943_v11 = vsel %vm20865_vm13, %v17731_v15, 0.0  ;;  %v20867_v10 = vld [vmem:[#allocation115_spill] sm:$0xff]  ;;  %vm20869_vm8 = vcmp.lt.s32.totalorder %v20707_v3, 7  ;;  %vm20874_vm13 = vcmp.lt.s32.totalorder %v20707_v3, 1 }
 0x38c   : > { %v17744_v1 = vsel %vm20863_vm15, %v6102_v4, %v6103_v50  ;;  %vm20866_vm6 = vmmov %vm20858_vm1  ;;  %vm20868_vm14 = vnez %v20867_v10  ;;  %13491 = vmatmul.mubr.msk.f32.gmra.mxu1 %vm20858_vm1, %v6943_v11  ;;  %v17761_v4 = vsel %vm20869_vm8, %v6878_v57, %v6879_v21  ;;  %v17770_v6 = vsel %vm20874_vm13, %v6105_v61, %v6106_v8 }
 0x38d   : > { %13444 = vmatmul.mubr.msk.f32.gmra.mxu0 %vm20866_vm6, %v17744_v1  ;;  %v6170_v62 = vsel %vm20868_vm14, %v17735_v48, 0.0  ;;  %20870 = vst [vmem:[#allocation152_spill] sm:$0xff] %v17761_v4  ;;  %vm20871_vm15 = vmmov %vm20858_vm1  ;;  %v6882_v50 = vrot.slane %v17306_v31, 1  ;;  %v6881_v11 = vrot.slane %v17303_v20, 1 }
 0x38e   : > { %13446 = vmatprep.mubr.msk.f32.mxu0 %vm20871_vm15, %v6170_v62  ;;  %vm20872_vm12 = vmmov %vm20869_vm8  ;;  %v20877_v62 = vld [vmem:[#allocation116_spill] sm:$0xff] }
 0x38f   : > { %v17766_v45 = vsel %vm20872_vm12, %v6879_v21, %v6880_v49  ;;  %vm20875_vm6 = vmmov %vm20858_vm1  ;;  %vm20878_vm8 = vnez %v20877_v62 }
 0x390   : > { %20873 = vst [vmem:[#allocation154_spill] sm:$0xff] %v17766_v45  ;;  %13493 = vmatprep.mubr.msk.f32.mxu1 %vm20875_vm6, %v17761_v4  ;;  %vm20876_vm1 = vmmov %vm20874_vm13  ;;  %v6945_v21 = vsel %vm20878_vm8, %v17766_v45, 0.0  ;;  %vm20881_vm13 = vnez %v20880_v60  ;;  %v6883_v45 = vrot.slane %v17319_v26, 1  ;;  %vm20894_vm8 = vcmp.lt.s32.totalorder %v20707_v3, 7 }
 0x391   : > { %v17778_v57 = vsel %vm20876_vm1, %v6104_v9, %v6105_v61  ;;  %vm20879_vm12 = vmmov %vm20875_vm6  ;;  %v6172_v15 = vsel %vm20881_vm13, %v17770_v6, 0.0  ;;  %v20147_v61 = vrot.slane %v17319_v26, 7 }
 0x392   : > { %13447 = vmatmul.mubr.msk.f32.gmra.mxu0 %vm20879_vm12, %v17778_v57  ;;  %vm20882_vm15 = vmmov %vm20875_vm6  ;;  %vm20883_vm6 = vcmp.lt.s32.totalorder %v20707_v3, 7 }
 0x393   : > { %13494 = vmatmul.mubr.msk.f32.gmra.mxu1 %vm20882_vm15, %v6945_v21  ;;  %v17791_v4 = vsel %vm20883_vm6, %v6880_v49, %v6881_v11  ;;  %vm20885_vm14 = vmmov %vm20879_vm12  ;;  %vm20887_vm15 = vcmp.lt.s32.totalorder %v20707_v3, 1  ;;  %v20891_v21 = vld [vmem:[#allocation123_spill] sm:$0xff] }
 0x394   : > { %20884 = vst [vmem:[#allocation68_spill] sm:$0xff] %v17791_v4  ;;  %13449 = vmatprep.mubr.msk.f32.mxu0 %vm20885_vm14, %v6172_v15  ;;  %vm20886_vm1 = vmmov %vm20883_vm6  ;;  %13496 = vmatprep.mubr.msk.f32.mxu1 %vm20879_vm12, %v17791_v4  ;;  %v17807_v49 = vsel %vm20887_vm15, %v6106_v8, %v20147_v61  ;;  %v20888_v15 = vld [vmem:[#allocation122_spill] sm:$0xff]  ;;  %v17820_v4 = vsel %vm20894_vm8, %v6882_v50, %v6883_v45  ;;  %v20896_v8 = vrot.slane %v17748_v12, 1 }
 0x395   : > { %v17796_v9 = vsel %vm20886_vm1, %v6881_v11, %v6882_v50  ;;  %vm20889_vm14 = vnez %v20888_v15  ;;  %vm20890_vm6 = vmmov %vm20879_vm12  ;;  %vm20892_vm1 = vnez %v20891_v21  ;;  %v20898_v15 = vld [vmem:[#allocation124_spill] sm:$0xff]  ;;  %v17839_v50 = vld [vmem:[%s19769_s7 + $0x1c] sm:$0xf] }
 0x396   : > { %v6947_v11 = vsel %vm20889_vm14, %v17796_v9, 0.0  ;;  %13450 = vmatmul.mubr.msk.f32.gmra.mxu0 %vm20890_vm6, %v17807_v49  ;;  %v7306_v62 = vsel %vm20892_vm1, %v17331_v47, 0.0  ;;  %vm20893_vm12 = vmmov %vm20890_vm6  ;;  %vm20899_vm14 = vnez %v20898_v15 }
 0x397   : > { %13497 = vmatmul.mubr.msk.f32.gmra.mxu1 %vm20893_vm12, %v6947_v11  ;;  %vm20895_vm13 = vmmov %vm20890_vm6  ;;  %v7318_v11 = vsel %vm20766_vm5, %v17509_v55, 0.0  ;;  %v21054_v55 = vld [vmem:[#allocation142_spill] sm:$0xff] }
 0x398   : > { %13504 = vmatprep.mubr.msk.f32.mxu0 %vm20895_vm13, %v7306_v62  ;;  %vm20897_vm15 = vmmov %vm20894_vm8  ;;  %13499 = vmatprep.mubr.msk.f32.mxu1 %vm20890_vm6, %v17820_v4  ;;  %vm20902_vm13 = vcmask 1043456   ;;  %v7312_v62 = vsel %vm20729_vm3, %v17412_v30, 0.0 }
 0x399   : > { %v17827_v61 = vsel %vm20897_vm15, %v6883_v45, %v20896_v8  ;;  %vm20900_vm12 = vmmov %vm20890_vm6  ;;  %vm20903_vm15 = vnez %v20711_v33  ;;  %v20925_v8 = vld [vmem:[#allocation95_spill] sm:$0xff] }
 0x39a   : > { %v6949_v47 = vsel %vm20899_vm14, %v17827_v61, 0.0  ;;  %13505 = vmatmul.mubr.msk.f32.vlgmr.msra.gmra.mxu0 %vm20900_vm12, %v17347_v54  ;;  %vm20901_vm8 = vmmov %vm20890_vm6  ;;  %v7308_v45 = vsel %vm20903_vm15, %v17335_v16, 0.0 }
 0x39b   : > { %13500 = vmatmul.mubr.msk.f32.gmra.mxu1 %vm20901_vm8, %v6949_v47  ;;  %13603 = vmatpush3.msk.msra.mxu0 %vm20902_vm13, %v17099_v46  ;;  %vm20904_vm14 = vmmov %vm20890_vm6  ;;  %vm20907_vm8 = vnez %v20716_v0  ;;  %v17860_v46 = vld [vmem:[%s19769_s7 + $0x20] sm:$0xf]  ;;  %v20927_v47 = vld [vmem:[#allocation132_spill] sm:$0xff] }
 0x39c   : > { %13554 = vmatprep.mubr.msk.f32.mxu1 %vm20890_vm6, %v17089_v23  ;;  %13507 = vmatprep.mubr.msk.f32.mxu0 %vm20904_vm14, %v7308_v45  ;;  %vm20905_vm12 = vmmov %vm20902_vm13  ;;  %v7310_v54 = vsel %vm20907_vm8, %v17374_v42, 0.0  ;;  %v20930_v45 = vld [vmem:[#allocation140_spill] sm:$0xff] }
 0x39d   : > { %13702 = vmatprep.subr.msk.mxu0 %vm20905_vm12, %v17839_v50  ;;  %vm20906_vm1 = vmmov %vm20890_vm6  ;;  %v8450_v28 = vsel %vm20766_vm5, %v20930_v45, 0.0 }
 0x39e   : > { %13508 = vmatmul.mubr.msk.f32.gmra.mxu0 %vm20906_vm1, %v17387_v58  ;;  %vm20908_vm13 = vmmov %vm20906_vm1 }
 0x39f   : > { %13555 = vmatmul.mubr.msk.f32.vlgmr.msra.gmra.mxu1 %vm20908_vm13, %v17081_v41  ;;  %vm20909_vm6 = vmmov %vm20906_vm1  ;;  %v7314_v41 = vsel %vm20742_vm4, %v17445_v35, 0.0 }
 0x3a0   : > { %13510 = vmatprep.mubr.msk.f32.mxu0 %vm20909_vm6, %v7310_v54  ;;  %vm20910_vm14 = vmmov %vm20905_vm12  ;;  %v21070_v54 = vld [vmem:[#allocation156_spill] sm:$0xff] }
 0x3a1   : > { %13653 = vmatpush3.msk.msra.mxu1 %vm20910_vm14, %v17364_v44  ;;  %vm20911_vm12 = vmmov %vm20906_vm1  ;;  %v7316_v44 = vsel %vm20754_vm2, %v17477_v53, 0.0 }
 0x3a2   : > { %13557 = vmatprep.mubr.msk.f32.mxu1 %vm20911_vm12, %v17125_v22  ;;  %vm20912_vm1 = vmmov %vm20910_vm14 }
 0x3a3   : > { %13752 = vmatprep.subr.msk.mxu1 %vm20912_vm1, %v17860_v46  ;;  %vm20913_vm8 = vmmov %vm20909_vm6 }
 0x3a4   : > { %13511 = vmatmul.mubr.msk.f32.gmra.mxu0 %vm20913_vm8, %v17421_v25  ;;  %vm20914_vm13 = vmmov %vm20909_vm6 }
 0x3a5   : > { %13558 = vmatmul.mubr.msk.f32.gmra.mxu1 %vm20914_vm13, %v17129_v2  ;;  %13513 = vmatprep.mubr.msk.f32.mxu0 %vm20909_vm6, %v7312_v62  ;;  %vm20915_vm14 = vmmov %vm20909_vm6  ;;  %v7320_v62 = vsel %vm20779_vm10, %v20930_v45, 0.0  ;;  %v20983_v2 = vld [vmem:[#allocation91_spill] sm:$0xff] }
 0x3a6   : > { %13560 = vmatprep.mubr.msk.f32.mxu1 %vm20915_vm14, %v17139_v40  ;;  %vm20916_vm12 = vmmov %vm20909_vm6  ;;  %v6108_v40 = vrot.slane %v17748_v12, 7  ;;  %v21062_v45 = vld [vmem:[#allocation151_spill] sm:$0xff] }
 0x3a7   : > { %vm20917_vm8 = vmmov %vm20909_vm6 }
 0x3a8   : > { %13514 = vmatmul.mubr.msk.f32.gmra.mxu0 %vm20916_vm12, %v17454_v37  ;;  %vm20918_vm1 = vmmov %vm20909_vm6 }
 0x3a9   : > { %13561 = vmatmul.mubr.msk.f32.gmra.mxu1 %vm20917_vm8, %v17149_v19  ;;  %13516 = vmatprep.mubr.msk.f32.mxu0 %vm20918_vm1, %v7314_v41  ;;  %vm20919_vm3 = vmmov %vm20918_vm1  ;;  %v20932_v41 = vld [vmem:[#allocation102_spill] sm:$0xff] }
 0x3aa   : > { %13563 = vmatprep.mubr.msk.f32.mxu1 %vm20919_vm3, %v17168_v34  ;;  %vm20920_vm13 = vmmov %vm20918_vm1  ;;  %v20949_v34 = vld [vmem:[#allocation66_spill] sm:$0xff] }
 0x3ab   : > { %vm20921_vm6 = vmmov %vm20918_vm1  ;;  %v20955_v19 = vld [vmem:[#allocation106_spill] sm:$0xff] }
 0x3ac   : > { %13517 = vmatmul.mubr.msk.f32.gmra.mxu0 %vm20920_vm13, %v17486_v51  ;;  %vm20922_vm14 = vmmov %vm20918_vm1 }
 0x3ad   : > { %13564 = vmatmul.mubr.msk.f32.gmra.mxu1 %vm20921_vm6, %v17165_v39  ;;  %13519 = vmatprep.mubr.msk.f32.mxu0 %vm20922_vm14, %v7316_v44  ;;  %vm20923_vm12 = vmmov %vm20918_vm1  ;;  %v20935_v44 = vld [vmem:[#allocation100_spill] sm:$0xff]  ;;  %v20946_v39 = vld [vmem:[#allocation121_spill] sm:$0xff] }
 0x3ae   : > { %13566 = vmatprep.mubr.msk.f32.mxu1 %vm20923_vm12, %v17186_v63  ;;  %vm20924_vm8 = vmmov %vm20918_vm1  ;;  %v20941_v63 = vld [vmem:[#allocation118_spill] sm:$0xff] }
 0x3af   : > { %vm20926_vm3 = vmmov %vm20918_vm1 }
 0x3b0   : > { %13520 = vmatmul.mubr.msk.f32.gmra.mxu0 %vm20924_vm8, %v17518_v13  ;;  %vm20928_vm13 = vmmov %vm20918_vm1 }
 0x3b1   : > { %13567 = vmatmul.mubr.msk.f32.gmra.mxu1 %vm20926_vm3, %v20925_v8  ;;  %13522 = vmatprep.mubr.msk.f32.mxu0 %vm20918_vm1, %v7318_v11  ;;  %vm20929_vm6 = vmmov %vm20918_vm1  ;;  %v20939_v8 = vld [vmem:[#allocation111_spill] sm:$0xff] }
 0x3b2   : > { %13569 = vmatprep.mubr.msk.f32.mxu1 %vm20928_vm13, %v20927_v47  ;;  %vm20933_vm14 = vmmov %vm20918_vm1  ;;  %v7322_v47 = vsel %vm20792_vm0, %v17573_v27, 0.0 }
 0x3b3   : > { %vm20934_vm12 = vmmov %vm20918_vm1 }
 0x3b4   : > { %13523 = vmatmul.mubr.msk.f32.gmra.mxu0 %vm20929_vm6, %v17550_v14  ;;  %vm20936_vm8 = vmmov %vm20918_vm1 }
 0x3b5   : > { %13570 = vmatmul.mubr.msk.f32.gmra.mxu1 %vm20933_vm14, %v20932_v41  ;;  %13525 = vmatprep.mubr.msk.f32.mxu0 %vm20934_vm12, %v7320_v62  ;;  %vm20937_vm3 = vmmov %vm20918_vm1  ;;  %v20944_v62 = vld [vmem:[#allocation149_spill] sm:$0xff] }
 0x3b6   : > { %13572 = vmatprep.mubr.msk.f32.mxu1 %vm20936_vm8, %v20935_v44  ;;  %vm20940_vm13 = vmmov %vm20918_vm1  ;;  %v7324_v41 = vsel %vm20804_vm7, %v20944_v62, 0.0  ;;  %v8454_v27 = vsel %vm20792_vm0, %v20944_v62, 0.0  ;;  %v21077_v62 = vld [vmem:[#allocation146_spill] sm:$0xff] }
 0x3b7   : > { %vm20942_vm6 = vmmov %vm20918_vm1  ;;  %v21085_v44 = vld [vmem:[#allocation130_spill] sm:$0xff] }
 0x3b8   : > { %13526 = vmatmul.mubr.msk.f32.gmra.mxu0 %vm20937_vm3, %v17582_v52  ;;  %vm20943_vm14 = vmmov %vm20918_vm1 }
 0x3b9   : > { %13573 = vmatmul.mubr.msk.f32.gmra.mxu1 %vm20918_vm1, %v20939_v8  ;;  %13528 = vmatprep.mubr.msk.f32.mxu0 %vm20940_vm13, %v7322_v47  ;;  %vm20947_vm12 = vmmov %vm20918_vm1  ;;  %v20952_v8 = vld [vmem:[#allocation103_spill] sm:$0xff]  ;;  %v21093_v47 = vld [vmem:[#allocation152_spill] sm:$0xff] }
 0x3ba   : > { %13575 = vmatprep.mubr.msk.f32.mxu1 %vm20942_vm6, %v20941_v63  ;;  %vm20948_vm8 = vmmov %vm20918_vm1  ;;  %v7326_v63 = vsel %vm20817_vm9, %v17637_v59, 0.0 }
 0x3bb   : > { %vm20950_vm3 = vmmov %vm20918_vm1 }
 0x3bc   : > { %13529 = vmatmul.mubr.msk.f32.gmra.mxu0 %vm20943_vm14, %v17614_v24  ;;  %vm20953_vm13 = vmmov %vm20918_vm1 }
 0x3bd   : > { %13576 = vmatmul.mubr.msk.f32.gmra.mxu1 %vm20947_vm12, %v20946_v39  ;;  %13531 = vmatprep.mubr.msk.f32.mxu0 %vm20948_vm8, %v7324_v41  ;;  %vm20954_vm6 = vmmov %vm20918_vm1  ;;  %v7328_v41 = vsel %vm20831_vm11, %v17671_v38, 0.0  ;;  %v20967_v39 = vld [vmem:[#allocation134_spill] sm:$0xff] }
 0x3be   : > { %13578 = vmatprep.mubr.msk.f32.mxu1 %vm20950_vm3, %v20949_v34  ;;  %vm20956_vm14 = vmmov %vm20918_vm1  ;;  %v20960_v34 = vld [vmem:[#allocation110_spill] sm:$0xff] }
 0x3bf   : > { %vm20957_vm12 = vmmov %vm20918_vm1 }
 0x3c0   : > { %13532 = vmatmul.mubr.msk.f32.gmra.mxu0 %vm20918_vm1, %v17646_v56  ;;  %vm20958_vm8 = vmmov %vm20918_vm1 }
 0x3c1   : > { %13579 = vmatmul.mubr.msk.f32.gmra.mxu1 %vm20953_vm13, %v20952_v8  ;;  %13534 = vmatprep.mubr.msk.f32.mxu0 %vm20954_vm6, %v7326_v63  ;;  %vm20959_vm3 = vmmov %vm20918_vm1  ;;  %v20962_v63 = vld [vmem:[#allocation108_spill] sm:$0xff] }
 0x3c2   : > { %13581 = vmatprep.mubr.msk.f32.mxu1 %vm20956_vm14, %v20955_v19  ;;  %vm20961_vm13 = vmmov %vm20918_vm1  ;;  %vm20963_vm6 = vnez %v20962_v63  ;;  %v20964_v8 = vld [vmem:[#allocation72_spill] sm:$0xff] }
 0x3c3   : > { %v7330_v19 = vsel %vm20963_vm6, %v17703_v17, 0.0  ;;  %vm20965_vm14 = vmmov %vm20918_vm1 }
 0x3c4   : > { %13535 = vmatmul.mubr.msk.f32.gmra.mxu0 %vm20957_vm12, %v17680_v7  ;;  %vm20966_vm12 = vmmov %vm20918_vm1 }
 0x3c5   : > { %13582 = vmatmul.mubr.msk.f32.gmra.mxu1 %vm20958_vm8, %v17265_v32  ;;  %13537 = vmatprep.mubr.msk.f32.mxu0 %vm20959_vm3, %v7328_v41  ;;  %vm20968_vm11 = vmmov %vm20918_vm1  ;;  %v20970_v41 = vld [vmem:[#allocation112_spill] sm:$0xff]  ;;  %v20972_v32 = vld [vmem:[#allocation133_spill] sm:$0xff] }
 0x3c6   : > { %13584 = vmatprep.mubr.msk.f32.mxu1 %vm20918_vm1, %v20960_v34  ;;  %vm20969_vm8 = vmmov %vm20918_vm1  ;;  %vm20971_vm3 = vnez %v20970_v41 }
 0x3c7   : > { %v7332_v34 = vsel %vm20971_vm3, %v17735_v48, 0.0  ;;  %vm20980_vm3 = vmmov %vm20918_vm1 }
 0x3c8   : > { %13538 = vmatmul.mubr.msk.f32.gmra.mxu0 %vm20961_vm13, %v17712_v5  ;;  %vm20973_vm13 = vmmov %vm20918_vm1 }
 0x3c9   : > { %13585 = vmatmul.mubr.msk.f32.gmra.mxu1 %vm20965_vm14, %v20964_v8  ;;  %13540 = vmatprep.mubr.msk.f32.mxu0 %vm20966_vm12, %v7330_v19  ;;  %v20974_v8 = vld [vmem:[#allocation113_spill] sm:$0xff]  ;;  %vm20975_vm14 = vmmov %vm20918_vm1 }
 0x3ca   : > { %13587 = vmatprep.mubr.msk.f32.mxu1 %vm20968_vm11, %v20967_v39  ;;  %vm20976_vm12 = vmmov %vm20918_vm1  ;;  %vm20977_vm11 = vnez %v20867_v10  ;;  %v20978_v39 = vld [vmem:[#allocation119_spill] sm:$0xff] }
 0x3cb   : > { %v7334_v19 = vsel %vm20977_vm11, %v17770_v6, 0.0  ;;  %vm20988_vm11 = vmmov %vm20980_vm3 }
 0x3cc   : > { %13541 = vmatmul.mubr.msk.f32.gmra.mxu0 %vm20969_vm8, %v17744_v1  ;;  %vm20979_vm8 = vmmov %vm20918_vm1 }
 0x3cd   : > { %13588 = vmatmul.mubr.msk.f32.gmra.mxu1 %vm20918_vm1, %v20972_v32  ;;  %13543 = vmatprep.mubr.msk.f32.mxu0 %vm20973_vm13, %v7332_v34  ;;  %v20981_v32 = vrot.slane %v17319_v26, 7  ;;  %vm20982_vm1 = vcmp.lt.s32.totalorder %v20707_v3, 1  ;;  %vm20984_vm13 = vmmov %vm20980_vm3 }
 0x3ce   : > { %13590 = vmatprep.mubr.msk.f32.mxu1 %vm20975_vm14, %v20974_v8  ;;  %vm20985_vm14 = vmmov %vm20980_vm3 }
 0x3cf   : > { %v17994_v34 = vsel %vm20982_vm1, %v20981_v32, %v6108_v40  ;;  %v20989_v32 = vld [vmem:[#allocation76_spill] sm:$0xff] }
 0x3d0   : > { %13544 = vmatmul.mubr.msk.f32.gmra.mxu0 %vm20976_vm12, %v17778_v57  ;;  %vm20986_vm12 = vnez %v20880_v60  ;;  %v20993_v60 = vld [vmem:[#allocation137_spill] sm:$0xff] }
 0x3d1   : > { %13591 = vmatmul.mubr.msk.f32.gmra.mxu1 %vm20979_vm8, %v20978_v39  ;;  %13546 = vmatprep.mubr.msk.f32.mxu0 %vm20980_vm3, %v7334_v19  ;;  %v7336_v8 = vsel %vm20986_vm12, %v17994_v34, 0.0  ;;  %vm20987_vm8 = vmmov %vm20980_vm3  ;;  %v20990_v19 = vrot.slane %v20989_v32, 7  ;;  %v21017_v39 = vld [vmem:[#allocation80_spill] sm:$0xff] }
 0x3d2   : > { %13593 = vmatprep.mubr.msk.f32.mxu1 %vm20984_vm13, %v20983_v2  ;;  %vm20991_vm13 = vmmov %vm20980_vm3 }
 0x3d3   : > { %v18012_v2 = vsel %vm20982_vm1, %v6108_v40, %v20990_v19  ;;  %vm20994_vm12 = vmmov %vm20980_vm3  ;;  %v21003_v19 = vld [vmem:[#allocation81_spill] sm:$0xff] }
 0x3d4   : > { %13547 = vmatmul.mubr.msk.f32.gmra.mxu0 %vm20985_vm14, %v17807_v49  ;;  %vm20992_vm14 = vmmov %vm20980_vm3 }
 0x3d5   : > { %13594 = vmatmul.mubr.msk.f32.gmra.mxu1 %vm20987_vm8, %v17303_v20  ;;  %13549 = vmatprep.mubr.msk.f32.mxu0 %vm20980_vm3, %v7336_v8  ;;  %vm20995_vm8 = vmmov %vm20980_vm3  ;;  %v20996_v8 = vld [vmem:[#allocation135_spill] sm:$0xff] }
 0x3d6   : > { %13596 = vmatprep.mubr.msk.f32.mxu1 %vm20988_vm11, %v17306_v31  ;;  %v20997_v31 = vld [vmem:[#allocation125_spill] sm:$0xff]  ;;  %vm20999_vm1 = vmmov %vm20980_vm3 }
 0x3d7   : > { %vm20998_vm11 = vnez %v20997_v31 }
 0x3d8   : > { %13550 = vmatmul.mubr.msk.f32.gmra.mxu0 %vm20991_vm13, %v18012_v2  ;;  %v8051_v20 = vsel %vm20998_vm11, %v20996_v8, 0.0  ;;  %vm21000_vm13 = vnez %v20891_v21  ;;  %v21006_v8 = vld [vmem:[#allocation127_spill] sm:$0xff] }
 0x3d9   : > { %13597 = vmatmul.mubr.msk.f32.gmra.mxu1 %vm20992_vm14, %v17319_v26  ;;  %13604 = vmatprep.mubr.msk.f32.mxu0 %vm20994_vm12, %v20993_v60  ;;  %v8438_v40 = vsel %vm21000_vm13, %v17335_v16, 0.0  ;;  %vm21001_vm14 = vcmask 1043456   ;;  %vm21002_vm12 = vmmov %vm20999_vm1  ;;  %v18036_v60 = vpop.f32.mrf.mxu1  ;;  %v21007_v26 = vld [vmem:[#allocation62_spill] sm:$0xff] }
 0x3da   : > { %13599 = vmatprep.mubr.msk.f32.mxu1 %vm20995_vm8, %v17748_v12  ;;  %vm21004_vm8 = vmmov %vm20999_vm1  ;;  %21005 = vst [vmem:[#allocation157_spill] sm:$0xff] %v18036_v60  ;;  %v21013_v60 = vld [vmem:[#allocation129_spill] sm:$0xff] }
 0x3db   : > { %vm21010_vm13 = vmmov %vm21004_vm8  ;;  %v18049_v16 = vpop.f32.mrf.mxu1 }
 0x3dc   : > { %13605 = vmatmul.mubr.msk.f32.vlgmr.msra.gmra.mxu0 %vm20980_vm3, %v8051_v20  ;;  %v18041_v20 = vld [vmem:[%s19771_s9 + $0x4] sm:$0xf]  ;;  %vm21008_vm3 = vnez %v21007_v26  ;;  %21011 = vst [vmem:[#allocation49_spill] sm:$0xff] %v18049_v16  ;;  %v21018_v26 = vld [vmem:[#allocation65_spill] sm:$0xff] }
 0x3dd   : > { %13600 = vmatmul.mubr.msk.f32.gmra.mxu1 %vm20999_vm1, %v20989_v32  ;;  %13703 = vmatpush3.msk.msra.mxu0 %vm21001_vm14, %v17839_v50  ;;  %v8053_v21 = vsel %vm21008_vm3, %v21006_v8, 0.0  ;;  %vm21009_vm1 = vmmov %vm21001_vm14  ;;  %v18054_v50 = vld [vmem:[%s19771_s9] sm:$0xf] }
 0x3de   : > { %13654 = vmatprep.mubr.msk.f32.mxu1 %vm21002_vm12, %v8438_v40  ;;  %13607 = vmatprep.mubr.msk.f32.mxu0 %vm21004_vm8, %v21003_v19  ;;  %vm21012_vm14 = vmmov %vm21004_vm8  ;;  %v8440_v40 = vsel %vm20903_vm15, %v17374_v42, 0.0  ;;  %v21024_v42 = vld [vmem:[#allocation139_spill] sm:$0xff] }
 0x3df   : > { %13802 = vmatprep.subr.msk.mxu0 %vm21009_vm1, %v18041_v20  ;;  %vm21014_vm12 = vmmov %vm21004_vm8 }
 0x3e0   : > { %13608 = vmatmul.mubr.msk.f32.gmra.mxu0 %vm21010_vm13, %v8053_v21  ;;  %vm21015_vm8 = vmmov %vm21009_vm1  ;;  %v18066_v21 = vpop.f32.mrf.mxu1  ;;  %vm21019_vm13 = vnez %v21018_v26  ;;  %v21027_v26 = vld [vmem:[#allocation70_spill] sm:$0xff] }
 0x3e1   : > { %13655 = vmatmul.mubr.msk.f32.vlgmr.msra.gmra.mxu1 %vm21012_vm14, %v17387_v58  ;;  %13610 = vmatprep.mubr.msk.f32.mxu0 %vm21014_vm12, %v21013_v60  ;;  %vm21016_vm1 = vmmov %vm21014_vm12  ;;  %v8055_v16 = vsel %vm21019_vm13, %v21017_v39, 0.0  ;;  %vm21023_vm12 = vnez %v20716_v0 }
 0x3e2   : > { %13753 = vmatpush3.msk.msra.mxu1 %vm21015_vm8, %v17860_v46  ;;  %13657 = vmatprep.mubr.msk.f32.mxu1 %vm21016_vm1, %v8440_v40  ;;  %vm21020_vm14 = vmmov %vm21015_vm8  ;;  %v8442_v33 = vsel %vm21023_vm12, %v17412_v30, 0.0  ;;  %v18081_v58 = vpop.f32.mrf.mxu1  ;;  %v21026_v40 = vld [vmem:[#allocation138_spill] sm:$0xff]  ;;  %vm21031_vm12 = vnez %v20728_v18  ;;  %v21039_v18 = vld [vmem:[#allocation131_spill] sm:$0xff] }
 0x3e3   : > { %13852 = vmatprep.subr.msk.mxu1 %vm21020_vm14, %v18054_v50  ;;  %vm21021_vm3 = vmmov %vm21016_vm1  ;;  %vm21028_vm14 = vnez %v21027_v26  ;;  %v8444_v0 = vsel %vm21031_vm12, %v17445_v35, 0.0  ;;  %v21032_v30 = vld [vmem:[#allocation126_spill] sm:$0xff]  ;;  %v21034_v26 = vld [vmem:[#allocation128_spill] sm:$0xff]  ;;  %v8446_v35 = vsel %vm20742_vm4, %v17477_v53, 0.0 }
 0x3e4   : > { %13611 = vmatmul.mubr.msk.f32.gmra.mxu0 %vm21021_vm3, %v8055_v16  ;;  %vm21022_vm15 = vmmov %vm21016_vm1  ;;  %v18084_v46 = vpop.f32.mrf.mxu1  ;;  %v8057_v16 = vsel %vm21028_vm14, %v21026_v40, 0.0  ;;  %v21035_v40 = vld [vmem:[#allocation77_spill] sm:$0xff]  ;;  %v21046_v53 = vld [vmem:[#allocation143_spill] sm:$0xff] }
 0x3e5   : > { %13658 = vmatmul.mubr.msk.f32.gmra.mxu1 %vm21022_vm15, %v17421_v25  ;;  %vm21025_vm8 = vmmov %vm21016_vm1  ;;  %vm21036_vm14 = vnez %v21035_v40  ;;  %v21042_v40 = vld [vmem:[#allocation141_spill] sm:$0xff] }
 0x3e6   : > { %13613 = vmatprep.mubr.msk.f32.mxu0 %vm21025_vm8, %v21024_v42  ;;  %13660 = vmatprep.mubr.msk.f32.mxu1 %vm21016_vm1, %v8442_v33  ;;  %vm21029_vm3 = vmmov %vm21016_vm1  ;;  %v18097_v25 = vpop.f32.mrf.mxu1 }
 0x3e7   : > { %vm21030_vm15 = vmmov %vm21016_vm1 }
 0x3e8   : > { %13614 = vmatmul.mubr.msk.f32.gmra.mxu0 %vm21029_vm3, %v8057_v16  ;;  %vm21033_vm8 = vmmov %vm21016_vm1  ;;  %v18100_v33 = vpop.f32.mrf.mxu1  ;;  %v8059_v16 = vsel %vm21036_vm14, %v21034_v26, 0.0  ;;  %v21043_v26 = vld [vmem:[#allocation83_spill] sm:$0xff] }
 0x3e9   : > { %13661 = vmatmul.mubr.msk.f32.gmra.mxu1 %vm21030_vm15, %v17454_v37  ;;  %13616 = vmatprep.mubr.msk.f32.mxu0 %vm21033_vm8, %v21032_v30  ;;  %vm21037_vm3 = vmmov %vm21016_vm1 }
 0x3ea   : > { %13663 = vmatprep.mubr.msk.f32.mxu1 %vm21016_vm1, %v8444_v0  ;;  %vm21038_vm15 = vmmov %vm21016_vm1  ;;  %v18113_v37 = vpop.f32.mrf.mxu1 }
 0x3eb   : > { %vm21040_vm12 = vmmov %vm21016_vm1 }
 0x3ec   : > { %13617 = vmatmul.mubr.msk.f32.gmra.mxu0 %vm21037_vm3, %v8059_v16  ;;  %vm21041_vm8 = vmmov %vm21016_vm1  ;;  %v18116_v0 = vpop.f32.mrf.mxu1  ;;  %vm21044_vm1 = vnez %v21043_v26  ;;  %v21050_v26 = vld [vmem:[#allocation145_spill] sm:$0xff] }
 0x3ed   : > { %13664 = vmatmul.mubr.msk.f32.gmra.mxu1 %vm21038_vm15, %v17486_v51  ;;  %13619 = vmatprep.mubr.msk.f32.mxu0 %vm21040_vm12, %v21039_v18  ;;  %v8061_v16 = vsel %vm21044_vm1, %v21042_v40, 0.0  ;;  %vm21045_vm15 = vmmov %vm21037_vm3  ;;  %v21051_v40 = vld [vmem:[#allocation87_spill] sm:$0xff] }
 0x3ee   : > { %13666 = vmatprep.mubr.msk.f32.mxu1 %vm21041_vm8, %v8446_v35  ;;  %vm21047_vm4 = vmmov %vm21037_vm3  ;;  %v18129_v51 = vpop.f32.mrf.mxu1  ;;  %vm21052_vm8 = vnez %v21051_v40 }
 0x3ef   : > { %vm21048_vm12 = vmmov %vm21037_vm3 }
 0x3f0   : > { %13620 = vmatmul.mubr.msk.f32.gmra.mxu0 %vm21037_vm3, %v8061_v16  ;;  %v18132_v35 = vpop.f32.mrf.mxu1  ;;  %v8063_v16 = vsel %vm21052_vm8, %v21050_v26, 0.0  ;;  %vm21055_vm2 = vmmov %vm21037_vm3 }
 0x3f1   : > { %13667 = vmatmul.mubr.msk.f32.gmra.mxu1 %vm21045_vm15, %v17518_v13  ;;  %13622 = vmatprep.mubr.msk.f32.mxu0 %vm21047_vm4, %v21046_v53  ;;  %21049 = vst [vmem:[#allocation60_spill] sm:$0xff] %v18132_v35  ;;  %vm21053_vm15 = vmmov %vm21037_vm3  ;;  %v21058_v35 = vld [vmem:[#allocation93_spill] sm:$0xff] }
 0x3f2   : > { %13669 = vmatprep.mubr.msk.f32.mxu1 %vm21048_vm12, %v8448_v36  ;;  %vm21056_vm4 = vmmov %vm21055_vm2  ;;  %v18146_v13 = vpop.f32.mrf.mxu1  ;;  %v21057_v36 = vld [vmem:[#allocation147_spill] sm:$0xff]  ;;  %vm21059_vm12 = vnez %v21058_v35  ;;  %v21066_v35 = vld [vmem:[#allocation97_spill] sm:$0xff] }
 0x3f3   : > { %v8065_v40 = vsel %vm21059_vm12, %v21057_v36, 0.0  ;;  %vm21060_vm8 = vmmov %vm21055_vm2 }
 0x3f4   : > { %13623 = vmatmul.mubr.msk.f32.gmra.mxu0 %vm21037_vm3, %v8063_v16  ;;  %vm21061_vm3 = vmmov %vm21055_vm2 }
 0x3f5   : > { %13670 = vmatmul.mubr.msk.f32.gmra.mxu1 %vm21053_vm15, %v17550_v14  ;;  %13625 = vmatprep.mubr.msk.f32.mxu0 %vm21055_vm2, %v21054_v55  ;;  %v18157_v14 = vpop.f32.mrf.mxu1  ;;  %vm21063_vm5 = vmmov %vm21055_vm2 }
 0x3f6   : > { %13672 = vmatprep.mubr.msk.f32.mxu1 %vm21056_vm4, %v8450_v28  ;;  %vm21064_vm15 = vmmov %vm21055_vm2  ;;  %v21065_v28 = vld [vmem:[#allocation153_spill] sm:$0xff]  ;;  %vm21067_vm2 = vnez %v21066_v35  ;;  %v21072_v35 = vld [vmem:[#allocation155_spill] sm:$0xff] }
 0x3f7   : > { %v18162_v16 = vpop.f32.mrf.mxu1  ;;  %vm21069_vm4 = vmmov %vm21061_vm3 }
 0x3f8   : > { %13626 = vmatmul.mubr.msk.f32.gmra.mxu0 %vm21060_vm8, %v8065_v40  ;;  %v8067_v40 = vsel %vm21067_vm2, %v21065_v28, 0.0  ;;  %vm21068_vm8 = vmmov %vm21061_vm3  ;;  %v21073_v28 = vld [vmem:[#allocation101_spill] sm:$0xff] }
 0x3f9   : > { %13673 = vmatmul.mubr.msk.f32.gmra.mxu1 %vm21061_vm3, %v17582_v52  ;;  %13628 = vmatprep.mubr.msk.f32.mxu0 %vm21063_vm5, %v21062_v45  ;;  %v18173_v52 = vpop.f32.mrf.mxu1  ;;  %vm21071_vm10 = vmmov %vm21061_vm3  ;;  %vm21074_vm5 = vnez %v21073_v28  ;;  %v21080_v28 = vld [vmem:[#allocation148_spill] sm:$0xff] }
 0x3fa   : > { %13675 = vmatprep.mubr.msk.f32.mxu1 %vm21064_vm15, %v8452_v43  ;;  %vm21075_vm15 = vmmov %vm21061_vm3 }
 0x3fb   : > { %v18178_v43 = vpop.f32.mrf.mxu1  ;;  %vm21078_vm0 = vmmov %vm21061_vm3 }
 0x3fc   : > { %13629 = vmatmul.mubr.msk.f32.gmra.mxu0 %vm21068_vm8, %v8067_v40  ;;  %v8069_v40 = vsel %vm21074_vm5, %v21072_v35, 0.0  ;;  %vm21076_vm8 = vmmov %vm21061_vm3  ;;  %v21081_v35 = vld [vmem:[#allocation105_spill] sm:$0xff] }
 0x3fd   : > { %13676 = vmatmul.mubr.msk.f32.gmra.mxu1 %vm21069_vm4, %v17614_v24  ;;  %13631 = vmatprep.mubr.msk.f32.mxu0 %vm21071_vm10, %v21070_v54  ;;  %v8456_v24 = vsel %vm20804_vm7, %v17637_v59, 0.0  ;;  %v18189_v11 = vpop.f32.mrf.mxu1  ;;  %vm21079_vm4 = vmmov %vm21078_vm0  ;;  %vm21082_vm10 = vnez %v21081_v35  ;;  %v8458_v59 = vsel %vm20817_vm9, %v17671_v38, 0.0  ;;  %v21088_v35 = vld [vmem:[#allocation150_spill] sm:$0xff]  ;;  %vm21092_vm9 = vnez %v20830_v29 }
 0x3fe   : > { %13678 = vmatprep.mubr.msk.f32.mxu1 %vm21061_vm3, %v8454_v27  ;;  %vm21083_vm3 = vmmov %vm21078_vm0  ;;  %v8460_v38 = vsel %vm21092_vm9, %v17703_v17, 0.0  ;;  %v8462_v29 = vsel %vm20963_vm6, %v17735_v48, 0.0  ;;  %vm21106_vm6 = vnez %v20970_v41  ;;  %v21114_v41 = vrot.slane %v17089_v23, 1 }
 0x3ff   : > { %v18194_v27 = vpop.f32.mrf.mxu1  ;;  %vm21086_vm7 = vmmov %vm21078_vm0  ;;  %v8464_v48 = vsel %vm21106_vm6, %v17770_v6, 0.0 }
 0x400   : > { %13632 = vmatmul.mubr.msk.f32.gmra.mxu0 %vm21075_vm15, %v8069_v40  ;;  %v8071_v40 = vsel %vm21082_vm10, %v21080_v28, 0.0  ;;  %vm21084_vm15 = vmmov %vm21078_vm0  ;;  %v21089_v28 = vld [vmem:[#allocation109_spill] sm:$0xff] }
 0x401   : > { %13679 = vmatmul.mubr.msk.f32.gmra.mxu1 %vm21076_vm8, %v17646_v56  ;;  %13634 = vmatprep.mubr.msk.f32.mxu0 %vm21078_vm0, %v21077_v62  ;;  %v18205_v56 = vpop.f32.mrf.mxu1  ;;  %vm21087_vm8 = vmmov %vm21078_vm0  ;;  %vm21090_vm0 = vnez %v21089_v28  ;;  %v21096_v28 = vld [vmem:[#allocation154_spill] sm:$0xff] }
 0x402   : > { %13681 = vmatprep.mubr.msk.f32.mxu1 %vm21079_vm4, %v8456_v24  ;;  %vm21091_vm4 = vmmov %vm21083_vm3 }
 0x403   : > { %v18210_v24 = vpop.f32.mrf.mxu1  ;;  %vm21101_vm9 = vmmov %vm21083_vm3 }
 0x404   : > { %13635 = vmatmul.mubr.msk.f32.gmra.mxu0 %vm21083_vm3, %v8071_v40  ;;  %v8073_v40 = vsel %vm21090_vm0, %v21088_v35, 0.0  ;;  %v21097_v35 = vld [vmem:[#allocation114_spill] sm:$0xff] }
 0x405   : > { %13682 = vmatmul.mubr.msk.f32.gmra.mxu1 %vm21084_vm15, %v17680_v7  ;;  %13637 = vmatprep.mubr.msk.f32.mxu0 %vm21086_vm7, %v21085_v44  ;;  %v18221_v7 = vpop.f32.mrf.mxu1  ;;  %vm21094_vm15 = vmmov %vm21083_vm3 }
 0x406   : > { %13684 = vmatprep.mubr.msk.f32.mxu1 %vm21087_vm8, %v8458_v59  ;;  %vm21095_vm7 = vmmov %vm21083_vm3  ;;  %vm21098_vm8 = vnez %v21097_v35  ;;  %v21103_v35 = vld [vmem:[#allocation116_spill] sm:$0xff] }
 0x407   : > { %v18226_v59 = vpop.f32.mrf.mxu1 }
 0x408   : > { %13638 = vmatmul.mubr.msk.f32.gmra.mxu0 %vm21091_vm4, %v8073_v40  ;;  %v8075_v40 = vsel %vm21098_vm8, %v21096_v28, 0.0  ;;  %vm21099_vm4 = vmmov %vm21083_vm3 }
 0x409   : > { %13685 = vmatmul.mubr.msk.f32.gmra.mxu1 %vm21083_vm3, %v17712_v5  ;;  %13640 = vmatprep.mubr.msk.f32.mxu0 %vm21094_vm15, %v21093_v47  ;;  %v18237_v17 = vpop.f32.mrf.mxu1  ;;  %v21100_v5 = vld [vmem:[#allocation68_spill] sm:$0xff]  ;;  %vm21102_vm15 = vmmov %vm21083_vm3 }
 0x40a   : > { %13687 = vmatprep.mubr.msk.f32.mxu1 %vm21095_vm7, %v8460_v38  ;;  %vm21104_vm7 = vnez %v21103_v35 }
 0x40b   : > { %v18242_v38 = vpop.f32.mrf.mxu1 }
 0x40c   : > { %13641 = vmatmul.mubr.msk.f32.gmra.mxu0 %vm21099_vm4, %v8075_v40  ;;  %v8077_v40 = vsel %vm21104_vm7, %v17796_v9, 0.0  ;;  %vm21105_vm4 = vmmov %vm21083_vm3 }
 0x40d   : > { %13688 = vmatmul.mubr.msk.f32.gmra.mxu1 %vm21083_vm3, %v17744_v1  ;;  %13643 = vmatprep.mubr.msk.f32.mxu0 %vm21101_vm9, %v21100_v5  ;;  %v6885_v1 = vrot.slane %v20989_v32, 1  ;;  %v18254_v63 = vpop.f32.mrf.mxu1  ;;  %vm21107_vm9 = vmmov %vm21083_vm3 }
 0x40e   : > { %13690 = vmatprep.mubr.msk.f32.mxu1 %vm21102_vm15, %v8462_v29  ;;  %vm21108_vm15 = vmmov %vm21083_vm3 }
 0x40f   : > { %v18259_v29 = vpop.f32.mrf.mxu1  ;;  %vm21111_vm7 = vmmov %vm21083_vm3 }
 0x410   : > { %13644 = vmatmul.mubr.msk.f32.gmra.mxu0 %vm21105_vm4, %v8077_v40  ;;  %v21109_v40 = vld [vmem:[#allocation122_spill] sm:$0xff] }
 0x411   : > { %13691 = vmatmul.mubr.msk.f32.gmra.mxu1 %vm21083_vm3, %v17778_v57  ;;  %13646 = vmatprep.mubr.msk.f32.mxu0 %vm21107_vm9, %v17820_v4  ;;  %vm21110_vm4 = vnez %v21109_v40  ;;  %v21112_v57 = vrot.slane %v17748_v12, 1  ;;  %vm21113_vm3 = vcmp.lt.s32.totalorder %v20707_v3, 7  ;;  %vm21116_vm9 = vmmov %vm21111_vm7 }
 0x412   : > { %13693 = vmatprep.mubr.msk.f32.mxu1 %vm21108_vm15, %v8464_v48  ;;  %v8079_v32 = vsel %vm21110_vm4, %v17827_v61, 0.0  ;;  %vm21115_vm6 = vmmov %vm21113_vm3  ;;  %vm21117_vm15 = vnez %v20867_v10  ;;  %vm21119_vm4 = vnez %v20898_v15  ;;  %v21123_v10 = vmov 0.0   ;;  %v21126_v15 = vld [vmem:[#allocation86_spill] sm:$0xff] }
 0x413   : > { %v18269_v6 = vsel %vm21113_vm3, %v21112_v57, %v6885_v1  ;;  %v18275_v35 = vsel %vm21115_vm6, %v6885_v1, %v21114_v41  ;;  %v8466_v48 = vsel %vm21117_vm15, %v17994_v34, 0.0  ;;  %vm21118_vm3 = vmmov %vm21111_vm7  ;;  %v21124_v34 = vld [vmem:[#allocation85_spill] sm:$0xff]  ;;  %v18307_v57 = vpop.f32.mrf.mxu0 }
 0x414   : > { %13647 = vmatmul.mubr.msk.f32.gmra.mxu0 %vm21111_vm7, %v8079_v32  ;;  %v18282_v32 = vpop.f32.mrf.mxu1  ;;  %v8081_v23 = vsel %vm21119_vm4, %v18275_v35, 0.0  ;;  %vm21120_vm6 = vmmov %vm21118_vm3  ;;  %21128 = vst [vmem:[#allocation61_spill] sm:$0xff] %v18307_v57  ;;  %v21134_v57 = vld [vmem:[#allocation94_spill] sm:$0xff] }
 0x415   : > { %13694 = vmatmul.mubr.msk.f32.gmra.mxu1 %vm21116_vm9, %v17807_v49  ;;  %13649 = vmatprep.mubr.msk.f32.mxu0 %vm21111_vm7, %v18269_v6  ;;  %vm21121_vm9 = vmmov %vm21118_vm3  ;;  %v13409_v41 = vpop.f32.mrf.mxu0 }
 0x416   : > { %13696 = vmatprep.mubr.msk.f32.mxu1 %vm21118_vm3, %v8466_v48  ;;  %v18291_v3 = vpop.f32.mrf.mxu1  ;;  %vm21122_vm15 = vmmov %vm21118_vm3  ;;  %v21130_v48 = vld [vmem:[#allocation89_spill] sm:$0xff] }
 0x417   : > { %vm21125_vm7 = vmmov %vm21118_vm3  ;;  %v6705_v31 = vpop.f32.mrf.mxu0 }
 0x418   : > { %13650 = vmatmul.mubr.msk.f32.gmra.mxu0 %vm21120_vm6, %v8081_v23  ;;  %v18298_v49 = vpop.f32.mrf.mxu1  ;;  %vm21127_vm4 = vmmov %vm21118_vm3  ;;  %vm21129_vm6 = vcmask 1043456  }
 0x419   : > { %13697 = vmatmul.mubr.msk.f32.gmra.mxu1 %vm21121_vm9, %v18012_v2  ;;  %13704 = vmatprep.mubr.msk.f32.mxu0 %vm21122_vm15, %v17125_v22  ;;  %v9215_v2 = vsel %vm20998_vm11, %v21006_v8, 0.0  ;;  %vm21131_vm9 = vmmov %vm21118_vm3 }
 0x41a   : > { %13699 = vmatprep.mubr.f32.mxu1 %v21123_v10  ;;  %v18302_v1 = vpop.f32.mrf.mxu1  ;;  %vm21132_vm15 = vmmov %vm21118_vm3 }
 0x41b   : > { %vm21139_vm11 = vmmov %vm21129_vm6 }
 0x41c   : > { %13705 = vmatmul.mubr.msk.f32.vlgmr.msra.gmra.mxu0 %vm21125_vm7, %v21124_v34  ;;  %v18313_v22 = vpop.f32.mrf.mxu1  ;;  %v21133_v34 = vld [vmem:[#allocation49_spill] sm:$0xff]  ;;  %vm21135_vm7 = vmmov %vm21118_vm3 }
 0x41d   : > { %13700 = vmatmul.mubr.f32.gmra.mxu1 %v21123_v10  ;;  %13707 = vmatprep.mubr.msk.f32.mxu0 %vm21127_vm4, %v21126_v15  ;;  %v6711_v15 = vadd.f32 %v13409_v41, %v21133_v34  ;;  %vm21138_vm4 = vmmov %vm21118_vm3  ;;  %v13412_v34 = vpop.f32.mrf.mxu0 }
 0x41e   : > { %13754 = vmatprep.mubr.msk.f32.mxu1 %vm21118_vm3, %v21003_v19  ;;  %13803 = vmatpush3.msk.msra.mxu0 %vm21129_vm6, %v18041_v20  ;;  %v13456_v23 = vpop.f32.mrf.mxu1  ;;  %v21136_v19 = vld [vmem:[#allocation144_spill] sm:$0xff]  ;;  %vm21144_vm6 = vmmov %vm21138_vm4 }
 0x41f   : > { %v18325_v20 = vadd.f32 %v13456_v23, %v21136_v19  ;;  %v21146_v19 = vld [vmem:[#allocation99_spill] sm:$0xff] }
 0x420   : > { %13708 = vmatmul.mubr.msk.f32.gmra.mxu0 %vm21131_vm9, %v21130_v48  ;;  %v18331_v8 = vpop.f32.mrf.mxu1  ;;  %v6706_v48 = vadd.f32 %v6705_v31, %v18066_v21  ;;  %vm21145_vm9 = vmmov %vm21138_vm4  ;;  %v6715_v21 = vpop.f32.mrf.mxu0 }
 0x421   : > { %13755 = vmatmul.mubr.msk.f32.vlgmr.msra.gmra.mxu1 %vm21132_vm15, %v9215_v2  ;;  %13710 = vmatprep.mubr.msk.f32.mxu0 %vm21135_vm7, %v21134_v57  ;;  %21137 = vst [vmem:[#allocation64_spill] sm:$0xff] %v18325_v20  ;;  %21140 = vst [vmem:[#allocation67_spill] sm:$0xff] %v18331_v8  ;;  %v21141_v2 = vld [vmem:[#allocation62_spill] sm:$0xff] }
 0x422   : > { %13757 = vmatprep.mubr.msk.f32.mxu1 %vm21138_vm4, %v21013_v60  ;;  %13853 = vmatpush3.msk.msra.mxu1 %vm21139_vm11, %v18054_v50  ;;  %vm21142_vm3 = vnez %v21141_v2  ;;  %v21143_v57 = vld [vmem:[#allocation90_spill] sm:$0xff]  ;;  %v13459_v23 = vpop.f32.mrf.mxu1  ;;  %v6721_v60 = vadd.f32 %v13412_v34, %v18081_v58  ;;  %vm21147_vm15 = vmmov %vm21138_vm4  ;;  %v13415_v8 = vpop.f32.mrf.mxu0  ;;  %v21151_v58 = vld [vmem:[#allocation95_spill] sm:$0xff] }
 0x423   : > { %v9217_v41 = vsel %vm21142_vm3, %v21017_v39, 0.0  ;;  %v18343_v50 = vadd.f32 %v13459_v23, %v6711_v15  ;;  %vm21148_vm7 = vmmov %vm21138_vm4  ;;  %v6716_v39 = vadd.f32 %v6715_v21, %v18084_v46  ;;  %v6731_v15 = vadd.f32 %v13415_v8, %v18097_v25  ;;  %v21156_v21 = vld [vmem:[#allocation128_spill] sm:$0xff]  ;;  %v21159_v25 = vld [vmem:[#allocation102_spill] sm:$0xff] }
 0x424   : > { %13711 = vmatmul.mubr.msk.f32.gmra.mxu0 %vm21144_vm6, %v21143_v57  ;;  %v7125_v31 = vpop.f32.mrf.mxu1  ;;  %v21149_v57 = vld [vmem:[#allocation138_spill] sm:$0xff]  ;;  %vm21152_vm11 = vmmov %vm21138_vm4  ;;  %v6725_v46 = vpop.f32.mrf.mxu0 }
 0x425   : > { %13758 = vmatmul.mubr.msk.f32.gmra.mxu1 %vm21145_vm9, %v9217_v41  ;;  %13713 = vmatprep.mubr.msk.f32.mxu0 %vm21147_vm15, %v21146_v19  ;;  %v18348_v2 = vadd.f32 %v7125_v31, %v6706_v48  ;;  %v9219_v41 = vsel %vm21019_vm13, %v21149_v57, 0.0  ;;  %vm21154_vm3 = vmmov %vm21138_vm4  ;;  %v6726_v48 = vadd.f32 %v6725_v46, %v18100_v33  ;;  %v21157_v31 = vld [vmem:[#allocation70_spill] sm:$0xff]  ;;  %v21165_v46 = vld [vmem:[#allocation32_spill] sm:$0xff] }
 0x426   : > { %13760 = vmatprep.mubr.msk.f32.mxu1 %vm21148_vm7, %v21024_v42  ;;  %v13462_v34 = vpop.f32.mrf.mxu1  ;;  %v21153_v42 = vld [vmem:[#allocation132_spill] sm:$0xff]  ;;  %vm21155_vm6 = vmmov %vm21154_vm3  ;;  %vm21158_vm13 = vnez %v21157_v31 }
 0x427   : > { %v18359_v23 = vadd.f32 %v13462_v34, %v6721_v60  ;;  %v9221_v57 = vsel %vm21158_vm13, %v21156_v21, 0.0  ;;  %vm21160_vm9 = vmmov %vm21154_vm3  ;;  %v21175_v21 = vld [vmem:[#allocation60_spill] sm:$0xff] }
 0x428   : > { %13714 = vmatmul.mubr.msk.f32.gmra.mxu0 %vm21138_vm4, %v21151_v58  ;;  %v7135_v20 = vpop.f32.mrf.mxu1  ;;  %vm21161_vm15 = vmmov %vm21154_vm3 }
 0x429   : > { %13761 = vmatmul.mubr.msk.f32.gmra.mxu1 %vm21152_vm11, %v9219_v41  ;;  %13716 = vmatprep.mubr.msk.f32.mxu0 %vm21154_vm3, %v21153_v42  ;;  %v18364_v19 = vadd.f32 %v7135_v20, %v6716_v39  ;;  %v13418_v41 = vpop.f32.mrf.mxu0  ;;  %vm21163_vm7 = vmmov %vm21154_vm3  ;;  %v18382_v39 = vld [vmem:[%s19764_s2] ss:$0 sm:$0xff] }
 0x42a   : > { %13763 = vmatprep.mubr.msk.f32.mxu1 %vm21155_vm6, %v21032_v30  ;;  %v13465_v8 = vpop.f32.mrf.mxu1  ;;  %v6741_v60 = vadd.f32 %v13418_v41, %v18113_v37  ;;  %v21162_v30 = vld [vmem:[#allocation100_spill] sm:$0xff]  ;;  %vm21164_vm4 = vmmov %vm21154_vm3  ;;  %v18387_v37 = vadd.f32 %v18382_v39, %v21165_v46 }
 0x42b   : > { %v18375_v58 = vadd.f32 %v13465_v8, %v6731_v15  ;;  %v6735_v33 = vpop.f32.mrf.mxu0  ;;  %v21166_v15 = vld [vmem:[#allocation141_spill] sm:$0xff]  ;;  %vm21169_vm11 = vmmov %vm21154_vm3 }
 0x42c   : > { %13717 = vmatmul.mubr.msk.f32.gmra.mxu0 %vm21160_vm9, %v21159_v25  ;;  %v7145_v34 = vpop.f32.mrf.mxu1  ;;  %v6736_v42 = vadd.f32 %v6735_v33, %v18116_v0  ;;  %v9223_v31 = vsel %vm21036_vm14, %v21166_v15, 0.0  ;;  %v21170_v0 = vld [vmem:[#allocation118_spill] sm:$0xff]  ;;  %vm21171_vm6 = vmmov %vm21154_vm3 }
 0x42d   : > { %13764 = vmatmul.mubr.msk.f32.gmra.mxu1 %vm21161_vm15, %v9221_v57  ;;  %13719 = vmatprep.mubr.msk.f32.mxu0 %vm21163_vm7, %v21162_v30  ;;  %v18389_v20 = vadd.f32 %v7145_v34, %v6726_v48  ;;  %v21168_v57 = vld [vmem:[#allocation111_spill] sm:$0xff]  ;;  %vm21172_vm13 = vmmov %vm21154_vm3  ;;  %v21173_v30 = vld [vmem:[#allocation30_spill] sm:$0xff] }
 0x42e   : > { %13766 = vmatprep.mubr.msk.f32.mxu1 %vm21164_vm4, %v21039_v18  ;;  %v13421_v18 = vpop.f32.mrf.mxu0  ;;  %v13468_v41 = vpop.f32.mrf.mxu1  ;;  %v18406_v33 = vadd.f32 %v21173_v30, %v18382_v39  ;;  %v21174_v34 = vld [vmem:[#allocation38_spill] sm:$0xff]  ;;  %vm21179_vm14 = vmmov %vm21154_vm3 }
 0x42f   : > { %v6751_v25 = vadd.f32 %v13421_v18, %v18129_v51  ;;  %v18400_v8 = vadd.f32 %v13468_v41, %v6741_v60  ;;  %v18410_v46 = vadd.f32 %v18382_v39, %v21174_v34  ;;  %v21178_v41 = vld [vmem:[#allocation121_spill] sm:$0xff]  ;;  %vm21180_vm9 = vmmov %vm21154_vm3  ;;  %v21181_v34 = vld [vmem:[#allocation66_spill] sm:$0xff] }
 0x430   : > { %13720 = vmatmul.mubr.msk.f32.gmra.mxu0 %vm21169_vm11, %v21168_v57  ;;  %v6745_v48 = vpop.f32.mrf.mxu0  ;;  %v7155_v15 = vpop.f32.mrf.mxu1  ;;  %vm21182_vm15 = vmmov %vm21154_vm3 }
 0x431   : > { %13767 = vmatmul.mubr.msk.f32.gmra.mxu1 %vm21154_vm3, %v9223_v31  ;;  %13722 = vmatprep.mubr.msk.f32.mxu0 %vm21171_vm6, %v21170_v0  ;;  %v6746_v51 = vadd.f32 %v6745_v48, %v21175_v21  ;;  %v11171_v31 = vmul.f32 -1.442695, %v18387_v37  ;;  %v18414_v18 = vadd.f32 %v7155_v15, %v6736_v42  ;;  %vm21184_vm7 = vmmov %vm21154_vm3  ;;  %v21185_v15 = vld [vmem:[#allocation35_spill] sm:$0xff]  ;;  %v11173_v60 = vmul.f32 -1.442695, %v18410_v46 }
 0x432   : > { %13769 = vmatprep.mubr.msk.f32.mxu1 %vm21172_vm13, %v21046_v53  ;;  %v9225_v53 = vsel %vm21044_vm1, %v21050_v26, 0.0  ;;  %v13424_v57 = vpop.f32.mrf.mxu0  ;;  %v13471_v0 = vpop.f32.mrf.mxu1  ;;  %v11172_v26 = vmul.f32 -1.442695, %v18406_v33  ;;  %v18432_v21 = vadd.f32 %v21185_v15, %v18382_v39  ;;  %vm21191_vm4 = vmmov %vm21154_vm3 }
 0x433   : > { %21176 = vst [vmem:[#allocation73_spill] sm:$0xff] %v18414_v18  ;;  %v6761_v30 = vadd.f32 %v13424_v57, %v18146_v13  ;;  %v18425_v48 = vadd.f32 %v13471_v0, %v6751_v25  ;;  %14219 = vpow2.f32 %v11171_v31  ;;  %v21186_v57 = vld [vmem:[#allocation44_spill] sm:$0xff]  ;;  %vm21192_vm11 = vmmov %vm21154_vm3  ;;  %v21193_v31 = vld [vmem:[#allocation106_spill] sm:$0xff] }
 0x434   : > { %13723 = vmatmul.mubr.msk.f32.gmra.mxu0 %vm21179_vm14, %v21178_v41  ;;  %v6755_v42 = vpop.f32.mrf.mxu0  ;;  %v18438_v25 = vadd.f32 %v18382_v39, %v21186_v57  ;;  %vm21196_vm6 = vmmov %vm21154_vm3  ;;  %14221 = vpow2.f32 %v11172_v26  ;;  %v21197_v57 = vld [vmem:[#allocation51_spill] sm:$0xff]  ;;  %v21219_v18 = vld [vmem:[#allocation4_spill] sm:$0xff] }
 0x435   : > { %13770 = vmatmul.mubr.msk.f32.gmra.mxu1 %vm21180_vm9, %v9225_v53  ;;  %13725 = vmatprep.mubr.msk.f32.mxu0 %vm21182_vm15, %v21181_v34  ;;  %21183 = vst [vmem:[#allocation79_spill] sm:$0xff] %v18425_v48  ;;  %v7165_v53 = vpop.f32.mrf.mxu1  ;;  %v6756_v13 = vadd.f32 %v6755_v42, %v18157_v14  ;;  %v21190_v48 = vld [vmem:[#allocation103_spill] sm:$0xff]  ;;  %v21194_v42 = vld [vmem:[#allocation41_spill] sm:$0xff]  ;;  %14223 = vpow2.f32 %v11173_v60  ;;  %vm21202_vm13 = vmmov %vm21154_vm3 }
 0x436   : > { %13772 = vmatprep.mubr.msk.f32.mxu1 %vm21184_vm7, %v21054_v55  ;;  %v18440_v41 = vadd.f32 %v7165_v53, %v6746_v51  ;;  %v21188_v55 = vld [vmem:[#allocation87_spill] sm:$0xff]  ;;  %v13427_v34 = vpop.f32.mrf.mxu0  ;;  %v18453_v51 = vadd.f32 %v21194_v42, %v18382_v39  ;;  %vm21205_vm14 = vmmov %vm21154_vm3  ;;  %v21206_v60 = vld [vmem:[#allocation110_spill] sm:$0xff] }
 0x437   : > { %vm21189_vm1 = vnez %v21188_v55  ;;  %v13474_v15 = vpop.f32.mrf.mxu1  ;;  %v6771_v14 = vadd.f32 %v13427_v34, %v18162_v16  ;;  %v18462_v55 = vadd.f32 %v18382_v39, %v21197_v57  ;;  %v11175_v34 = vmul.f32 -1.442695, %v18438_v25  ;;  %v21201_v26 = vld [vmem:[#allocation107_spill] sm:$0xff]  ;;  %vm21207_vm9 = vmmov %vm21154_vm3 }
 0x438   : > { %21187 = vst [vmem:[#allocation104_spill] sm:$0xff] %v18440_v41  ;;  %v9227_v0 = vsel %vm21189_vm1, %v21057_v36, 0.0  ;;  %13726 = vmatmul.mubr.msk.f32.gmra.mxu0 %vm21191_vm4, %v21190_v48  ;;  %v18455_v53 = vadd.f32 %v13474_v15, %v6761_v30  ;;  %v6765_v36 = vpop.f32.mrf.mxu0  ;;  %v11174_v48 = vmul.f32 -1.442695, %v18432_v21  ;;  %v21199_v30 = vld [vmem:[#allocation153_spill] sm:$0xff]  ;;  %v21212_v15 = vld [vmem:[#allocation47_spill] sm:$0xff]  ;;  %vm21218_vm15 = vmmov %vm21154_vm3 }
 0x439   : > { %13773 = vmatmul.mubr.msk.f32.gmra.mxu1 %vm21192_vm11, %v9227_v0  ;;  %13728 = vmatprep.mubr.msk.f32.mxu0 %vm21154_vm3, %v21193_v31  ;;  %v7175_v16 = vpop.f32.mrf.mxu1  ;;  %v6766_v0 = vadd.f32 %v6765_v36, %v18173_v52  ;;  %vm21221_vm7 = vmmov %vm21154_vm3 }
 0x43a   : > { %21195 = vst [vmem:[#allocation115_spill] sm:$0xff] %v18455_v53  ;;  %13775 = vmatprep.mubr.msk.f32.mxu1 %vm21196_vm6, %v21062_v45  ;;  %v18466_v31 = vadd.f32 %v7175_v16, %v6756_v13  ;;  %v9229_v45 = vsel %vm21059_vm12, %v21199_v30, 0.0  ;;  %v13430_v42 = vpop.f32.mrf.mxu0  ;;  %v21203_v53 = vld [vmem:[#allocation2_spill] sm:$0xff]  ;;  %v21208_v13 = vld [vmem:[#allocation3_spill] sm:$0xff]  ;;  %v11176_v16 = vmul.f32 -1.442695, %v18453_v51  ;;  %vm21211_vm12 = vmmov %vm21154_vm3  ;;  %14225 = vpow2.f32 %v11174_v48 }
 0x43b   : > { %v18475_v57 = vadd.f32 %v21203_v53, %v18382_v39  ;;  %v13477_v41 = vpop.f32.mrf.mxu1  ;;  %v6781_v52 = vadd.f32 %v13430_v42, %v18178_v43  ;;  %v18483_v36 = vadd.f32 %v18382_v39, %v21208_v13  ;;  %v11177_v43 = vmul.f32 -1.442695, %v18462_v55  ;;  %vm21223_vm1 = vmmov %vm21154_vm3 }
 0x43c   : > { %21198 = vst [vmem:[#allocation120_spill] sm:$0xff] %v18466_v31  ;;  %13729 = vmatmul.mubr.msk.f32.gmra.mxu0 %vm21202_vm13, %v21201_v26  ;;  %v18486_v30 = vadd.f32 %v13477_v41, %v6771_v14  ;;  %v6775_v53 = vpop.f32.mrf.mxu0  ;;  %14227 = vpow2.f32 %v11175_v34  ;;  %v21215_v14 = vld [vmem:[#allocation155_spill] sm:$0xff]  ;;  %v21217_v31 = vld [vmem:[#allocation72_spill] sm:$0xff]  ;;  %vm21232_vm4 = vmmov %vm21223_vm1 }
 0x43d   : > { %21204 = vst [vmem:[#allocation123_spill] sm:$0xff] %v18475_v57  ;;  %13776 = vmatmul.mubr.msk.f32.gmra.mxu1 %vm21205_vm14, %v9229_v45  ;;  %13731 = vmatprep.mubr.msk.f32.mxu0 %vm21207_vm9, %v21206_v60  ;;  %21209 = vst [vmem:[#allocation124_spill] sm:$0xff] %v18483_v36  ;;  %v18492_v45 = vadd.f32 %v21212_v15, %v18382_v39  ;;  %v7185_v42 = vpop.f32.mrf.mxu1  ;;  %v6776_v26 = vadd.f32 %v6775_v53, %v18189_v11  ;;  %v21213_v60 = vld [vmem:[#allocation57_spill] sm:$0xff]  ;;  %v9231_v48 = vsel %vm21067_vm2, %v21215_v14, 0.0  ;;  %v21222_v53 = vld [vmem:[#allocation134_spill] sm:$0xff]  ;;  %vm21250_vm9 = vcmask 1043456  }
 0x43e   : > { %21210 = vst [vmem:[#allocation140_spill] sm:$0xff] %v18486_v30  ;;  %13778 = vmatprep.mubr.msk.f32.mxu1 %vm21211_vm12, %v21070_v54  ;;  %v18498_v13 = vadd.f32 %v18382_v39, %v21213_v60  ;;  %v18500_v41 = vadd.f32 %v7185_v42, %v6766_v0  ;;  %v13433_v30 = vpop.f32.mrf.mxu0  ;;  %v11188_v15 = vmul.f32 -1.442695, %v18475_v57  ;;  %v18510_v11 = vadd.f32 %v21219_v18, %v18382_v39  ;;  %v21224_v60 = vld [vmem:[#allocation54_spill] sm:$0xff]  ;;  %vm21226_vm2 = vmmov %vm21223_vm1 }
 0x43f   : > { %v13480_v34 = vpop.f32.mrf.mxu1  ;;  %v6791_v0 = vadd.f32 %v13433_v30, %v18194_v27  ;;  %v11187_v42 = vmul.f32 -1.442695, %v18483_v36  ;;  %v18519_v14 = vadd.f32 %v21224_v60, %v18382_v39  ;;  %14229 = vpow2.f32 %v11176_v16  ;;  %v21231_v16 = vld [vmem:[#allocation133_spill] sm:$0xff]  ;;  %vm21234_vm11 = vmmov %vm21223_vm1 }
 0x440   : > { %21214 = vst [vmem:[#allocation84_spill] sm:$0xff] %v18500_v41  ;;  %13732 = vmatmul.mubr.msk.f32.gmra.mxu0 %vm21218_vm15, %v21217_v31  ;;  %21220 = vst [vmem:[#allocation92_spill] sm:$0xff] %v18510_v11  ;;  %v18521_v31 = vadd.f32 %v13480_v34, %v6781_v52  ;;  %v6785_v18 = vpop.f32.mrf.mxu0  ;;  %v11178_v54 = vmul.f32 -1.442695, %v18492_v45  ;;  %14231 = vpow2.f32 %v11177_v43  ;;  %v11179_v60 = vmul.f32 -1.442695, %v18498_v13  ;;  %v14220_v36 = vpop.eup %14219 }
 0x441   : > { %13779 = vmatmul.mubr.msk.f32.gmra.mxu1 %vm21221_vm7, %v9231_v48  ;;  %13734 = vmatprep.mubr.msk.f32.mxu0 %vm21223_vm1, %v21222_v53  ;;  %v21227_v48 = vld [vmem:[#allocation69_spill] sm:$0xff]  ;;  %v7195_v30 = vpop.f32.mrf.mxu1  ;;  %v6786_v53 = vadd.f32 %v6785_v18, %v18205_v56  ;;  %v21229_v52 = vld [vmem:[#allocation148_spill] sm:$0xff]  ;;  %14233 = vpow2.f32 %v11188_v15  ;;  %v21233_v41 = vld [vmem:[#allocation63_spill] sm:$0xff] }
 0x442   : > { %21225 = vst [vmem:[#allocation149_spill] sm:$0xff] %v18521_v31  ;;  %13781 = vmatprep.mubr.msk.f32.mxu1 %vm21226_vm2, %v21077_v62  ;;  %v18528_v27 = vadd.f32 %v18382_v39, %v21227_v48  ;;  %v18532_v57 = vadd.f32 %v7195_v30, %v6776_v26  ;;  %v9233_v62 = vsel %vm21074_vm5, %v21229_v52, 0.0  ;;  %v13436_v31 = vpop.f32.mrf.mxu0  ;;  %v11190_v48 = vmul.f32 -1.442695, %v18510_v11  ;;  %v21235_v18 = vld [vmem:[#allocation113_spill] sm:$0xff]  ;;  %vm21236_vm3 = vmmov %vm21223_vm1  ;;  %v21237_v52 = vld [vmem:[#allocation78_spill] sm:$0xff] }
 0x443   : > { %v18542_v56 = vadd.f32 %v21233_v41, %v18382_v39  ;;  %v13483_v43 = vpop.f32.mrf.mxu1  ;;  %v6801_v26 = vadd.f32 %v13436_v31, %v18210_v24  ;;  %14235 = vpow2.f32 %v11187_v42  ;;  %v11180_v30 = vmul.f32 -1.442695, %v18519_v14  ;;  %vm21239_vm5 = vmmov %vm21223_vm1  ;;  %v21240_v11 = vld [vmem:[#allocation150_spill] sm:$0xff] }
 0x444   : > { %21228 = vst [vmem:[#allocation96_spill] sm:$0xff] %v18532_v57  ;;  %13735 = vmatmul.mubr.msk.f32.gmra.mxu0 %vm21232_vm4, %v21231_v16  ;;  %v18551_v15 = vadd.f32 %v18382_v39, %v21237_v52  ;;  %v18553_v34 = vadd.f32 %v13483_v43, %v6791_v0  ;;  %v6795_v41 = vpop.f32.mrf.mxu0  ;;  %14237 = vpow2.f32 %v11178_v54  ;;  %v14222_v16 = vpop.eup %14221  ;;  %v849_v42 = vadd.f32 1.0, %v14220_v36  ;;  %vm21243_vm6 = vmmov %vm21223_vm1  ;;  %v21244_v57 = vld [vmem:[#allocation74_spill] sm:$0xff] }
 0x445   : > { %13782 = vmatmul.mubr.msk.f32.gmra.mxu1 %vm21234_vm11, %v9233_v62  ;;  %13737 = vmatprep.mubr.msk.f32.mxu0 %vm21236_vm3, %v21235_v18  ;;  %v11181_v62 = vmul.f32 -1.442695, %v18528_v27  ;;  %v7205_v24 = vpop.f32.mrf.mxu1  ;;  %v6796_v31 = vadd.f32 %v6795_v41, %v18221_v7  ;;  %14239 = vpow2.f32 %v11179_v60  ;;  %v9235_v0 = vsel %vm21082_vm10, %v21240_v11, 0.0  ;;  %vm21245_vm13 = vmmov %vm21223_vm1  ;;  %v21246_v60 = vld [vmem:[#allocation91_spill] sm:$0xff] }
 0x446   : > { %21238 = vst [vmem:[#allocation98_spill] sm:$0xff] %v18553_v34  ;;  %13784 = vmatprep.mubr.msk.f32.mxu1 %vm21239_vm5, %v21085_v44  ;;  %v18559_v18 = vadd.f32 %v7205_v24, %v6786_v53  ;;  %v13439_v43 = vpop.f32.mrf.mxu0  ;;  %v21242_v34 = vld [vmem:[#allocation119_spill] sm:$0xff]  ;;  %v14224_v44 = vpop.eup %14223  ;;  %14241 = vpow2.f32 %v11190_v48  ;;  %v11182_v54 = vmul.f32 -1.442695, %v18542_v56  ;;  %v18569_v7 = vadd.f32 %v21244_v57, %v18382_v39  ;;  %vm21247_vm14 = vmmov %vm21223_vm1 }
 0x447   : > { %v13486_v36 = vpop.f32.mrf.mxu1  ;;  %v6811_v53 = vadd.f32 %v13439_v43, %v18226_v59  ;;  %14243 = vpow2.f32 %v11180_v30  ;;  %v11183_v11 = vmul.f32 -1.442695, %v18551_v15  ;;  %vm21249_vm10 = vmmov %vm21223_vm1  ;;  %v18587_v59 = vld [vmem:[%s19771_s9 + $0x8] sm:$0xf]  ;;  %v850_v24 = vadd.f32 1.0, %v14222_v16  ;;  %v21255_v16 = vld [vmem:[#allocation5_spill] sm:$0xff] }
 0x448   : > { %13738 = vmatmul.mubr.msk.f32.gmra.mxu0 %vm21243_vm6, %v21242_v34  ;;  %v21248_v34 = vld [vmem:[#allocation88_spill] sm:$0xff]  ;;  %v18580_v41 = vadd.f32 %v13486_v36, %v6801_v26  ;;  %v6805_v57 = vpop.f32.mrf.mxu0  ;;  %14245 = vpow2.f32 %v11181_v62  ;;  %13902 = vmatprep.subr.msk.mxu0 %vm21250_vm9, %v18587_v59  ;;  %v851_v26 = vadd.f32 1.0, %v14224_v44  ;;  %v9237_v36 = vsel %vm21090_vm0, %v21096_v28, 0.0  ;;  %vm21254_vm12 = vmmov %vm21223_vm1  ;;  %v21257_v44 = vld [vmem:[#allocation75_spill] sm:$0xff] }
 0x449   : > { %13785 = vmatmul.mubr.msk.f32.gmra.mxu1 %vm21245_vm13, %v9235_v0  ;;  %13740 = vmatprep.mubr.msk.f32.mxu0 %vm21247_vm14, %v21246_v60  ;;  %v18578_v48 = vadd.f32 %v18382_v39, %v21248_v34  ;;  %v7215_v30 = vpop.f32.mrf.mxu1  ;;  %v6806_v52 = vadd.f32 %v6805_v57, %v18237_v17  ;;  %v14226_v0 = vpop.eup %14225  ;;  %14247 = vrcp.f32 %v849_v42  ;;  %v21253_v34 = vld [vmem:[#allocation71_spill] sm:$0xff]  ;;  %v18601_v17 = vadd.f32 %v18382_v39, %v21255_v16  ;;  %vm21256_vm15 = vmmov %vm21223_vm1  ;;  %v21259_v28 = vld [vmem:[#allocation82_spill] sm:$0xff] }
 0x44a   : > { %13787 = vmatprep.mubr.msk.f32.mxu1 %vm21249_vm10, %v21093_v47  ;;  %v18592_v43 = vadd.f32 %v7215_v30, %v6796_v31  ;;  %v13442_v60 = vpop.f32.mrf.mxu0  ;;  %v14228_v62 = vpop.eup %14227  ;;  %14249 = vpow2.f32 %v11182_v54  ;;  %v11184_v57 = vmul.f32 -1.442695, %v18569_v7  ;;  %vm21258_vm7 = vmmov %vm21223_vm1  ;;  %v18610_v30 = vadd.f32 %v21259_v28, %v18382_v39 }
 0x44b   : > { %v13489_v42 = vpop.f32.mrf.mxu1  ;;  %v6821_v31 = vadd.f32 %v13442_v60, %v18242_v38  ;;  %14251 = vpow2.f32 %v11183_v11  ;;  %v11185_v47 = vmul.f32 -1.442695, %v18578_v48  ;;  %vm21261_vm0 = vmmov %vm21223_vm1  ;;  %v853_v11 = vadd.f32 1.0, %v14228_v62 }
 0x44c   : > { %21251 = vst [vmem:[#allocation108_spill] sm:$0xff] %v18592_v43  ;;  %13741 = vmatmul.mubr.msk.f32.gmra.mxu0 %vm21254_vm12, %v21253_v34  ;;  %v18613_v34 = vadd.f32 %v13489_v42, %v6811_v53  ;;  %v6815_v54 = vpop.f32.mrf.mxu0  ;;  %14253 = vrcp.f32 %v850_v24  ;;  %v14230_v60 = vpop.eup %14229  ;;  %v9239_v43 = vsel %vm21098_vm8, %v17796_v9, 0.0  ;;  %v21263_v42 = vld [vmem:[#allocation136_spill] sm:$0xff]  ;;  %vm21264_vm1 = vmmov %vm21261_vm0  ;;  %v11189_v24 = vmul.f32 -1.442695, %v18601_v17 }
 0x44d   : > { %13788 = vmatmul.mubr.msk.f32.gmra.mxu1 %vm21256_vm15, %v9237_v36  ;;  %13743 = vmatprep.mubr.msk.f32.mxu0 %vm21258_vm7, %v21257_v44  ;;  %v852_v36 = vadd.f32 1.0, %v14226_v0  ;;  %v7225_v16 = vpop.f32.mrf.mxu1  ;;  %v6816_v38 = vadd.f32 %v6815_v54, %v18254_v63  ;;  %14255 = vrcp.f32 %v851_v26  ;;  %v21265_v0 = vld [vmem:[#allocation6_spill] sm:$0xff]  ;;  %vm21266_vm2 = vmmov %vm21261_vm0  ;;  %v21268_v26 = vld [vmem:[#allocation7_spill] sm:$0xff]  ;;  %v11186_v54 = vmul.f32 -1.442695, %v18610_v30 }
 0x44e   : > { %21260 = vst [vmem:[#allocation112_spill] sm:$0xff] %v18613_v34  ;;  %13790 = vmatprep.mubr.msk.f32.mxu1 %vm21261_vm0, %v21100_v5  ;;  %v18618_v44 = vadd.f32 %v7225_v16, %v6806_v52  ;;  %v13445_v53 = vpop.f32.mrf.mxu0  ;;  %v14232_v5 = vpop.eup %14231  ;;  %v18628_v34 = vadd.f32 %v21265_v0, %v18382_v39  ;;  %14257 = vpow2.f32 %v11184_v57  ;;  %vm21267_vm4 = vmmov %vm21261_vm0  ;;  %v18638_v62 = vadd.f32 %v18382_v39, %v21268_v26  ;;  %v21273_v26 = vld [vmem:[#allocation76_spill] sm:$0xff] }
 0x44f   : > { %v13492_v63 = vpop.f32.mrf.mxu1  ;;  %v6831_v52 = vadd.f32 %v13445_v53, %v18259_v29  ;;  %v18634_v9 = vpop.eup %14233  ;;  %14259 = vpow2.f32 %v11185_v47  ;;  %vm21269_vm8 = vmmov %vm21261_vm0  ;;  %v854_v29 = vadd.f32 1.0, %v14230_v60  ;;  %v21271_v47 = vld [vmem:[#allocation116_spill] sm:$0xff]  ;;  %vm21279_vm13 = vnez %v21109_v40 }
 0x450   : > { %13744 = vmatmul.mubr.msk.f32.gmra.mxu0 %vm21264_vm1, %v21263_v42  ;;  %v18641_v16 = vadd.f32 %v13492_v63, %v6821_v31  ;;  %v18645_v57 = vpop.eup %14235  ;;  %14261 = vrcp.f32 %v852_v36  ;;  %v855_v42 = vadd.f32 1.0, %v14232_v5  ;;  %vm21272_vm11 = vnez %v21271_v47  ;;  %vm21274_vm3 = vmmov %vm21261_vm0 }
 0x451   : > { %13791 = vmatmul.mubr.msk.f32.gmra.mxu1 %vm21266_vm2, %v9239_v43  ;;  %13746 = vmatprep.mubr.msk.f32.mxu0 %vm21267_vm4, %v17748_v12  ;;  %v6825_v43 = vpop.f32.mrf.mxu0  ;;  %v7235_v12 = vpop.f32.mrf.mxu1  ;;  %14263 = vrcp.f32 %v853_v11  ;;  %v9241_v31 = vsel %vm21272_vm11, %v17827_v61, 0.0  ;;  %v11192_v36 = vmul.f32 -1.442695, %v18628_v34  ;;  %vm21275_vm5 = vmmov %vm21261_vm0  ;;  %v11191_v11 = vmul.f32 -1.442695, %v18638_v62  ;;  %v21276_v61 = vld [vmem:[#allocation8_spill] sm:$0xff] }
 0x452   : > { %13793 = vmatprep.mubr.msk.f32.mxu1 %vm21269_vm8, %v17820_v4  ;;  %v6826_v28 = vadd.f32 %v6825_v43, %v18282_v32  ;;  %v14238_v53 = vpop.eup %14237  ;;  %v18648_v0 = vadd.f32 %v7235_v12, %v6816_v38  ;;  %14265 = vpow2.f32 %v11189_v24  ;;  %v18664_v5 = vadd.f32 %v21276_v61, %v18382_v39  ;;  %vm21277_vm6 = vmmov %vm21261_vm0 }
 0x453   : > { %v13448_v63 = vpop.f32.mrf.mxu0  ;;  %v14240_v4 = vpop.eup %14239  ;;  %14267 = vpow2.f32 %v11186_v54  ;;  %vm21281_vm14 = vmmov %vm21261_vm0  ;;  %vm21297_vm7 = vcmask 1043456  }
 0x454   : > { %21270 = vst [vmem:[#allocation137_spill] sm:$0xff] %v18648_v0  ;;  %13747 = vmatmul.mubr.msk.f32.gmra.mxu0 %vm21274_vm3, %v21273_v26  ;;  %v13495_v60 = vpop.f32.mrf.mxu1  ;;  %v6841_v32 = vadd.f32 %v13448_v63, %v18291_v3  ;;  %v18659_v38 = vpop.eup %14241  ;;  %14269 = vrcp.f32 %v854_v29  ;;  %v856_v3 = vadd.f32 1.0, %v14238_v53  ;;  %v857_v26 = vadd.f32 1.0, %v14240_v4  ;;  %vm21283_vm10 = vmmov %vm21261_vm0 }
 0x455   : > { %13794 = vmatmul.mubr.msk.f32.gmra.mxu1 %vm21275_vm5, %v9241_v31  ;;  %13749 = vmatprep.mubr.f32.mxu0 %v21123_v10  ;;  %v18666_v43 = vadd.f32 %v13495_v60, %v6831_v52  ;;  %v6835_v24 = vpop.f32.mrf.mxu0  ;;  %v14244_v12 = vpop.eup %14243  ;;  %14271 = vrcp.f32 %v855_v42  ;;  %v9243_v52 = vsel %vm21279_vm13, %v18275_v35, 0.0  ;;  %v21280_v60 = vld [vmem:[#allocation9_spill] sm:$0xff]  ;;  %v11194_v35 = vmul.f32 -1.442695, %v18664_v5  ;;  %vm21288_vm9 = vmmov %vm21261_vm0 }
 0x456   : > { %13796 = vmatprep.mubr.msk.f32.mxu1 %vm21277_vm6, %v18269_v6  ;;  %v7245_v47 = vpop.f32.mrf.mxu1  ;;  %v6836_v31 = vadd.f32 %v6835_v24, %v18298_v49  ;;  %v14246_v63 = vpop.eup %14245  ;;  %14273 = vpow2.f32 %v11192_v36  ;;  %v18679_v29 = vadd.f32 %v18382_v39, %v21280_v60  ;;  %v858_v61 = vadd.f32 1.0, %v14244_v12  ;;  %v21285_v24 = vld [vmem:[#allocation157_spill] sm:$0xff]  ;;  %vm21293_vm12 = vmmov %vm21261_vm0 }
 0x457   : > { %v18671_v0 = vadd.f32 %v7245_v47, %v6826_v28  ;;  %v13451_v54 = vpop.f32.mrf.mxu0  ;;  %v14248_v6 = vpop.eup %14247  ;;  %v21282_v28 = vld [vmem:[#allocation18_spill] sm:$0xff]  ;;  %14275 = vpow2.f32 %v11191_v11  ;;  %v21286_v47 = vld [vmem:[#allocation61_spill] sm:$0xff]  ;;  %v859_v11 = vadd.f32 1.0, %v14246_v63  ;;  %vm21296_vm15 = vmmov %vm21261_vm0 }
 0x458   : > { %13750 = vmatmul.mubr.f32.gmra.mxu0 %v21123_v10  ;;  %v13498_v53 = vpop.f32.mrf.mxu1  ;;  %v6851_v49 = vadd.f32 %v13451_v54, %v18302_v1  ;;  %v14250_v42 = vpop.eup %14249  ;;  %14277 = vrcp.f32 %v856_v3  ;;  %v11193_v12 = vmul.f32 -1.442695, %v18679_v29  ;;  %v21289_v3 = vld [vmem:[#allocation10_spill] sm:$0xff]  ;;  %vm21299_vm1 = vmmov %vm21261_vm0 }
 0x459   : > { %21278 = vst [vmem:[#allocation135_spill] sm:$0xff] %v18671_v0  ;;  %13797 = vmatmul.mubr.msk.f32.gmra.mxu1 %vm21281_vm14, %v9243_v52  ;;  %13804 = vmatprep.mubr.msk.f32.mxu0 %vm21283_vm10, %v21282_v28  ;;  %v18686_v40 = vadd.f32 %v13498_v53, %v6841_v32  ;;  %v6845_v4 = vpop.f32.mrf.mxu0  ;;  %v14252_v36 = vpop.eup %14251  ;;  %v6696_v52 = vadd.f32 %v21286_v47, %v21285_v24  ;;  %14279 = vrcp.f32 %v857_v26  ;;  %v21287_v53 = vld [vmem:[#allocation19_spill] sm:$0xff]  ;;  %vm21301_vm2 = vmmov %vm21261_vm0 }
 0x45a   : > { %13799 = vmatprep.mubr.f32.mxu1 %v21123_v10  ;;  %v7255_v60 = vpop.f32.mrf.mxu1  ;;  %v6846_v1 = vadd.f32 %v6845_v4, %v18313_v22  ;;  %v14254_v54 = vpop.eup %14253  ;;  %v945_v28 = vmul.f32 %v14248_v6, %v18387_v37  ;;  %v18700_v24 = vadd.f32 %v21289_v3, %v18382_v39  ;;  %v21290_v47 = vld [vmem:[#allocation67_spill] sm:$0xff]  ;;  %v21291_v37 = vld [vmem:[#allocation64_spill] sm:$0xff]  ;;  %v866_v6 = vadd.f32 1.0, %v18634_v9  ;;  %vm21303_vm4 = vmmov %vm21261_vm0 }
 0x45b   : > { %21284 = vst [vmem:[#allocation125_spill] sm:$0xff] %v18686_v40  ;;  %v18693_v0 = vadd.f32 %v7255_v60, %v6836_v31  ;;  %v13506_v32 = vpop.f32.mrf.mxu0  ;;  %v14256_v40 = vpop.eup %14255  ;;  %v7274_v22 = vadd.f32 %v21290_v47, %v6696_v52  ;;  %v21292_v31 = vld [vmem:[#allocation20_spill] sm:$0xff]  ;;  %14281 = vpow2.f32 %v11194_v35  ;;  %v21294_v60 = vld [vmem:[#allocation11_spill] sm:$0xff]  ;;  %v860_v47 = vadd.f32 1.0, %v14250_v42  ;;  %vm21305_vm8 = vmmov %vm21261_vm0 }
 0x45c   : > { %13805 = vmatmul.mubr.msk.f32.vlgmr.msra.gmra.mxu0 %vm21288_vm9, %v21287_v53  ;;  %v13501_v4 = vpop.f32.mrf.mxu1  ;;  %v7663_v63 = vadd.f32 %v13506_v32, %v21291_v37  ;;  %v14258_v26 = vpop.eup %14257  ;;  %v18710_v53 = vadd.f32 %v18382_v39, %v21294_v60  ;;  %v946_v32 = vmul.f32 %v14254_v54, %v18406_v33  ;;  %14283 = vrcp.f32 %v858_v61  ;;  %v21300_v61 = vld [vmem:[#allocation22_spill] sm:$0xff]  ;;  %vm21307_vm11 = vmmov %vm21261_vm0 }
 0x45d   : > { %13800 = vmatmul.mubr.f32.gmra.mxu1 %v21123_v10  ;;  %13807 = vmatprep.mubr.msk.f32.mxu0 %vm21293_vm12, %v21292_v31  ;;  %v18712_v3 = vadd.f32 %v13501_v4, %v6851_v49  ;;  %v7503_v52 = vpop.f32.mrf.mxu0  ;;  %v14260_v10 = vpop.eup %14259  ;;  %v947_v31 = vmul.f32 %v14256_v40, %v18410_v46  ;;  %14285 = vrcp.f32 %v859_v11  ;;  %v861_v60 = vadd.f32 1.0, %v14252_v36  ;;  %v21302_v36 = vld [vmem:[#allocation13_spill] sm:$0xff]  ;;  %vm21309_vm3 = vmmov %vm21261_vm0 }
 0x45e   : > { %13854 = vmatprep.mubr.msk.f32.mxu1 %vm21296_vm15, %v945_v28  ;;  %13903 = vmatpush3.msk.msra.mxu0 %vm21297_vm7, %v18587_v59  ;;  %v7265_v37 = vpop.f32.mrf.mxu1  ;;  %v7662_v9 = vadd.f32 %v7503_v52, %v7274_v22  ;;  %v14262_v35 = vpop.eup %14261  ;;  %v21298_v28 = vld [vmem:[#allocation21_spill] sm:$0xff]  ;;  %14287 = vpow2.f32 %v11193_v12  ;;  %v11196_v59 = vmul.f32 -1.442695, %v18700_v24  ;;  %v11195_v40 = vmul.f32 -1.442695, %v18710_v53  ;;  %vm21310_vm5 = vmmov %vm21261_vm0 }
 0x45f   : > { %21295 = vst [vmem:[#allocation81_spill] sm:$0xff] %v18712_v3  ;;  %v18719_v49 = vadd.f32 %v7265_v37, %v6846_v1  ;;  %v13509_v4 = vpop.f32.mrf.mxu0  ;;  %v14264_v3 = vpop.eup %14263  ;;  %14289 = vrcp.f32 %v866_v6  ;;  %v18731_v1 = vadd.f32 %v18382_v39, %v21302_v36  ;;  %v948_v22 = vmul.f32 %v14262_v35, %v18432_v21  ;;  %v21306_v21 = vld [vmem:[#allocation12_spill] sm:$0xff]  ;;  %vm21313_vm6 = vmmov %vm21261_vm0 }
 0x460   : > { %13808 = vmatmul.mubr.msk.f32.gmra.mxu0 %vm21261_vm0, %v21298_v28  ;;  %v13556_v33 = vpop.f32.mrf.mxu1  ;;  %v7665_v42 = vadd.f32 %v13509_v4, %v18343_v50  ;;  %v14266_v46 = vpop.eup %14265  ;;  %14291 = vrcp.f32 %v860_v47  ;;  %v862_v50 = vadd.f32 1.0, %v14258_v26  ;;  %v949_v37 = vmul.f32 %v14264_v3, %v18438_v25  ;;  %v21308_v3 = vld [vmem:[#allocation24_spill] sm:$0xff]  ;;  %vm21314_vm13 = vmmov %vm21261_vm0 }
 0x461   : > { %13855 = vmatmul.mubr.msk.f32.vlgmr.msra.gmra.mxu1 %vm21299_vm1, %v946_v32  ;;  %13810 = vmatprep.mubr.msk.f32.mxu0 %vm21301_vm2, %v21300_v61  ;;  %v18733_v54 = vadd.f32 %v13556_v33, %v7663_v63  ;;  %v7513_v11 = vpop.f32.mrf.mxu0  ;;  %v14268_v12 = vpop.eup %14267  ;;  %14293 = vrcp.f32 %v861_v60  ;;  %v863_v4 = vadd.f32 1.0, %v14260_v10  ;;  %v21304_v33 = vld [vmem:[#allocation23_spill] sm:$0xff]  ;;  %v865_v61 = vadd.f32 1.0, %v18645_v57  ;;  %vm21316_vm14 = vmmov %vm21261_vm0 }
 0x462   : > { %13857 = vmatprep.mubr.msk.f32.mxu1 %vm21303_vm4, %v947_v31  ;;  %v7859_v52 = vpop.f32.mrf.mxu1  ;;  %v7664_v32 = vadd.f32 %v7513_v11, %v18348_v2  ;;  %v14270_v6 = vpop.eup %14269  ;;  %14295 = vpow2.f32 %v11196_v59  ;;  %v18746_v26 = vadd.f32 %v21306_v21, %v18382_v39  ;;  %v11197_v47 = vmul.f32 -1.442695, %v18731_v1  ;;  %vm21318_vm10 = vmmov %vm21261_vm0 }
 0x463   : > { %v18739_v28 = vadd.f32 %v7859_v52, %v7662_v9  ;;  %v14272_v31 = vpop.eup %14271  ;;  %14297 = vpow2.f32 %v11195_v40  ;;  %v950_v60 = vmul.f32 %v14270_v6, %v18453_v51  ;;  %v864_v59 = vadd.f32 1.0, %v14268_v12  ;;  %v21315_v6 = vld [vmem:[#allocation27_spill] sm:$0xff]  ;;  %vm21321_vm9 = vmmov %vm21261_vm0 }
 0x464   : > { %v13512_v63 = vpop.f32.mrf.mxu0  ;;  %13811 = vmatmul.mubr.msk.f32.gmra.mxu0 %vm21305_vm8, %v21304_v33  ;;  %v18752_v10 = vpop.eup %14273  ;;  %14299 = vrcp.f32 %v862_v50  ;;  %v951_v40 = vmul.f32 %v14272_v31, %v18462_v55  ;;  %v11198_v12 = vmul.f32 -1.442695, %v18746_v26  ;;  %v867_v55 = vadd.f32 1.0, %v14266_v46  ;;  %vm21322_vm12 = vmmov %vm21261_vm0 }
 0x465   : > { %v13559_v2 = vpop.f32.mrf.mxu1  ;;  %13858 = vmatmul.mubr.msk.f32.gmra.mxu1 %vm21307_vm11, %v948_v22  ;;  %v7667_v25 = vadd.f32 %v13512_v63, %v18359_v23  ;;  %13813 = vmatprep.mubr.msk.f32.mxu0 %vm21309_vm3, %v21308_v3  ;;  %v14276_v35 = vpop.eup %14275  ;;  %v21311_v22 = vld [vmem:[#allocation15_spill] sm:$0xff]  ;;  %14301 = vrcp.f32 %v863_v4  ;;  %v21312_v63 = vld [vmem:[#allocation25_spill] sm:$0xff]  ;;  %vm21324_vm15 = vmmov %vm21261_vm0 }
 0x466   : > { %v18755_v9 = vadd.f32 %v13559_v2, %v7665_v42  ;;  %13860 = vmatprep.mubr.msk.f32.mxu1 %vm21310_vm5, %v949_v37  ;;  %v7523_v57 = vpop.f32.mrf.mxu0  ;;  %v14278_v11 = vpop.eup %14277  ;;  %v18762_v52 = vadd.f32 %v18382_v39, %v21311_v22  ;;  %14303 = vrcp.f32 %v865_v61  ;;  %v21320_v22 = vld [vmem:[#allocation26_spill] sm:$0xff]  ;;  %vm21325_vm7 = vmmov %vm21261_vm0 }
 0x467   : > { %v7869_v36 = vpop.f32.mrf.mxu1  ;;  %v7666_v23 = vadd.f32 %v7523_v57, %v18364_v19  ;;  %v14280_v51 = vpop.eup %14279  ;;  %14305 = vpow2.f32 %v11197_v47  ;;  %v952_v21 = vmul.f32 %v14278_v11, %v18492_v45  ;;  %v21319_v47 = vld [vmem:[#allocation17_spill] sm:$0xff]  ;;  %vm21329_vm1 = vmmov %vm21261_vm0 }
 0x468   : > { %v18765_v42 = vadd.f32 %v7869_v36, %v7664_v32  ;;  %v13515_v37 = vpop.f32.mrf.mxu0  ;;  %13814 = vmatmul.mubr.msk.f32.gmra.mxu0 %vm21313_vm6, %v21312_v63  ;;  %v21317_v32 = vld [vmem:[#allocation14_spill] sm:$0xff]  ;;  %v18781_v61 = vpop.eup %14281  ;;  %14307 = vrcp.f32 %v864_v59  ;;  %v11199_v46 = vmul.f32 -1.442695, %v18762_v52  ;;  %v18788_v57 = vadd.f32 %v18382_v39, %v21319_v47  ;;  %vm21332_vm2 = vmmov %vm21261_vm0 }
 0x469   : > { %v13562_v50 = vpop.f32.mrf.mxu1  ;;  %13861 = vmatmul.mubr.msk.f32.gmra.mxu1 %vm21314_vm13, %v950_v60  ;;  %v7669_v19 = vadd.f32 %v13515_v37, %v18375_v58  ;;  %13816 = vmatprep.mubr.msk.f32.mxu0 %vm21316_vm14, %v21315_v6  ;;  %v18776_v4 = vadd.f32 %v21317_v32, %v18382_v39  ;;  %v14284_v3 = vpop.eup %14283  ;;  %v868_v59 = vadd.f32 1.0, %v18659_v38  ;;  %14309 = vpow2.f32 %v11198_v12  ;;  %v21326_v12 = vld [vmem:[#allocation16_spill] sm:$0xff]  ;;  %v21327_v32 = vld [vmem:[#allocation73_spill] sm:$0xff]  ;;  %vm21333_vm4 = vmmov %vm21261_vm0 }
 0x46a   : > { %v18778_v33 = vadd.f32 %v13562_v50, %v7667_v25  ;;  %13863 = vmatprep.mubr.msk.f32.mxu1 %vm21318_vm10, %v951_v40  ;;  %v7533_v31 = vpop.f32.mrf.mxu0  ;;  %v953_v25 = vmul.f32 %v14280_v51, %v18498_v13  ;;  %v14286_v45 = vpop.eup %14285  ;;  %v21323_v40 = vld [vmem:[#allocation29_spill] sm:$0xff]  ;;  %14311 = vrcp.f32 %v867_v55  ;;  %v869_v38 = vadd.f32 1.0, %v14276_v35  ;;  %vm21336_vm8 = vmmov %vm21261_vm0 }
 0x46b   : > { %v7879_v58 = vpop.f32.mrf.mxu1  ;;  %v7668_v2 = vadd.f32 %v7533_v31, %v18389_v20  ;;  %v14288_v37 = vpop.eup %14287  ;;  %v11200_v13 = vmul.f32 -1.442695, %v18776_v4  ;;  %v18808_v50 = vadd.f32 %v21326_v12, %v18382_v39  ;;  %14313 = vpow2.f32 %v11199_v46  ;;  %vm21337_vm11 = vmmov %vm21261_vm0 }
 0x46c   : > { %v18791_v60 = vadd.f32 %v7879_v58, %v7666_v23  ;;  %v13518_v36 = vpop.f32.mrf.mxu0  ;;  %13817 = vmatmul.mubr.msk.f32.gmra.mxu0 %vm21321_vm9, %v21320_v22  ;;  %v18804_v51 = vpop.eup %14289  ;;  %14315 = vrcp.f32 %v868_v59  ;;  %v870_v22 = vadd.f32 1.0, %v18752_v10  ;;  %vm21340_vm3 = vmmov %vm21261_vm0 }
 0x46d   : > { %v13565_v20 = vpop.f32.mrf.mxu1  ;;  %13864 = vmatmul.mubr.msk.f32.gmra.mxu1 %vm21322_vm12, %v952_v21  ;;  %v7671_v11 = vadd.f32 %v13518_v36, %v18400_v8  ;;  %13819 = vmatprep.mubr.msk.f32.mxu0 %vm21324_vm15, %v21323_v40  ;;  %v954_v8 = vmul.f32 %v14284_v3, %v18519_v14  ;;  %v14292_v55 = vpop.eup %14291  ;;  %v955_v21 = vmul.f32 %v14286_v45, %v18528_v27  ;;  %v21330_v14 = vld [vmem:[#allocation79_spill] sm:$0xff]  ;;  %14317 = vpow2.f32 %v11200_v13  ;;  %vm21341_vm5 = vmmov %vm21261_vm0 }
 0x46e   : > { %v18801_v23 = vadd.f32 %v13565_v20, %v7669_v19  ;;  %13866 = vmatprep.mubr.msk.f32.mxu1 %vm21325_vm7, %v953_v25  ;;  %v7543_v63 = vpop.f32.mrf.mxu0  ;;  %v11201_v19 = vmul.f32 -1.442695, %v18788_v57  ;;  %v21328_v25 = vld [vmem:[#allocation28_spill] sm:$0xff]  ;;  %v14294_v35 = vpop.eup %14293  ;;  %v21331_v36 = vld [vmem:[#allocation31_spill] sm:$0xff]  ;;  %14319 = vrcp.f32 %v869_v38  ;;  %v11202_v59 = vmul.f32 -1.442695, %v18808_v50  ;;  %vm21344_vm6 = vmmov %vm21261_vm0 }
 0x46f   : > { %v7889_v6 = vpop.f32.mrf.mxu1  ;;  %v7670_v31 = vadd.f32 %v7543_v63, %v21327_v32  ;;  %v14296_v46 = vpop.eup %14295  ;;  %v956_v20 = vmul.f32 %v14292_v55, %v18542_v56  ;;  %v21334_v63 = vld [vmem:[#allocation104_spill] sm:$0xff]  ;;  %v957_v10 = vmul.f32 %v14294_v35, %v18551_v15  ;;  %v21335_v32 = vld [vmem:[#allocation33_spill] sm:$0xff]  ;;  %v21339_v55 = vld [vmem:[#allocation34_spill] sm:$0xff] }
 0x470   : > { %v18814_v58 = vadd.f32 %v7889_v6, %v7668_v2  ;;  %v13521_v47 = vpop.f32.mrf.mxu0  ;;  %13820 = vmatmul.mubr.msk.f32.gmra.mxu0 %vm21261_vm0, %v21328_v25  ;;  %v14298_v45 = vpop.eup %14297  ;;  %v871_v6 = vadd.f32 1.0, %v14288_v37  ;;  %14321 = vpow2.f32 %v11201_v19  ;;  %v872_v19 = vadd.f32 1.0, %v18781_v61  ;;  %vm21345_vm13 = vmmov %vm21261_vm0  ;;  %v21346_v61 = vld [vmem:[#allocation140_spill] sm:$0xff] }
 0x471   : > { %v13568_v39 = vpop.f32.mrf.mxu1  ;;  %13867 = vmatmul.mubr.msk.f32.gmra.mxu1 %vm21329_vm1, %v954_v8  ;;  %v7673_v3 = vadd.f32 %v13521_v47, %v21330_v14  ;;  %13822 = vmatprep.mubr.msk.f32.mxu0 %vm21332_vm2, %v21331_v36  ;;  %v14300_v8 = vpop.eup %14299  ;;  %v21338_v47 = vld [vmem:[#allocation115_spill] sm:$0xff]  ;;  %14323 = vrcp.f32 %v870_v22  ;;  %v21342_v14 = vld [vmem:[#allocation120_spill] sm:$0xff]  ;;  %vm21348_vm14 = vmmov %vm21261_vm0 }
 0x472   : > { %v18823_v27 = vadd.f32 %v13568_v39, %v7671_v11  ;;  %13869 = vmatprep.mubr.msk.f32.mxu1 %vm21333_vm4, %v955_v21  ;;  %v7553_v2 = vpop.f32.mrf.mxu0  ;;  %v14302_v21 = vpop.eup %14301  ;;  %14325 = vpow2.f32 %v11202_v59  ;;  %v958_v35 = vmul.f32 %v14300_v8, %v18569_v7  ;;  %v21347_v7 = vld [vmem:[#allocation37_spill] sm:$0xff]  ;;  %vm21349_vm10 = vmmov %vm21261_vm0 }
 0x473   : > { %v7899_v40 = vpop.f32.mrf.mxu1  ;;  %v7672_v12 = vadd.f32 %v7553_v2, %v21334_v63  ;;  %v14304_v25 = vpop.eup %14303  ;;  %14327 = vrcp.f32 %v871_v6  ;;  %v21343_v63 = vld [vmem:[#allocation36_spill] sm:$0xff]  ;;  %vm21353_vm9 = vmmov %vm21261_vm0 }
 0x474   : > { %v18830_v13 = vadd.f32 %v7899_v40, %v7670_v31  ;;  %v13524_v11 = vpop.f32.mrf.mxu0  ;;  %13823 = vmatmul.mubr.msk.f32.gmra.mxu0 %vm21336_vm8, %v21335_v32  ;;  %v14306_v31 = vpop.eup %14305  ;;  %v959_v40 = vmul.f32 %v14302_v21, %v18578_v48  ;;  %14329 = vrcp.f32 %v872_v19  ;;  %v21350_v21 = vld [vmem:[#allocation84_spill] sm:$0xff]  ;;  %vm21354_vm12 = vmmov %vm21261_vm0 }
 0x475   : > { %v13571_v38 = vpop.f32.mrf.mxu1  ;;  %13870 = vmatmul.mubr.msk.f32.gmra.mxu1 %vm21337_vm11, %v956_v20  ;;  %v7675_v56 = vadd.f32 %v13524_v11, %v21338_v47  ;;  %13825 = vmatprep.mubr.msk.f32.mxu0 %vm21340_vm3, %v21339_v55  ;;  %v14308_v2 = vpop.eup %14307  ;;  %v873_v20 = vadd.f32 1.0, %v14298_v45  ;;  %v21351_v47 = vld [vmem:[#allocation124_spill] sm:$0xff]  ;;  %vm21357_vm15 = vmmov %vm21261_vm0 }
 0x476   : > { %v18838_v37 = vadd.f32 %v13571_v38, %v7673_v3  ;;  %13872 = vmatprep.mubr.msk.f32.mxu1 %vm21341_vm5, %v957_v10  ;;  %v7563_v15 = vpop.f32.mrf.mxu0  ;;  %v14310_v8 = vpop.eup %14309  ;;  %v960_v6 = vmul.f32 %v14308_v2, %v18610_v30  ;;  %v961_v55 = vmul.f32 %v14304_v25, %v21351_v47  ;;  %v21356_v30 = vld [vmem:[#allocation40_spill] sm:$0xff]  ;;  %vm21358_vm7 = vmmov %vm21261_vm0  ;;  %v21361_v47 = vld [vmem:[#allocation42_spill] sm:$0xff] }
 0x477   : > { %v7909_v39 = vpop.f32.mrf.mxu1  ;;  %v7674_v36 = vadd.f32 %v7563_v15, %v21342_v14  ;;  %v14312_v45 = vpop.eup %14311  ;;  %14331 = vrcp.f32 %v873_v20  ;;  %v875_v15 = vadd.f32 1.0, %v14306_v31  ;;  %vm21362_vm1 = vmmov %vm21261_vm0 }
 0x478   : > { %v18845_v22 = vadd.f32 %v7909_v39, %v7672_v12  ;;  %v13527_v3 = vpop.f32.mrf.mxu0  ;;  %13826 = vmatmul.mubr.msk.f32.gmra.mxu0 %vm21344_vm6, %v21343_v63  ;;  %v874_v12 = vadd.f32 1.0, %v14296_v46  ;;  %v14314_v14 = vpop.eup %14313  ;;  %v21355_v46 = vld [vmem:[#allocation149_spill] sm:$0xff]  ;;  %v963_v63 = vmul.f32 %v14312_v45, %v18601_v17  ;;  %v21364_v45 = vld [vmem:[#allocation43_spill] sm:$0xff]  ;;  %vm21365_vm2 = vmmov %vm21261_vm0 }
 0x479   : > { %v13574_v10 = vpop.f32.mrf.mxu1  ;;  %13873 = vmatmul.mubr.msk.f32.gmra.mxu1 %vm21345_vm13, %v958_v35  ;;  %v7677_v59 = vadd.f32 %v13527_v3, %v21346_v61  ;;  %13828 = vmatprep.mubr.msk.f32.mxu0 %vm21348_vm14, %v21347_v7  ;;  %v14316_v2 = vpop.eup %14315  ;;  %vm21366_vm4 = vmmov %vm21261_vm0 }
 0x47a   : > { %v18853_v11 = vadd.f32 %v13574_v10, %v7675_v56  ;;  %13875 = vmatprep.mubr.msk.f32.mxu1 %vm21349_vm10, %v959_v40  ;;  %v7573_v48 = vpop.f32.mrf.mxu0  ;;  %v21352_v56 = vld [vmem:[#allocation39_spill] sm:$0xff]  ;;  %v14318_v31 = vpop.eup %14317  ;;  %14333 = vrcp.f32 %v874_v12  ;;  %v876_v10 = vadd.f32 1.0, %v14310_v8  ;;  %vm21369_vm8 = vmmov %vm21261_vm0 }
 0x47b   : > { %v7919_v32 = vpop.f32.mrf.mxu1  ;;  %v7676_v38 = vadd.f32 %v7573_v48, %v21350_v21  ;;  %v14320_v7 = vpop.eup %14319  ;;  %14335 = vrcp.f32 %v875_v15  ;;  %v877_v48 = vadd.f32 1.0, %v14314_v14  ;;  %v21367_v15 = vld [vmem:[#allocation92_spill] sm:$0xff]  ;;  %vm21370_vm11 = vmmov %vm21261_vm0 }
 0x47c   : > { %v18859_v35 = vadd.f32 %v7919_v32, %v7674_v36  ;;  %v13530_v39 = vpop.f32.mrf.mxu0  ;;  %13829 = vmatmul.mubr.msk.f32.gmra.mxu0 %vm21353_vm9, %v21352_v56  ;;  %v21359_v36 = vld [vmem:[#allocation123_spill] sm:$0xff]  ;;  %v21360_v32 = vld [vmem:[#allocation96_spill] sm:$0xff]  ;;  %v964_v56 = vmul.f32 %v14316_v2, %v21367_v15  ;;  %v965_v14 = vmul.f32 %v14320_v7, %v18638_v62  ;;  %14337 = vrcp.f32 %v876_v10  ;;  %v21371_v2 = vld [vmem:[#allocation46_spill] sm:$0xff] }
 0x47d   : > { %v13577_v40 = vpop.f32.mrf.mxu1  ;;  %13876 = vmatmul.mubr.msk.f32.gmra.mxu1 %vm21354_vm12, %v960_v6  ;;  %v7679_v19 = vadd.f32 %v13530_v39, %v21355_v46  ;;  %13831 = vmatprep.mubr.msk.f32.mxu0 %vm21357_vm15, %v21356_v30  ;;  %v962_v20 = vmul.f32 %v18804_v51, %v21359_v36  ;;  %v21363_v51 = vld [vmem:[#allocation98_spill] sm:$0xff]  ;;  %14339 = vrcp.f32 %v877_v48  ;;  %vm21372_vm3 = vmmov %vm21261_vm0 }
 0x47e   : > { %v18867_v3 = vadd.f32 %v13577_v40, %v7677_v59  ;;  %13878 = vmatprep.mubr.msk.f32.mxu1 %vm21358_vm7, %v961_v55  ;;  %v7583_v25 = vpop.f32.mrf.mxu0  ;;  %v14322_v55 = vpop.eup %14321  ;;  %v878_v40 = vadd.f32 1.0, %v14318_v31  ;;  %vm21373_vm5 = vmmov %vm21261_vm0 }
 0x47f   : > { %v7929_v61 = vpop.f32.mrf.mxu1  ;;  %v7678_v59 = vadd.f32 %v7583_v25, %v21360_v32  ;;  %v879_v25 = vadd.f32 1.0, %v14322_v55  ;;  %vm21376_vm6 = vmmov %vm21261_vm0 }
 0x480   : > { %v18873_v6 = vadd.f32 %v7929_v61, %v7676_v38  ;;  %v13533_v21 = vpop.f32.mrf.mxu0  ;;  %13832 = vmatmul.mubr.msk.f32.gmra.mxu0 %vm21261_vm0, %v21361_v47  ;;  %v14324_v38 = vpop.eup %14323  ;;  %v21368_v61 = vld [vmem:[#allocation45_spill] sm:$0xff]  ;;  %14341 = vrcp.f32 %v878_v40  ;;  %vm21377_vm13 = vmmov %vm21261_vm0 }
 0x481   : > { %v13580_v39 = vpop.f32.mrf.mxu1  ;;  %13879 = vmatmul.mubr.msk.f32.gmra.mxu1 %vm21362_vm1, %v962_v20  ;;  %v7681_v17 = vadd.f32 %v13533_v21, %v21363_v51  ;;  %13834 = vmatprep.mubr.msk.f32.mxu0 %vm21365_vm2, %v21364_v45  ;;  %v14326_v30 = vpop.eup %14325  ;;  %14343 = vrcp.f32 %v879_v25  ;;  %v21375_v51 = vld [vmem:[#allocation48_spill] sm:$0xff]  ;;  %vm21380_vm14 = vmmov %vm21261_vm0 }
 0x482   : > { %v18882_v8 = vadd.f32 %v13580_v39, %v7679_v19  ;;  %13881 = vmatprep.mubr.msk.f32.mxu1 %vm21366_vm4, %v963_v63  ;;  %v7593_v12 = vpop.f32.mrf.mxu0  ;;  %v14328_v63 = vpop.eup %14327  ;;  %v880_v7 = vadd.f32 1.0, %v14326_v30  ;;  %vm21381_vm10 = vmmov %vm21261_vm0 }
 0x483   : > { %v7939_v46 = vpop.f32.mrf.mxu1  ;;  %v7680_v20 = vadd.f32 %v7593_v12, %v18559_v18  ;;  %v966_v18 = vmul.f32 %v14324_v38, %v18628_v34  ;;  %v967_v21 = vmul.f32 %v14328_v63, %v18679_v29  ;;  %v21378_v34 = vld [vmem:[#allocation112_spill] sm:$0xff]  ;;  %v21379_v38 = vld [vmem:[#allocation50_spill] sm:$0xff]  ;;  %vm21383_vm9 = vmmov %vm21261_vm0 }
 0x484   : > { %v18887_v36 = vadd.f32 %v7939_v46, %v7678_v59  ;;  %v13536_v19 = vpop.f32.mrf.mxu0  ;;  %13835 = vmatmul.mubr.msk.f32.gmra.mxu0 %vm21369_vm8, %v21368_v61  ;;  %v14330_v59 = vpop.eup %14329  ;;  %14345 = vrcp.f32 %v880_v7  ;;  %vm21384_vm12 = vmmov %vm21261_vm0 }
 0x485   : > { %v13583_v32 = vpop.f32.mrf.mxu1  ;;  %13882 = vmatmul.mubr.msk.f32.gmra.mxu1 %vm21370_vm11, %v964_v56  ;;  %v7683_v62 = vadd.f32 %v13536_v19, %v18580_v41  ;;  %13837 = vmatprep.mubr.msk.f32.mxu0 %vm21372_vm3, %v21371_v2  ;;  %v21374_v41 = vld [vmem:[#allocation108_spill] sm:$0xff]  ;;  %v968_v56 = vmul.f32 %v14330_v59, %v18664_v5  ;;  %v21385_v5 = vld [vmem:[#allocation53_spill] sm:$0xff]  ;;  %vm21386_vm15 = vmmov %vm21261_vm0 }
 0x486   : > { %v18896_v31 = vadd.f32 %v13583_v32, %v7681_v17  ;;  %13884 = vmatprep.mubr.msk.f32.mxu1 %vm21373_vm5, %v965_v14  ;;  %v7603_v10 = vpop.f32.mrf.mxu0  ;;  %v14332_v17 = vpop.eup %14331  ;;  %v21382_v19 = vld [vmem:[#allocation52_spill] sm:$0xff]  ;;  %vm21387_vm7 = vmmov %vm21261_vm0 }
 0x487   : > { %v7949_v48 = vpop.f32.mrf.mxu1  ;;  %v7682_v55 = vadd.f32 %v7603_v10, %v21374_v41  ;;  %v14334_v40 = vpop.eup %14333  ;;  %v969_v46 = vmul.f32 %v14332_v17, %v18710_v53  ;;  %vm21391_vm1 = vmmov %vm21261_vm0 }
 0x488   : > { %v18901_v47 = vadd.f32 %v7949_v48, %v7680_v20  ;;  %v13539_v39 = vpop.f32.mrf.mxu0  ;;  %13838 = vmatmul.mubr.msk.f32.gmra.mxu0 %vm21376_vm6, %v21375_v51  ;;  %v14336_v61 = vpop.eup %14335  ;;  %v21389_v48 = vld [vmem:[#allocation137_spill] sm:$0xff]  ;;  %v21392_v51 = vld [vmem:[#allocation56_spill] sm:$0xff]  ;;  %vm21393_vm2 = vmmov %vm21261_vm0 }
 0x489   : > { %v13586_v45 = vpop.f32.mrf.mxu1  ;;  %13885 = vmatmul.mubr.msk.f32.gmra.mxu1 %vm21377_vm13, %v966_v18  ;;  %v7685_v12 = vadd.f32 %v13539_v39, %v21378_v34  ;;  %13840 = vmatprep.mubr.msk.f32.mxu0 %vm21380_vm14, %v21379_v38  ;;  %v14338_v10 = vpop.eup %14337  ;;  %v971_v18 = vmul.f32 %v14336_v61, %v18731_v1  ;;  %vm21394_vm4 = vmmov %vm21261_vm0 }
 0x48a   : > { %v18910_v15 = vadd.f32 %v13586_v45, %v7683_v62  ;;  %13887 = vmatprep.mubr.msk.f32.mxu1 %vm21381_vm10, %v967_v21  ;;  %v7613_v29 = vpop.f32.mrf.mxu0  ;;  %v14340_v41 = vpop.eup %14339  ;;  %v972_v17 = vmul.f32 %v14338_v10, %v18746_v26  ;;  %vm21398_vm8 = vmmov %vm21261_vm0  ;;  %v21405_v10 = vld [vmem:[#allocation59_spill] sm:$0xff] }
 0x48b   : > { %v7959_v14 = vpop.f32.mrf.mxu1  ;;  %v7684_v25 = vadd.f32 %v7613_v29, %v18618_v44  ;;  %v970_v44 = vmul.f32 %v14334_v40, %v18700_v24  ;;  %v21396_v29 = vld [vmem:[#allocation135_spill] sm:$0xff]  ;;  %vm21399_vm11 = vmmov %vm21261_vm0 }
 0x48c   : > { %v18915_v30 = vadd.f32 %v7959_v14, %v7682_v55  ;;  %v13542_v20 = vpop.f32.mrf.mxu0  ;;  %13841 = vmatmul.mubr.msk.f32.gmra.mxu0 %vm21383_vm9, %v21382_v19  ;;  %v21401_v19 = vld [vmem:[#allocation117_spill] sm:$0xff]  ;;  %vm21402_vm3 = vmmov %vm21261_vm0 }
 0x48d   : > { %v13589_v63 = vpop.f32.mrf.mxu1  ;;  %13888 = vmatmul.mubr.msk.f32.gmra.mxu1 %vm21384_vm12, %v968_v56  ;;  %v7687_v32 = vadd.f32 %v13542_v20, %v18641_v16  ;;  %13843 = vmatprep.mubr.msk.f32.mxu0 %vm21386_vm15, %v21385_v5  ;;  %v21390_v16 = vld [vmem:[#allocation55_spill] sm:$0xff]  ;;  %v14342_v34 = vpop.eup %14341  ;;  %vm21403_vm5 = vmmov %vm21261_vm0 }
 0x48e   : > { %v18924_v62 = vadd.f32 %v13589_v63, %v7685_v12  ;;  %13890 = vmatprep.mubr.msk.f32.mxu1 %vm21387_vm7, %v969_v46  ;;  %v7623_v53 = vpop.f32.mrf.mxu0  ;;  %v973_v12 = vmul.f32 %v14340_v41, %v18762_v52  ;;  %v14344_v40 = vpop.eup %14343  ;;  %v974_v61 = vmul.f32 %v14342_v34, %v18776_v4  ;;  %vm21406_vm6 = vmmov %vm21261_vm0 }
 0x48f   : > { %v7969_v2 = vpop.f32.mrf.mxu1  ;;  %v7686_v59 = vadd.f32 %v7623_v53, %v21389_v48  ;;  %v975_v5 = vmul.f32 %v14344_v40, %v18788_v57  ;;  %vm21407_vm13 = vmmov %vm21261_vm0  ;;  %v21408_v48 = vld [vmem:[#allocation81_spill] sm:$0xff] }
 0x490   : > { %v18929_v7 = vadd.f32 %v7969_v2, %v7684_v25  ;;  %v13545_v21 = vpop.f32.mrf.mxu0  ;;  %13844 = vmatmul.mubr.msk.f32.gmra.mxu0 %vm21261_vm0, %v21390_v16  ;;  %v21400_v25 = vld [vmem:[#allocation125_spill] sm:$0xff]  ;;  %vm21409_vm14 = vmmov %vm21261_vm0 }
 0x491   : > { %v13592_v55 = vpop.f32.mrf.mxu1  ;;  %13891 = vmatmul.mubr.msk.f32.gmra.mxu1 %vm21391_vm1, %v970_v44  ;;  %v7689_v39 = vadd.f32 %v13545_v21, %v18666_v43  ;;  %13846 = vmatprep.mubr.msk.f32.mxu0 %vm21393_vm2, %v21392_v51  ;;  %v21397_v43 = vld [vmem:[#allocation58_spill] sm:$0xff]  ;;  %vm21411_vm10 = vmmov %vm21261_vm0 }
 0x492   : > { %21388 = vst [vmem:[#allocation127_spill] sm:$0xff] %v18929_v7  ;;  %v18938_v24 = vadd.f32 %v13592_v55, %v7687_v32  ;;  %13893 = vmatprep.mubr.msk.f32.mxu1 %vm21394_vm4, %v971_v18  ;;  %v7633_v1 = vpop.f32.mrf.mxu0  ;;  %v14346_v32 = vpop.eup %14345  ;;  %vm21439_vm9 = vmmov %vm21261_vm0 }
 0x493   : > { %v7979_v45 = vpop.f32.mrf.mxu1  ;;  %v7688_v56 = vadd.f32 %v7633_v1, %v21396_v29  ;;  %v976_v57 = vmul.f32 %v14346_v32, %v18808_v50  ;;  %vm21440_vm12 = vmmov %vm21261_vm0 }
 0x494   : > { %v18943_v38 = vadd.f32 %v7979_v45, %v7686_v59  ;;  %v13548_v14 = vpop.f32.mrf.mxu0  ;;  %13847 = vmatmul.mubr.msk.f32.gmra.mxu0 %vm21398_vm8, %v21397_v43  ;;  %vm21442_vm15 = vmmov %vm21261_vm0 }
 0x495   : > { %v13595_v46 = vpop.f32.mrf.mxu1  ;;  %13894 = vmatmul.mubr.msk.f32.gmra.mxu1 %vm21399_vm11, %v972_v17  ;;  %v7691_v20 = vadd.f32 %v13548_v14, %v21400_v25  ;;  %13849 = vmatprep.mubr.msk.f32.mxu0 %vm21402_vm3, %v21401_v19  ;;  %vm21443_vm7 = vmmov %vm21261_vm0 }
 0x496   : > { %21395 = vst [vmem:[#allocation129_spill] sm:$0xff] %v18943_v38  ;;  %v18952_v26 = vadd.f32 %v13595_v46, %v7689_v39  ;;  %13896 = vmatprep.mubr.msk.f32.mxu1 %vm21403_vm5, %v973_v12  ;;  %v7643_v52 = vpop.f32.mrf.mxu0  ;;  %vm21444_vm1 = vmmov %vm21261_vm0 }
 0x497   : > { %v7989_v63 = vpop.f32.mrf.mxu1  ;;  %v7690_v44 = vadd.f32 %v7643_v52, %v18693_v0  ;;  %vm21445_vm2 = vmmov %vm21261_vm0 }
 0x498   : > { %v18957_v53 = vadd.f32 %v7989_v63, %v7688_v56  ;;  %v13551_v2 = vpop.f32.mrf.mxu0  ;;  %13850 = vmatmul.mubr.msk.f32.gmra.mxu0 %vm21406_vm6, %v21405_v10  ;;  %vm21446_vm4 = vmmov %vm21261_vm0 }
 0x499   : > { %v13598_v18 = vpop.f32.mrf.mxu1  ;;  %13897 = vmatmul.mubr.msk.f32.gmra.mxu1 %vm21407_vm13, %v974_v61  ;;  %v7693_v59 = vadd.f32 %v13551_v2, %v21408_v48  ;;  %vm21447_vm8 = vmmov %vm21261_vm0 }
 0x49a   : > { %21404 = vst [vmem:[#allocation80_spill] sm:$0xff] %v18957_v53  ;;  %v18964_v21 = vadd.f32 %v13598_v18, %v7691_v20  ;;  %13899 = vmatprep.mubr.msk.f32.mxu1 %vm21409_vm14, %v975_v5  ;;  %v7653_v4 = vpop.f32.mrf.mxu0  ;;  %vm21448_vm11 = vmmov %vm21261_vm0 }
 0x49b   : > { %v7999_v16 = vpop.f32.mrf.mxu1  ;;  %v7692_v0 = vadd.f32 %v7653_v4, %v18719_v49  ;;  %vm21449_vm3 = vmmov %vm21261_vm0 }
 0x49c   : > { %v18968_v41 = vadd.f32 %v7999_v16, %v7690_v44  ;;  %v18971_v55 = vpop.f32.mrf.mxu0  ;;  %vm21450_vm5 = vmmov %vm21261_vm0 }
 0x49d   : > { %v13601_v39 = vpop.f32.mrf.mxu1  ;;  %13900 = vmatmul.mubr.msk.f32.gmra.mxu1 %vm21411_vm10, %v976_v57  ;;  %vm21451_vm6 = vmmov %vm21261_vm0 }
 0x49e   : > { %21410 = vst [vmem:[#allocation139_spill] sm:$0xff] %v18968_v41  ;;  %v18974_v51 = vadd.f32 %v13601_v39, %v7693_v59  ;;  %v18976_v1 = vpop.f32.mrf.mxu0  ;;  %vm21452_vm13 = vmmov %vm21261_vm0 }
 0x49f   : > { %v8009_v17 = vpop.f32.mrf.mxu1  ;;  %vm21453_vm14 = vmmov %vm21261_vm0 }
 0x4a0   : > { %v18978_v45 = vadd.f32 %v8009_v17, %v7692_v0  ;;  %v18980_v34 = vpop.f32.mrf.mxu0  ;;  %vm21454_vm10 = vmmov %vm21261_vm0 }
 0x4a1   : > { %v18982_v50 = vpop.f32.mrf.mxu1 }
 0x4a2   : > { %21412 = vst [vmem:[#allocation126_spill] sm:$0xff] %v18978_v45  ;;  %v18984_v12 = vpop.f32.mrf.mxu0 }
 0x4a3   : > { %v18986_v29 = vpop.f32.mrf.mxu1 }
 0x4a4   : > { %v18988_v49 = vpop.f32.mrf.mxu0 }
 0x4a5   : > { %v18990_v56 = vpop.f32.mrf.mxu1 }
 0x4a6   : > { %v18992_v14 = vpop.f32.mrf.mxu0 }
 0x4a7   : > { %v18994_v43 = vpop.f32.mrf.mxu1 }
 0x4a8   : > { %v18996_v40 = vpop.f32.mrf.mxu0 }
 0x4a9   : > { %v18998_v46 = vpop.f32.mrf.mxu1 }
 0x4aa   : > { %v19000_v25 = vpop.f32.mrf.mxu0 }
 0x4ab   : > { %v19002_v20 = vpop.f32.mrf.mxu1 }
 0x4ac   : > { %v13618_v19 = vpop.f32.mrf.mxu0 }
 0x4ad   : > { %v19004_v52 = vpop.f32.mrf.mxu1  ;;  %v8415_v61 = vadd.f32 %v13618_v19, %v18823_v27 }
 0x4ae   : > { %v19007_v63 = vpop.f32.mrf.mxu0 }
 0x4af   : > { %v19009_v32 = vpop.f32.mrf.mxu1 }
 0x4b0   : > { %v13621_v5 = vpop.f32.mrf.mxu0 }
 0x4b1   : > { %v13668_v44 = vpop.f32.mrf.mxu1  ;;  %v8417_v2 = vadd.f32 %v13621_v5, %v18838_v37 }
 0x4b2   : > { %v19012_v10 = vadd.f32 %v13668_v44, %v8415_v61  ;;  %v19014_v18 = vpop.f32.mrf.mxu0 }
 0x4b3   : > { %v19016_v48 = vpop.f32.mrf.mxu1 }
 0x4b4   : > { %v13624_v59 = vpop.f32.mrf.mxu0 }
 0x4b5   : > { %v13671_v4 = vpop.f32.mrf.mxu1  ;;  %v8419_v57 = vadd.f32 %v13624_v59, %v18853_v11 }
 0x4b6   : > { %v19019_v16 = vadd.f32 %v13671_v4, %v8417_v2  ;;  %v19021_v27 = vpop.f32.mrf.mxu0 }
 0x4b7   : > { %v19023_v0 = vpop.f32.mrf.mxu1 }
 0x4b8   : > { %v13627_v39 = vpop.f32.mrf.mxu0 }
 0x4b9   : > { %v13674_v17 = vpop.f32.mrf.mxu1  ;;  %v8421_v37 = vadd.f32 %v13627_v39, %v18867_v3 }
 0x4ba   : > { %v19026_v19 = vadd.f32 %v13674_v17, %v8419_v57  ;;  %v19028_v61 = vpop.f32.mrf.mxu0 }
 0x4bb   : > { %v19030_v5 = vpop.f32.mrf.mxu1 }
 0x4bc   : > { %21413 = vst [vmem:[#allocation131_spill] sm:$0xff] %v19026_v19  ;;  %v13630_v44 = vpop.f32.mrf.mxu0 }
 0x4bd   : > { %v13677_v45 = vpop.f32.mrf.mxu1  ;;  %v8423_v11 = vadd.f32 %v13630_v44, %v18882_v8 }
 0x4be   : > { %v19033_v2 = vadd.f32 %v13677_v45, %v8421_v37  ;;  %v19035_v59 = vpop.f32.mrf.mxu0 }
 0x4bf   : > { %v19037_v4 = vpop.f32.mrf.mxu1 }
 0x4c0   : > { %21414 = vst [vmem:[#allocation143_spill] sm:$0xff] %v19033_v2  ;;  %v13633_v41 = vpop.f32.mrf.mxu0 }
 0x4c1   : > { %v13680_v53 = vpop.f32.mrf.mxu1  ;;  %v8425_v3 = vadd.f32 %v13633_v41, %v18896_v31 }
 0x4c2   : > { %v19040_v57 = vadd.f32 %v13680_v53, %v8423_v11  ;;  %v19042_v39 = vpop.f32.mrf.mxu0 }
 0x4c3   : > { %v19044_v17 = vpop.f32.mrf.mxu1 }
 0x4c4   : > { %21415 = vst [vmem:[#allocation145_spill] sm:$0xff] %v19040_v57  ;;  %21416 = vst [vmem:[#allocation142_spill] sm:$0xff] %v19044_v17  ;;  %v13636_v38 = vpop.f32.mrf.mxu0 }
 0x4c5   : > { %v13683_v7 = vpop.f32.mrf.mxu1  ;;  %v8427_v8 = vadd.f32 %v13636_v38, %v18910_v15 }
 0x4c6   : > { %v19047_v45 = vadd.f32 %v13683_v7, %v8425_v3  ;;  %v19049_v37 = vpop.f32.mrf.mxu0 }
 0x4c7   : > { %v19051_v44 = vpop.f32.mrf.mxu1 }
 0x4c8   : > { %21417 = vst [vmem:[#allocation147_spill] sm:$0xff] %v19047_v45  ;;  %21418 = vst [vmem:[#allocation151_spill] sm:$0xff] %v19051_v44  ;;  %v13639_v2 = vpop.f32.mrf.mxu0 }
 0x4c9   : > { %v13686_v19 = vpop.f32.mrf.mxu1  ;;  %v8429_v31 = vadd.f32 %v13639_v2, %v18924_v62 }
 0x4ca   : > { %v19054_v53 = vadd.f32 %v13686_v19, %v8427_v8  ;;  %v19056_v41 = vpop.f32.mrf.mxu0 }
 0x4cb   : > { %21420 = vst [vmem:[#allocation146_spill] sm:$0xff] %v19056_v41  ;;  %v19058_v11 = vpop.f32.mrf.mxu1 }
 0x4cc   : > { %21419 = vst [vmem:[#allocation156_spill] sm:$0xff] %v19054_v53  ;;  %v13642_v57 = vpop.f32.mrf.mxu0 }
 0x4cd   : > { %v13689_v17 = vpop.f32.mrf.mxu1  ;;  %v8431_v15 = vadd.f32 %v13642_v57, %v18938_v24 }
 0x4ce   : > { %v19061_v7 = vadd.f32 %v13689_v17, %v8429_v31  ;;  %v19063_v38 = vpop.f32.mrf.mxu0 }
 0x4cf   : > { %v19065_v3 = vpop.f32.mrf.mxu1 }
 0x4d0   : > { %21421 = vst [vmem:[#allocation130_spill] sm:$0xff] %v19061_v7  ;;  %v13645_v45 = vpop.f32.mrf.mxu0  ;;  %v8407_v7 = vadd.f32 %v18971_v55, %v18733_v54 }
 0x4d1   : > { %v13692_v44 = vpop.f32.mrf.mxu1  ;;  %v8433_v62 = vadd.f32 %v13645_v45, %v18952_v26 }
 0x4d2   : > { %v19068_v19 = vadd.f32 %v13692_v44, %v8431_v15  ;;  %v19070_v2 = vpop.f32.mrf.mxu0  ;;  %v8406_v15 = vadd.f32 %v18976_v1, %v18739_v28 }
 0x4d3   : > { %21423 = vst [vmem:[#allocation154_spill] sm:$0xff] %v19070_v2  ;;  %v19072_v8 = vpop.f32.mrf.mxu1 }
 0x4d4   : > { %21422 = vst [vmem:[#allocation152_spill] sm:$0xff] %v19068_v19  ;;  %v13648_v53 = vpop.f32.mrf.mxu0  ;;  %v8794_v55 = vadd.f32 %v18986_v29, %v8406_v15 }
 0x4d5   : > { %v13695_v41 = vpop.f32.mrf.mxu1  ;;  %v8435_v24 = vadd.f32 %v13648_v53, %v18964_v21  ;;  %v8795_v53 = vadd.f32 %v18982_v50, %v8407_v7  ;;  %v8411_v50 = vadd.f32 %v18988_v49, %v18778_v33 }
 0x4d6   : > { %v19075_v57 = vadd.f32 %v13695_v41, %v8433_v62  ;;  %v19077_v17 = vpop.f32.mrf.mxu0  ;;  %v8409_v41 = vadd.f32 %v18980_v34, %v18755_v9  ;;  %v8410_v34 = vadd.f32 %v18992_v14, %v18791_v60 }
 0x4d7   : > { %v19079_v31 = vpop.f32.mrf.mxu1  ;;  %v8799_v49 = vadd.f32 %v18998_v46, %v8411_v50 }
 0x4d8   : > { %v13651_v26 = vpop.f32.mrf.mxu0 }
 0x4d9   : > { %v13698_v45 = vpop.f32.mrf.mxu1  ;;  %v8437_v44 = vadd.f32 %v13651_v26, %v18974_v51  ;;  %v8408_v51 = vadd.f32 %v18984_v12, %v18765_v42  ;;  %v19110_v42 = vld [vmem:[%s19770_s8] ss:$0 sm:$0xff] }
 0x4da   : > { %v19086_v19 = vadd.f32 %v13698_v45, %v8435_v24  ;;  %v19088_v2 = vpop.f32.mrf.mxu0  ;;  %v8797_v45 = vadd.f32 %v18990_v56, %v8409_v41  ;;  %v8413_v56 = vadd.f32 %v18996_v40, %v18801_v23 }
 0x4db   : > { %v19090_v21 = vpop.f32.mrf.mxu1  ;;  %v8796_v29 = vadd.f32 %v18994_v43, %v8408_v51  ;;  %v8412_v43 = vadd.f32 %v19000_v25, %v18814_v58 }
 0x4dc   : > { %v13706_v62 = vpop.f32.mrf.mxu0 }
 0x4dd   : > { %v13701_v54 = vpop.f32.mrf.mxu1  ;;  %v9183_v28 = vadd.f32 %v13706_v62, %v8795_v53 }
 0x4de   : > { %v19098_v26 = vadd.f32 %v13701_v54, %v8437_v44  ;;  %v9023_v1 = vpop.f32.mrf.mxu0  ;;  %v8798_v54 = vadd.f32 %v19002_v20, %v8410_v34  ;;  %v8414_v34 = vadd.f32 %v19007_v63, %v18830_v13 }
 0x4df   : > { %v19100_v24 = vpop.f32.mrf.mxu1  ;;  %v9182_v7 = vadd.f32 %v9023_v1, %v8794_v55  ;;  %v8801_v1 = vadd.f32 %v19004_v52, %v8413_v56 }
 0x4e0   : > { %v13709_v9 = vpop.f32.mrf.mxu0  ;;  %v8802_v63 = vadd.f32 %v19016_v48, %v8414_v34 }
 0x4e1   : > { %v13756_v12 = vpop.f32.mrf.mxu1  ;;  %v9185_v15 = vadd.f32 %v13709_v9, %v8797_v45  ;;  %v8800_v9 = vadd.f32 %v19009_v32, %v8412_v43 }
 0x4e2   : > { %v9571_v44 = vadd.f32 %v13756_v12, %v9183_v28  ;;  %v9033_v53 = vpop.f32.mrf.mxu0 }
 0x4e3   : > { %v9411_v33 = vpop.f32.mrf.mxu1  ;;  %v9184_v14 = vadd.f32 %v9033_v53, %v8796_v29 }
 0x4e4   : > { %v19117_v41 = vadd.f32 %v19110_v42, %v9571_v44  ;;  %v9570_v60 = vadd.f32 %v9411_v33, %v9182_v7  ;;  %v13712_v62 = vpop.f32.mrf.mxu0 }
 0x4e5   : > { %v13759_v55 = vpop.f32.mrf.mxu1  ;;  %v9187_v40 = vadd.f32 %v13712_v62, %v8799_v49 }
 0x4e6   : > { %v11874_v51 = vmul.f32 -1.442695, %v19117_v41  ;;  %v19124_v28 = vadd.f32 %v19110_v42, %v9570_v60  ;;  %v9573_v23 = vadd.f32 %v13759_v55, %v9185_v15  ;;  %v9043_v46 = vpop.f32.mrf.mxu0 }
 0x4e7   : > { %v9421_v45 = vpop.f32.mrf.mxu1  ;;  %v9186_v50 = vadd.f32 %v9043_v46, %v8798_v54 }
 0x4e8   : > { %14347 = vpow2.f32 %v11874_v51  ;;  %v11873_v7 = vmul.f32 -1.442695, %v19124_v28  ;;  %v19129_v20 = vadd.f32 %v19110_v42, %v9573_v23  ;;  %v9572_v58 = vadd.f32 %v9421_v45, %v9184_v14  ;;  %v13715_v25 = vpop.f32.mrf.mxu0 }
 0x4e9   : > { %v13762_v12 = vpop.f32.mrf.mxu1  ;;  %v9189_v29 = vadd.f32 %v13715_v25, %v8801_v1  ;;  %v8416_v14 = vadd.f32 %v19014_v18, %v18845_v22 }
 0x4ea   : > { %14349 = vpow2.f32 %v11873_v7  ;;  %v11876_v52 = vmul.f32 -1.442695, %v19129_v20  ;;  %v19136_v44 = vadd.f32 %v19110_v42, %v9572_v58  ;;  %v9575_v15 = vadd.f32 %v13762_v12, %v9187_v40  ;;  %v9053_v53 = vpop.f32.mrf.mxu0 }
 0x4eb   : > { %v9431_v56 = vpop.f32.mrf.mxu1  ;;  %v9188_v33 = vadd.f32 %v9053_v53, %v8800_v9  ;;  %v8418_v40 = vadd.f32 %v19021_v27, %v18859_v35  ;;  %v8804_v45 = vadd.f32 %v19023_v0, %v8416_v14  ;;  %v8422_v7 = vadd.f32 %v19035_v59, %v18887_v36  ;;  %v21424_v53 = vld [vmem:[#allocation142_spill] sm:$0xff] }
 0x4ec   : > { %14351 = vpow2.f32 %v11876_v52  ;;  %v11875_v49 = vmul.f32 -1.442695, %v19136_v44  ;;  %v19140_v32 = vadd.f32 %v19110_v42, %v9575_v15  ;;  %v9574_v60 = vadd.f32 %v9431_v56, %v9186_v50  ;;  %v13718_v13 = vpop.f32.mrf.mxu0  ;;  %v21425_v56 = vld [vmem:[#allocation151_spill] sm:$0xff] }
 0x4ed   : > { %v13765_v62 = vpop.f32.mrf.mxu1  ;;  %v9191_v54 = vadd.f32 %v13718_v13, %v19012_v10  ;;  %v8420_v50 = vadd.f32 %v19028_v61, %v18873_v6  ;;  %v8424_v35 = vadd.f32 %v19042_v39, %v18901_v47  ;;  %v8806_v0 = vadd.f32 %v19030_v5, %v8418_v40 }
 0x4ee   : > { %14353 = vpow2.f32 %v11875_v49  ;;  %v11878_v43 = vmul.f32 -1.442695, %v19140_v32  ;;  %v19148_v55 = vadd.f32 %v19110_v42, %v9574_v60  ;;  %v9577_v51 = vadd.f32 %v13765_v62, %v9189_v29  ;;  %v9063_v23 = vpop.f32.mrf.mxu0 }
 0x4ef   : > { %v9441_v46 = vpop.f32.mrf.mxu1  ;;  %v9190_v1 = vadd.f32 %v9063_v23, %v8802_v63  ;;  %v8426_v6 = vadd.f32 %v19049_v37, %v18915_v30  ;;  %v8808_v15 = vadd.f32 %v19037_v4, %v8420_v50  ;;  %v8810_v5 = vadd.f32 %v21424_v53, %v8422_v7  ;;  %v21427_v4 = vld [vmem:[#allocation127_spill] sm:$0xff] }
 0x4f0   : > { %14355 = vpow2.f32 %v11878_v43  ;;  %v11877_v48 = vmul.f32 -1.442695, %v19148_v55  ;;  %v19154_v22 = vadd.f32 %v19110_v42, %v9577_v51  ;;  %v9576_v10 = vadd.f32 %v9441_v46, %v9188_v33  ;;  %v13721_v18 = vpop.f32.mrf.mxu0  ;;  %v21429_v51 = vld [vmem:[#allocation129_spill] sm:$0xff] }
 0x4f1   : > { %v13768_v27 = vpop.f32.mrf.mxu1  ;;  %v9193_v61 = vadd.f32 %v13721_v18, %v19019_v16  ;;  %v19178_v33 = vadd.f32 %v21425_v56, %v8424_v35  ;;  %v21426_v16 = vld [vmem:[#allocation131_spill] sm:$0xff]  ;;  %v19186_v62 = vadd.f32 %v19058_v11, %v8426_v6  ;;  %v8430_v23 = vadd.f32 %v19063_v38, %v21429_v51 }
 0x4f2   : > { %14357 = vpow2.f32 %v11877_v48  ;;  %v11880_v58 = vmul.f32 -1.442695, %v19154_v22  ;;  %v19165_v25 = vadd.f32 %v19110_v42, %v9576_v10  ;;  %v9579_v9 = vadd.f32 %v13768_v27, %v9191_v54  ;;  %v9073_v34 = vpop.f32.mrf.mxu0  ;;  %v21428_v54 = vld [vmem:[#allocation146_spill] sm:$0xff]  ;;  %v21430_v35 = vld [vmem:[#allocation143_spill] sm:$0xff] }
 0x4f3   : > { %v9451_v36 = vpop.f32.mrf.mxu1  ;;  %v9192_v59 = vadd.f32 %v9073_v34, %v8804_v45  ;;  %v8428_v43 = vadd.f32 %v21428_v54, %v21427_v4  ;;  %v19209_v56 = vadd.f32 %v19072_v8, %v8430_v23 }
 0x4f4   : > { %14359 = vpow2.f32 %v11880_v58  ;;  %v11879_v47 = vmul.f32 -1.442695, %v19165_v25  ;;  %v19173_v39 = vadd.f32 %v19110_v42, %v9579_v9  ;;  %v9578_v12 = vadd.f32 %v9451_v36, %v9190_v1  ;;  %v13724_v29 = vpop.f32.mrf.mxu0 }
 0x4f5   : > { %v14348_v52 = vpop.eup %14347  ;;  %v13771_v30 = vpop.f32.mrf.mxu1  ;;  %v9195_v37 = vadd.f32 %v13724_v29, %v21426_v16 }
 0x4f6   : > { %v9737_v49 = vadd.f32 1.0, %v14348_v52  ;;  %14361 = vpow2.f32 %v11879_v47  ;;  %v11882_v60 = vmul.f32 -1.442695, %v19173_v39  ;;  %v19183_v13 = vadd.f32 %v19110_v42, %v9578_v12  ;;  %v9083_v63 = vpop.f32.mrf.mxu0 }
 0x4f7   : > { %v14350_v14 = vpop.eup %14349  ;;  %v9581_v40 = vadd.f32 %v13771_v30, %v9193_v61  ;;  %v9461_v46 = vpop.f32.mrf.mxu1  ;;  %v9194_v11 = vadd.f32 %v9083_v63, %v8806_v0  ;;  %v19201_v61 = vadd.f32 %v19065_v3, %v8428_v43  ;;  %v21431_v30 = vld [vmem:[#allocation80_spill] sm:$0xff]  ;;  %v21432_v3 = vld [vmem:[#allocation154_spill] sm:$0xff]  ;;  %v21433_v43 = vld [vmem:[#allocation145_spill] sm:$0xff] }
 0x4f8   : > { %14363 = vrcp.f32 %v9737_v49  ;;  %v9736_v1 = vadd.f32 1.0, %v14350_v14  ;;  %v11881_v48 = vmul.f32 -1.442695, %v19183_v13  ;;  %v9580_v10 = vadd.f32 %v9461_v46, %v9192_v59  ;;  %v13727_v18 = vpop.f32.mrf.mxu0 }
 0x4f9   : > { %v14352_v45 = vpop.eup %14351  ;;  %14365 = vpow2.f32 %v11882_v60  ;;  %v19194_v50 = vadd.f32 %v19110_v42, %v9581_v40  ;;  %v13774_v7 = vpop.f32.mrf.mxu1  ;;  %v9197_v27 = vadd.f32 %v13727_v18, %v21430_v35  ;;  %v8432_v16 = vadd.f32 %v21432_v3, %v21431_v30  ;;  %v21434_v18 = vld [vmem:[#allocation139_spill] sm:$0xff] }
 0x4fa   : > { %14367 = vrcp.f32 %v9736_v1  ;;  %v9739_v58 = vadd.f32 1.0, %v14352_v45  ;;  %v19198_v38 = vadd.f32 %v19110_v42, %v9580_v10  ;;  %v9583_v9 = vadd.f32 %v13774_v7, %v9195_v37  ;;  %v9093_v34 = vpop.f32.mrf.mxu0  ;;  %v21435_v35 = vld [vmem:[#allocation147_spill] sm:$0xff] }
 0x4fb   : > { %v14354_v6 = vpop.eup %14353  ;;  %14369 = vpow2.f32 %v11881_v48  ;;  %v11884_v36 = vmul.f32 -1.442695, %v19194_v50  ;;  %v9471_v59 = vpop.f32.mrf.mxu1  ;;  %v9196_v47 = vadd.f32 %v9093_v34, %v8808_v15  ;;  %v8434_v45 = vadd.f32 %v19077_v17, %v21434_v18 }
 0x4fc   : > { %14371 = vrcp.f32 %v9739_v58  ;;  %v9738_v0 = vadd.f32 1.0, %v14354_v6  ;;  %v11883_v12 = vmul.f32 -1.442695, %v19198_v38  ;;  %v19206_v29 = vadd.f32 %v19110_v42, %v9583_v9  ;;  %v13730_v52 = vpop.f32.mrf.mxu0 }
 0x4fd   : > { %v14356_v53 = vpop.eup %14355  ;;  %14373 = vpow2.f32 %v11884_v36  ;;  %v9582_v37 = vadd.f32 %v9471_v59, %v9194_v11  ;;  %v13777_v49 = vpop.f32.mrf.mxu1  ;;  %v9199_v8 = vadd.f32 %v13730_v52, %v21433_v43  ;;  %v19230_v36 = vadd.f32 %v19079_v31, %v8432_v16 }
 0x4fe   : > { %14375 = vrcp.f32 %v9738_v0  ;;  %v9741_v15 = vadd.f32 1.0, %v14356_v53  ;;  %v11886_v60 = vmul.f32 -1.442695, %v19206_v29  ;;  %v9585_v63 = vadd.f32 %v13777_v49, %v9197_v27  ;;  %v9103_v14 = vpop.f32.mrf.mxu0 }
 0x4ff   : > { %v14358_v4 = vpop.eup %14357  ;;  %14377 = vpow2.f32 %v11883_v12  ;;  %v19215_v54 = vadd.f32 %v19110_v42, %v9582_v37  ;;  %v9481_v51 = vpop.f32.mrf.mxu1  ;;  %v9198_v23 = vadd.f32 %v9103_v14, %v8810_v5  ;;  %v19235_v3 = vadd.f32 %v19090_v21, %v8434_v45  ;;  %v21436_v37 = vld [vmem:[#allocation126_spill] sm:$0xff] }
 0x500   : > { %14379 = vrcp.f32 %v9741_v15  ;;  %v9740_v40 = vadd.f32 1.0, %v14358_v4  ;;  %v19219_v46 = vadd.f32 %v19110_v42, %v9585_v63  ;;  %v9584_v1 = vadd.f32 %v9481_v51, %v9196_v47  ;;  %v13733_v48 = vpop.f32.mrf.mxu0  ;;  %v21437_v63 = vld [vmem:[#allocation156_spill] sm:$0xff] }
 0x501   : > { %v14360_v10 = vpop.eup %14359  ;;  %14381 = vpow2.f32 %v11886_v60  ;;  %v11885_v11 = vmul.f32 -1.442695, %v19215_v54  ;;  %v13780_v7 = vpop.f32.mrf.mxu1  ;;  %v9201_v27 = vadd.f32 %v13733_v48, %v21435_v35  ;;  %v19239_v49 = vadd.f32 %v19088_v2, %v21436_v37 }
 0x502   : > { %14383 = vrcp.f32 %v9740_v40  ;;  %v9743_v58 = vadd.f32 1.0, %v14360_v10  ;;  %v11888_v5 = vmul.f32 -1.442695, %v19219_v46  ;;  %v19227_v9 = vadd.f32 %v19110_v42, %v9584_v1  ;;  %v9113_v34 = vpop.f32.mrf.mxu0 }
 0x503   : > { %v14362_v6 = vpop.eup %14361  ;;  %14385 = vpow2.f32 %v11885_v11  ;;  %v9587_v17 = vadd.f32 %v13780_v7, %v9199_v8  ;;  %v9491_v59 = vpop.f32.mrf.mxu1  ;;  %v9200_v47 = vadd.f32 %v9113_v34, %v19178_v33 }
 0x504   : > { %14387 = vrcp.f32 %v9743_v58  ;;  %v9742_v0 = vadd.f32 1.0, %v14362_v6  ;;  %v11887_v12 = vmul.f32 -1.442695, %v19227_v9  ;;  %v9586_v52 = vadd.f32 %v9491_v59, %v9198_v23  ;;  %v13736_v53 = vpop.f32.mrf.mxu0 }
 0x505   : > { %v14364_v30 = vpop.eup %14363  ;;  %14389 = vpow2.f32 %v11888_v5  ;;  %v19242_v31 = vadd.f32 %v19110_v42, %v9587_v17  ;;  %v13783_v16 = vpop.f32.mrf.mxu1  ;;  %v9203_v14 = vadd.f32 %v13736_v53, %v21437_v63  ;;  %v21441_v63 = vld [vmem:[#allocation152_spill] sm:$0xff] }
 0x506   : > { %v14366_v33 = vpop.eup %14365  ;;  %14391 = vrcp.f32 %v9742_v0  ;;  %v19245_v15 = vadd.f32 %v19110_v42, %v9586_v52  ;;  %v9589_v60 = vadd.f32 %v13783_v16, %v9201_v27  ;;  %v9123_v4 = vpop.f32.mrf.mxu0  ;;  %v9833_v11 = vmul.f32 %v14364_v30, %v19117_v41  ;;  %v21438_v27 = vld [vmem:[#allocation130_spill] sm:$0xff] }
 0x507   : > { %v14368_v21 = vpop.eup %14367  ;;  %v9745_v43 = vadd.f32 1.0, %v14366_v33  ;;  %14393 = vpow2.f32 %v11887_v12  ;;  %v11890_v2 = vmul.f32 -1.442695, %v19242_v31  ;;  %v9501_v8 = vpop.f32.mrf.mxu1  ;;  %v9202_v51 = vadd.f32 %v9123_v4, %v19186_v62 }
 0x508   : > { %v14370_v23 = vpop.eup %14369  ;;  %v9832_v40 = vmul.f32 %v14368_v21, %v19124_v28  ;;  %v11889_v1 = vmul.f32 -1.442695, %v19245_v15  ;;  %v19253_v48 = vadd.f32 %v19110_v42, %v9589_v60  ;;  %v9588_v10 = vadd.f32 %v9501_v8, %v9200_v47  ;;  %v13739_v18 = vpop.f32.mrf.mxu0 }
 0x509   : > { %v14372_v45 = vpop.eup %14371  ;;  %14395 = vrcp.f32 %v9745_v43  ;;  %v9744_v7 = vadd.f32 1.0, %v14370_v23  ;;  %v13786_v35 = vpop.f32.mrf.mxu1  ;;  %v9205_v58 = vadd.f32 %v13739_v18, %v21438_v27 }
 0x50a   : > { %v14374_v5 = vpop.eup %14373  ;;  %v9835_v62 = vmul.f32 %v14372_v45, %v19129_v20  ;;  %14397 = vpow2.f32 %v11890_v2  ;;  %v11892_v28 = vmul.f32 -1.442695, %v19253_v48  ;;  %v19260_v34 = vadd.f32 %v19110_v42, %v9588_v10  ;;  %13904 = vmatprep.mubr.msk.f32.mxu0 %vm21439_vm9, %v9832_v40  ;;  %v9133_v6 = vpop.f32.mrf.mxu0  ;;  %vm21455_vm9 = vmmov %vm21261_vm0 }
 0x50b   : > { %v14376_v17 = vpop.eup %14375  ;;  %14399 = vrcp.f32 %v9744_v7  ;;  %v9747_v41 = vadd.f32 1.0, %v14374_v5  ;;  %v9591_v59 = vadd.f32 %v13786_v35, %v9203_v14  ;;  %v9511_v47 = vpop.f32.mrf.mxu1  ;;  %13905 = vmatmul.mubr.msk.f32.vlgmr.msra.gmra.mxu0 %vm21440_vm12, %v9833_v11  ;;  %v9204_v0 = vadd.f32 %v9133_v6, %v19201_v61  ;;  %vm21456_vm12 = vmmov %vm21261_vm0 }
 0x50c   : > { %v14378_v12 = vpop.eup %14377  ;;  %v9834_v20 = vmul.f32 %v14376_v17, %v19136_v44  ;;  %14401 = vpow2.f32 %v11889_v1  ;;  %v11891_v52 = vmul.f32 -1.442695, %v19260_v34  ;;  %v9590_v53 = vadd.f32 %v9511_v47, %v9202_v51  ;;  %v13742_v30 = vpop.f32.mrf.mxu0 }
 0x50d   : > { %v14380_v37 = vpop.eup %14379  ;;  %14403 = vrcp.f32 %v9747_v41  ;;  %v9746_v16 = vadd.f32 1.0, %v14378_v12  ;;  %v19268_v33 = vadd.f32 %v19110_v42, %v9591_v59  ;;  %v13789_v60 = vpop.f32.mrf.mxu1  ;;  %v9207_v14 = vadd.f32 %v13742_v30, %v21441_v63 }
 0x50e   : > { %v14382_v4 = vpop.eup %14381  ;;  %v9837_v61 = vmul.f32 %v14380_v37, %v19140_v32  ;;  %14405 = vpow2.f32 %v11892_v28  ;;  %v19273_v44 = vadd.f32 %v19110_v42, %v9590_v53  ;;  %v9593_v21 = vadd.f32 %v13789_v60, %v9205_v58  ;;  %13907 = vmatprep.mubr.msk.f32.mxu0 %vm21442_vm15, %v9834_v20  ;;  %v9143_v43 = vpop.f32.mrf.mxu0  ;;  %vm21457_vm15 = vmmov %vm21261_vm0 }
 0x50f   : > { %v14384_v2 = vpop.eup %14383  ;;  %14407 = vrcp.f32 %v9746_v16  ;;  %v9749_v8 = vadd.f32 1.0, %v14382_v4  ;;  %v11894_v51 = vmul.f32 -1.442695, %v19268_v33  ;;  %v9521_v23 = vpop.f32.mrf.mxu1  ;;  %13908 = vmatmul.mubr.msk.f32.gmra.mxu0 %vm21443_vm7, %v9835_v62  ;;  %v9206_v40 = vadd.f32 %v9143_v43, %v19209_v56  ;;  %vm21458_vm7 = vmmov %vm21261_vm0 }
 0x510   : > { %v14386_v1 = vpop.eup %14385  ;;  %v9836_v32 = vmul.f32 %v14384_v2, %v19148_v55  ;;  %14409 = vpow2.f32 %v11891_v52  ;;  %v11893_v10 = vmul.f32 -1.442695, %v19273_v44  ;;  %v19282_v18 = vadd.f32 %v19110_v42, %v9593_v21  ;;  %v13745_v45 = vpop.f32.mrf.mxu0 }
 0x511   : > { %v14388_v11 = vpop.eup %14387  ;;  %14411 = vrcp.f32 %v9749_v8  ;;  %v9748_v7 = vadd.f32 1.0, %v14386_v1  ;;  %v9592_v35 = vadd.f32 %v9521_v23, %v9204_v0  ;;  %v13792_v27 = vpop.f32.mrf.mxu1  ;;  %v9209_v58 = vadd.f32 %v13745_v45, %v19075_v57 }
 0x512   : > { %v14390_v5 = vpop.eup %14389  ;;  %v9839_v56 = vmul.f32 %v14388_v11, %v19154_v22  ;;  %14413 = vpow2.f32 %v11894_v51  ;;  %v11896_v55 = vmul.f32 -1.442695, %v19282_v18  ;;  %v9595_v62 = vadd.f32 %v13792_v27, %v9207_v14  ;;  %13910 = vmatprep.mubr.msk.f32.mxu0 %vm21261_vm0, %v9836_v32  ;;  %v9153_v28 = vpop.f32.mrf.mxu0 }
 0x513   : > { %v14392_v6 = vpop.eup %14391  ;;  %14415 = vrcp.f32 %v9748_v7  ;;  %v9751_v17 = vadd.f32 1.0, %v14390_v5  ;;  %v19289_v41 = vadd.f32 %v19110_v42, %v9592_v35  ;;  %v9531_v59 = vpop.f32.mrf.mxu1  ;;  %13911 = vmatmul.mubr.msk.f32.gmra.mxu0 %vm21444_vm1, %v9837_v61  ;;  %v9208_v57 = vadd.f32 %v9153_v28, %v19230_v36  ;;  %vm21459_vm1 = vmmov %vm21261_vm0 }
 0x514   : > { %v14394_v47 = vpop.eup %14393  ;;  %v9838_v22 = vmul.f32 %v14392_v6, %v19165_v25  ;;  %14417 = vpow2.f32 %v11893_v10  ;;  %v19295_v0 = vadd.f32 %v19110_v42, %v9595_v62  ;;  %v9594_v12 = vadd.f32 %v9531_v59, %v9206_v40  ;;  %v13748_v20 = vpop.f32.mrf.mxu0 }
 0x515   : > { %14419 = vrcp.f32 %v9751_v17  ;;  %v9750_v52 = vadd.f32 1.0, %v14394_v47  ;;  %v11895_v53 = vmul.f32 -1.442695, %v19289_v41  ;;  %v13795_v30 = vpop.f32.mrf.mxu1  ;;  %v9211_v37 = vadd.f32 %v13748_v20, %v19086_v19 }
 0x516   : > { %v14396_v16 = vpop.eup %14395  ;;  %14421 = vpow2.f32 %v11896_v55  ;;  %v11898_v36 = vmul.f32 -1.442695, %v19295_v0  ;;  %v19301_v60 = vadd.f32 %v19110_v42, %v9594_v12  ;;  %v9597_v25 = vadd.f32 %v13795_v30, %v9209_v58  ;;  %13913 = vmatprep.mubr.msk.f32.mxu0 %vm21445_vm2, %v9838_v22  ;;  %v9163_v63 = vpop.f32.mrf.mxu0  ;;  %vm21460_vm2 = vmmov %vm21261_vm0 }
 0x517   : > { %v14398_v14 = vpop.eup %14397  ;;  %v8824_v4 = vadd.f32 %v19100_v24, %v19239_v49  ;;  %14423 = vrcp.f32 %v9750_v52  ;;  %v9541_v61 = vpop.f32.mrf.mxu1  ;;  %13914 = vmatmul.mubr.msk.f32.gmra.mxu0 %vm21446_vm4, %v9839_v56  ;;  %v9210_v19 = vadd.f32 %v9163_v63, %v19235_v3  ;;  %v9841_v40 = vmul.f32 %v14396_v16, %v19173_v39  ;;  %vm21461_vm4 = vmmov %vm21261_vm0 }
 0x518   : > { %v14400_v21 = vpop.eup %14399  ;;  %v9753_v43 = vadd.f32 1.0, %v14398_v14  ;;  %14425 = vpow2.f32 %v11895_v53  ;;  %v11897_v2 = vmul.f32 -1.442695, %v19301_v60  ;;  %v19310_v8 = vadd.f32 %v19110_v42, %v9597_v25  ;;  %v13751_v51 = vpop.f32.mrf.mxu0 }
 0x519   : > { %v14402_v23 = vpop.eup %14401  ;;  %v9840_v24 = vmul.f32 %v14400_v21, %v19183_v13  ;;  %14427 = vpow2.f32 %v11898_v36  ;;  %v9596_v49 = vadd.f32 %v9541_v61, %v9208_v57  ;;  %v13798_v1 = vpop.f32.mrf.mxu1  ;;  %v9213_v39 = vadd.f32 %v13751_v51, %v19098_v26 }
 0x51a   : > { %v14404_v32 = vpop.eup %14403  ;;  %14429 = vrcp.f32 %v9753_v43  ;;  %v9752_v3 = vadd.f32 1.0, %v14402_v23  ;;  %v11900_v10 = vmul.f32 -1.442695, %v19310_v8  ;;  %v9599_v45 = vadd.f32 %v13798_v1, %v9211_v37  ;;  %v9173_v11 = vpop.f32.mrf.mxu0 }
 0x51b   : > { %v14406_v7 = vpop.eup %14405  ;;  %14431 = vpow2.f32 %v11897_v2  ;;  %v19316_v35 = vadd.f32 %v19110_v42, %v9596_v49  ;;  %13916 = vmatprep.mubr.msk.f32.mxu0 %vm21447_vm8, %v9840_v24  ;;  %v9551_v13 = vpop.f32.mrf.mxu1  ;;  %v9212_v27 = vadd.f32 %v9173_v11, %v8824_v4  ;;  %v9843_v28 = vmul.f32 %v14404_v32, %v19194_v50  ;;  %vm21462_vm8 = vmmov %vm21261_vm0 }
 0x51c   : > { %v14408_v58 = vpop.eup %14407  ;;  %14433 = vrcp.f32 %v9752_v3  ;;  %v9755_v5 = vadd.f32 1.0, %v14406_v7  ;;  %v19321_v56 = vadd.f32 %v19110_v42, %v9599_v45  ;;  %v9598_v55 = vadd.f32 %v9551_v13, %v9210_v19  ;;  %13917 = vmatmul.mubr.msk.f32.gmra.mxu0 %vm21448_vm11, %v9841_v40  ;;  %vm21463_vm11 = vmmov %vm21261_vm0 }
 0x51d   : > { %v14410_v62 = vpop.eup %14409  ;;  %v9842_v6 = vmul.f32 %v14408_v58, %v19198_v38  ;;  %14435 = vpow2.f32 %v11900_v10  ;;  %v11899_v17 = vmul.f32 -1.442695, %v19316_v35  ;;  %v13801_v26 = vpop.f32.mrf.mxu1 }
 0x51e   : > { %v14412_v59 = vpop.eup %14411  ;;  %14437 = vrcp.f32 %v9755_v5  ;;  %v9754_v57 = vadd.f32 1.0, %v14410_v62  ;;  %v11902_v47 = vmul.f32 -1.442695, %v19321_v56  ;;  %v19329_v22 = vadd.f32 %v19110_v42, %v9598_v55 }
 0x51f   : > { %v14414_v12 = vpop.eup %14413  ;;  %14439 = vpow2.f32 %v11899_v17  ;;  %v9601_v20 = vadd.f32 %v13801_v26, %v9213_v39  ;;  %13919 = vmatprep.mubr.msk.f32.mxu0 %vm21449_vm3, %v9842_v6  ;;  %v9561_v50 = vpop.f32.mrf.mxu1  ;;  %v9845_v63 = vmul.f32 %v14412_v59, %v19206_v29  ;;  %vm21464_vm3 = vmmov %vm21261_vm0 }
 0x520   : > { %v14416_v52 = vpop.eup %14415  ;;  %14441 = vrcp.f32 %v9754_v57  ;;  %v9757_v38 = vadd.f32 1.0, %v14414_v12  ;;  %v11901_v53 = vmul.f32 -1.442695, %v19329_v22  ;;  %v9600_v30 = vadd.f32 %v9561_v50, %v9212_v27  ;;  %13920 = vmatmul.mubr.msk.f32.gmra.mxu0 %vm21450_vm5, %v9843_v28  ;;  %vm21465_vm5 = vmmov %vm21261_vm0 }
 0x521   : > { %v14418_v37 = vpop.eup %14417  ;;  %v9844_v16 = vmul.f32 %v14416_v52, %v19215_v54  ;;  %14443 = vpow2.f32 %v11902_v47  ;;  %v19336_v36 = vadd.f32 %v19110_v42, %v9601_v20 }
 0x522   : > { %v14420_v25 = vpop.eup %14419  ;;  %14445 = vrcp.f32 %v9757_v38  ;;  %v9756_v14 = vadd.f32 1.0, %v14418_v37  ;;  %v19340_v4 = vadd.f32 %v19110_v42, %v9600_v30 }
 0x523   : > { %v14422_v61 = vpop.eup %14421  ;;  %14447 = vpow2.f32 %v11901_v53  ;;  %v11904_v19 = vmul.f32 -1.442695, %v19336_v36  ;;  %13922 = vmatprep.mubr.msk.f32.mxu0 %vm21451_vm6, %v9844_v16  ;;  %v9847_v42 = vmul.f32 %v14420_v25, %v19219_v46  ;;  %vm21466_vm6 = vmmov %vm21261_vm0 }
 0x524   : > { %v14424_v21 = vpop.eup %14423  ;;  %14449 = vrcp.f32 %v9756_v14  ;;  %v9759_v54 = vadd.f32 1.0, %v14422_v61  ;;  %v11903_v43 = vmul.f32 -1.442695, %v19340_v4  ;;  %13923 = vmatmul.mubr.msk.f32.gmra.mxu0 %vm21452_vm13, %v9845_v63  ;;  %vm21467_vm13 = vmmov %vm21261_vm0 }
 0x525   : > { %v14426_v2 = vpop.eup %14425  ;;  %v9846_v29 = vmul.f32 %v14424_v21, %v19227_v9  ;;  %14451 = vpow2.f32 %v11904_v19 }
 0x526   : > { %v14428_v51 = vpop.eup %14427  ;;  %14453 = vrcp.f32 %v9759_v54  ;;  %v9758_v23 = vadd.f32 1.0, %v14426_v2 }
 0x527   : > { %v14430_v40 = vpop.eup %14429  ;;  %v9761_v24 = vadd.f32 1.0, %v14428_v51  ;;  %14455 = vpow2.f32 %v11903_v43  ;;  %13925 = vmatprep.mubr.msk.f32.mxu0 %vm21453_vm14, %v9846_v29  ;;  %vm21468_vm14 = vmmov %vm21261_vm0 }
 0x528   : > { %v14432_v49 = vpop.eup %14431  ;;  %14457 = vrcp.f32 %v9758_v23  ;;  %13926 = vmatmul.mubr.msk.f32.gmra.mxu0 %vm21454_vm10, %v9847_v42  ;;  %v9849_v46 = vmul.f32 %v14430_v40, %v19242_v31  ;;  %vm21469_vm10 = vmmov %vm21261_vm0  ;;  %v13856_v23 = vpop.f32.mrf.mxu1 }
 0x529   : > { %v14434_v1 = vpop.eup %14433  ;;  %v9760_v32 = vadd.f32 1.0, %v14432_v49  ;;  %14459 = vrcp.f32 %v9761_v24 }
 0x52a   : > { %v14436_v3 = vpop.eup %14435  ;;  %v9848_v9 = vmul.f32 %v14434_v1, %v19245_v15  ;;  %v10260_v24 = vpop.f32.mrf.mxu1 }
 0x52b   : > { %v14438_v10 = vpop.eup %14437  ;;  %14461 = vrcp.f32 %v9760_v32  ;;  %v9763_v45 = vadd.f32 1.0, %v14436_v3 }
 0x52c   : > { %v14440_v11 = vpop.eup %14439  ;;  %13928 = vmatprep.mubr.msk.f32.mxu0 %vm21455_vm9, %v9848_v9  ;;  %v9851_v15 = vmul.f32 %v14438_v10, %v19253_v48  ;;  %v13859_v1 = vpop.f32.mrf.mxu1  ;;  %vm11040_vm9 = vcmask 64512  }
 0x52d   : > { %v14442_v7 = vpop.eup %14441  ;;  %v9762_v39 = vadd.f32 1.0, %v14440_v11  ;;  %13929 = vmatmul.mubr.msk.f32.gmra.mxu0 %vm21456_vm12, %v9849_v46  ;;  %14463 = vrcp.f32 %v9763_v45 }
 0x52e   : > { %v14444_v13 = vpop.eup %14443  ;;  %v9850_v27 = vmul.f32 %v14442_v7, %v19260_v34  ;;  %v10270_v3 = vpop.f32.mrf.mxu1 }
 0x52f   : > { %v14446_v58 = vpop.eup %14445  ;;  %14465 = vrcp.f32 %v9762_v39  ;;  %v9765_v5 = vadd.f32 1.0, %v14444_v13 }
 0x530   : > { %v14448_v55 = vpop.eup %14447  ;;  %13931 = vmatprep.mubr.msk.f32.mxu0 %vm21457_vm15, %v9850_v27  ;;  %v9853_v34 = vmul.f32 %v14446_v58, %v19268_v33  ;;  %v13862_v10 = vpop.f32.mrf.mxu1 }
 0x531   : > { %v14450_v31 = vpop.eup %14449  ;;  %v9764_v62 = vadd.f32 1.0, %v14448_v55  ;;  %13932 = vmatmul.mubr.msk.f32.gmra.mxu0 %vm21458_vm7, %v9851_v15  ;;  %14467 = vrcp.f32 %v9765_v5 }
 0x532   : > { %v14452_v28 = vpop.eup %14451  ;;  %v9852_v6 = vmul.f32 %v14450_v31, %v19273_v44  ;;  %v10280_v45 = vpop.f32.mrf.mxu1 }
 0x533   : > { %v14454_v17 = vpop.eup %14453  ;;  %14469 = vrcp.f32 %v9764_v62  ;;  %v9767_v26 = vadd.f32 1.0, %v14452_v28 }
 0x534   : > { %v14456_v59 = vpop.eup %14455  ;;  %13934 = vmatprep.mubr.msk.f32.mxu0 %vm21261_vm0, %v9852_v6  ;;  %v9855_v20 = vmul.f32 %v14454_v17, %v19282_v18  ;;  %v13865_v7 = vpop.f32.mrf.mxu1 }
 0x535   : > { %v14458_v48 = vpop.eup %14457  ;;  %v9766_v57 = vadd.f32 1.0, %v14456_v59  ;;  %13935 = vmatmul.mubr.msk.f32.gmra.mxu0 %vm21459_vm1, %v9853_v34  ;;  %14471 = vrcp.f32 %v9767_v26 }
 0x536   : > { %v9854_v47 = vmul.f32 %v14458_v48, %v19289_v41  ;;  %v14460_v12 = vpop.eup %14459  ;;  %v10290_v13 = vpop.f32.mrf.mxu1 }
 0x537   : > { %14473 = vrcp.f32 %v9766_v57  ;;  %v9857_v52 = vmul.f32 %v14460_v12, %v19295_v0 }
 0x538   : > { %v14462_v44 = vpop.eup %14461  ;;  %13937 = vmatprep.mubr.msk.f32.mxu0 %vm21460_vm2, %v9854_v47  ;;  %v19420_v58 = vpop.f32.mrf.mxu1 }
 0x539   : > { %v9856_v33 = vmul.f32 %v14462_v44, %v19301_v60  ;;  %13938 = vmatmul.mubr.msk.f32.gmra.mxu0 %vm21461_vm4, %v9855_v20 }
 0x53a   : > { %v14464_v50 = vpop.eup %14463  ;;  %v19424_v5 = vpop.f32.mrf.mxu1 }
 0x53b   : > { %13940 = vmatprep.mubr.msk.f32.mxu0 %vm21462_vm8, %v9856_v33  ;;  %v9859_v18 = vmul.f32 %v14464_v50, %v19310_v8  ;;  %v13806_v8 = vpop.f32.mrf.mxu0  ;;  %v19457_v50 = vld [vmem:[%s19772_s10] ss:$0 sm:$0xff] }
 0x53c   : > { %v14466_v38 = vpop.eup %14465  ;;  %v19428_v31 = vpop.f32.mrf.mxu1  ;;  %v10266_v20 = vadd.f32 %v13856_v23, %v13806_v8 }
 0x53d   : > { %v9858_v41 = vmul.f32 %v14466_v38, %v19316_v35  ;;  %13941 = vmatmul.mubr.msk.f32.gmra.mxu0 %vm21463_vm11, %v9857_v52 }
 0x53e   : > { %v14468_v53 = vpop.eup %14467  ;;  %v19432_v28 = vpop.f32.mrf.mxu1 }
 0x53f   : > { %13943 = vmatprep.mubr.msk.f32.mxu0 %vm21464_vm3, %v9858_v41  ;;  %v9861_v0 = vmul.f32 %v14468_v53, %v19321_v56 }
 0x540   : > { %v14470_v30 = vpop.eup %14469  ;;  %v19436_v17 = vpop.f32.mrf.mxu1 }
 0x541   : > { %v9860_v60 = vmul.f32 %v14470_v30, %v19329_v22  ;;  %13944 = vmatmul.mubr.msk.f32.gmra.mxu0 %vm21465_vm5, %v9859_v18  ;;  %v9936_v22 = vpop.f32.mrf.mxu0 }
 0x542   : > { %v14472_v37 = vpop.eup %14471  ;;  %v19440_v26 = vpop.f32.mrf.mxu1  ;;  %v10261_v52 = vadd.f32 %v10260_v24, %v9936_v22 }
 0x543   : > { %13946 = vmatprep.mubr.msk.f32.mxu0 %vm21466_vm6, %v9860_v60  ;;  %v9863_v25 = vmul.f32 %v14472_v37, %v19336_v36  ;;  %v13809_v63 = vpop.f32.mrf.mxu0 }
 0x544   : > { %v14474_v16 = vpop.eup %14473  ;;  %v19444_v48 = vpop.f32.mrf.mxu1  ;;  %v10276_v53 = vadd.f32 %v13859_v1, %v13809_v63 }
 0x545   : > { %v9862_v35 = vmul.f32 %v14474_v16, %v19340_v4  ;;  %13947 = vmatmul.mubr.msk.f32.gmra.mxu0 %vm21467_vm13, %v9861_v0  ;;  %v9946_v14 = vpop.f32.mrf.mxu0 }
 0x546   : > { %v19448_v47 = vpop.f32.mrf.mxu1  ;;  %v10271_v0 = vadd.f32 %v10270_v3, %v9946_v14 }
 0x547   : > { %13949 = vmatprep.mubr.msk.f32.mxu0 %vm21468_vm14, %v9862_v35  ;;  %v13812_v61 = vpop.f32.mrf.mxu0 }
 0x548   : > { %v19452_v44 = vpop.f32.mrf.mxu1  ;;  %v10286_v8 = vadd.f32 %v13862_v10, %v13812_v61 }
 0x549   : > { %13950 = vmatmul.mubr.msk.f32.gmra.mxu0 %vm21469_vm10, %v9863_v25  ;;  %v19382_v19 = vpop.f32.mrf.mxu0 }
 0x54a   : > { %v19459_v18 = vpop.f32.mrf.mxu1 }
 0x54b   : > { %v19384_v56 = vpop.f32.mrf.mxu0 }
 0x54c   : > { %v19468_v22 = vpop.f32.mrf.mxu1  ;;  %v10296_v10 = vadd.f32 %v13865_v7, %v19384_v56 }
 0x54d   : > { %v19386_v21 = vpop.f32.mrf.mxu0 }
 0x54f   : > { %v19388_v4 = vpop.f32.mrf.mxu0 }
 0x551   : > { %v19390_v54 = vpop.f32.mrf.mxu0 }
 0x553   : > { %v19392_v36 = vpop.f32.mrf.mxu0 }
 0x555   : > { %v19394_v43 = vpop.f32.mrf.mxu0 }
 0x557   : > { %v19396_v2 = vpop.f32.mrf.mxu0 }
 0x559   : > { %v19398_v29 = vpop.f32.mrf.mxu0 }
 0x55b   : > { %v19400_v51 = vpop.f32.mrf.mxu0 }
 0x55d   : > { %v19402_v42 = vpop.f32.mrf.mxu0 }
 0x55f   : > { %v19404_v40 = vpop.f32.mrf.mxu0 }
 0x561   : > { %v19406_v49 = vpop.f32.mrf.mxu0 }
 0x563   : > { %v19408_v32 = vpop.f32.mrf.mxu0 }
 0x565   : > { %v19410_v9 = vpop.f32.mrf.mxu0 }
 0x567   : > { %v19412_v46 = vpop.f32.mrf.mxu0 }
 0x569   : > { %v19414_v11 = vpop.f32.mrf.mxu0 }
 0x56b   : > { %v19416_v39 = vpop.f32.mrf.mxu0 }
 0x56d   : > { %v19418_v27 = vpop.f32.mrf.mxu0 }
 0x56f   : > { %v19422_v15 = vpop.f32.mrf.mxu0 }
 0x571   : > { %v19426_v55 = vpop.f32.mrf.mxu0 }
 0x573   : > { %v19430_v62 = vpop.f32.mrf.mxu0 }
 0x575   : > { %v19434_v6 = vpop.f32.mrf.mxu0 }
 0x577   : > { %v19438_v34 = vpop.f32.mrf.mxu0 }
 0x579   : > { %v19442_v59 = vpop.f32.mrf.mxu0 }
 0x57b   : > { %v19446_v57 = vpop.f32.mrf.mxu0 }
 0x57d   : > { %v19450_v12 = vpop.f32.mrf.mxu0 }
 0x5cb   : > { %v13906_v33 = vpop.f32.mrf.mxu0 }
 0x5cc   : > { %v10746_v38 = vadd.f32 %v13906_v33, %v10266_v20  ;;  %v10281_v20 = vadd.f32 %v10280_v45, %v19382_v19  ;;  %v10291_v45 = vadd.f32 %v10290_v13, %v19386_v21  ;;  %v10306_v21 = vadd.f32 %v19420_v58, %v19388_v4 }
 0x5cd   : > { %v10586_v41 = vpop.f32.mrf.mxu0  ;;  %v10316_v4 = vadd.f32 %v19428_v31, %v19392_v36  ;;  %v10326_v36 = vadd.f32 %v19436_v17, %v19396_v2 }
 0x5ce   : > { %v19462_v30 = vadd.f32 %v19457_v50, %v10746_v38  ;;  %v10745_v60 = vadd.f32 %v10586_v41, %v10261_v52  ;;  %v19480_v38 = vpop.f32.mrf.mxu1 }
 0x5cf   : > { %v13909_v37 = vpop.f32.mrf.mxu0 }
 0x5d0   : > { %v12008_v16 = vmul.f32 -1.442695, %v19462_v30  ;;  %v19466_v35 = vadd.f32 %v19457_v50, %v10745_v60  ;;  %v10748_v25 = vadd.f32 %v13909_v37, %v10276_v53 }
 0x5d1   : > { %v10596_v23 = vpop.f32.mrf.mxu0 }
 0x5d2   : > { %14475 = vpow2.f32 %v12008_v16  ;;  %v12007_v63 = vmul.f32 -1.442695, %v19466_v35  ;;  %v19472_v24 = vadd.f32 %v19457_v50, %v10748_v25  ;;  %v10747_v1 = vadd.f32 %v10596_v23, %v10271_v0  ;;  %v19491_v16 = vpop.f32.mrf.mxu1 }
 0x5d3   : > { %v13912_v14 = vpop.f32.mrf.mxu0 }
 0x5d4   : > { %14477 = vpow2.f32 %v12007_v63  ;;  %v12010_v3 = vmul.f32 -1.442695, %v19472_v24  ;;  %v19477_v33 = vadd.f32 %v19457_v50, %v10747_v1  ;;  %v10750_v61 = vadd.f32 %v13912_v14, %v10286_v8 }
 0x5d5   : > { %v10606_v52 = vpop.f32.mrf.mxu0 }
 0x5d6   : > { %14479 = vpow2.f32 %v12010_v3  ;;  %v12009_v41 = vmul.f32 -1.442695, %v19477_v33  ;;  %v19484_v53 = vadd.f32 %v19457_v50, %v10750_v61  ;;  %v10749_v19 = vadd.f32 %v10606_v52, %v10281_v20  ;;  %v19505_v3 = vpop.f32.mrf.mxu1 }
 0x5d7   : > { %v13915_v60 = vpop.f32.mrf.mxu0  ;;  %v10301_v20 = vadd.f32 %v19424_v5, %v19390_v54  ;;  %v10311_v54 = vadd.f32 %v19432_v28, %v19394_v43 }
 0x5d8   : > { %14481 = vpow2.f32 %v12009_v41  ;;  %v12012_v37 = vmul.f32 -1.442695, %v19484_v53  ;;  %v19489_v0 = vadd.f32 %v19457_v50, %v10749_v19  ;;  %v10752_v56 = vadd.f32 %v13915_v60, %v10296_v10  ;;  %v19521_v31 = vpop.f32.mrf.mxu1 }
 0x5d9   : > { %v10616_v7 = vpop.f32.mrf.mxu0 }
 0x5da   : > { %14483 = vpow2.f32 %v12012_v37  ;;  %v12011_v25 = vmul.f32 -1.442695, %v19489_v0  ;;  %v19495_v8 = vadd.f32 %v19457_v50, %v10752_v56  ;;  %v10751_v23 = vadd.f32 %v10616_v7, %v10291_v45 }
 0x5dc   : > { %14485 = vpow2.f32 %v12011_v25  ;;  %v12014_v13 = vmul.f32 -1.442695, %v19495_v8  ;;  %v19501_v63 = vadd.f32 %v19457_v50, %v10751_v23  ;;  %v13918_v1 = vpop.f32.mrf.mxu0 }
 0x5dd   : > { %v10754_v14 = vadd.f32 %v13918_v1, %v10306_v21 }
 0x5de   : > { %14487 = vpow2.f32 %v12014_v13  ;;  %v12013_v61 = vmul.f32 -1.442695, %v19501_v63  ;;  %v10626_v10 = vpop.f32.mrf.mxu0  ;;  %v10321_v13 = vadd.f32 %v19440_v26, %v19398_v29 }
 0x5df   : > { %v14476_v52 = vpop.eup %14475  ;;  %v19511_v58 = vadd.f32 %v19457_v50, %v10754_v14  ;;  %v10753_v41 = vadd.f32 %v10626_v10, %v10301_v20  ;;  %v10336_v10 = vadd.f32 %v19444_v48, %v19400_v51 }
 0x5e0   : > { %v10913_v19 = vadd.f32 1.0, %v14476_v52  ;;  %14489 = vpow2.f32 %v12013_v61  ;;  %v13921_v45 = vpop.f32.mrf.mxu0  ;;  %v19535_v52 = vpop.f32.mrf.mxu1 }
 0x5e1   : > { %v14478_v60 = vpop.eup %14477  ;;  %v12016_v5 = vmul.f32 -1.442695, %v19511_v58  ;;  %v19517_v37 = vadd.f32 %v19457_v50, %v10753_v41  ;;  %v10756_v56 = vadd.f32 %v13921_v45, %v10316_v4 }
 0x5e2   : > { %14491 = vrcp.f32 %v10913_v19  ;;  %v10912_v7 = vadd.f32 1.0, %v14478_v60  ;;  %v10636_v25 = vpop.f32.mrf.mxu0  ;;  %v10331_v60 = vadd.f32 %v19448_v47, %v19402_v42 }
 0x5e3   : > { %v14480_v23 = vpop.eup %14479  ;;  %14493 = vpow2.f32 %v12016_v5  ;;  %v12015_v21 = vmul.f32 -1.442695, %v19517_v37  ;;  %v19525_v43 = vadd.f32 %v19457_v50, %v10756_v56  ;;  %v10755_v28 = vadd.f32 %v10636_v25, %v10311_v54 }
 0x5e4   : > { %14495 = vrcp.f32 %v10912_v7  ;;  %v10915_v1 = vadd.f32 1.0, %v14480_v23  ;;  %v13924_v20 = vpop.f32.mrf.mxu0  ;;  %v19547_v7 = vpop.f32.mrf.mxu1 }
 0x5e5   : > { %v14482_v2 = vpop.eup %14481  ;;  %14497 = vpow2.f32 %v12015_v21  ;;  %v12018_v17 = vmul.f32 -1.442695, %v19525_v43  ;;  %v19531_v14 = vadd.f32 %v19457_v50, %v10755_v28  ;;  %v10758_v61 = vadd.f32 %v13924_v20, %v10326_v36 }
 0x5e6   : > { %14499 = vrcp.f32 %v10915_v1  ;;  %v10914_v4 = vadd.f32 1.0, %v14482_v2  ;;  %v10646_v41 = vpop.f32.mrf.mxu0 }
 0x5e7   : > { %v14484_v29 = vpop.eup %14483  ;;  %14501 = vpow2.f32 %v12018_v17  ;;  %v12017_v26 = vmul.f32 -1.442695, %v19531_v14  ;;  %v19539_v19 = vadd.f32 %v19457_v50, %v10758_v61  ;;  %v10757_v45 = vadd.f32 %v10646_v41, %v10321_v13 }
 0x5e8   : > { %14503 = vrcp.f32 %v10914_v4  ;;  %v10917_v54 = vadd.f32 1.0, %v14484_v29  ;;  %v13927_v5 = vpop.f32.mrf.mxu0  ;;  %v10346_v13 = vadd.f32 %v19452_v44, %v19404_v40  ;;  %v19561_v4 = vpop.f32.mrf.mxu1  ;;  %v10356_v40 = vadd.f32 %v19468_v22, %v19408_v32 }
 0x5e9   : > { %v14486_v51 = vpop.eup %14485  ;;  %14505 = vpow2.f32 %v12017_v26  ;;  %v12020_v48 = vmul.f32 -1.442695, %v19539_v19  ;;  %v19545_v56 = vadd.f32 %v19457_v50, %v10757_v45  ;;  %v10760_v36 = vadd.f32 %v13927_v5, %v10336_v10 }
 0x5ea   : > { %14507 = vrcp.f32 %v10917_v54  ;;  %v10916_v25 = vadd.f32 1.0, %v14486_v51  ;;  %v10656_v23 = vpop.f32.mrf.mxu0  ;;  %v10341_v10 = vadd.f32 %v19459_v18, %v19406_v49  ;;  %v19577_v22 = vpop.f32.mrf.mxu1 }
 0x5eb   : > { %v14488_v21 = vpop.eup %14487  ;;  %14509 = vpow2.f32 %v12020_v48  ;;  %v12019_v42 = vmul.f32 -1.442695, %v19545_v56  ;;  %v19551_v47 = vadd.f32 %v19457_v50, %v10760_v36  ;;  %v10759_v28 = vadd.f32 %v10656_v23, %v10331_v60 }
 0x5ec   : > { %14511 = vrcp.f32 %v10916_v25  ;;  %v10919_v1 = vadd.f32 1.0, %v14488_v21 }
 0x5ed   : > { %v14490_v20 = vpop.eup %14489  ;;  %14513 = vpow2.f32 %v12019_v42  ;;  %v12022_v2 = vmul.f32 -1.442695, %v19551_v47  ;;  %v19557_v17 = vadd.f32 %v19457_v50, %v10759_v28  ;;  %v13930_v61 = vpop.f32.mrf.mxu0  ;;  %v10351_v42 = vadd.f32 %v19480_v38, %v19410_v9 }
 0x5ee   : > { %14515 = vrcp.f32 %v10919_v1  ;;  %v10918_v41 = vadd.f32 1.0, %v14490_v20  ;;  %v10762_v29 = vadd.f32 %v13930_v61, %v10346_v13  ;;  %v10366_v28 = vadd.f32 %v19491_v16, %v19412_v46 }
 0x5ef   : > { %v14492_v26 = vpop.eup %14491  ;;  %14517 = vpow2.f32 %v12022_v2  ;;  %v12021_v49 = vmul.f32 -1.442695, %v19557_v17  ;;  %v10666_v44 = vpop.f32.mrf.mxu0  ;;  %v10361_v9 = vadd.f32 %v19505_v3, %v19414_v11  ;;  %v10376_v11 = vadd.f32 %v19521_v31, %v19416_v39 }
 0x5f0   : > { %v14494_v18 = vpop.eup %14493  ;;  %v11009_v45 = vmul.f32 %v14492_v26, %v19462_v30  ;;  %14519 = vrcp.f32 %v10918_v41  ;;  %v19575_v60 = vadd.f32 %v19457_v50, %v10762_v29  ;;  %v10761_v54 = vadd.f32 %v10666_v44, %v10341_v10  ;;  %v19599_v29 = vpop.f32.mrf.mxu1 }
 0x5f1   : > { %v14496_v5 = vpop.eup %14495  ;;  %v10921_v51 = vadd.f32 1.0, %v14494_v18  ;;  %14521 = vpow2.f32 %v12021_v49  ;;  %v13933_v48 = vpop.f32.mrf.mxu0 }
 0x5f2   : > { %v14498_v32 = vpop.eup %14497  ;;  %11042 = vst.msk [vmem:[%s19568_s20 + $0x8] sm:$0xff] %vm11040_vm9, %v11009_v45  ;;  %v11008_v36 = vmul.f32 %v14496_v5, %v19466_v35  ;;  %v12024_v25 = vmul.f32 -1.442695, %v19575_v60  ;;  %v19584_v30 = vadd.f32 %v19457_v50, %v10761_v54  ;;  %v10764_v23 = vadd.f32 %v13933_v48, %v10356_v40 }
 0x5f3   : > { %v14500_v21 = vpop.eup %14499  ;;  %14523 = vrcp.f32 %v10921_v51  ;;  %v10920_v13 = vadd.f32 1.0, %v14498_v32  ;;  %v10676_v1 = vpop.f32.mrf.mxu0 }
 0x5f4   : > { %v14502_v20 = vpop.eup %14501  ;;  %11041 = vst.msk [vmem:[%s19568_s20] sm:$0xff] %vm11040_vm9, %v11008_v36  ;;  %v11011_v35 = vmul.f32 %v14500_v21, %v19472_v24  ;;  %14525 = vpow2.f32 %v12024_v25  ;;  %v12023_v2 = vmul.f32 -1.442695, %v19584_v30  ;;  %v19595_v61 = vadd.f32 %v19457_v50, %v10764_v23  ;;  %v13898_v36 = vpop.f32.mrf.mxu1 }
 0x5f5   : > { %v14504_v10 = vpop.eup %14503  ;;  %14527 = vrcp.f32 %v10920_v13  ;;  %v10923_v46 = vadd.f32 1.0, %v14502_v20  ;;  %v10763_v38 = vadd.f32 %v10676_v1, %v10351_v42  ;;  %v13936_v16 = vpop.f32.mrf.mxu0  ;;  %v10386_v13 = vadd.f32 %v19547_v7, %v19422_v15 }
 0x5f6   : > { %v14506_v41 = vpop.eup %14505  ;;  %11044 = vst.msk [vmem:[%s19568_s20 + $0x18] sm:$0xff] %vm11040_vm9, %v11011_v35  ;;  %v11010_v24 = vmul.f32 %v14504_v10, %v19477_v33  ;;  %14529 = vpow2.f32 %v12023_v2  ;;  %v12026_v26 = vmul.f32 -1.442695, %v19595_v61  ;;  %v10766_v40 = vadd.f32 %v13936_v16, %v10366_v28 }
 0x5f7   : > { %v14508_v49 = vpop.eup %14507  ;;  %14531 = vrcp.f32 %v10923_v46  ;;  %v10922_v3 = vadd.f32 1.0, %v14506_v41  ;;  %v19608_v44 = vadd.f32 %v19457_v50, %v10763_v38  ;;  %v10686_v18 = vpop.f32.mrf.mxu0  ;;  %v10371_v28 = vadd.f32 %v19535_v52, %v19418_v27 }
 0x5f8   : > { %v14510_v45 = vpop.eup %14509  ;;  %11043 = vst.msk [vmem:[%s19568_s20 + $0x10] sm:$0xff] %vm11040_vm9, %v11010_v24  ;;  %v11013_v33 = vmul.f32 %v14508_v49, %v19484_v53  ;;  %14533 = vpow2.f32 %v12026_v26  ;;  %v19614_v54 = vadd.f32 %v19457_v50, %v10766_v40  ;;  %v10765_v5 = vadd.f32 %v10686_v18, %v10361_v9  ;;  %v10400_v38 = vpop.f32.mrf.mxu1 }
 0x5f9   : > { %v14512_v51 = vpop.eup %14511  ;;  %14535 = vrcp.f32 %v10922_v3  ;;  %v10925_v39 = vadd.f32 1.0, %v14510_v45  ;;  %v12025_v31 = vmul.f32 -1.442695, %v19608_v44  ;;  %v13939_v48 = vpop.f32.mrf.mxu0  ;;  %v10381_v27 = vadd.f32 %v19561_v4, %v19426_v55 }
 0x5fa   : > { %v14514_v32 = vpop.eup %14513  ;;  %11046 = vst.msk [vmem:[%s19568_s20 + $0x28] sm:$0xff] %vm11040_vm9, %v11013_v33  ;;  %v11012_v25 = vmul.f32 %v14512_v51, %v19489_v0  ;;  %v12028_v53 = vmul.f32 -1.442695, %v19614_v54  ;;  %v19622_v23 = vadd.f32 %v19457_v50, %v10765_v5  ;;  %v10768_v21 = vadd.f32 %v13939_v48, %v10376_v11 }
 0x5fb   : > { %v14516_v42 = vpop.eup %14515  ;;  %14537 = vrcp.f32 %v10925_v39  ;;  %v10924_v1 = vadd.f32 1.0, %v14514_v32  ;;  %v10696_v20 = vpop.f32.mrf.mxu0  ;;  %v10396_v40 = vadd.f32 %v19577_v22, %v19430_v62  ;;  %v10391_v3 = vadd.f32 %v19599_v29, %v19434_v6 }
 0x5fc   : > { %v14518_v35 = vpop.eup %14517  ;;  %11045 = vst.msk [vmem:[%s19568_s20 + $0x20] sm:$0xff] %vm11040_vm9, %v11012_v25  ;;  %v11015_v0 = vmul.f32 %v14516_v42, %v19495_v8  ;;  %14539 = vpow2.f32 %v12025_v31  ;;  %v12027_v2 = vmul.f32 -1.442695, %v19622_v23  ;;  %v19633_v10 = vadd.f32 %v19457_v50, %v10768_v21  ;;  %v13901_v62 = vpop.f32.mrf.mxu1 }
 0x5fd   : > { %v14520_v9 = vpop.eup %14519  ;;  %14541 = vrcp.f32 %v10924_v1  ;;  %v10927_v15 = vadd.f32 1.0, %v14518_v35  ;;  %v10767_v52 = vadd.f32 %v10696_v20, %v10371_v28  ;;  %v13942_v7 = vpop.f32.mrf.mxu0  ;;  %v10406_v48 = vadd.f32 %v13898_v36, %v19438_v34 }
 0x5fe   : > { %v14522_v46 = vpop.eup %14521  ;;  %11048 = vst.msk [vmem:[%s19568_s20 + $0x38] sm:$0xff] %vm11040_vm9, %v11015_v0  ;;  %v11014_v8 = vmul.f32 %v14520_v9, %v19501_v63  ;;  %14543 = vpow2.f32 %v12028_v53  ;;  %v12030_v16 = vmul.f32 -1.442695, %v19633_v10  ;;  %v10770_v41 = vadd.f32 %v13942_v7, %v10386_v13  ;;  %v10410_v1 = vpop.f32.mrf.mxu1 }
 0x5ff   : > { %14545 = vrcp.f32 %v10927_v15  ;;  %v10926_v24 = vadd.f32 1.0, %v14522_v46  ;;  %v19642_v26 = vadd.f32 %v19457_v50, %v10767_v52  ;;  %v10706_v55 = vpop.f32.mrf.mxu0  ;;  %v10401_v28 = vadd.f32 %v10400_v38, %v19442_v59 }
 0x600   : > { %v14524_v4 = vpop.eup %14523  ;;  %11047 = vst.msk [vmem:[%s19568_s20 + $0x30] sm:$0xff] %vm11040_vm9, %v11014_v8  ;;  %14547 = vpow2.f32 %v12027_v2  ;;  %v19649_v49 = vadd.f32 %v19457_v50, %v10770_v41  ;;  %v10769_v63 = vadd.f32 %v10706_v55, %v10381_v27  ;;  %v10416_v46 = vadd.f32 %v13901_v62, %v19446_v57 }
 0x601   : > { %v14526_v11 = vpop.eup %14525  ;;  %v11017_v18 = vmul.f32 %v14524_v4, %v19511_v58  ;;  %14549 = vrcp.f32 %v10926_v24  ;;  %v12029_v45 = vmul.f32 -1.442695, %v19642_v26  ;;  %v13945_v33 = vpop.f32.mrf.mxu0  ;;  %v10411_v38 = vadd.f32 %v10410_v1, %v19450_v12 }
 0x602   : > { %v14528_v5 = vpop.eup %14527  ;;  %v10929_v22 = vadd.f32 1.0, %v14526_v11  ;;  %14551 = vpow2.f32 %v12030_v16  ;;  %v12032_v51 = vmul.f32 -1.442695, %v19649_v49  ;;  %v19657_v39 = vadd.f32 %v19457_v50, %v10769_v63 }
 0x603   : > { %v14530_v31 = vpop.eup %14529  ;;  %11050 = vst.msk [vmem:[%s19568_s20 + $0x48] sm:$0xff] %vm11040_vm9, %v11017_v18  ;;  %v11016_v6 = vmul.f32 %v14528_v5, %v19517_v37  ;;  %14553 = vpow2.f32 %v12029_v45  ;;  %v10772_v58 = vadd.f32 %v13945_v33, %v10396_v40  ;;  %v10716_v29 = vpop.f32.mrf.mxu0 }
 0x604   : > { %v14532_v32 = vpop.eup %14531  ;;  %14555 = vrcp.f32 %v10929_v22  ;;  %v10928_v25 = vadd.f32 1.0, %v14530_v31  ;;  %v12031_v53 = vmul.f32 -1.442695, %v19657_v39  ;;  %v10771_v21 = vadd.f32 %v10716_v29, %v10391_v3 }
 0x605   : > { %v14534_v42 = vpop.eup %14533  ;;  %11049 = vst.msk [vmem:[%s19568_s20 + $0x40] sm:$0xff] %vm11040_vm9, %v11016_v6  ;;  %v11019_v34 = vmul.f32 %v14532_v32, %v19525_v43  ;;  %14557 = vpow2.f32 %v12032_v51  ;;  %v19669_v37 = vadd.f32 %v19457_v50, %v10772_v58  ;;  %v13948_v36 = vpop.f32.mrf.mxu0 }
 0x606   : > { %v14536_v13 = vpop.eup %14535  ;;  %14559 = vrcp.f32 %v10928_v25  ;;  %v10931_v20 = vadd.f32 1.0, %v14534_v42  ;;  %v19672_v35 = vadd.f32 %v19457_v50, %v10771_v21  ;;  %v10774_v0 = vadd.f32 %v13948_v36, %v10406_v48 }
 0x607   : > { %11052 = vst.msk [vmem:[%s19568_s20 + $0x58] sm:$0xff] %vm11040_vm9, %v11019_v34  ;;  %v11018_v59 = vmul.f32 %v14536_v13, %v19531_v14  ;;  %14561 = vpow2.f32 %v12031_v53  ;;  %v12034_v43 = vmul.f32 -1.442695, %v19669_v37  ;;  %v10726_v2 = vpop.f32.mrf.mxu0 }
 0x608   : > { %v14538_v9 = vpop.eup %14537  ;;  %14563 = vrcp.f32 %v10931_v20  ;;  %v12033_v27 = vmul.f32 -1.442695, %v19672_v35  ;;  %v19680_v15 = vadd.f32 %v19457_v50, %v10774_v0  ;;  %v10773_v52 = vadd.f32 %v10726_v2, %v10401_v28 }
 0x609   : > { %v14540_v7 = vpop.eup %14539  ;;  %11051 = vst.msk [vmem:[%s19568_s20 + $0x50] sm:$0xff] %vm11040_vm9, %v11018_v59  ;;  %v11021_v14 = vmul.f32 %v14538_v9, %v19539_v19  ;;  %14565 = vpow2.f32 %v12034_v43  ;;  %v13951_v8 = vpop.f32.mrf.mxu0 }
 0x60a   : > { %v14542_v16 = vpop.eup %14541  ;;  %v10930_v41 = vadd.f32 1.0, %v14540_v7  ;;  %14567 = vpow2.f32 %v12033_v27  ;;  %v12036_v24 = vmul.f32 -1.442695, %v19680_v15  ;;  %v19689_v55 = vadd.f32 %v19457_v50, %v10773_v52 }
 0x60b   : > { %v14544_v4 = vpop.eup %14543  ;;  %11054 = vst.msk [vmem:[%s19568_s20 + $0x68] sm:$0xff] %vm11040_vm9, %v11021_v14  ;;  %v11020_v57 = vmul.f32 %v14542_v16, %v19545_v56  ;;  %v10776_v12 = vadd.f32 %v13951_v8, %v10416_v46  ;;  %v10736_v40 = vpop.f32.mrf.mxu0 }
 0x60c   : > { %v14546_v19 = vpop.eup %14545  ;;  %14569 = vrcp.f32 %v10930_v41  ;;  %v10933_v63 = vadd.f32 1.0, %v14544_v4  ;;  %v12035_v11 = vmul.f32 -1.442695, %v19689_v55  ;;  %v10775_v3 = vadd.f32 %v10736_v40, %v10411_v38 }
 0x60d   : > { %v14548_v18 = vpop.eup %14547  ;;  %11053 = vst.msk [vmem:[%s19568_s20 + $0x60] sm:$0xff] %vm11040_vm9, %v11020_v57  ;;  %v11023_v45 = vmul.f32 %v14546_v19, %v19551_v47  ;;  %14571 = vpow2.f32 %v12036_v24  ;;  %v19699_v33 = vadd.f32 %v19457_v50, %v10776_v12 }
 0x60e   : > { %v14550_v56 = vpop.eup %14549  ;;  %14573 = vrcp.f32 %v10933_v63  ;;  %v10932_v5 = vadd.f32 1.0, %v14548_v18  ;;  %v19702_v62 = vadd.f32 %v19457_v50, %v10775_v3 }
 0x60f   : > { %v14552_v22 = vpop.eup %14551  ;;  %11056 = vst.msk [vmem:[%s19568_s20 + $0x78] sm:$0xff] %vm11040_vm9, %v11023_v45  ;;  %v11022_v51 = vmul.f32 %v14550_v56, %v19557_v17  ;;  %14575 = vpow2.f32 %v12035_v11  ;;  %v12038_v31 = vmul.f32 -1.442695, %v19699_v33 }
 0x610   : > { %v14554_v47 = vpop.eup %14553  ;;  %14577 = vrcp.f32 %v10932_v5  ;;  %v10935_v48 = vadd.f32 1.0, %v14552_v22  ;;  %v12037_v6 = vmul.f32 -1.442695, %v19702_v62 }
 0x611   : > { %v14556_v58 = vpop.eup %14555  ;;  %11055 = vst.msk [vmem:[%s19568_s20 + $0x70] sm:$0xff] %vm11040_vm9, %v11022_v51  ;;  %v10934_v29 = vadd.f32 1.0, %v14554_v47  ;;  %14579 = vpow2.f32 %v12038_v31 }
 0x612   : > { %v14558_v50 = vpop.eup %14557  ;;  %v11025_v32 = vmul.f32 %v14556_v58, %v19575_v60  ;;  %14581 = vrcp.f32 %v10935_v48 }
 0x613   : > { %v14560_v17 = vpop.eup %14559  ;;  %14583 = vrcp.f32 %v10934_v29  ;;  %v10937_v25 = vadd.f32 1.0, %v14558_v50 }
 0x614   : > { %v14562_v53 = vpop.eup %14561  ;;  %11058 = vst.msk [vmem:[%s19568_s20 + $0x88] sm:$0xff] %vm11040_vm9, %v11025_v32  ;;  %v11024_v21 = vmul.f32 %v14560_v17, %v19584_v30  ;;  %14585 = vpow2.f32 %v12037_v6 }
 0x615   : > { %v14564_v42 = vpop.eup %14563  ;;  %14587 = vrcp.f32 %v10937_v25  ;;  %v10936_v28 = vadd.f32 1.0, %v14562_v53 }
 0x616   : > { %v14566_v34 = vpop.eup %14565  ;;  %11057 = vst.msk [vmem:[%s19568_s20 + $0x80] sm:$0xff] %vm11040_vm9, %v11024_v21  ;;  %v11027_v60 = vmul.f32 %v14564_v42, %v19595_v61 }
 0x617   : > { %v14568_v36 = vpop.eup %14567  ;;  %14589 = vrcp.f32 %v10936_v28  ;;  %v10939_v13 = vadd.f32 1.0, %v14566_v34 }
 0x618   : > { %11060 = vst.msk [vmem:[%s19568_s20 + $0x98] sm:$0xff] %vm11040_vm9, %v11027_v60  ;;  %v10938_v1 = vadd.f32 1.0, %v14568_v36 }
 0x619   : > { %v14570_v20 = vpop.eup %14569  ;;  %14591 = vrcp.f32 %v10939_v13 }
 0x61a   : > { %v14572_v30 = vpop.eup %14571  ;;  %v11026_v0 = vmul.f32 %v14570_v20, %v19608_v44  ;;  %14593 = vrcp.f32 %v10938_v1 }
 0x61b   : > { %v14574_v59 = vpop.eup %14573  ;;  %v10941_v43 = vadd.f32 1.0, %v14572_v30 }
 0x61c   : > { %v14576_v2 = vpop.eup %14575  ;;  %11059 = vst.msk [vmem:[%s19568_s20 + $0x90] sm:$0xff] %vm11040_vm9, %v11026_v0  ;;  %v11029_v61 = vmul.f32 %v14574_v59, %v19614_v54 }
 0x61d   : > { %v14578_v9 = vpop.eup %14577  ;;  %14595 = vrcp.f32 %v10941_v43  ;;  %v10940_v27 = vadd.f32 1.0, %v14576_v2 }
 0x61e   : > { %v14580_v52 = vpop.eup %14579  ;;  %11062 = vst.msk [vmem:[%s19568_s20 + $0xa8] sm:$0xff] %vm11040_vm9, %v11029_v61  ;;  %v11028_v7 = vmul.f32 %v14578_v9, %v19622_v23 }
 0x61f   : > { %v14582_v44 = vpop.eup %14581  ;;  %14597 = vrcp.f32 %v10940_v27  ;;  %v10943_v46 = vadd.f32 1.0, %v14580_v52 }
 0x620   : > { %v14584_v38 = vpop.eup %14583  ;;  %11061 = vst.msk [vmem:[%s19568_s20 + $0xa0] sm:$0xff] %vm11040_vm9, %v11028_v7  ;;  %v11031_v54 = vmul.f32 %v14582_v44, %v19633_v10 }
 0x621   : > { %v14586_v14 = vpop.eup %14585  ;;  %v11030_v8 = vmul.f32 %v14584_v38, %v19642_v26  ;;  %14599 = vrcp.f32 %v10943_v46 }
 0x622   : > { %v14588_v16 = vpop.eup %14587  ;;  %11064 = vst.msk [vmem:[%s19568_s20 + $0xb8] sm:$0xff] %vm11040_vm9, %v11031_v54  ;;  %v10942_v23 = vadd.f32 1.0, %v14586_v14 }
 0x623   : > { %11063 = vst.msk [vmem:[%s19568_s20 + $0xb0] sm:$0xff] %vm11040_vm9, %v11030_v8  ;;  %v11033_v41 = vmul.f32 %v14588_v16, %v19649_v49 }
 0x624   : > { %v14590_v24 = vpop.eup %14589  ;;  %14601 = vrcp.f32 %v10942_v23 }
 0x625   : > { %11066 = vst.msk [vmem:[%s19568_s20 + $0xc8] sm:$0xff] %vm11040_vm9, %v11033_v41  ;;  %v11032_v10 = vmul.f32 %v14590_v24, %v19657_v39 }
 0x626   : > { %v14592_v26 = vpop.eup %14591 }
 0x627   : > { %v14594_v4 = vpop.eup %14593  ;;  %11065 = vst.msk [vmem:[%s19568_s20 + $0xc0] sm:$0xff] %vm11040_vm9, %v11032_v10  ;;  %v11035_v57 = vmul.f32 %v14592_v26, %v19669_v37 }
 0x628   : > { %v11034_v12 = vmul.f32 %v14594_v4, %v19672_v35 }
 0x629   : > { %11068 = vst.msk [vmem:[%s19568_s20 + $0xd8] sm:$0xff] %vm11040_vm9, %v11035_v57 }
 0x62a   : > { %v14596_v49 = vpop.eup %14595  ;;  %11067 = vst.msk [vmem:[%s19568_s20 + $0xd0] sm:$0xff] %vm11040_vm9, %v11034_v12 }
 0x62b   : > { %v11037_v40 = vmul.f32 %v14596_v49, %v19680_v15 }
 0x62c   : > { %v14598_v19 = vpop.eup %14597 }
 0x62d   : > { %11070 = vst.msk [vmem:[%s19568_s20 + $0xe8] sm:$0xff] %vm11040_vm9, %v11037_v40  ;;  %v11036_v39 = vmul.f32 %v14598_v19, %v19689_v55 }
 0x62e   : > { %v14600_v63 = vpop.eup %14599 }
 0x62f   : > { %11069 = vst.msk [vmem:[%s19568_s20 + $0xe0] sm:$0xff] %vm11040_vm9, %v11036_v39  ;;  %v11039_v11 = vmul.f32 %v14600_v63, %v19699_v33 }
 0x631   : > { %v14602_v37 = vpop.eup %14601  ;;  %11072 = vst.msk [vmem:[%s19568_s20 + $0xf8] sm:$0xff] %vm11040_vm9, %v11039_v11 }
 0x632   : > { %v11038_v35 = vmul.f32 %v14602_v37, %v19702_v62 }
 0x634   : > { %11071 = vst.msk [vmem:[%s19568_s20 + $0xf0] sm:$0xff] %vm11040_vm9, %v11038_v35 }
 0x635 PF: > { %s21_s17 = sadd.s32 1, %s14611_s17  }
 0x636   : > { %p18_p4 = scmp.ge.s32.totalorder %s21_s17, 4  }
 0x638   :  { %20 = sbr.rel (!%p18_p4) target bundleno = 1 (0x1), region = 96 }

</bundles_post_ra>
